<compile_context>
chip_gen: v5e
topology: v5e:2x2
jax: 0.10.0
libtpu: 0.0.40
codegen_flags: <defaults>
</compile_context>

<pallas_src>
import jax
import jax.numpy as jnp
from jax.experimental import pallas as pl
from jax.experimental.pallas import tpu as pltpu

INPUT_SIZE = 3 * 32 * 32   # 3072
HIDDEN = 512
OUTPUT_SIZE = 10

N_PAD = 128                # fc3 / softmax / output padded to a full lane width
MAX_TILE_B = 512           # VMEM-safe on v7x, near HBM roofline on v5e/v6e


def _round_up(v, m):
    return -(-v // m) * m


def _choose_tile_b(B):
    """Batch tile rows: multiple of 8, no gross over-padding, >=2 tiles when
    the batch is big enough so both v7x TensorCores get work."""
    b8 = _round_up(B, 8)
    if b8 < 256:
        return b8                                   # tiny batch: one minimal tile
    num_tiles = max(2, -(-b8 // MAX_TILE_B))
    return _round_up(-(-b8 // num_tiles), 8)


def mlp_kernel(x_ref, w1_ref, b1_ref, w2_ref, b2_ref, w3_ref, b3_ref, o_ref):
    # x / weights arrive in bf16; all matmuls accumulate in f32 on the MXU.
    # fc1 + ReLU
    h1 = jnp.dot(x_ref[...], w1_ref[...], preferred_element_type=jnp.float32)
    h1 = jnp.maximum(h1 + b1_ref[...], 0.0)

    # fc2 + ReLU
    h2 = jnp.dot(h1.astype(jnp.bfloat16), w2_ref[...],
                 preferred_element_type=jnp.float32)
    h2 = jnp.maximum(h2 + b2_ref[...], 0.0)

    # fc3 (padded to 128 lanes; padded columns get logit -1e30 from the bias)
    logits = jnp.dot(h2.astype(jnp.bfloat16), w3_ref[...],
                     preferred_element_type=jnp.float32)
    logits = logits + b3_ref[...]

    # Numerically stable softmax over the padded last dim; padded lanes
    # contribute exp(-1e30) == 0 to the denominator.
    m = jnp.max(logits, axis=-1, keepdims=True)
    e = jnp.exp(logits - m)
    denom = jnp.sum(e, axis=-1, keepdims=True)
    # EUP approximate reciprocal + one Newton step (keeps sum-to-1 ~1e-6).
    r = pl.reciprocal(denom, approx=True)
    r = r * (2.0 - denom * r)
    o_ref[...] = e * r


def prepare_params(params):
    """One-time parameter prep: bf16 weights + fc3 padded to 128 lanes.
    Run once (outside the per-call forward) so no per-call cast/pad traffic."""
    w1, b1, w2, b2, w3, b3 = params
    w1b = w1.astype(jnp.bfloat16)
    w2b = w2.astype(jnp.bfloat16)
    w3p = jnp.zeros((HIDDEN, N_PAD), jnp.float32)
    w3p = w3p.at[:, :OUTPUT_SIZE].set(w3).astype(jnp.bfloat16)
    b3p = jnp.full((1, N_PAD), -1e30, jnp.float32)
    b3p = b3p.at[:, :OUTPUT_SIZE].set(b3)
    return (w1b, b1, w2b, b2, w3p, b3p)


@jax.jit
def mlpnet_forward(x_nchw, prepared):
    w1b, b1, w2b, b2, w3p, b3p = prepared
    B = x_nchw.shape[0]

    # `xb.view(-1, input_size)` — row-major flatten; activations enter the
    # kernel in bf16 (upstream producers should emit bf16 directly so the
    # convert fuses away; here it is one small fused XLA op under jit).
    x_flat = x_nchw.reshape(B, INPUT_SIZE).astype(jnp.bfloat16)

    tile_b = _choose_tile_b(B)
    num_tiles = pl.cdiv(B, tile_b)
    B_pad = num_tiles * tile_b
    if B_pad != B:
        x_flat = jnp.pad(x_flat, ((0, B_pad - B), (0, 0)))

    # Advisory cost estimate for the XLA scheduler.
    flops = 2 * B_pad * (INPUT_SIZE * HIDDEN + HIDDEN * HIDDEN + HIDDEN * N_PAD)
    bytes_accessed = (x_flat.size * 2
                      + w1b.size * 2 + w2b.size * 2 + w3p.size * 2
                      + b1.size * 4 + b2.size * 4 + b3p.size * 4
                      + B_pad * N_PAD * 4)
    cost = pl.CostEstimate(flops=flops,
                           transcendentals=B_pad * N_PAD,
                           bytes_accessed=bytes_accessed)

    batch_map = lambda i: (i, 0)      # x / out: one tile per grid step
    const_map = lambda i: (0, 0)      # weights/biases: VMEM-resident

    def const_spec(shape):
        # Single-buffered: DMA'd once, no dead second copy in VMEM.
        return pl.BlockSpec(shape, const_map, pipeline_mode=pl.Buffered(1))

    out = pl.pallas_call(
        mlp_kernel,
        out_shape=jax.ShapeDtypeStruct((B_pad, N_PAD), jnp.float32),
        grid=(num_tiles,),
        in_specs=[
            pl.BlockSpec((tile_b, INPUT_SIZE), batch_map),   # x tile (bf16)
            const_spec((INPUT_SIZE, HIDDEN)),                # w1 (bf16)
            const_spec((1, HIDDEN)),                         # b1 (f32)
            const_spec((HIDDEN, HIDDEN)),                    # w2 (bf16)
            const_spec((1, HIDDEN)),                         # b2 (f32)
            const_spec((HIDDEN, N_PAD)),                     # w3 padded (bf16)
            const_spec((1, N_PAD)),                          # b3 padded (f32)
        ],
        out_specs=pl.BlockSpec((tile_b, N_PAD), batch_map),
        compiler_params=pltpu.CompilerParams(
            dimension_semantics=("parallel",),   # v7x: batch tiles over 2 TCs
            vmem_limit_bytes=32 << 20,           # safe within v7x 64 MiB physical
        ),
        cost_estimate=cost,
    )(x_flat, w1b, b1, w2b, b2, w3p, b3p)

    # Drop batch padding and the 118 padded output lanes.
    return out[:B, :OUTPUT_SIZE]


def init_params(key):
    """Deterministic init; Linear weights stored as (in, out), biases as (1, out)."""
    ks = jax.random.split(key, 6)

    def lin(kw, kb, fan_in, fan_out):
        bound = 1.0 / jnp.sqrt(fan_in)  # matches nn.Linear default init range
        w = jax.random.uniform(kw, (fan_in, fan_out), jnp.float32, -bound, bound)
        b = jax.random.uniform(kb, (1, fan_out), jnp.float32, -bound, bound)
        return w, b

    w1, b1 = lin(ks[0], ks[1], INPUT_SIZE, HIDDEN)
    w2, b2 = lin(ks[2], ks[3], HIDDEN, HIDDEN)
    w3, b3 = lin(ks[4], ks[5], HIDDEN, OUTPUT_SIZE)
    return (w1, b1, w2, b2, w3, b3)


def mlpnet_reference(x_nchw, params):
    """Pure-JAX f32 reference for verification."""
    w1, b1, w2, b2, w3, b3 = params
    x = x_nchw.reshape(x_nchw.shape[0], INPUT_SIZE).astype(jnp.float32)
    h1 = jnp.maximum(x @ w1 + b1, 0.0)
    h2 = jnp.maximum(h1 @ w2 + b2, 0.0)
    return jax.nn.softmax(h2 @ w3 + b3, axis=-1)


if __name__ == "__main__":
    key = jax.random.PRNGKey(0)
    kx, kp = jax.random.split(key)

    # CIFAR-like input implied by input_size = 3*32*32; small batch.
    x = jax.random.normal(kx, (2, 3, 32, 32), dtype=jnp.float32)
    params = init_params(kp)
    prepared = prepare_params(params)   # one-time bf16 cast + fc3 padding

    out = mlpnet_forward(x, prepared)
    out = jax.block_until_ready(out)

    ref = mlpnet_reference(x, params)
    assert out.shape == (2, OUTPUT_SIZE)
    # bf16 inputs/weights feed the MXU (f32 accumulate); softmax outputs are in
    # [0, 1], so atol dominates.
    assert jnp.allclose(out, ref, atol=2e-2, rtol=0.0), "mismatch vs JAX reference"
    assert jnp.allclose(jnp.sum(out, axis=-1), 1.0, atol=1e-4), "softmax rows must sum to 1"

    print("KERNEL_OK")
</pallas_src>

<mosaic_0001>
module attributes {stable_mosaic.version = 11 : i64} {
  func.func @mlp_kernel(%arg0: i32, %arg1: memref<8x3072xbf16, #tpu.memory_space<vmem>>, %arg2: memref<3072x512xbf16, #tpu.memory_space<vmem>>, %arg3: memref<1x512xf32, #tpu.memory_space<vmem>>, %arg4: memref<512x512xbf16, #tpu.memory_space<vmem>>, %arg5: memref<1x512xf32, #tpu.memory_space<vmem>>, %arg6: memref<512x128xbf16, #tpu.memory_space<vmem>>, %arg7: memref<1x128xf32, #tpu.memory_space<vmem>>, %arg8: memref<8x128xf32, #tpu.memory_space<vmem>>) attributes {dimension_semantics = [#tpu.dimension_semantics<parallel>], iteration_bounds = array<i64: 1>, scalar_prefetch = 0 : i64, scratch_operands = 0 : i64, tpu.core_type = #tpu.core_type<tc>, window_params = [{transform_indices = @transform_0, window_bounds = array<i64: 8, 3072>}, {pipeline_mode = #tpu.pipeline_mode<synchronous>, transform_indices = @transform_1, window_bounds = array<i64: 3072, 512>}, {pipeline_mode = #tpu.pipeline_mode<synchronous>, transform_indices = @transform_2, window_bounds = array<i64: 1, 512>}, {pipeline_mode = #tpu.pipeline_mode<synchronous>, transform_indices = @transform_3, window_bounds = array<i64: 512, 512>}, {pipeline_mode = #tpu.pipeline_mode<synchronous>, transform_indices = @transform_4, window_bounds = array<i64: 1, 512>}, {pipeline_mode = #tpu.pipeline_mode<synchronous>, transform_indices = @transform_5, window_bounds = array<i64: 512, 128>}, {pipeline_mode = #tpu.pipeline_mode<synchronous>, transform_indices = @transform_6, window_bounds = array<i64: 1, 128>}, {transform_indices = @transform_7, window_bounds = array<i64: 8, 128>}]} {
    %c0 = arith.constant 0 : index
    %c0_0 = arith.constant 0 : index
    %0 = vector.load %arg1[%c0, %c0_0] : memref<8x3072xbf16, #tpu.memory_space<vmem>>, vector<8x3072xbf16>
    %c0_1 = arith.constant 0 : index
    %c0_2 = arith.constant 0 : index
    %1 = vector.load %arg2[%c0_1, %c0_2] : memref<3072x512xbf16, #tpu.memory_space<vmem>>, vector<3072x512xbf16>
    %cst = arith.constant dense<0.000000e+00> : vector<8x512xf32>
    %2 = tpu.matmul %0, %1, %cst {dimension_numbers = #tpu.dot_dimension_numbers<[1], [0], [0], [1], [0, 0, 1, 1], [], []>} : vector<8x3072xbf16>, vector<3072x512xbf16>, vector<8x512xf32> -> vector<8x512xf32>
    %c0_3 = arith.constant 0 : index
    %c0_4 = arith.constant 0 : index
    %3 = vector.load %arg3[%c0_3, %c0_4] : memref<1x512xf32, #tpu.memory_space<vmem>>, vector<1x512xf32>
    %4 = vector.broadcast %3 : vector<1x512xf32> to vector<8x512xf32>
    %5 = arith.addf %2, %4 : vector<8x512xf32>
    %cst_5 = arith.constant 0.000000e+00 : f32
    %6 = vector.broadcast %cst_5 : f32 to vector<8x512xf32>
    %7 = arith.maximumf %5, %6 : vector<8x512xf32>
    %8 = arith.truncf %7 : vector<8x512xf32> to vector<8x512xbf16>
    %c0_6 = arith.constant 0 : index
    %c0_7 = arith.constant 0 : index
    %9 = vector.load %arg4[%c0_6, %c0_7] : memref<512x512xbf16, #tpu.memory_space<vmem>>, vector<512x512xbf16>
    %cst_8 = arith.constant dense<0.000000e+00> : vector<8x512xf32>
    %10 = tpu.matmul %8, %9, %cst_8 {dimension_numbers = #tpu.dot_dimension_numbers<[1], [0], [0], [1], [0, 0, 1, 1], [], []>} : vector<8x512xbf16>, vector<512x512xbf16>, vector<8x512xf32> -> vector<8x512xf32>
    %c0_9 = arith.constant 0 : index
    %c0_10 = arith.constant 0 : index
    %11 = vector.load %arg5[%c0_9, %c0_10] : memref<1x512xf32, #tpu.memory_space<vmem>>, vector<1x512xf32>
    %12 = vector.broadcast %11 : vector<1x512xf32> to vector<8x512xf32>
    %13 = arith.addf %10, %12 : vector<8x512xf32>
    %cst_11 = arith.constant 0.000000e+00 : f32
    %14 = vector.broadcast %cst_11 : f32 to vector<8x512xf32>
    %15 = arith.maximumf %13, %14 : vector<8x512xf32>
    %16 = arith.truncf %15 : vector<8x512xf32> to vector<8x512xbf16>
    %c0_12 = arith.constant 0 : index
    %c0_13 = arith.constant 0 : index
    %17 = vector.load %arg6[%c0_12, %c0_13] : memref<512x128xbf16, #tpu.memory_space<vmem>>, vector<512x128xbf16>
    %cst_14 = arith.constant dense<0.000000e+00> : vector<8x128xf32>
    %18 = tpu.matmul %16, %17, %cst_14 {dimension_numbers = #tpu.dot_dimension_numbers<[1], [0], [0], [1], [0, 0, 1, 1], [], []>} : vector<8x512xbf16>, vector<512x128xbf16>, vector<8x128xf32> -> vector<8x128xf32>
    %c0_15 = arith.constant 0 : index
    %c0_16 = arith.constant 0 : index
    %19 = vector.load %arg7[%c0_15, %c0_16] : memref<1x128xf32, #tpu.memory_space<vmem>>, vector<1x128xf32>
    %20 = vector.broadcast %19 : vector<1x128xf32> to vector<8x128xf32>
    %21 = arith.addf %18, %20 : vector<8x128xf32>
    %cst_17 = arith.constant dense<0xFF800000> : vector<8xf32>
    %22 = vector.multi_reduction <maximumf>, %21, %cst_17 [1] : vector<8x128xf32> to vector<8xf32>
    %23 = vector.shape_cast %22 : vector<8xf32> to vector<8x1xf32>
    %24 = vector.broadcast %23 : vector<8x1xf32> to vector<8x128xf32>
    %25 = arith.subf %21, %24 : vector<8x128xf32>
    %26 = math.exp %25 : vector<8x128xf32>
    %cst_18 = arith.constant dense<0.000000e+00> : vector<8xf32>
    %27 = vector.multi_reduction <add>, %26, %cst_18 [1] : vector<8x128xf32> to vector<8xf32>
    %28 = vector.shape_cast %27 : vector<8xf32> to vector<8x1xf32>
    %29 = tpu.reciprocal %28 {approx = true} : vector<8x1xf32> -> vector<8x1xf32>
    %30 = arith.mulf %28, %29 : vector<8x1xf32>
    %cst_19 = arith.constant 2.000000e+00 : f32
    %31 = vector.broadcast %cst_19 : f32 to vector<8x1xf32>
    %32 = arith.subf %31, %30 : vector<8x1xf32>
    %33 = arith.mulf %29, %32 : vector<8x1xf32>
    %34 = vector.broadcast %33 : vector<8x1xf32> to vector<8x128xf32>
    %35 = arith.mulf %26, %34 : vector<8x128xf32>
    %c0_20 = arith.constant 0 : index
    %c0_21 = arith.constant 0 : index
    %36 = vector.load %arg8[%c0_20, %c0_21] : memref<8x128xf32, #tpu.memory_space<vmem>>, vector<8x128xf32>
    tpu.vector_store %arg8[%c0_20, %c0_21], %35 {strides = array<i32>} : memref<8x128xf32, #tpu.memory_space<vmem>>, vector<8x128xf32>,
    return
  }
  func.func @transform_0(%arg0: i32) -> (i32, i32) {
    %c0_i32 = arith.constant 0 : i32
    %c0_i32_0 = arith.constant 0 : i32
    return %arg0, %c0_i32 : i32, i32
  }
  func.func @transform_1(%arg0: i32) -> (i32, i32) {
    %c0_i32 = arith.constant 0 : i32
    %c0_i32_0 = arith.constant 0 : i32
    %c0_i32_1 = arith.constant 0 : i32
    return %c0_i32, %c0_i32_0 : i32, i32
  }
  func.func @transform_2(%arg0: i32) -> (i32, i32) {
    %c0_i32 = arith.constant 0 : i32
    %c0_i32_0 = arith.constant 0 : i32
    %c0_i32_1 = arith.constant 0 : i32
    return %c0_i32, %c0_i32_0 : i32, i32
  }
  func.func @transform_3(%arg0: i32) -> (i32, i32) {
    %c0_i32 = arith.constant 0 : i32
    %c0_i32_0 = arith.constant 0 : i32
    %c0_i32_1 = arith.constant 0 : i32
    return %c0_i32, %c0_i32_0 : i32, i32
  }
  func.func @transform_4(%arg0: i32) -> (i32, i32) {
    %c0_i32 = arith.constant 0 : i32
    %c0_i32_0 = arith.constant 0 : i32
    %c0_i32_1 = arith.constant 0 : i32
    return %c0_i32, %c0_i32_0 : i32, i32
  }
  func.func @transform_5(%arg0: i32) -> (i32, i32) {
    %c0_i32 = arith.constant 0 : i32
    %c0_i32_0 = arith.constant 0 : i32
    %c0_i32_1 = arith.constant 0 : i32
    return %c0_i32, %c0_i32_0 : i32, i32
  }
  func.func @transform_6(%arg0: i32) -> (i32, i32) {
    %c0_i32 = arith.constant 0 : i32
    %c0_i32_0 = arith.constant 0 : i32
    %c0_i32_1 = arith.constant 0 : i32
    return %c0_i32, %c0_i32_0 : i32, i32
  }
  func.func @transform_7(%arg0: i32) -> (i32, i32) {
    %c0_i32 = arith.constant 0 : i32
    %c0_i32_0 = arith.constant 0 : i32
    return %arg0, %c0_i32 : i32, i32
  }
}

</mosaic_0001>

<bundles_post_ra>
// kernel: mlpnet_forward.1
= control target key start
LH: loop header
LB: loop body
LE: loop exit
PB: predicated region body
PF: predicated region fallthrough
CT: control target
= control target key end

     0   :  { %12 = vsyncpa [#allocation3], 0  ;;  %s12592_s0 = inlined_call_operand.vmem [shape: bf16[8,3072], index: 0, kind: input, shape index: {}]   ;;  %s12593_s1 = inlined_call_operand.hbm [shape: bf16[3072,512], index: 1, kind: input, shape index: {}]   ;;  %s12594_s2 = inlined_call_operand.hbm [shape: f32[1,512], index: 2, kind: input, shape index: {}]   ;;  %s12595_s3 = inlined_call_operand.hbm [shape: bf16[512,512], index: 3, kind: input, shape index: {}]   ;;  %s12596_s4 = inlined_call_operand.hbm [shape: f32[1,512], index: 4, kind: input, shape index: {}]   ;;  %s12597_s5 = inlined_call_operand.hbm [shape: bf16[512,128], index: 5, kind: input, shape index: {}]   ;;  %s12598_s6 = inlined_call_operand.hbm [shape: f32[1,128], index: 6, kind: input, shape index: {}]   ;;  %s12599_s7 = inlined_call_operand.vmem [shape: f32[8,128], index: 7, kind: output, shape index: {}]  }
   0x1   :  { %13 = vsyncpa [#allocation5], 0 }
   0x2   :  { %14 = vsyncpa [#allocation8], 0  ;;  %s36_s26 = sshll.u32 %s12594_s2, 4  ;;  %s37_s26 = int_to_ptr.hbm [resolvable:$true] %s36_s26 }
   0x3   :  { %15 = vsyncpa [#allocation11], 0  ;;  %s12221_s27 = smov [#allocation4]   ;;  %s60_s8 = sshll.u32 %s12596_s4, 4  ;;  %s61_s8 = int_to_ptr.hbm [resolvable:$true] %s60_s8 }
   0x4   :  { %s38_s28 = sshll.u32 %s12221_s27, 4  ;;  %s12222_s9 = smov [#allocation7]   ;;  %s39_s28 = int_to_ptr.vmem [resolvable:$true] %s38_s28 }
   0x5   :  { %41 = dma.hbm_to_vmem [thread:$0]  %s37_s26, 64, %s39_s28, [#allocation5]  }
   0x6   :  { %s62_s10 = sshll.u32 %s12222_s9, 4  ;;  %s22_s13 = sshll.u32 %s12593_s1, 4  ;;  %s63_s10 = int_to_ptr.vmem [resolvable:$true] %s62_s10  ;;  %s23_s13 = int_to_ptr.hbm [resolvable:$true] %s22_s13 }
   0x7   :  { %65 = dma.hbm_to_vmem [thread:$0]  %s61_s8, 64, %s63_s10, [#allocation8]  }
   0x8   :  { %s12223_s2 = smov [#allocation2]   ;;  %s46_s17 = sshll.u32 %s12595_s3, 4  ;;  %s47_s17 = int_to_ptr.hbm [resolvable:$true] %s46_s17 }
   0x9   :  { %s24_s14 = sshll.u32 %s12223_s2, 4  ;;  %s12224_s18 = smov 256   ;;  %s25_s14 = int_to_ptr.vmem [resolvable:$true] %s24_s14 }
   0xa   :  { %s12225_s4 = smov 16   ;;  %s12226_s19 = smov [#allocation6]  }
   0xb   :  { %30 = dma.hbm_to_vmem [thread:$0]  %s23_s13, 98304, %s25_s14, [#allocation3], %s12224_s18, %s12224_s18, %s12225_s4  }
   0xc   :  { %s48_s20 = sshll.u32 %s12226_s19, 4  ;;  %s70_s1 = sshll.u32 %s12597_s5, 4  ;;  %s49_s20 = int_to_ptr.vmem [resolvable:$true] %s48_s20  ;;  %s71_s1 = int_to_ptr.hbm [resolvable:$true] %s70_s1 }
   0xd   :  { %54 = dma.hbm_to_vmem [thread:$0]  %s47_s17, 16384, %s49_s20, [#allocation5], %s12224_s18, %s12224_s18, %s12225_s4  }
   0xe   :  { %s12227_s23 = smov [#allocation9]   ;;  %s84_s3 = sshll.u32 %s12598_s6, 4  ;;  %s85_s3 = int_to_ptr.hbm [resolvable:$true] %s84_s3 }
   0xf   :  { %s72_s24 = sshll.u32 %s12227_s23, 4  ;;  %s12228_s27 = smov 64   ;;  %s73_s24 = int_to_ptr.vmem [resolvable:$true] %s72_s24 }
  0x10   :  { %s12229_s28 = smov 4   ;;  %s12230_s29 = smov [#allocation10]  }
  0x11   :  { %78 = dma.hbm_to_vmem [thread:$0]  %s71_s1, 4096, %s73_s24, [#allocation8], %s12228_s27, %s12228_s27, %s12229_s28  }
  0x12   :  { %s86_s30 = sshll.u32 %s12230_s29, 4  ;;  %s87_s30 = int_to_ptr.vmem [resolvable:$true] %s86_s30 }
  0x13   :  { %89 = dma.hbm_to_vmem [thread:$0]  %s85_s3, 16, %s87_s30, [#allocation11]  }
  0x14   :  { %12213 = dma.done.wait [#allocation3], 98304  }
  0x15   :  { %12214 = vsyncadd [#allocation3], 4294868992 }
  0x16   :  { %12215 = dma.done.wait [#allocation5], 16448  }
  0x17   :  { %12216 = vsyncadd [#allocation5], 4294950848 }
  0x18   :  { %12217 = dma.done.wait [#allocation8], 4160  }
  0x19   :  { %12218 = vsyncadd [#allocation8], 4294963136 }
  0x1a   :  { %12219 = dma.done.wait [#allocation11], 16  }
  0x1b   :  { %12220 = vsyncadd [#allocation11], 4294967280  ;;  %v7525_v0 = vld [vmem:[#allocation2 + $0xe0] sm:$0xf]  ;;  %v11153_v1 = vld [vmem:[#allocation2 + $0xec] sm:$0xf0] }
  0x1c   :  { %v7653_v2 = vld [vmem:[#allocation2 + $0x1e0] sm:$0xf]  ;;  %v7526_v3 = vor.u32 %v11153_v1, %v7525_v0  ;;  %v11185_v4 = vld [vmem:[#allocation2 + $0x1ec] sm:$0xf0] }
  0x1d   :  { %v7781_v5 = vld [vmem:[#allocation2 + $0x2e0] sm:$0xf]  ;;  %v11217_v6 = vld [vmem:[#allocation2 + $0x2ec] sm:$0xf0]  ;;  %v7654_v7 = vor.u32 %v11185_v4, %v7653_v2 }
  0x1e   :  { %v7782_v8 = vor.u32 %v11217_v6, %v7781_v5  ;;  %v7909_v9 = vld [vmem:[#allocation2 + $0x3e0] sm:$0xf]  ;;  %v11249_v10 = vld [vmem:[#allocation2 + $0x3ec] sm:$0xf0]  ;;  %4828 = vmatpush.bf16.msra.mxu0 %v7526_v3 }
  0x1f   :  { %v7509_v11 = vld [vmem:[#allocation2 + $0xc0] sm:$0xf]  ;;  %v7910_v12 = vor.u32 %v11249_v10, %v7909_v9  ;;  %v11149_v13 = vld [vmem:[#allocation2 + $0xcc] sm:$0xf0]  ;;  %4841 = vmatpush.bf16.msra.mxu1 %v7654_v7 }
  0x20   :  { %v7637_v14 = vld [vmem:[#allocation2 + $0x1c0] sm:$0xf]  ;;  %v11181_v15 = vld [vmem:[#allocation2 + $0x1cc] sm:$0xf0]  ;;  %4854 = vmatpush.bf16.msra.mxu2 %v7782_v8  ;;  %v7510_v16 = vor.u32 %v11149_v13, %v7509_v11 }
  0x21   :  { %v7638_v17 = vor.u32 %v11181_v15, %v7637_v14  ;;  %v7765_v18 = vld [vmem:[#allocation2 + $0x2c0] sm:$0xf]  ;;  %v11213_v19 = vld [vmem:[#allocation2 + $0x2cc] sm:$0xf0]  ;;  %4867 = vmatpush.bf16.msra.mxu3 %v7910_v12 }
  0x22   :  { %v7893_v20 = vld [vmem:[#allocation2 + $0x3c0] sm:$0xf]  ;;  %v7766_v21 = vor.u32 %v11213_v19, %v7765_v18  ;;  %v11245_v22 = vld [vmem:[#allocation2 + $0x3cc] sm:$0xf0]  ;;  %4829 = vmatpush.bf16.msra.mxu0 %v7510_v16 }
  0x23   :  { %v7493_v23 = vld [vmem:[#allocation2 + $0xa0] sm:$0xf]  ;;  %v11145_v24 = vld [vmem:[#allocation2 + $0xac] sm:$0xf0]  ;;  %v7894_v25 = vor.u32 %v11245_v22, %v7893_v20  ;;  %4842 = vmatpush.bf16.msra.mxu1 %v7638_v17 }
  0x24   :  { %v7621_v26 = vld [vmem:[#allocation2 + $0x1a0] sm:$0xf]  ;;  %v11177_v27 = vld [vmem:[#allocation2 + $0x1ac] sm:$0xf0]  ;;  %v7494_v29 = vor.u32 %v11145_v24, %v7493_v23  ;;  %4855 = vmatpush.bf16.msra.mxu2 %v7766_v21 }
  0x25   :  { %v7749_v28 = vld [vmem:[#allocation2 + $0x2a0] sm:$0xf]  ;;  %v11209_v30 = vld [vmem:[#allocation2 + $0x2ac] sm:$0xf0]  ;;  %v7622_v33 = vor.u32 %v11177_v27, %v7621_v26  ;;  %4868 = vmatpush.bf16.msra.mxu3 %v7894_v25 }
  0x26   :  { %v7877_v31 = vld [vmem:[#allocation2 + $0x3a0] sm:$0xf]  ;;  %v11241_v32 = vld [vmem:[#allocation2 + $0x3ac] sm:$0xf0]  ;;  %v7750_v34 = vor.u32 %v11209_v30, %v7749_v28  ;;  %4830 = vmatpush.bf16.msra.mxu0 %v7494_v29 }
  0x27   :  { %v7477_v35 = vld [vmem:[#allocation2 + $0x80] sm:$0xf]  ;;  %v11141_v36 = vld [vmem:[#allocation2 + $0x8c] sm:$0xf0]  ;;  %v7878_v38 = vor.u32 %v11241_v32, %v7877_v31  ;;  %4843 = vmatpush.bf16.msra.mxu1 %v7622_v33 }
  0x28   :  { %v7605_v37 = vld [vmem:[#allocation2 + $0x180] sm:$0xf]  ;;  %v11173_v39 = vld [vmem:[#allocation2 + $0x18c] sm:$0xf0]  ;;  %v7478_v44 = vor.u32 %v11141_v36, %v7477_v35  ;;  %4856 = vmatpush.bf16.msra.mxu2 %v7750_v34 }
  0x29   :  { %v7733_v40 = vld [vmem:[#allocation2 + $0x280] sm:$0xf]  ;;  %v11205_v41 = vld [vmem:[#allocation2 + $0x28c] sm:$0xf0]  ;;  %v7606_v45 = vor.u32 %v11173_v39, %v7605_v37  ;;  %4869 = vmatpush.bf16.msra.mxu3 %v7878_v38 }
  0x2a   :  { %v7861_v42 = vld [vmem:[#allocation2 + $0x380] sm:$0xf]  ;;  %v11237_v43 = vld [vmem:[#allocation2 + $0x38c] sm:$0xf0]  ;;  %v7734_v46 = vor.u32 %v11205_v41, %v7733_v40  ;;  %4831 = vmatpush.bf16.msra.mxu0 %v7478_v44 }
  0x2b   :  { %v7461_v47 = vld [vmem:[#allocation2 + $0x60] sm:$0xf]  ;;  %v11137_v48 = vld [vmem:[#allocation2 + $0x6c] sm:$0xf0]  ;;  %v7862_v50 = vor.u32 %v11237_v43, %v7861_v42  ;;  %4844 = vmatpush.bf16.msra.mxu1 %v7606_v45 }
  0x2c   :  { %v7589_v49 = vld [vmem:[#allocation2 + $0x160] sm:$0xf]  ;;  %v11169_v51 = vld [vmem:[#allocation2 + $0x16c] sm:$0xf0]  ;;  %v7462_v56 = vor.u32 %v11137_v48, %v7461_v47  ;;  %4857 = vmatpush.bf16.msra.mxu2 %v7734_v46 }
  0x2d   :  { %v7717_v52 = vld [vmem:[#allocation2 + $0x260] sm:$0xf]  ;;  %v11201_v53 = vld [vmem:[#allocation2 + $0x26c] sm:$0xf0]  ;;  %v7590_v57 = vor.u32 %v11169_v51, %v7589_v49  ;;  %4870 = vmatpush.bf16.msra.mxu3 %v7862_v50 }
  0x2e   :  { %v7845_v54 = vld [vmem:[#allocation2 + $0x360] sm:$0xf]  ;;  %v11233_v55 = vld [vmem:[#allocation2 + $0x36c] sm:$0xf0]  ;;  %v7718_v58 = vor.u32 %v11201_v53, %v7717_v52  ;;  %4832 = vmatpush.bf16.msra.mxu0 %v7462_v56 }
  0x2f   :  { %v7445_v59 = vld [vmem:[#allocation2 + $0x40] sm:$0xf]  ;;  %v11133_v60 = vld [vmem:[#allocation2 + $0x4c] sm:$0xf0]  ;;  %v7846_v62 = vor.u32 %v11233_v55, %v7845_v54  ;;  %4845 = vmatpush.bf16.msra.mxu1 %v7590_v57 }
  0x30   :  { %v7573_v61 = vld [vmem:[#allocation2 + $0x140] sm:$0xf]  ;;  %v11165_v63 = vld [vmem:[#allocation2 + $0x14c] sm:$0xf0]  ;;  %v7446_v4 = vor.u32 %v11133_v60, %v7445_v59  ;;  %4858 = vmatpush.bf16.msra.mxu2 %v7718_v58 }
  0x31   :  { %v7701_v0 = vld [vmem:[#allocation2 + $0x240] sm:$0xf]  ;;  %v11197_v1 = vld [vmem:[#allocation2 + $0x24c] sm:$0xf0]  ;;  %v7574_v5 = vor.u32 %v11165_v63, %v7573_v61  ;;  %4871 = vmatpush.bf16.msra.mxu3 %v7846_v62 }
  0x32   :  { %v7829_v2 = vld [vmem:[#allocation2 + $0x340] sm:$0xf]  ;;  %v11229_v3 = vld [vmem:[#allocation2 + $0x34c] sm:$0xf0]  ;;  %v7702_v6 = vor.u32 %v11197_v1, %v7701_v0  ;;  %4833 = vmatpush.bf16.msra.mxu0 %v7446_v4 }
  0x33   :  { %v7429_v7 = vld [vmem:[#allocation2 + $0x20] sm:$0xf]  ;;  %v11129_v8 = vld [vmem:[#allocation2 + $0x2c] sm:$0xf0]  ;;  %v7830_v10 = vor.u32 %v11229_v3, %v7829_v2  ;;  %4846 = vmatpush.bf16.msra.mxu1 %v7574_v5  ;;  %v115_v2 = vld [vmem:[%s12592_s0 + $0x8] sm:$0xff] }
  0x34   :  { %v7557_v9 = vld [vmem:[#allocation2 + $0x120] sm:$0xf]  ;;  %v11161_v11 = vld [vmem:[#allocation2 + $0x12c] sm:$0xf0]  ;;  %v7430_v16 = vor.u32 %v11129_v8, %v7429_v7  ;;  %4859 = vmatpush.bf16.msra.mxu2 %v7702_v6  ;;  %v918_v8 = vunpack.c.l.b16 %v115_v2 }
  0x35   :  { %v7685_v12 = vld [vmem:[#allocation2 + $0x220] sm:$0xf]  ;;  %v11193_v13 = vld [vmem:[#allocation2 + $0x22c] sm:$0xf0]  ;;  %v7558_v19 = vor.u32 %v11161_v11, %v7557_v9  ;;  %4872 = vmatpush.bf16.msra.mxu3 %v7830_v10  ;;  %v919_v10 = vunpack.c.h.b16 %v115_v2 }
  0x36   :  { %v7813_v14 = vld [vmem:[#allocation2 + $0x320] sm:$0xf]  ;;  %v11225_v15 = vld [vmem:[#allocation2 + $0x32c] sm:$0xf0]  ;;  %v7686_v20 = vor.u32 %v11193_v13, %v7685_v12  ;;  %4834 = vmatpush.bf16.msra.mxu0 %v7430_v16 }
  0x37   :  { %v7413_v17 = vld [vmem:[#allocation2] sm:$0xf]  ;;  %v11125_v18 = vld [vmem:[#allocation2 + $0xc] sm:$0xf0]  ;;  %v7814_v24 = vor.u32 %v11225_v15, %v7813_v14  ;;  %4847 = vmatpush.bf16.msra.mxu1 %v7558_v19 }
  0x38   :  { %v7541_v21 = vld [vmem:[#allocation2 + $0x100] sm:$0xf]  ;;  %v11157_v22 = vld [vmem:[#allocation2 + $0x10c] sm:$0xf0]  ;;  %v7414_v31 = vor.u32 %v11125_v18, %v7413_v17  ;;  %4860 = vmatpush.bf16.msra.mxu2 %v7686_v20  ;;  %v12295_v18 = vpack.c.b16 %v918_v8, %v918_v8  ;;  %v12299_v20 = vpack.c.b16 %v919_v10, %v919_v10 }
  0x39   :  { %v7669_v23 = vld [vmem:[#allocation2 + $0x200] sm:$0xf]  ;;  %v11189_v25 = vld [vmem:[#allocation2 + $0x20c] sm:$0xf0]  ;;  %v7542_v35 = vor.u32 %v11157_v22, %v7541_v21  ;;  %4873 = vmatpush.bf16.msra.mxu3 %v7814_v24 }
  0x3a   :  { %v7797_v26 = vld [vmem:[#allocation2 + $0x300] sm:$0xf]  ;;  %v11221_v27 = vld [vmem:[#allocation2 + $0x30c] sm:$0xf0]  ;;  %v7670_v36 = vor.u32 %v11189_v25, %v7669_v23  ;;  %4835 = vmatpush.bf16.msra.mxu0 %v7414_v31 }
  0x3b   :  { %v8037_v28 = vld [vmem:[#allocation2 + $0x4e0] sm:$0xf]  ;;  %v11281_v29 = vld [vmem:[#allocation2 + $0x4ec] sm:$0xf0]  ;;  %v7798_v39 = vor.u32 %v11221_v27, %v7797_v26  ;;  %4848 = vmatpush.bf16.msra.mxu1 %v7542_v35 }
  0x3c   :  { %v8165_v30 = vld [vmem:[#allocation2 + $0x5e0] sm:$0xf]  ;;  %v11313_v32 = vld [vmem:[#allocation2 + $0x5ec] sm:$0xf0]  ;;  %v8038_v40 = vor.u32 %v11281_v29, %v8037_v28  ;;  %4861 = vmatpush.bf16.msra.mxu2 %v7670_v36 }
  0x3d   :  { %v8293_v33 = vld [vmem:[#allocation2 + $0x6e0] sm:$0xf]  ;;  %v11345_v34 = vld [vmem:[#allocation2 + $0x6ec] sm:$0xf0]  ;;  %v8166_v41 = vor.u32 %v11313_v32, %v8165_v30  ;;  %4874 = vmatpush.bf16.msra.mxu3 %v7798_v39 }
  0x3e   :  { %v8421_v37 = vld [vmem:[#allocation2 + $0x7e0] sm:$0xf]  ;;  %v11377_v38 = vld [vmem:[#allocation2 + $0x7ec] sm:$0xf0]  ;;  %v8294_v42 = vor.u32 %v11345_v34, %v8293_v33  ;;  %4880 = vmatpush.bf16.msrb.mxu0 %v8038_v40 }
  0x3f   :  { %v8021_v43 = vld [vmem:[#allocation2 + $0x4c0] sm:$0xf]  ;;  %v11277_v44 = vld [vmem:[#allocation2 + $0x4cc] sm:$0xf0]  ;;  %v8422_v46 = vor.u32 %v11377_v38, %v8421_v37  ;;  %4893 = vmatpush.bf16.msrb.mxu1 %v8166_v41  ;;  %4862 = vmatmul.bf16.vlgmr.msra.gmra.mxu2 %v12295_v18 }
  0x40   :  { %v8149_v45 = vld [vmem:[#allocation2 + $0x5c0] sm:$0xf]  ;;  %v11309_v47 = vld [vmem:[#allocation2 + $0x5cc] sm:$0xf0]  ;;  %v8022_v52 = vor.u32 %v11277_v44, %v8021_v43  ;;  %4906 = vmatpush.bf16.msrb.mxu2 %v8294_v42  ;;  %4875 = vmatmul.bf16.vlgmr.msra.gmra.mxu3 %v12299_v20 }
  0x41   :  { %v8277_v48 = vld [vmem:[#allocation2 + $0x6c0] sm:$0xf]  ;;  %v11341_v49 = vld [vmem:[#allocation2 + $0x6cc] sm:$0xf0]  ;;  %v8150_v54 = vor.u32 %v11309_v47, %v8149_v45  ;;  %4919 = vmatpush.bf16.msrb.mxu3 %v8422_v46 }
  0x42   :  { %v8405_v50 = vld [vmem:[#allocation2 + $0x7c0] sm:$0xf]  ;;  %v11373_v51 = vld [vmem:[#allocation2 + $0x7cc] sm:$0xf0]  ;;  %v8278_v55 = vor.u32 %v11341_v49, %v8277_v48  ;;  %4881 = vmatpush.bf16.msrb.mxu0 %v8022_v52 }
  0x43   :  { %v8005_v53 = vld [vmem:[#allocation2 + $0x4a0] sm:$0xf]  ;;  %v11273_v56 = vld [vmem:[#allocation2 + $0x4ac] sm:$0xf0]  ;;  %v8406_v59 = vor.u32 %v11373_v51, %v8405_v50  ;;  %4894 = vmatpush.bf16.msrb.mxu1 %v8150_v54 }
  0x44   :  { %v8133_v57 = vld [vmem:[#allocation2 + $0x5a0] sm:$0xf]  ;;  %v11305_v58 = vld [vmem:[#allocation2 + $0x5ac] sm:$0xf0]  ;;  %v8006_v0 = vor.u32 %v11273_v56, %v8005_v53  ;;  %4907 = vmatpush.bf16.msrb.mxu2 %v8278_v55 }
  0x45   :  { %v8261_v60 = vld [vmem:[#allocation2 + $0x6a0] sm:$0xf]  ;;  %v11337_v61 = vld [vmem:[#allocation2 + $0x6ac] sm:$0xf0]  ;;  %v8134_v1 = vor.u32 %v11305_v58, %v8133_v57  ;;  %4920 = vmatpush.bf16.msrb.mxu3 %v8406_v59 }
  0x46   :  { %v8389_v62 = vld [vmem:[#allocation2 + $0x7a0] sm:$0xf]  ;;  %v11369_v63 = vld [vmem:[#allocation2 + $0x7ac] sm:$0xf0]  ;;  %v8262_v4 = vor.u32 %v11337_v61, %v8261_v60  ;;  %4882 = vmatpush.bf16.msrb.mxu0 %v8006_v0 }
  0x47   :  { %v114_v3 = vld [vmem:[%s12592_s0] sm:$0xff]  ;;  %v11269_v6 = vld [vmem:[#allocation2 + $0x48c] sm:$0xf0]  ;;  %v8390_v11 = vor.u32 %v11369_v63, %v8389_v62  ;;  %4895 = vmatpush.bf16.msrb.mxu1 %v8134_v1 }
  0x48   :  { %v7989_v5 = vld [vmem:[#allocation2 + $0x480] sm:$0xf]  ;;  %v916_v9 = vunpack.c.l.b16 %v114_v3  ;;  %v11301_v12 = vld [vmem:[#allocation2 + $0x58c] sm:$0xf0]  ;;  %v917_v15 = vunpack.c.h.b16 %v114_v3  ;;  %4908 = vmatpush.bf16.msrb.mxu2 %v8262_v4  ;;  %v117_v3 = vld [vmem:[%s12592_s0 + $0x18] sm:$0xff] }
  0x49   :  { %v8117_v7 = vld [vmem:[#allocation2 + $0x580] sm:$0xf]  ;;  %v11333_v14 = vld [vmem:[#allocation2 + $0x68c] sm:$0xf0]  ;;  %v7990_v21 = vor.u32 %v11269_v6, %v7989_v5  ;;  %4921 = vmatpush.bf16.msrb.mxu3 %v8390_v11 }
  0x4a   :  { %v8245_v13 = vld [vmem:[#allocation2 + $0x680] sm:$0xf]  ;;  %v11365_v17 = vld [vmem:[#allocation2 + $0x78c] sm:$0xf0]  ;;  %v12297_v19 = vpack.c.b16 %v916_v9, %v916_v9  ;;  %v12301_v22 = vpack.c.b16 %v917_v15, %v917_v15  ;;  %v8118_v23 = vor.u32 %v11301_v12, %v8117_v7  ;;  %v922_v15 = vunpack.c.l.b16 %v117_v3 }
  0x4b   :  { %v8373_v16 = vld [vmem:[#allocation2 + $0x780] sm:$0xf]  ;;  %v8246_v24 = vor.u32 %v11333_v14, %v8245_v13  ;;  %v11265_v26 = vld [vmem:[#allocation2 + $0x46c] sm:$0xf0]  ;;  %4883 = vmatpush.bf16.msrb.mxu0 %v7990_v21 }
  0x4c   :  { %v7973_v25 = vld [vmem:[#allocation2 + $0x460] sm:$0xf]  ;;  %v8374_v28 = vor.u32 %v11365_v17, %v8373_v16  ;;  %v11297_v29 = vld [vmem:[#allocation2 + $0x56c] sm:$0xf0]  ;;  %4836 = vmatmul.bf16.vlgmr.msra.gmra.mxu0 %v12297_v19  ;;  %4849 = vmatmul.bf16.vlgmr.msra.gmra.mxu1 %v12301_v22 }
  0x4d   :  { %v8101_v27 = vld [vmem:[#allocation2 + $0x560] sm:$0xf]  ;;  %v11329_v31 = vld [vmem:[#allocation2 + $0x66c] sm:$0xf0]  ;;  %v7974_v34 = vor.u32 %v11265_v26, %v7973_v25  ;;  %4896 = vmatpush.bf16.msrb.mxu1 %v8118_v23  ;;  %4909 = vmatpush.bf16.msrb.mxu2 %v8246_v24  ;;  %v923_v25 = vunpack.c.h.b16 %v117_v3 }
  0x4e   :  { %v8229_v30 = vld [vmem:[#allocation2 + $0x660] sm:$0xf]  ;;  %v11361_v33 = vld [vmem:[#allocation2 + $0x76c] sm:$0xf0]  ;;  %v8102_v35 = vor.u32 %v11297_v29, %v8101_v27  ;;  %4922 = vmatpush.bf16.msrb.mxu3 %v8374_v28 }
  0x4f   :  { %v8357_v32 = vld [vmem:[#allocation2 + $0x760] sm:$0xf]  ;;  %v8230_v36 = vor.u32 %v11329_v31, %v8229_v30  ;;  %v11261_v38 = vld [vmem:[#allocation2 + $0x44c] sm:$0xf0]  ;;  %4884 = vmatpush.bf16.msrb.mxu0 %v7974_v34 }
  0x50   :  { %v7957_v37 = vld [vmem:[#allocation2 + $0x440] sm:$0xf]  ;;  %v8358_v40 = vor.u32 %v11361_v33, %v8357_v32  ;;  %v11293_v41 = vld [vmem:[#allocation2 + $0x54c] sm:$0xf0] }
  0x51   :  { %v8085_v39 = vld [vmem:[#allocation2 + $0x540] sm:$0xf]  ;;  %v11325_v43 = vld [vmem:[#allocation2 + $0x64c] sm:$0xf0]  ;;  %v7958_v46 = vor.u32 %v11261_v38, %v7957_v37  ;;  %4897 = vmatpush.bf16.msrb.mxu1 %v8102_v35  ;;  %4910 = vmatpush.bf16.msrb.mxu2 %v8230_v36  ;;  %v12313_v38 = vpack.c.b16 %v922_v15, %v922_v15 }
  0x52   :  { %v8213_v42 = vld [vmem:[#allocation2 + $0x640] sm:$0xf]  ;;  %v11357_v45 = vld [vmem:[#allocation2 + $0x74c] sm:$0xf0]  ;;  %v8086_v47 = vor.u32 %v11293_v41, %v8085_v39  ;;  %4923 = vmatpush.bf16.msrb.mxu3 %v8358_v40 }
  0x53   :  { %v8341_v44 = vld [vmem:[#allocation2 + $0x740] sm:$0xf]  ;;  %v8214_v48 = vor.u32 %v11325_v43, %v8213_v42  ;;  %v11257_v50 = vld [vmem:[#allocation2 + $0x42c] sm:$0xf0]  ;;  %4885 = vmatpush.bf16.msrb.mxu0 %v7958_v46  ;;  %v12317_v42 = vpack.c.b16 %v923_v25, %v923_v25 }
  0x54   :  { %v7941_v49 = vld [vmem:[#allocation2 + $0x420] sm:$0xf]  ;;  %v8342_v52 = vor.u32 %v11357_v45, %v8341_v44  ;;  %v11289_v53 = vld [vmem:[#allocation2 + $0x52c] sm:$0xf0] }
  0x55   :  { %v8069_v51 = vld [vmem:[#allocation2 + $0x520] sm:$0xf]  ;;  %v11321_v55 = vld [vmem:[#allocation2 + $0x62c] sm:$0xf0]  ;;  %v7942_v59 = vor.u32 %v11257_v50, %v7941_v49  ;;  %4898 = vmatpush.bf16.msrb.mxu1 %v8086_v47  ;;  %4911 = vmatpush.bf16.msrb.mxu2 %v8214_v48 }
  0x56   :  { %v8197_v54 = vld [vmem:[#allocation2 + $0x620] sm:$0xf]  ;;  %v11353_v57 = vld [vmem:[#allocation2 + $0x72c] sm:$0xf0]  ;;  %v8070_v63 = vor.u32 %v11289_v53, %v8069_v51  ;;  %4924 = vmatpush.bf16.msrb.mxu3 %v8342_v52 }
  0x57   :  { %v8325_v56 = vld [vmem:[#allocation2 + $0x720] sm:$0xf]  ;;  %v11253_v60 = vld [vmem:[#allocation2 + $0x40c] sm:$0xf0]  ;;  %v8198_v0 = vor.u32 %v11321_v55, %v8197_v54  ;;  %4886 = vmatpush.bf16.msrb.mxu0 %v7942_v59 }
  0x58   :  { %v7925_v58 = vld [vmem:[#allocation2 + $0x400] sm:$0xf]  ;;  %v11285_v62 = vld [vmem:[#allocation2 + $0x50c] sm:$0xf0]  ;;  %v8326_v4 = vor.u32 %v11353_v57, %v8325_v56 }
  0x59   :  { %v8053_v61 = vld [vmem:[#allocation2 + $0x500] sm:$0xf]  ;;  %v11317_v2 = vld [vmem:[#allocation2 + $0x60c] sm:$0xf0]  ;;  %v7926_v11 = vor.u32 %v11253_v60, %v7925_v58  ;;  %4899 = vmatpush.bf16.msrb.mxu1 %v8070_v63  ;;  %4912 = vmatpush.bf16.msrb.mxu2 %v8198_v0 }
  0x5a   :  { %v8181_v1 = vld [vmem:[#allocation2 + $0x600] sm:$0xf]  ;;  %v11349_v6 = vld [vmem:[#allocation2 + $0x70c] sm:$0xf0]  ;;  %v8054_v16 = vor.u32 %v11285_v62, %v8053_v61  ;;  %4925 = vmatpush.bf16.msrb.mxu3 %v8326_v4 }
  0x5b   :  { %v8309_v5 = vld [vmem:[#allocation2 + $0x700] sm:$0xf]  ;;  %v116_v7 = vld [vmem:[%s12592_s0 + $0x10] sm:$0xff]  ;;  %v8182_v17 = vor.u32 %v11317_v2, %v8181_v1  ;;  %4887 = vmatpush.bf16.msrb.mxu0 %v7926_v11 }
  0x5c   :  { %v8549_v8 = vld [vmem:[#allocation2 + $0x8e0] sm:$0xf]  ;;  %v11409_v9 = vld [vmem:[#allocation2 + $0x8ec] sm:$0xf0]  ;;  %v920_v24 = vunpack.c.l.b16 %v116_v7  ;;  %v8310_v26 = vor.u32 %v11349_v6, %v8309_v5  ;;  %v921_v28 = vunpack.c.h.b16 %v116_v7 }
  0x5d   :  { %v8677_v10 = vld [vmem:[#allocation2 + $0x9e0] sm:$0xf]  ;;  %v11441_v12 = vld [vmem:[#allocation2 + $0x9ec] sm:$0xf0]  ;;  %v8550_v27 = vor.u32 %v11409_v9, %v8549_v8  ;;  %4900 = vmatpush.bf16.msrb.mxu1 %v8054_v16  ;;  %4913 = vmatpush.bf16.msrb.mxu2 %v8182_v17 }
  0x5e   :  { %v8805_v13 = vld [vmem:[#allocation2 + $0xae0] sm:$0xf]  ;;  %v11473_v14 = vld [vmem:[#allocation2 + $0xaec] sm:$0xf0]  ;;  %v8678_v29 = vor.u32 %v11441_v12, %v8677_v10  ;;  %v12315_v41 = vpack.c.b16 %v920_v24, %v920_v24  ;;  %4926 = vmatpush.bf16.msrb.mxu3 %v8310_v26  ;;  %v12319_v44 = vpack.c.b16 %v921_v28, %v921_v28 }
  0x5f   :  { %v8933_v21 = vld [vmem:[#allocation2 + $0xbe0] sm:$0xf]  ;;  %v11505_v23 = vld [vmem:[#allocation2 + $0xbec] sm:$0xf0]  ;;  %v8806_v30 = vor.u32 %v11473_v14, %v8805_v13  ;;  %4932 = vmatpush.bf16.msra.mxu0 %v8550_v27 }
  0x60   :  { %v8533_v31 = vld [vmem:[#allocation2 + $0x8c0] sm:$0xf]  ;;  %v11405_v32 = vld [vmem:[#allocation2 + $0x8cc] sm:$0xf0]  ;;  %v8934_v34 = vor.u32 %v11505_v23, %v8933_v21  ;;  %4914 = vmatmul.bf16.vlgmr.msrb.gmra.mxu2 %v12313_v38  ;;  %4888 = vmatmul.bf16.vlgmr.msrb.gmra.mxu0 %v12315_v41 }
  0x61   :  { %v8661_v33 = vld [vmem:[#allocation2 + $0x9c0] sm:$0xf]  ;;  %v11437_v35 = vld [vmem:[#allocation2 + $0x9cc] sm:$0xf0]  ;;  %v8534_v43 = vor.u32 %v11405_v32, %v8533_v31  ;;  %4945 = vmatpush.bf16.msra.mxu1 %v8678_v29  ;;  %4958 = vmatpush.bf16.msra.mxu2 %v8806_v30 }
  0x62   :  { %v8789_v36 = vld [vmem:[#allocation2 + $0xac0] sm:$0xf]  ;;  %v11469_v37 = vld [vmem:[#allocation2 + $0xacc] sm:$0xf0]  ;;  %v8662_v45 = vor.u32 %v11437_v35, %v8661_v33  ;;  %4971 = vmatpush.bf16.msra.mxu3 %v8934_v34  ;;  %4901 = vmatmul.bf16.vlgmr.msrb.gmra.mxu1 %v12319_v44 }
  0x63   :  { %v8917_v39 = vld [vmem:[#allocation2 + $0xbc0] sm:$0xf]  ;;  %v11501_v40 = vld [vmem:[#allocation2 + $0xbcc] sm:$0xf0]  ;;  %v8790_v46 = vor.u32 %v11469_v37, %v8789_v36  ;;  %4927 = vmatmul.bf16.vlgmr.msrb.gmra.mxu3 %v12317_v42  ;;  %4933 = vmatpush.bf16.msra.mxu0 %v8534_v43 }
  0x64   :  { %v8517_v47 = vld [vmem:[#allocation2 + $0x8a0] sm:$0xf]  ;;  %v11401_v48 = vld [vmem:[#allocation2 + $0x8ac] sm:$0xf0]  ;;  %v8918_v50 = vor.u32 %v11501_v40, %v8917_v39 }
  0x65   :  { %v8645_v49 = vld [vmem:[#allocation2 + $0x9a0] sm:$0xf]  ;;  %v11433_v51 = vld [vmem:[#allocation2 + $0x9ac] sm:$0xf0]  ;;  %v8518_v56 = vor.u32 %v11401_v48, %v8517_v47  ;;  %4946 = vmatpush.bf16.msra.mxu1 %v8662_v45  ;;  %4959 = vmatpush.bf16.msra.mxu2 %v8790_v46 }
  0x66   :  { %v8773_v52 = vld [vmem:[#allocation2 + $0xaa0] sm:$0xf]  ;;  %v11465_v53 = vld [vmem:[#allocation2 + $0xaac] sm:$0xf0]  ;;  %v8646_v57 = vor.u32 %v11433_v51, %v8645_v49  ;;  %4972 = vmatpush.bf16.msra.mxu3 %v8918_v50 }
  0x67   :  { %v8901_v54 = vld [vmem:[#allocation2 + $0xba0] sm:$0xf]  ;;  %v11497_v55 = vld [vmem:[#allocation2 + $0xbac] sm:$0xf0]  ;;  %v8774_v58 = vor.u32 %v11465_v53, %v8773_v52  ;;  %4934 = vmatpush.bf16.msra.mxu0 %v8518_v56 }
  0x68   :  { %v8501_v59 = vld [vmem:[#allocation2 + $0x880] sm:$0xf]  ;;  %v11397_v60 = vld [vmem:[#allocation2 + $0x88c] sm:$0xf0]  ;;  %v8902_v62 = vor.u32 %v11497_v55, %v8901_v54 }
  0x69   :  { %v8629_v61 = vld [vmem:[#allocation2 + $0x980] sm:$0xf]  ;;  %v11429_v63 = vld [vmem:[#allocation2 + $0x98c] sm:$0xf0]  ;;  %v8502_v4 = vor.u32 %v11397_v60, %v8501_v59  ;;  %4947 = vmatpush.bf16.msra.mxu1 %v8646_v57  ;;  %4960 = vmatpush.bf16.msra.mxu2 %v8774_v58 }
  0x6a   :  { %v8757_v0 = vld [vmem:[#allocation2 + $0xa80] sm:$0xf]  ;;  %v11461_v1 = vld [vmem:[#allocation2 + $0xa8c] sm:$0xf0]  ;;  %v8630_v5 = vor.u32 %v11429_v63, %v8629_v61  ;;  %4973 = vmatpush.bf16.msra.mxu3 %v8902_v62  ;;  %v119_v61 = vld [vmem:[%s12592_s0 + $0x28] sm:$0xff] }
  0x6b   :  { %v8885_v2 = vld [vmem:[#allocation2 + $0xb80] sm:$0xf]  ;;  %v11493_v3 = vld [vmem:[#allocation2 + $0xb8c] sm:$0xf0]  ;;  %v8758_v6 = vor.u32 %v11461_v1, %v8757_v0  ;;  %4935 = vmatpush.bf16.msra.mxu0 %v8502_v4 }
  0x6c   :  { %v8485_v7 = vld [vmem:[#allocation2 + $0x860] sm:$0xf]  ;;  %v11393_v8 = vld [vmem:[#allocation2 + $0x86c] sm:$0xf0]  ;;  %v8886_v10 = vor.u32 %v11493_v3, %v8885_v2 }
  0x6d   :  { %v8613_v9 = vld [vmem:[#allocation2 + $0x960] sm:$0xf]  ;;  %v11425_v11 = vld [vmem:[#allocation2 + $0x96c] sm:$0xf0]  ;;  %v8486_v16 = vor.u32 %v11393_v8, %v8485_v7  ;;  %4948 = vmatpush.bf16.msra.mxu1 %v8630_v5  ;;  %4961 = vmatpush.bf16.msra.mxu2 %v8758_v6 }
  0x6e   :  { %v8741_v12 = vld [vmem:[#allocation2 + $0xa60] sm:$0xf]  ;;  %v11457_v13 = vld [vmem:[#allocation2 + $0xa6c] sm:$0xf0]  ;;  %v8614_v17 = vor.u32 %v11425_v11, %v8613_v9  ;;  %4974 = vmatpush.bf16.msra.mxu3 %v8886_v10  ;;  %v926_v10 = vunpack.c.l.b16 %v119_v61 }
  0x6f   :  { %v8869_v14 = vld [vmem:[#allocation2 + $0xb60] sm:$0xf]  ;;  %v11489_v15 = vld [vmem:[#allocation2 + $0xb6c] sm:$0xf0]  ;;  %v8742_v21 = vor.u32 %v11457_v13, %v8741_v12  ;;  %4936 = vmatpush.bf16.msra.mxu0 %v8486_v16 }
  0x70   :  { %v8469_v23 = vld [vmem:[#allocation2 + $0x840] sm:$0xf]  ;;  %v11389_v24 = vld [vmem:[#allocation2 + $0x84c] sm:$0xf0]  ;;  %v8870_v26 = vor.u32 %v11489_v15, %v8869_v14  ;;  %v927_v14 = vunpack.c.h.b16 %v119_v61 }
  0x71   :  { %v8597_v25 = vld [vmem:[#allocation2 + $0x940] sm:$0xf]  ;;  %v11421_v27 = vld [vmem:[#allocation2 + $0x94c] sm:$0xf0]  ;;  %v8470_v32 = vor.u32 %v11389_v24, %v8469_v23  ;;  %4949 = vmatpush.bf16.msra.mxu1 %v8614_v17  ;;  %4962 = vmatpush.bf16.msra.mxu2 %v8742_v21 }
  0x72   :  { %v8725_v28 = vld [vmem:[#allocation2 + $0xa40] sm:$0xf]  ;;  %v11453_v29 = vld [vmem:[#allocation2 + $0xa4c] sm:$0xf0]  ;;  %v8598_v34 = vor.u32 %v11421_v27, %v8597_v25  ;;  %4975 = vmatpush.bf16.msra.mxu3 %v8870_v26 }
  0x73   :  { %v8853_v30 = vld [vmem:[#allocation2 + $0xb40] sm:$0xf]  ;;  %v11485_v31 = vld [vmem:[#allocation2 + $0xb4c] sm:$0xf0]  ;;  %v8726_v35 = vor.u32 %v11453_v29, %v8725_v28  ;;  %4937 = vmatpush.bf16.msra.mxu0 %v8470_v32  ;;  %v12333_v29 = vpack.c.b16 %v926_v10, %v926_v10 }
  0x74   :  { %v8453_v33 = vld [vmem:[#allocation2 + $0x820] sm:$0xf]  ;;  %v11385_v36 = vld [vmem:[#allocation2 + $0x82c] sm:$0xf0]  ;;  %v8854_v40 = vor.u32 %v11485_v31, %v8853_v30 }
  0x75   :  { %v8581_v37 = vld [vmem:[#allocation2 + $0x920] sm:$0xf]  ;;  %v11417_v39 = vld [vmem:[#allocation2 + $0x92c] sm:$0xf0]  ;;  %v8454_v49 = vor.u32 %v11385_v36, %v8453_v33  ;;  %4950 = vmatpush.bf16.msra.mxu1 %v8598_v34  ;;  %4963 = vmatpush.bf16.msra.mxu2 %v8726_v35  ;;  %v12337_v33 = vpack.c.b16 %v927_v14, %v927_v14 }
  0x76   :  { %v8709_v43 = vld [vmem:[#allocation2 + $0xa20] sm:$0xf]  ;;  %v11449_v45 = vld [vmem:[#allocation2 + $0xa2c] sm:$0xf0]  ;;  %v8582_v53 = vor.u32 %v11417_v39, %v8581_v37  ;;  %4976 = vmatpush.bf16.msra.mxu3 %v8854_v40 }
  0x77   :  { %v8837_v46 = vld [vmem:[#allocation2 + $0xb20] sm:$0xf]  ;;  %v11481_v47 = vld [vmem:[#allocation2 + $0xb2c] sm:$0xf0]  ;;  %v8710_v54 = vor.u32 %v11449_v45, %v8709_v43  ;;  %4938 = vmatpush.bf16.msra.mxu0 %v8454_v49 }
  0x78   :  { %v8437_v48 = vld [vmem:[#allocation2 + $0x800] sm:$0xf]  ;;  %v11381_v50 = vld [vmem:[#allocation2 + $0x80c] sm:$0xf0]  ;;  %v8838_v58 = vor.u32 %v11481_v47, %v8837_v46 }
  0x79   :  { %v8565_v51 = vld [vmem:[#allocation2 + $0x900] sm:$0xf]  ;;  %v11413_v52 = vld [vmem:[#allocation2 + $0x90c] sm:$0xf0]  ;;  %v8438_v1 = vor.u32 %v11381_v50, %v8437_v48  ;;  %4951 = vmatpush.bf16.msra.mxu1 %v8582_v53  ;;  %4964 = vmatpush.bf16.msra.mxu2 %v8710_v54 }
  0x7a   :  { %v8693_v55 = vld [vmem:[#allocation2 + $0xa00] sm:$0xf]  ;;  %v11445_v56 = vld [vmem:[#allocation2 + $0xa0c] sm:$0xf0]  ;;  %v8566_v6 = vor.u32 %v11413_v52, %v8565_v51  ;;  %4977 = vmatpush.bf16.msra.mxu3 %v8838_v58 }
  0x7b   :  { %v118_v57 = vld [vmem:[%s12592_s0 + $0x20] sm:$0xff]  ;;  %v11477_v60 = vld [vmem:[#allocation2 + $0xb0c] sm:$0xf0]  ;;  %v8694_v7 = vor.u32 %v11445_v56, %v8693_v55  ;;  %4939 = vmatpush.bf16.msra.mxu0 %v8438_v1 }
  0x7c   :  { %v8821_v59 = vld [vmem:[#allocation2 + $0xb00] sm:$0xf]  ;;  %v11537_v63 = vld [vmem:[#allocation2 + $0xcec] sm:$0xf0]  ;;  %v924_v5 = vunpack.c.l.b16 %v118_v57  ;;  %v925_v11 = vunpack.c.h.b16 %v118_v57 }
  0x7d   :  { %v9061_v62 = vld [vmem:[#allocation2 + $0xce0] sm:$0xf]  ;;  %v11569_v2 = vld [vmem:[#allocation2 + $0xdec] sm:$0xf0]  ;;  %v8822_v12 = vor.u32 %v11477_v60, %v8821_v59  ;;  %4952 = vmatpush.bf16.msra.mxu1 %v8566_v6  ;;  %4965 = vmatpush.bf16.msra.mxu2 %v8694_v7 }
  0x7e   :  { %v9189_v0 = vld [vmem:[#allocation2 + $0xde0] sm:$0xf]  ;;  %v11601_v4 = vld [vmem:[#allocation2 + $0xeec] sm:$0xf0]  ;;  %v9062_v13 = vor.u32 %v11537_v63, %v9061_v62  ;;  %v12331_v25 = vpack.c.b16 %v924_v5, %v924_v5  ;;  %v12335_v30 = vpack.c.b16 %v925_v11, %v925_v11 }
  0x7f   :  { %v9317_v3 = vld [vmem:[#allocation2 + $0xee0] sm:$0xf]  ;;  %v11633_v9 = vld [vmem:[#allocation2 + $0xfec] sm:$0xf0]  ;;  %v9190_v15 = vor.u32 %v11569_v2, %v9189_v0  ;;  %4978 = vmatpush.bf16.msra.mxu3 %v8822_v12 }
  0x80   :  { %v9445_v8 = vld [vmem:[#allocation2 + $0xfe0] sm:$0xf]  ;;  %v9318_v16 = vor.u32 %v11601_v4, %v9317_v3  ;;  %v11533_v21 = vld [vmem:[#allocation2 + $0xccc] sm:$0xf0]  ;;  %4984 = vmatpush.bf16.msrb.mxu0 %v9062_v13  ;;  %4966 = vmatmul.bf16.vlgmr.msra.gmra.mxu2 %v12333_v29 }
  0x81   :  { %v9045_v17 = vld [vmem:[#allocation2 + $0xcc0] sm:$0xf]  ;;  %v9446_v24 = vor.u32 %v11633_v9, %v9445_v8  ;;  %v11565_v26 = vld [vmem:[#allocation2 + $0xdcc] sm:$0xf0]  ;;  %4997 = vmatpush.bf16.msrb.mxu1 %v9190_v15  ;;  %4940 = vmatmul.bf16.vlgmr.msra.gmra.mxu0 %v12331_v25 }
  0x82   :  { %v9173_v23 = vld [vmem:[#allocation2 + $0xdc0] sm:$0xf]  ;;  %v11597_v28 = vld [vmem:[#allocation2 + $0xecc] sm:$0xf0]  ;;  %v9046_v34 = vor.u32 %v11533_v21, %v9045_v17  ;;  %5010 = vmatpush.bf16.msrb.mxu2 %v9318_v16  ;;  %4953 = vmatmul.bf16.vlgmr.msra.gmra.mxu1 %v12335_v30 }
  0x83   :  { %v9301_v27 = vld [vmem:[#allocation2 + $0xec0] sm:$0xf]  ;;  %v11629_v32 = vld [vmem:[#allocation2 + $0xfcc] sm:$0xf0]  ;;  %v9174_v35 = vor.u32 %v11565_v26, %v9173_v23  ;;  %5023 = vmatpush.bf16.msrb.mxu3 %v9446_v24 }
  0x84   :  { %v9429_v31 = vld [vmem:[#allocation2 + $0xfc0] sm:$0xf]  ;;  %v9302_v36 = vor.u32 %v11597_v28, %v9301_v27  ;;  %v11529_v39 = vld [vmem:[#allocation2 + $0xcac] sm:$0xf0]  ;;  %4979 = vmatmul.bf16.vlgmr.msra.gmra.mxu3 %v12337_v33  ;;  %4985 = vmatpush.bf16.msrb.mxu0 %v9046_v34 }
  0x85   :  { %v9029_v37 = vld [vmem:[#allocation2 + $0xca0] sm:$0xf]  ;;  %v9430_v43 = vor.u32 %v11629_v32, %v9429_v31  ;;  %v11561_v45 = vld [vmem:[#allocation2 + $0xdac] sm:$0xf0]  ;;  %4998 = vmatpush.bf16.msrb.mxu1 %v9174_v35 }
  0x86   :  { %v9157_v40 = vld [vmem:[#allocation2 + $0xda0] sm:$0xf]  ;;  %v11593_v47 = vld [vmem:[#allocation2 + $0xeac] sm:$0xf0]  ;;  %v9030_v50 = vor.u32 %v11529_v39, %v9029_v37  ;;  %5011 = vmatpush.bf16.msrb.mxu2 %v9302_v36 }
  0x87   :  { %v9285_v46 = vld [vmem:[#allocation2 + $0xea0] sm:$0xf]  ;;  %v11625_v49 = vld [vmem:[#allocation2 + $0xfac] sm:$0xf0]  ;;  %v9158_v51 = vor.u32 %v11561_v45, %v9157_v40  ;;  %5024 = vmatpush.bf16.msrb.mxu3 %v9430_v43 }
  0x88   :  { %v9413_v48 = vld [vmem:[#allocation2 + $0xfa0] sm:$0xf]  ;;  %v9286_v52 = vor.u32 %v11593_v47, %v9285_v46  ;;  %v11525_v54 = vld [vmem:[#allocation2 + $0xc8c] sm:$0xf0]  ;;  %4986 = vmatpush.bf16.msrb.mxu0 %v9030_v50 }
  0x89   :  { %v9013_v53 = vld [vmem:[#allocation2 + $0xc80] sm:$0xf]  ;;  %v9414_v56 = vor.u32 %v11625_v49, %v9413_v48  ;;  %v11557_v57 = vld [vmem:[#allocation2 + $0xd8c] sm:$0xf0]  ;;  %4999 = vmatpush.bf16.msrb.mxu1 %v9158_v51 }
  0x8a   :  { %v9141_v55 = vld [vmem:[#allocation2 + $0xd80] sm:$0xf]  ;;  %v11589_v59 = vld [vmem:[#allocation2 + $0xe8c] sm:$0xf0]  ;;  %v9014_v62 = vor.u32 %v11525_v54, %v9013_v53  ;;  %5012 = vmatpush.bf16.msrb.mxu2 %v9286_v52 }
  0x8b   :  { %v9269_v58 = vld [vmem:[#allocation2 + $0xe80] sm:$0xf]  ;;  %v11621_v61 = vld [vmem:[#allocation2 + $0xf8c] sm:$0xf0]  ;;  %v9142_v63 = vor.u32 %v11557_v57, %v9141_v55  ;;  %5025 = vmatpush.bf16.msrb.mxu3 %v9414_v56 }
  0x8c   :  { %v9397_v60 = vld [vmem:[#allocation2 + $0xf80] sm:$0xf]  ;;  %v9270_v0 = vor.u32 %v11589_v59, %v9269_v58  ;;  %v11521_v2 = vld [vmem:[#allocation2 + $0xc6c] sm:$0xf0]  ;;  %4987 = vmatpush.bf16.msrb.mxu0 %v9014_v62  ;;  %v121_v59 = vld [vmem:[%s12592_s0 + $0x38] sm:$0xff] }
  0x8d   :  { %v8997_v1 = vld [vmem:[#allocation2 + $0xc60] sm:$0xf]  ;;  %v9398_v4 = vor.u32 %v11621_v61, %v9397_v60  ;;  %v11553_v5 = vld [vmem:[#allocation2 + $0xd6c] sm:$0xf0]  ;;  %5000 = vmatpush.bf16.msrb.mxu1 %v9142_v63 }
  0x8e   :  { %v9125_v3 = vld [vmem:[#allocation2 + $0xd60] sm:$0xf]  ;;  %v11585_v7 = vld [vmem:[#allocation2 + $0xe6c] sm:$0xf0]  ;;  %v8998_v10 = vor.u32 %v11521_v2, %v8997_v1  ;;  %5013 = vmatpush.bf16.msrb.mxu2 %v9270_v0 }
  0x8f   :  { %v9253_v6 = vld [vmem:[#allocation2 + $0xe60] sm:$0xf]  ;;  %v11617_v9 = vld [vmem:[#allocation2 + $0xf6c] sm:$0xf0]  ;;  %v9126_v11 = vor.u32 %v11553_v5, %v9125_v3  ;;  %5026 = vmatpush.bf16.msrb.mxu3 %v9398_v4 }
  0x90   :  { %v9381_v8 = vld [vmem:[#allocation2 + $0xf60] sm:$0xf]  ;;  %v9254_v12 = vor.u32 %v11585_v7, %v9253_v6  ;;  %v11517_v14 = vld [vmem:[#allocation2 + $0xc4c] sm:$0xf0]  ;;  %4988 = vmatpush.bf16.msrb.mxu0 %v8998_v10 }
  0x91   :  { %v8981_v13 = vld [vmem:[#allocation2 + $0xc40] sm:$0xf]  ;;  %v9382_v16 = vor.u32 %v11617_v9, %v9381_v8  ;;  %v11549_v17 = vld [vmem:[#allocation2 + $0xd4c] sm:$0xf0]  ;;  %5001 = vmatpush.bf16.msrb.mxu1 %v9126_v11  ;;  %v930_v8 = vunpack.c.l.b16 %v121_v59 }
  0x92   :  { %v9109_v15 = vld [vmem:[#allocation2 + $0xd40] sm:$0xf]  ;;  %v11581_v23 = vld [vmem:[#allocation2 + $0xe4c] sm:$0xf0]  ;;  %v8982_v27 = vor.u32 %v11517_v14, %v8981_v13  ;;  %5014 = vmatpush.bf16.msrb.mxu2 %v9254_v12  ;;  %v931_v12 = vunpack.c.h.b16 %v121_v59 }
  0x93   :  { %v9237_v21 = vld [vmem:[#allocation2 + $0xe40] sm:$0xf]  ;;  %v11613_v26 = vld [vmem:[#allocation2 + $0xf4c] sm:$0xf0]  ;;  %v9110_v28 = vor.u32 %v11549_v17, %v9109_v15  ;;  %5027 = vmatpush.bf16.msrb.mxu3 %v9382_v16 }
  0x94   :  { %v9365_v24 = vld [vmem:[#allocation2 + $0xf40] sm:$0xf]  ;;  %v9238_v31 = vor.u32 %v11581_v23, %v9237_v21  ;;  %v11513_v34 = vld [vmem:[#allocation2 + $0xc2c] sm:$0xf0]  ;;  %4989 = vmatpush.bf16.msrb.mxu0 %v8982_v27 }
  0x95   :  { %v8965_v32 = vld [vmem:[#allocation2 + $0xc20] sm:$0xf]  ;;  %v9366_v36 = vor.u32 %v11613_v26, %v9365_v24  ;;  %v11545_v37 = vld [vmem:[#allocation2 + $0xd2c] sm:$0xf0]  ;;  %5002 = vmatpush.bf16.msrb.mxu1 %v9110_v28  ;;  %v12351_v28 = vpack.c.b16 %v930_v8, %v930_v8 }
  0x96   :  { %v9093_v35 = vld [vmem:[#allocation2 + $0xd20] sm:$0xf]  ;;  %v11577_v40 = vld [vmem:[#allocation2 + $0xe2c] sm:$0xf0]  ;;  %v8966_v47 = vor.u32 %v11513_v34, %v8965_v32  ;;  %5015 = vmatpush.bf16.msrb.mxu2 %v9238_v31 }
  0x97   :  { %v9221_v39 = vld [vmem:[#allocation2 + $0xe20] sm:$0xf]  ;;  %v11609_v45 = vld [vmem:[#allocation2 + $0xf2c] sm:$0xf0]  ;;  %v9094_v51 = vor.u32 %v11545_v37, %v9093_v35  ;;  %5028 = vmatpush.bf16.msrb.mxu3 %v9366_v36  ;;  %v12355_v35 = vpack.c.b16 %v931_v12, %v931_v12 }
  0x98   :  { %v9349_v43 = vld [vmem:[#allocation2 + $0xf20] sm:$0xf]  ;;  %v11509_v48 = vld [vmem:[#allocation2 + $0xc0c] sm:$0xf0]  ;;  %v9222_v52 = vor.u32 %v11577_v40, %v9221_v39  ;;  %4990 = vmatpush.bf16.msrb.mxu0 %v8966_v47 }
  0x99   :  { %v8949_v46 = vld [vmem:[#allocation2 + $0xc00] sm:$0xf]  ;;  %v11541_v50 = vld [vmem:[#allocation2 + $0xd0c] sm:$0xf0]  ;;  %v9350_v56 = vor.u32 %v11609_v45, %v9349_v43  ;;  %5003 = vmatpush.bf16.msrb.mxu1 %v9094_v51 }
  0x9a   :  { %v9077_v49 = vld [vmem:[#allocation2 + $0xd00] sm:$0xf]  ;;  %v11573_v54 = vld [vmem:[#allocation2 + $0xe0c] sm:$0xf0]  ;;  %v8950_v63 = vor.u32 %v11509_v48, %v8949_v46  ;;  %5016 = vmatpush.bf16.msrb.mxu2 %v9222_v52 }
  0x9b   :  { %v9205_v53 = vld [vmem:[#allocation2 + $0xe00] sm:$0xf]  ;;  %v120_v55 = vld [vmem:[%s12592_s0 + $0x30] sm:$0xff]  ;;  %v9078_v4 = vor.u32 %v11541_v50, %v9077_v49  ;;  %5029 = vmatpush.bf16.msrb.mxu3 %v9350_v56 }
  0x9c   :  { %v9333_v57 = vld [vmem:[#allocation2 + $0xf00] sm:$0xf]  ;;  %v11605_v58 = vld [vmem:[#allocation2 + $0xf0c] sm:$0xf0]  ;;  %v928_v3 = vunpack.c.l.b16 %v120_v55  ;;  %v9206_v5 = vor.u32 %v11573_v54, %v9205_v53  ;;  %v929_v9 = vunpack.c.h.b16 %v120_v55  ;;  %4991 = vmatpush.bf16.msrb.mxu0 %v8950_v63 }
  0x9d   :  { %v9573_v60 = vld [vmem:[#allocation2 + $0x10e0] sm:$0xf]  ;;  %v11665_v61 = vld [vmem:[#allocation2 + $0x10ec] sm:$0xf0]  ;;  %v9334_v10 = vor.u32 %v11605_v58, %v9333_v57  ;;  %5004 = vmatpush.bf16.msrb.mxu1 %v9078_v4 }
  0x9e   :  { %v9701_v62 = vld [vmem:[#allocation2 + $0x11e0] sm:$0xf]  ;;  %v11697_v0 = vld [vmem:[#allocation2 + $0x11ec] sm:$0xf0]  ;;  %v9574_v11 = vor.u32 %v11665_v61, %v9573_v60  ;;  %v12349_v23 = vpack.c.b16 %v928_v3, %v928_v3  ;;  %5017 = vmatpush.bf16.msrb.mxu2 %v9206_v5  ;;  %v12353_v31 = vpack.c.b16 %v929_v9, %v929_v9 }
  0x9f   :  { %v9829_v1 = vld [vmem:[#allocation2 + $0x12e0] sm:$0xf]  ;;  %v11729_v2 = vld [vmem:[#allocation2 + $0x12ec] sm:$0xf0]  ;;  %v9702_v13 = vor.u32 %v11697_v0, %v9701_v62  ;;  %5030 = vmatpush.bf16.msrb.mxu3 %v9334_v10 }
  0xa0   :  { %v9957_v6 = vld [vmem:[#allocation2 + $0x13e0] sm:$0xf]  ;;  %v11761_v7 = vld [vmem:[#allocation2 + $0x13ec] sm:$0xf0]  ;;  %v9830_v14 = vor.u32 %v11729_v2, %v9829_v1  ;;  %5036 = vmatpush.bf16.msra.mxu0 %v9574_v11  ;;  %5005 = vmatmul.bf16.vlgmr.msrb.gmra.mxu1 %v12353_v31 }
  0xa1   :  { %v9557_v15 = vld [vmem:[#allocation2 + $0x10c0] sm:$0xf]  ;;  %v11661_v16 = vld [vmem:[#allocation2 + $0x10cc] sm:$0xf0]  ;;  %v9958_v21 = vor.u32 %v11761_v7, %v9957_v6  ;;  %5049 = vmatpush.bf16.msra.mxu1 %v9702_v13  ;;  %4992 = vmatmul.bf16.vlgmr.msrb.gmra.mxu0 %v12349_v23 }
  0xa2   :  { %v9685_v17 = vld [vmem:[#allocation2 + $0x11c0] sm:$0xf]  ;;  %v11693_v24 = vld [vmem:[#allocation2 + $0x11cc] sm:$0xf0]  ;;  %v9558_v36 = vor.u32 %v11661_v16, %v9557_v15  ;;  %5062 = vmatpush.bf16.msra.mxu2 %v9830_v14  ;;  %5031 = vmatmul.bf16.vlgmr.msrb.gmra.mxu3 %v12355_v35 }
  0xa3   :  { %v9813_v26 = vld [vmem:[#allocation2 + $0x12c0] sm:$0xf]  ;;  %v11725_v27 = vld [vmem:[#allocation2 + $0x12cc] sm:$0xf0]  ;;  %v9686_v37 = vor.u32 %v11693_v24, %v9685_v17  ;;  %5075 = vmatpush.bf16.msra.mxu3 %v9958_v21  ;;  %5018 = vmatmul.bf16.vlgmr.msrb.gmra.mxu2 %v12351_v28 }
  0xa4   :  { %v9941_v32 = vld [vmem:[#allocation2 + $0x13c0] sm:$0xf]  ;;  %v11757_v34 = vld [vmem:[#allocation2 + $0x13cc] sm:$0xf0]  ;;  %v9814_v39 = vor.u32 %v11725_v27, %v9813_v26  ;;  %5037 = vmatpush.bf16.msra.mxu0 %v9558_v36 }
  0xa5   :  { %v9541_v40 = vld [vmem:[#allocation2 + $0x10a0] sm:$0xf]  ;;  %v11657_v43 = vld [vmem:[#allocation2 + $0x10ac] sm:$0xf0]  ;;  %v9942_v46 = vor.u32 %v11757_v34, %v9941_v32  ;;  %5050 = vmatpush.bf16.msra.mxu1 %v9686_v37 }
  0xa6   :  { %v9669_v45 = vld [vmem:[#allocation2 + $0x11a0] sm:$0xf]  ;;  %v11689_v47 = vld [vmem:[#allocation2 + $0x11ac] sm:$0xf0]  ;;  %v9542_v52 = vor.u32 %v11657_v43, %v9541_v40  ;;  %5063 = vmatpush.bf16.msra.mxu2 %v9814_v39 }
  0xa7   :  { %v9797_v48 = vld [vmem:[#allocation2 + $0x12a0] sm:$0xf]  ;;  %v11721_v49 = vld [vmem:[#allocation2 + $0x12ac] sm:$0xf0]  ;;  %v9670_v53 = vor.u32 %v11689_v47, %v9669_v45  ;;  %5076 = vmatpush.bf16.msra.mxu3 %v9942_v46 }
  0xa8   :  { %v9925_v50 = vld [vmem:[#allocation2 + $0x13a0] sm:$0xf]  ;;  %v11753_v51 = vld [vmem:[#allocation2 + $0x13ac] sm:$0xf0]  ;;  %v9798_v54 = vor.u32 %v11721_v49, %v9797_v48  ;;  %5038 = vmatpush.bf16.msra.mxu0 %v9542_v52 }
  0xa9   :  { %v9525_v55 = vld [vmem:[#allocation2 + $0x1080] sm:$0xf]  ;;  %v11653_v56 = vld [vmem:[#allocation2 + $0x108c] sm:$0xf0]  ;;  %v9926_v58 = vor.u32 %v11753_v51, %v9925_v50  ;;  %5051 = vmatpush.bf16.msra.mxu1 %v9670_v53 }
  0xaa   :  { %v9653_v57 = vld [vmem:[#allocation2 + $0x1180] sm:$0xf]  ;;  %v11685_v59 = vld [vmem:[#allocation2 + $0x118c] sm:$0xf0]  ;;  %v9526_v0 = vor.u32 %v11653_v56, %v9525_v55  ;;  %5064 = vmatpush.bf16.msra.mxu2 %v9798_v54 }
  0xab   :  { %v9781_v60 = vld [vmem:[#allocation2 + $0x1280] sm:$0xf]  ;;  %v11717_v61 = vld [vmem:[#allocation2 + $0x128c] sm:$0xf0]  ;;  %v9654_v1 = vor.u32 %v11685_v59, %v9653_v57  ;;  %5077 = vmatpush.bf16.msra.mxu3 %v9926_v58 }
  0xac   :  { %v9909_v62 = vld [vmem:[#allocation2 + $0x1380] sm:$0xf]  ;;  %v11749_v63 = vld [vmem:[#allocation2 + $0x138c] sm:$0xf0]  ;;  %v9782_v2 = vor.u32 %v11717_v61, %v9781_v60  ;;  %5039 = vmatpush.bf16.msra.mxu0 %v9526_v0 }
  0xad   :  { %v9509_v3 = vld [vmem:[#allocation2 + $0x1060] sm:$0xf]  ;;  %v11649_v4 = vld [vmem:[#allocation2 + $0x106c] sm:$0xf0]  ;;  %v9910_v6 = vor.u32 %v11749_v63, %v9909_v62  ;;  %5052 = vmatpush.bf16.msra.mxu1 %v9654_v1  ;;  %v123_v1 = vld [vmem:[%s12592_s0 + $0x48] sm:$0xff] }
  0xae   :  { %v9637_v5 = vld [vmem:[#allocation2 + $0x1160] sm:$0xf]  ;;  %v11681_v7 = vld [vmem:[#allocation2 + $0x116c] sm:$0xf0]  ;;  %v9510_v12 = vor.u32 %v11649_v4, %v9509_v3  ;;  %5065 = vmatpush.bf16.msra.mxu2 %v9782_v2 }
  0xaf   :  { %v9765_v8 = vld [vmem:[#allocation2 + $0x1260] sm:$0xf]  ;;  %v11713_v9 = vld [vmem:[#allocation2 + $0x126c] sm:$0xf0]  ;;  %v9638_v13 = vor.u32 %v11681_v7, %v9637_v5  ;;  %5078 = vmatpush.bf16.msra.mxu3 %v9910_v6 }
  0xb0   :  { %v9893_v10 = vld [vmem:[#allocation2 + $0x1360] sm:$0xf]  ;;  %v11745_v11 = vld [vmem:[#allocation2 + $0x136c] sm:$0xf0]  ;;  %v9766_v14 = vor.u32 %v11713_v9, %v9765_v8  ;;  %5040 = vmatpush.bf16.msra.mxu0 %v9510_v12 }
  0xb1   :  { %v9493_v15 = vld [vmem:[#allocation2 + $0x1040] sm:$0xf]  ;;  %v11645_v16 = vld [vmem:[#allocation2 + $0x104c] sm:$0xf0]  ;;  %v9894_v21 = vor.u32 %v11745_v11, %v9893_v10  ;;  %5053 = vmatpush.bf16.msra.mxu1 %v9638_v13 }
  0xb2   :  { %v9621_v17 = vld [vmem:[#allocation2 + $0x1140] sm:$0xf]  ;;  %v11677_v24 = vld [vmem:[#allocation2 + $0x114c] sm:$0xf0]  ;;  %v9494_v36 = vor.u32 %v11645_v16, %v9493_v15  ;;  %5066 = vmatpush.bf16.msra.mxu2 %v9766_v14  ;;  %v934_v14 = vunpack.c.l.b16 %v123_v1 }
  0xb3   :  { %v9749_v26 = vld [vmem:[#allocation2 + $0x1240] sm:$0xf]  ;;  %v11709_v27 = vld [vmem:[#allocation2 + $0x124c] sm:$0xf0]  ;;  %v9622_v37 = vor.u32 %v11677_v24, %v9621_v17  ;;  %5079 = vmatpush.bf16.msra.mxu3 %v9894_v21  ;;  %v935_v21 = vunpack.c.h.b16 %v123_v1 }
  0xb4   :  { %v9877_v32 = vld [vmem:[#allocation2 + $0x1340] sm:$0xf]  ;;  %v11741_v34 = vld [vmem:[#allocation2 + $0x134c] sm:$0xf0]  ;;  %v9750_v39 = vor.u32 %v11709_v27, %v9749_v26  ;;  %5041 = vmatpush.bf16.msra.mxu0 %v9494_v36 }
  0xb5   :  { %v9477_v40 = vld [vmem:[#allocation2 + $0x1020] sm:$0xf]  ;;  %v11641_v43 = vld [vmem:[#allocation2 + $0x102c] sm:$0xf0]  ;;  %v9878_v46 = vor.u32 %v11741_v34, %v9877_v32  ;;  %5054 = vmatpush.bf16.msra.mxu1 %v9622_v37 }
  0xb6   :  { %v9605_v45 = vld [vmem:[#allocation2 + $0x1120] sm:$0xf]  ;;  %v11673_v47 = vld [vmem:[#allocation2 + $0x112c] sm:$0xf0]  ;;  %v9478_v53 = vor.u32 %v11641_v43, %v9477_v40  ;;  %5067 = vmatpush.bf16.msra.mxu2 %v9750_v39 }
  0xb7   :  { %v9733_v48 = vld [vmem:[#allocation2 + $0x1220] sm:$0xf]  ;;  %v11705_v49 = vld [vmem:[#allocation2 + $0x122c] sm:$0xf0]  ;;  %v9606_v57 = vor.u32 %v11673_v47, %v9605_v45  ;;  %5080 = vmatpush.bf16.msra.mxu3 %v9878_v46  ;;  %v12369_v45 = vpack.c.b16 %v934_v14, %v934_v14 }
  0xb8   :  { %v9861_v50 = vld [vmem:[#allocation2 + $0x1320] sm:$0xf]  ;;  %v11737_v51 = vld [vmem:[#allocation2 + $0x132c] sm:$0xf0]  ;;  %v9734_v58 = vor.u32 %v11705_v49, %v9733_v48  ;;  %5042 = vmatpush.bf16.msra.mxu0 %v9478_v53  ;;  %v12373_v49 = vpack.c.b16 %v935_v21, %v935_v21 }
  0xb9   :  { %v9461_v52 = vld [vmem:[#allocation2 + $0x1000] sm:$0xf]  ;;  %v11637_v54 = vld [vmem:[#allocation2 + $0x100c] sm:$0xf0]  ;;  %v9862_v62 = vor.u32 %v11737_v51, %v9861_v50  ;;  %5055 = vmatpush.bf16.msra.mxu1 %v9606_v57 }
  0xba   :  { %v9589_v55 = vld [vmem:[#allocation2 + $0x1100] sm:$0xf]  ;;  %v11669_v56 = vld [vmem:[#allocation2 + $0x110c] sm:$0xf0]  ;;  %v9462_v5 = vor.u32 %v11637_v54, %v9461_v52  ;;  %5068 = vmatpush.bf16.msra.mxu2 %v9734_v58 }
  0xbb   :  { %v9717_v59 = vld [vmem:[#allocation2 + $0x1200] sm:$0xf]  ;;  %v11701_v60 = vld [vmem:[#allocation2 + $0x120c] sm:$0xf0]  ;;  %v9590_v10 = vor.u32 %v11669_v56, %v9589_v55  ;;  %5081 = vmatpush.bf16.msra.mxu3 %v9862_v62 }
  0xbc   :  { %v122_v61 = vld [vmem:[%s12592_s0 + $0x40] sm:$0xff]  ;;  %v11733_v0 = vld [vmem:[#allocation2 + $0x130c] sm:$0xf0]  ;;  %v9718_v11 = vor.u32 %v11701_v60, %v9717_v59  ;;  %5043 = vmatpush.bf16.msra.mxu0 %v9462_v5 }
  0xbd   :  { %v9845_v63 = vld [vmem:[#allocation2 + $0x1300] sm:$0xf]  ;;  %v11793_v3 = vld [vmem:[#allocation2 + $0x14ec] sm:$0xf0]  ;;  %v932_v9 = vunpack.c.l.b16 %v122_v61  ;;  %v933_v15 = vunpack.c.h.b16 %v122_v61  ;;  %5056 = vmatpush.bf16.msra.mxu1 %v9590_v10 }
  0xbe   :  { %v10085_v2 = vld [vmem:[#allocation2 + $0x14e0] sm:$0xf]  ;;  %v11825_v6 = vld [vmem:[#allocation2 + $0x15ec] sm:$0xf0]  ;;  %v9846_v16 = vor.u32 %v11733_v0, %v9845_v63  ;;  %5069 = vmatpush.bf16.msra.mxu2 %v9718_v11 }
  0xbf   :  { %v10213_v4 = vld [vmem:[#allocation2 + $0x15e0] sm:$0xf]  ;;  %v11857_v8 = vld [vmem:[#allocation2 + $0x16ec] sm:$0xf0]  ;;  %v10086_v17 = vor.u32 %v11793_v3, %v10085_v2  ;;  %v12367_v37 = vpack.c.b16 %v932_v9, %v932_v9  ;;  %v12371_v46 = vpack.c.b16 %v933_v15, %v933_v15 }
  0xc0   :  { %v10341_v7 = vld [vmem:[#allocation2 + $0x16e0] sm:$0xf]  ;;  %v11889_v13 = vld [vmem:[#allocation2 + $0x17ec] sm:$0xf0]  ;;  %v10214_v24 = vor.u32 %v11825_v6, %v10213_v4  ;;  %5082 = vmatpush.bf16.msra.mxu3 %v9846_v16 }
  0xc1   :  { %v10469_v12 = vld [vmem:[#allocation2 + $0x17e0] sm:$0xf]  ;;  %v10342_v26 = vor.u32 %v11857_v8, %v10341_v7  ;;  %v11789_v32 = vld [vmem:[#allocation2 + $0x14cc] sm:$0xf0]  ;;  %5088 = vmatpush.bf16.msrb.mxu0 %v10086_v17  ;;  %5070 = vmatmul.bf16.vlgmr.msra.gmra.mxu2 %v12369_v45 }
  0xc2   :  { %v10069_v27 = vld [vmem:[#allocation2 + $0x14c0] sm:$0xf]  ;;  %v10470_v36 = vor.u32 %v11889_v13, %v10469_v12  ;;  %v11821_v39 = vld [vmem:[#allocation2 + $0x15cc] sm:$0xf0]  ;;  %5101 = vmatpush.bf16.msrb.mxu1 %v10214_v24  ;;  %5044 = vmatmul.bf16.vlgmr.msra.gmra.mxu0 %v12367_v37 }
  0xc3   :  { %v10197_v34 = vld [vmem:[#allocation2 + $0x15c0] sm:$0xf]  ;;  %v11853_v43 = vld [vmem:[#allocation2 + $0x16cc] sm:$0xf0]  ;;  %v10070_v50 = vor.u32 %v11789_v32, %v10069_v27  ;;  %5114 = vmatpush.bf16.msrb.mxu2 %v10342_v26  ;;  %5057 = vmatmul.bf16.vlgmr.msra.gmra.mxu1 %v12371_v46 }
  0xc4   :  { %v10325_v40 = vld [vmem:[#allocation2 + $0x16c0] sm:$0xf]  ;;  %v11885_v48 = vld [vmem:[#allocation2 + $0x17cc] sm:$0xf0]  ;;  %v10198_v51 = vor.u32 %v11821_v39, %v10197_v34  ;;  %5127 = vmatpush.bf16.msrb.mxu3 %v10470_v36 }
  0xc5   :  { %v10453_v47 = vld [vmem:[#allocation2 + $0x17c0] sm:$0xf]  ;;  %v10326_v52 = vor.u32 %v11853_v43, %v10325_v40  ;;  %v11785_v54 = vld [vmem:[#allocation2 + $0x14ac] sm:$0xf0]  ;;  %5083 = vmatmul.bf16.vlgmr.msra.gmra.mxu3 %v12373_v49  ;;  %5089 = vmatpush.bf16.msrb.mxu0 %v10070_v50 }
  0xc6   :  { %v10053_v53 = vld [vmem:[#allocation2 + $0x14a0] sm:$0xf]  ;;  %v10454_v56 = vor.u32 %v11885_v48, %v10453_v47  ;;  %v11817_v57 = vld [vmem:[#allocation2 + $0x15ac] sm:$0xf0]  ;;  %5102 = vmatpush.bf16.msrb.mxu1 %v10198_v51 }
  0xc7   :  { %v10181_v55 = vld [vmem:[#allocation2 + $0x15a0] sm:$0xf]  ;;  %v11849_v59 = vld [vmem:[#allocation2 + $0x16ac] sm:$0xf0]  ;;  %v10054_v62 = vor.u32 %v11785_v54, %v10053_v53  ;;  %5115 = vmatpush.bf16.msrb.mxu2 %v10326_v52 }
  0xc8   :  { %v10309_v58 = vld [vmem:[#allocation2 + $0x16a0] sm:$0xf]  ;;  %v11881_v61 = vld [vmem:[#allocation2 + $0x17ac] sm:$0xf0]  ;;  %v10182_v63 = vor.u32 %v11817_v57, %v10181_v55  ;;  %5128 = vmatpush.bf16.msrb.mxu3 %v10454_v56 }
  0xc9   :  { %v10437_v60 = vld [vmem:[#allocation2 + $0x17a0] sm:$0xf]  ;;  %v10310_v0 = vor.u32 %v11849_v59, %v10309_v58  ;;  %v11781_v2 = vld [vmem:[#allocation2 + $0x148c] sm:$0xf0]  ;;  %5090 = vmatpush.bf16.msrb.mxu0 %v10054_v62  ;;  %v4837_v57 = vpop.f32.mrf.mxu0 }
  0xca   :  { %v10037_v1 = vld [vmem:[#allocation2 + $0x1480] sm:$0xf]  ;;  %v10438_v4 = vor.u32 %v11881_v61, %v10437_v60  ;;  %v11813_v5 = vld [vmem:[#allocation2 + $0x158c] sm:$0xf0]  ;;  %5103 = vmatpush.bf16.msrb.mxu1 %v10182_v63 }
  0xcb   :  { %v10165_v3 = vld [vmem:[#allocation2 + $0x1580] sm:$0xf]  ;;  %v11845_v7 = vld [vmem:[#allocation2 + $0x168c] sm:$0xf0]  ;;  %v10038_v10 = vor.u32 %v11781_v2, %v10037_v1  ;;  %5116 = vmatpush.bf16.msrb.mxu2 %v10310_v0  ;;  %v4850_v0 = vpop.f32.mrf.mxu1 }
  0xcc   :  { %v10293_v6 = vld [vmem:[#allocation2 + $0x1680] sm:$0xf]  ;;  %v11877_v9 = vld [vmem:[#allocation2 + $0x178c] sm:$0xf0]  ;;  %v10166_v12 = vor.u32 %v11813_v5, %v10165_v3  ;;  %5129 = vmatpush.bf16.msrb.mxu3 %v10438_v4 }
  0xcd   :  { %v10421_v8 = vld [vmem:[#allocation2 + $0x1780] sm:$0xf]  ;;  %v10294_v13 = vor.u32 %v11845_v7, %v10293_v6  ;;  %v11777_v14 = vld [vmem:[#allocation2 + $0x146c] sm:$0xf0]  ;;  %5091 = vmatpush.bf16.msrb.mxu0 %v10038_v10 }
  0xce   :  { %v10021_v11 = vld [vmem:[#allocation2 + $0x1460] sm:$0xf]  ;;  %v11809_v16 = vld [vmem:[#allocation2 + $0x156c] sm:$0xf0]  ;;  %v10422_v17 = vor.u32 %v11877_v9, %v10421_v8  ;;  %5104 = vmatpush.bf16.msrb.mxu1 %v10166_v12 }
  0xcf   :  { %v10149_v15 = vld [vmem:[#allocation2 + $0x1560] sm:$0xf]  ;;  %v11841_v24 = vld [vmem:[#allocation2 + $0x166c] sm:$0xf0]  ;;  %v10022_v34 = vor.u32 %v11777_v14, %v10021_v11  ;;  %5117 = vmatpush.bf16.msrb.mxu2 %v10294_v13 }
  0xd0   :  { %v10277_v21 = vld [vmem:[#allocation2 + $0x1660] sm:$0xf]  ;;  %v11873_v32 = vld [vmem:[#allocation2 + $0x176c] sm:$0xf0]  ;;  %v10150_v39 = vor.u32 %v11809_v16, %v10149_v15  ;;  %5130 = vmatpush.bf16.msrb.mxu3 %v10422_v17 }
  0xd1   :  { %v894_v26 = vld [vmem:[#allocation4] sm:$0xf]  ;;  %v10278_v40 = vor.u32 %v11841_v24, %v10277_v21  ;;  %v11773_v43 = vld [vmem:[#allocation2 + $0x144c] sm:$0xf0]  ;;  %5092 = vmatpush.bf16.msrb.mxu0 %v10022_v34  ;;  %v4863_v21 = vpop.f32.mrf.mxu2 }
  0xd2   :  { %v10405_v27 = vld [vmem:[#allocation2 + $0x1760] sm:$0xf]  ;;  %v896_v48 = vperm.slane %v894_v26, 0  ;;  %v11805_v51 = vld [vmem:[#allocation2 + $0x154c] sm:$0xf0]  ;;  %5105 = vmatpush.bf16.msrb.mxu1 %v10150_v39 }
  0xd3   :  { %v10005_v36 = vld [vmem:[#allocation2 + $0x1440] sm:$0xf]  ;;  %v10406_v50 = vor.u32 %v11873_v32, %v10405_v27  ;;  %v11837_v53 = vld [vmem:[#allocation2 + $0x164c] sm:$0xf0]  ;;  %5118 = vmatpush.bf16.msrb.mxu2 %v10278_v40  ;;  %v125_v32 = vld [vmem:[%s12592_s0 + $0x58] sm:$0xff] }
  0xd4   :  { %v10133_v47 = vld [vmem:[#allocation2 + $0x1540] sm:$0xf]  ;;  %v11869_v55 = vld [vmem:[#allocation2 + $0x174c] sm:$0xf0]  ;;  %v10006_v56 = vor.u32 %v11773_v43, %v10005_v36  ;;  %v4838_v63 = vadd.f32 %v4837_v57, %v896_v48  ;;  %v4876_v36 = vpop.f32.mrf.mxu3  ;;  %v11151_v39 = vld [vmem:[#allocation2 + $0xe4] sm:$0xf] }
  0xd5   :  { %v10261_v52 = vld [vmem:[#allocation2 + $0x1640] sm:$0xf]  ;;  %v10134_v58 = vor.u32 %v11805_v51, %v10133_v47  ;;  %v11769_v61 = vld [vmem:[#allocation2 + $0x142c] sm:$0xf0]  ;;  %5131 = vmatpush.bf16.msrb.mxu3 %v10406_v50  ;;  %v7527_v40 = vld [vmem:[#allocation2 + $0xf0] sm:$0xf0] }
  0xd6   :  { %v10389_v54 = vld [vmem:[#allocation2 + $0x1740] sm:$0xf]  ;;  %v10262_v59 = vor.u32 %v11837_v53, %v10261_v52  ;;  %v11801_v2 = vld [vmem:[#allocation2 + $0x152c] sm:$0xf0]  ;;  %v4851_v8 = vadd.f32 %v4850_v0, %v4838_v63  ;;  %5093 = vmatpush.bf16.msrb.mxu0 %v10006_v56  ;;  %v11183_v43 = vld [vmem:[#allocation2 + $0x1e4] sm:$0xf]  ;;  %v7530_v63 = vor.u32 %v11151_v39, %v7527_v40  ;;  %v939_v0 = vunpack.c.h.b16 %v125_v32 }
  0xd7   :  { %v9989_v60 = vld [vmem:[#allocation2 + $0x1420] sm:$0xf]  ;;  %v10390_v1 = vor.u32 %v11869_v55, %v10389_v54  ;;  %v11833_v4 = vld [vmem:[#allocation2 + $0x162c] sm:$0xf0]  ;;  %5106 = vmatpush.bf16.msrb.mxu1 %v10134_v58  ;;  %v7655_v48 = vld [vmem:[#allocation2 + $0x1f0] sm:$0xf0]  ;;  %v4839_v54 = vpop.f32.mrf.mxu0 }
  0xd8   :  { %v10117_v62 = vld [vmem:[#allocation2 + $0x1520] sm:$0xf]  ;;  %v11865_v6 = vld [vmem:[#allocation2 + $0x172c] sm:$0xf0]  ;;  %v9990_v9 = vor.u32 %v11769_v61, %v9989_v60  ;;  %5119 = vmatpush.bf16.msrb.mxu2 %v10262_v59  ;;  %v4864_v34 = vadd.f32 %v4863_v21, %v4851_v8  ;;  %v11215_v50 = vld [vmem:[#allocation2 + $0x2e4] sm:$0xf]  ;;  %v938_v59 = vunpack.c.l.b16 %v125_v32  ;;  %v4852_v61 = vpop.f32.mrf.mxu1 }
  0xd9   :  { %v10245_v3 = vld [vmem:[#allocation2 + $0x1620] sm:$0xf]  ;;  %v11765_v10 = vld [vmem:[#allocation2 + $0x140c] sm:$0xf0]  ;;  %v10118_v13 = vor.u32 %v11801_v2, %v10117_v62  ;;  %5132 = vmatpush.bf16.msrb.mxu3 %v10390_v1  ;;  %v7783_v51 = vld [vmem:[#allocation2 + $0x2f0] sm:$0xf0]  ;;  %v7658_v1 = vor.u32 %v11183_v43, %v7655_v48 }
  0xda   :  { %v10373_v5 = vld [vmem:[#allocation2 + $0x1720] sm:$0xf]  ;;  %v11797_v12 = vld [vmem:[#allocation2 + $0x150c] sm:$0xf0]  ;;  %v10246_v14 = vor.u32 %v11833_v4, %v10245_v3  ;;  %5094 = vmatpush.bf16.msrb.mxu0 %v9990_v9  ;;  %v12385_v53 = vadd.f32 %v4876_v36, %v4864_v34  ;;  %v11247_v57 = vld [vmem:[#allocation2 + $0x3e4] sm:$0xf]  ;;  %v7786_v2 = vor.u32 %v11215_v50, %v7783_v51 }
  0xdb   :  { %v9973_v7 = vld [vmem:[#allocation2 + $0x1400] sm:$0xf]  ;;  %v11829_v16 = vld [vmem:[#allocation2 + $0x160c] sm:$0xf0]  ;;  %v10374_v24 = vor.u32 %v11865_v6, %v10373_v5  ;;  %5107 = vmatpush.bf16.msrb.mxu1 %v10118_v13  ;;  %v7911_v58 = vld [vmem:[#allocation2 + $0x3f0] sm:$0xf0] }
  0xdc   :  { %v10101_v11 = vld [vmem:[#allocation2 + $0x1500] sm:$0xf]  ;;  %v124_v17 = vld [vmem:[%s12592_s0 + $0x50] sm:$0xff]  ;;  %v9974_v47 = vor.u32 %v11765_v10, %v9973_v7  ;;  %5120 = vmatpush.bf16.msrb.mxu2 %v10246_v14  ;;  %v11147_v3 = vld [vmem:[#allocation2 + $0xc4] sm:$0xf]  ;;  %v7914_v6 = vor.u32 %v11247_v57, %v7911_v58  ;;  %v4878_v21 = vpop.f32.mrf.mxu3 }
  0xdd   :  { %v10229_v15 = vld [vmem:[#allocation2 + $0x1600] sm:$0xf]  ;;  %v11861_v27 = vld [vmem:[#allocation2 + $0x170c] sm:$0xf0]  ;;  %v936_v52 = vunpack.c.l.b16 %v124_v17  ;;  %v10102_v55 = vor.u32 %v11797_v12, %v10101_v11  ;;  %v937_v60 = vunpack.c.h.b16 %v124_v17  ;;  %5133 = vmatpush.bf16.msrb.mxu3 %v10374_v24  ;;  %v7511_v4 = vld [vmem:[#allocation2 + $0xd0] sm:$0xf0]  ;;  %v12389_v11 = vpack.c.b16 %v938_v59, %v938_v59 }
  0xde   :  { %v10357_v26 = vld [vmem:[#allocation2 + $0x1700] sm:$0xf]  ;;  %v10230_v56 = vor.u32 %v11829_v16, %v10229_v15  ;;  %v11179_v5 = vld [vmem:[#allocation2 + $0x1c4] sm:$0xf]  ;;  %5095 = vmatpush.bf16.msrb.mxu0 %v9974_v47  ;;  %v7639_v8 = vld [vmem:[#allocation2 + $0x1d0] sm:$0xf0]  ;;  %v4865_v15 = vpop.f32.mrf.mxu2  ;;  %v12393_v16 = vpack.c.b16 %v939_v0, %v939_v0  ;;  %v7514_v17 = vor.u32 %v11147_v3, %v7511_v4 }
  0xdf   :  { %v10358_v62 = vor.u32 %v11861_v27, %v10357_v26  ;;  %v12387_v7 = vpack.c.b16 %v936_v52, %v936_v52  ;;  %v11211_v9 = vld [vmem:[#allocation2 + $0x2c4] sm:$0xf]  ;;  %v7767_v10 = vld [vmem:[#allocation2 + $0x2d0] sm:$0xf0]  ;;  %5108 = vmatpush.bf16.msrb.mxu1 %v10102_v55  ;;  %v12391_v12 = vpack.c.b16 %v937_v60, %v937_v60  ;;  %v7642_v24 = vor.u32 %v11179_v5, %v7639_v8  ;;  %v4889_v0 = vpop.f32.mrf.mxu0 }
  0xe0   :  { %5121 = vmatpush.bf16.msrb.mxu2 %v10230_v56  ;;  %v11243_v13 = vld [vmem:[#allocation2 + $0x3c4] sm:$0xf]  ;;  %v7895_v14 = vld [vmem:[#allocation2 + $0x3d0] sm:$0xf0]  ;;  %v7770_v26 = vor.u32 %v11211_v9, %v7767_v10  ;;  %v4902_v8 = vpop.f32.mrf.mxu1 }
  0xe1   :  { %5134 = vmatpush.bf16.msrb.mxu3 %v10358_v62  ;;  %v11143_v27 = vld [vmem:[#allocation2 + $0xa4] sm:$0xf]  ;;  %v7495_v32 = vld [vmem:[#allocation2 + $0xb0] sm:$0xf0]  ;;  %5096 = vmatmul.bf16.vlgmr.msrb.gmra.mxu0 %v12387_v7  ;;  %v7898_v36 = vor.u32 %v11243_v13, %v7895_v14 }
  0xe2   :  { %5140 = vmatpush.bf16.msra.mxu0 %v7530_v63  ;;  %v11175_v34 = vld [vmem:[#allocation2 + $0x1a4] sm:$0xf]  ;;  %v7623_v39 = vld [vmem:[#allocation2 + $0x1b0] sm:$0xf0]  ;;  %5109 = vmatmul.bf16.vlgmr.msrb.gmra.mxu1 %v12391_v12  ;;  %v7498_v50 = vor.u32 %v11143_v27, %v7495_v32 }
  0xe3   :  { %5153 = vmatpush.bf16.msra.mxu1 %v7658_v1  ;;  %v11207_v40 = vld [vmem:[#allocation2 + $0x2a4] sm:$0xf]  ;;  %v7751_v43 = vld [vmem:[#allocation2 + $0x2b0] sm:$0xf0]  ;;  %5122 = vmatmul.bf16.vlgmr.msrb.gmra.mxu2 %v12389_v11  ;;  %v7626_v51 = vor.u32 %v11175_v34, %v7623_v39 }
  0xe4   :  { %5166 = vmatpush.bf16.msra.mxu2 %v7786_v2  ;;  %v11239_v47 = vld [vmem:[#allocation2 + $0x3a4] sm:$0xf]  ;;  %v7879_v48 = vld [vmem:[#allocation2 + $0x3b0] sm:$0xf0]  ;;  %5135 = vmatmul.bf16.vlgmr.msrb.gmra.mxu3 %v12393_v16  ;;  %v7754_v52 = vor.u32 %v11207_v40, %v7751_v43 }
  0xe5   :  { %5179 = vmatpush.bf16.msra.mxu3 %v7914_v6  ;;  %v11139_v54 = vld [vmem:[#allocation2 + $0x84] sm:$0xf]  ;;  %v7479_v55 = vld [vmem:[#allocation2 + $0x90] sm:$0xf0]  ;;  %v7882_v57 = vor.u32 %v11239_v47, %v7879_v48  ;;  %v4890_v6 = vadd.f32 %v4889_v0, %v12385_v53 }
  0xe6   :  { %5141 = vmatpush.bf16.msra.mxu0 %v7514_v17  ;;  %v11171_v56 = vld [vmem:[#allocation2 + $0x184] sm:$0xf]  ;;  %v7607_v58 = vld [vmem:[#allocation2 + $0x190] sm:$0xf0]  ;;  %v7482_v63 = vor.u32 %v11139_v54, %v7479_v55  ;;  %v4915_v39 = vpop.f32.mrf.mxu2 }
  0xe7   :  { %5154 = vmatpush.bf16.msra.mxu1 %v7642_v24  ;;  %v11203_v59 = vld [vmem:[#allocation2 + $0x284] sm:$0xf]  ;;  %v7735_v60 = vld [vmem:[#allocation2 + $0x290] sm:$0xf0]  ;;  %v7610_v1 = vor.u32 %v11171_v56, %v7607_v58  ;;  %v4903_v21 = vadd.f32 %v4902_v8, %v4890_v6  ;;  %v4891_v56 = vpop.f32.mrf.mxu0 }
  0xe8   :  { %5167 = vmatpush.bf16.msra.mxu2 %v7770_v26  ;;  %v11235_v61 = vld [vmem:[#allocation2 + $0x384] sm:$0xf]  ;;  %v7863_v62 = vld [vmem:[#allocation2 + $0x390] sm:$0xf0]  ;;  %v7738_v2 = vor.u32 %v11203_v59, %v7735_v60 }
  0xe9   :  { %5180 = vmatpush.bf16.msra.mxu3 %v7898_v36  ;;  %v11135_v3 = vld [vmem:[#allocation2 + $0x64] sm:$0xf]  ;;  %v7463_v4 = vld [vmem:[#allocation2 + $0x70] sm:$0xf0]  ;;  %v7866_v9 = vor.u32 %v11235_v61, %v7863_v62  ;;  %v4916_v48 = vadd.f32 %v4915_v39, %v4903_v21  ;;  %v4904_v62 = vpop.f32.mrf.mxu1 }
  0xea   :  { %5142 = vmatpush.bf16.msra.mxu0 %v7498_v50  ;;  %v11167_v5 = vld [vmem:[#allocation2 + $0x164] sm:$0xf]  ;;  %v7591_v10 = vld [vmem:[#allocation2 + $0x170] sm:$0xf0]  ;;  %v7466_v24 = vor.u32 %v11135_v3, %v7463_v4  ;;  %v4928_v50 = vpop.f32.mrf.mxu3 }
  0xeb   :  { %5155 = vmatpush.bf16.msra.mxu1 %v7626_v51  ;;  %v11199_v13 = vld [vmem:[#allocation2 + $0x264] sm:$0xf]  ;;  %v7719_v14 = vld [vmem:[#allocation2 + $0x270] sm:$0xf0]  ;;  %v7594_v26 = vor.u32 %v11167_v5, %v7591_v10  ;;  %v12400_v55 = vadd.f32 %v4928_v50, %v4916_v48 }
  0xec   :  { %5168 = vmatpush.bf16.msra.mxu2 %v7754_v52  ;;  %v11231_v15 = vld [vmem:[#allocation2 + $0x364] sm:$0xf]  ;;  %v7847_v17 = vld [vmem:[#allocation2 + $0x370] sm:$0xf0]  ;;  %v7722_v27 = vor.u32 %v11199_v13, %v7719_v14 }
  0xed   :  { %5181 = vmatpush.bf16.msra.mxu3 %v7882_v57  ;;  %v11131_v32 = vld [vmem:[#allocation2 + $0x44] sm:$0xf]  ;;  %v7447_v34 = vld [vmem:[#allocation2 + $0x50] sm:$0xf0]  ;;  %v7850_v53 = vor.u32 %v11231_v15, %v7847_v17 }
  0xee   :  { %5143 = vmatpush.bf16.msra.mxu0 %v7482_v63  ;;  %v11163_v36 = vld [vmem:[#allocation2 + $0x144] sm:$0xf]  ;;  %v7575_v40 = vld [vmem:[#allocation2 + $0x150] sm:$0xf0]  ;;  %v7450_v54 = vor.u32 %v11131_v32, %v7447_v34  ;;  %v4917_v17 = vpop.f32.mrf.mxu2 }
  0xef   :  { %5156 = vmatpush.bf16.msra.mxu1 %v7610_v1  ;;  %v11195_v43 = vld [vmem:[#allocation2 + $0x244] sm:$0xf]  ;;  %v7703_v47 = vld [vmem:[#allocation2 + $0x250] sm:$0xf0]  ;;  %v7578_v57 = vor.u32 %v11163_v36, %v7575_v40 }
  0xf0   :  { %5169 = vmatpush.bf16.msra.mxu2 %v7738_v2  ;;  %v11227_v51 = vld [vmem:[#allocation2 + $0x344] sm:$0xf]  ;;  %v7831_v52 = vld [vmem:[#allocation2 + $0x350] sm:$0xf0]  ;;  %v7706_v58 = vor.u32 %v11195_v43, %v7703_v47 }
  0xf1   :  { %5182 = vmatpush.bf16.msra.mxu3 %v7866_v9  ;;  %v11127_v59 = vld [vmem:[#allocation2 + $0x24] sm:$0xf]  ;;  %v7431_v60 = vld [vmem:[#allocation2 + $0x30] sm:$0xf0]  ;;  %v7834_v63 = vor.u32 %v11227_v51, %v7831_v52 }
  0xf2   :  { %5144 = vmatpush.bf16.msra.mxu0 %v7466_v24  ;;  %v11159_v61 = vld [vmem:[#allocation2 + $0x124] sm:$0xf]  ;;  %v7559_v0 = vld [vmem:[#allocation2 + $0x130] sm:$0xf0]  ;;  %v7434_v5 = vor.u32 %v11127_v59, %v7431_v60  ;;  %v4930_v32 = vpop.f32.mrf.mxu3 }
  0xf3   :  { %5157 = vmatpush.bf16.msra.mxu1 %v7594_v26  ;;  %v11191_v1 = vld [vmem:[#allocation2 + $0x224] sm:$0xf]  ;;  %v7687_v2 = vld [vmem:[#allocation2 + $0x230] sm:$0xf0]  ;;  %v7562_v9 = vor.u32 %v11159_v61, %v7559_v0 }
  0xf4   :  { %5170 = vmatpush.bf16.msra.mxu2 %v7722_v27  ;;  %v11223_v3 = vld [vmem:[#allocation2 + $0x324] sm:$0xf]  ;;  %v7815_v4 = vld [vmem:[#allocation2 + $0x330] sm:$0xf0]  ;;  %v7690_v10 = vor.u32 %v11191_v1, %v7687_v2 }
  0xf5   :  { %5183 = vmatpush.bf16.msra.mxu3 %v7850_v53  ;;  %v11123_v6 = vld [vmem:[#allocation2 + $0x4] sm:$0xf]  ;;  %v7415_v8 = vld [vmem:[#allocation2 + $0x10] sm:$0xf0]  ;;  %v7818_v21 = vor.u32 %v11223_v3, %v7815_v4 }
  0xf6   :  { %5145 = vmatpush.bf16.msra.mxu0 %v7450_v54  ;;  %v11155_v13 = vld [vmem:[#allocation2 + $0x104] sm:$0xf]  ;;  %v7543_v14 = vld [vmem:[#allocation2 + $0x110] sm:$0xf0]  ;;  %v7418_v53 = vor.u32 %v11123_v6, %v7415_v8 }
  0xf7   :  { %5158 = vmatpush.bf16.msra.mxu1 %v7578_v57  ;;  %v11187_v15 = vld [vmem:[#allocation2 + $0x204] sm:$0xf]  ;;  %v7671_v24 = vld [vmem:[#allocation2 + $0x210] sm:$0xf0]  ;;  %v7546_v48 = vor.u32 %v11155_v13, %v7543_v14 }
  0xf8   :  { %5171 = vmatpush.bf16.msra.mxu2 %v7706_v58  ;;  %v11219_v26 = vld [vmem:[#allocation2 + $0x304] sm:$0xf]  ;;  %v7799_v27 = vld [vmem:[#allocation2 + $0x310] sm:$0xf0]  ;;  %v7674_v50 = vor.u32 %v11187_v15, %v7671_v24 }
  0xf9   :  { %5184 = vmatpush.bf16.msra.mxu3 %v7834_v63  ;;  %v11279_v34 = vld [vmem:[#allocation2 + $0x4e4] sm:$0xf]  ;;  %v8039_v36 = vld [vmem:[#allocation2 + $0x4f0] sm:$0xf0]  ;;  %v7802_v54 = vor.u32 %v11219_v26, %v7799_v27 }
  0xfa   :  { %v11311_v39 = vld [vmem:[#allocation2 + $0x5e4] sm:$0xf]  ;;  %5146 = vmatpush.bf16.msra.mxu0 %v7434_v5  ;;  %v8167_v40 = vld [vmem:[#allocation2 + $0x5f0] sm:$0xf0]  ;;  %v8042_v56 = vor.u32 %v11279_v34, %v8039_v36 }
  0xfb   :  { %v11343_v43 = vld [vmem:[#allocation2 + $0x6e4] sm:$0xf]  ;;  %v8295_v47 = vld [vmem:[#allocation2 + $0x6f0] sm:$0xf0]  ;;  %5159 = vmatpush.bf16.msra.mxu1 %v7562_v9  ;;  %v8170_v57 = vor.u32 %v11311_v39, %v8167_v40 }
  0xfc   :  { %5172 = vmatpush.bf16.msra.mxu2 %v7690_v10  ;;  %v11375_v51 = vld [vmem:[#allocation2 + $0x7e4] sm:$0xf]  ;;  %v8423_v52 = vld [vmem:[#allocation2 + $0x7f0] sm:$0xf0]  ;;  %v8298_v58 = vor.u32 %v11343_v43, %v8295_v47 }
  0xfd   :  { %5185 = vmatpush.bf16.msra.mxu3 %v7818_v21  ;;  %v11275_v59 = vld [vmem:[#allocation2 + $0x4c4] sm:$0xf]  ;;  %v8023_v60 = vld [vmem:[#allocation2 + $0x4d0] sm:$0xf0]  ;;  %v8426_v62 = vor.u32 %v11375_v51, %v8423_v52 }
  0xfe   :  { %v11307_v61 = vld [vmem:[#allocation2 + $0x5c4] sm:$0xf]  ;;  %5147 = vmatpush.bf16.msra.mxu0 %v7418_v53  ;;  %v8151_v63 = vld [vmem:[#allocation2 + $0x5d0] sm:$0xf0]  ;;  %v8026_v4 = vor.u32 %v11275_v59, %v8023_v60 }
  0xff   :  { %v11339_v0 = vld [vmem:[#allocation2 + $0x6c4] sm:$0xf]  ;;  %v8279_v1 = vld [vmem:[#allocation2 + $0x6d0] sm:$0xf0]  ;;  %5160 = vmatpush.bf16.msra.mxu1 %v7546_v48  ;;  %v8154_v5 = vor.u32 %v11307_v61, %v8151_v63  ;;  %v4941_v48 = vpop.f32.mrf.mxu0 }
 0x100   :  { %5173 = vmatpush.bf16.msra.mxu2 %v7674_v50  ;;  %v11371_v2 = vld [vmem:[#allocation2 + $0x7c4] sm:$0xf]  ;;  %v8407_v3 = vld [vmem:[#allocation2 + $0x7d0] sm:$0xf0]  ;;  %v8282_v6 = vor.u32 %v11339_v0, %v8279_v1  ;;  %v4942_v52 = vadd.f32 %v4941_v48, %v12400_v55 }
 0x101   :  { %5186 = vmatpush.bf16.msra.mxu3 %v7802_v54  ;;  %v11271_v8 = vld [vmem:[#allocation2 + $0x4a4] sm:$0xf]  ;;  %v8007_v9 = vld [vmem:[#allocation2 + $0x4b0] sm:$0xf0]  ;;  %v8410_v13 = vor.u32 %v11371_v2, %v8407_v3  ;;  %5148 = vmatmul.bf16.vlgmr.msra.gmra.mxu0 %v12297_v19 }
 0x102   :  { %5192 = vmatpush.bf16.msrb.mxu0 %v8042_v56  ;;  %v11303_v10 = vld [vmem:[#allocation2 + $0x5a4] sm:$0xf]  ;;  %v8135_v14 = vld [vmem:[#allocation2 + $0x5b0] sm:$0xf0]  ;;  %v8010_v26 = vor.u32 %v11271_v8, %v8007_v9  ;;  %5161 = vmatmul.bf16.vlgmr.msra.gmra.mxu1 %v12301_v22  ;;  %v4954_v56 = vpop.f32.mrf.mxu1 }
 0x103   :  { %5205 = vmatpush.bf16.msrb.mxu1 %v8170_v57  ;;  %v11335_v15 = vld [vmem:[#allocation2 + $0x6a4] sm:$0xf]  ;;  %v8263_v17 = vld [vmem:[#allocation2 + $0x6b0] sm:$0xf0]  ;;  %5174 = vmatmul.bf16.vlgmr.msra.gmra.mxu2 %v12295_v18  ;;  %v8138_v27 = vor.u32 %v11303_v10, %v8135_v14  ;;  %v4955_v63 = vadd.f32 %v4954_v56, %v4942_v52  ;;  %v4967_v14 = vpop.f32.mrf.mxu2 }
 0x104   :  { %5218 = vmatpush.bf16.msrb.mxu2 %v8298_v58  ;;  %v11367_v21 = vld [vmem:[#allocation2 + $0x7a4] sm:$0xf]  ;;  %v8391_v24 = vld [vmem:[#allocation2 + $0x7b0] sm:$0xf0]  ;;  %5187 = vmatmul.bf16.vlgmr.msra.gmra.mxu3 %v12299_v20  ;;  %v8266_v32 = vor.u32 %v11335_v15, %v8263_v17 }
 0x105   :  { %5231 = vmatpush.bf16.msrb.mxu3 %v8426_v62  ;;  %v11267_v34 = vld [vmem:[#allocation2 + $0x484] sm:$0xf]  ;;  %v7991_v36 = vld [vmem:[#allocation2 + $0x490] sm:$0xf0]  ;;  %v8394_v53 = vor.u32 %v11367_v21, %v8391_v24  ;;  %v4968_v24 = vadd.f32 %v4967_v14, %v4955_v63 }
 0x106   :  { %5193 = vmatpush.bf16.msrb.mxu0 %v8026_v4  ;;  %v11299_v39 = vld [vmem:[#allocation2 + $0x584] sm:$0xf]  ;;  %v8119_v40 = vld [vmem:[#allocation2 + $0x590] sm:$0xf0]  ;;  %v7994_v54 = vor.u32 %v11267_v34, %v7991_v36 }
 0x107   :  { %5206 = vmatpush.bf16.msrb.mxu1 %v8154_v5  ;;  %v11331_v43 = vld [vmem:[#allocation2 + $0x684] sm:$0xf]  ;;  %v8247_v47 = vld [vmem:[#allocation2 + $0x690] sm:$0xf0]  ;;  %v8122_v57 = vor.u32 %v11299_v39, %v8119_v40  ;;  %v4943_v34 = vpop.f32.mrf.mxu0 }
 0x108   :  { %5219 = vmatpush.bf16.msrb.mxu2 %v8282_v6  ;;  %v11363_v50 = vld [vmem:[#allocation2 + $0x784] sm:$0xf]  ;;  %v8375_v51 = vld [vmem:[#allocation2 + $0x790] sm:$0xf0]  ;;  %v8250_v58 = vor.u32 %v11331_v43, %v8247_v47 }
 0x109   :  { %5232 = vmatpush.bf16.msrb.mxu3 %v8410_v13  ;;  %v11263_v59 = vld [vmem:[#allocation2 + $0x464] sm:$0xf]  ;;  %v7975_v60 = vld [vmem:[#allocation2 + $0x470] sm:$0xf0]  ;;  %v8378_v62 = vor.u32 %v11363_v50, %v8375_v51 }
 0x10a   :  { %5194 = vmatpush.bf16.msrb.mxu0 %v8010_v26  ;;  %v11295_v61 = vld [vmem:[#allocation2 + $0x564] sm:$0xf]  ;;  %v8103_v0 = vld [vmem:[#allocation2 + $0x570] sm:$0xf0]  ;;  %v7978_v5 = vor.u32 %v11263_v59, %v7975_v60  ;;  %v4980_v26 = vpop.f32.mrf.mxu3  ;;  %v4956_v39 = vpop.f32.mrf.mxu1 }
 0x10b   :  { %5207 = vmatpush.bf16.msrb.mxu1 %v8138_v27  ;;  %v11327_v1 = vld [vmem:[#allocation2 + $0x664] sm:$0xf]  ;;  %v8231_v2 = vld [vmem:[#allocation2 + $0x670] sm:$0xf0]  ;;  %v8106_v55 = vor.u32 %v11295_v61, %v8103_v0 }
 0x10c   :  { %5220 = vmatpush.bf16.msrb.mxu2 %v8266_v32  ;;  %v11359_v3 = vld [vmem:[#allocation2 + $0x764] sm:$0xf]  ;;  %v8359_v4 = vld [vmem:[#allocation2 + $0x770] sm:$0xf0]  ;;  %v8234_v6 = vor.u32 %v11327_v1, %v8231_v2 }
 0x10d   :  { %5233 = vmatpush.bf16.msrb.mxu3 %v8394_v53  ;;  %v11259_v8 = vld [vmem:[#allocation2 + $0x444] sm:$0xf]  ;;  %v7959_v9 = vld [vmem:[#allocation2 + $0x450] sm:$0xf0]  ;;  %v8362_v13 = vor.u32 %v11359_v3, %v8359_v4  ;;  %v12407_v53 = vadd.f32 %v4980_v26, %v4968_v24 }
 0x10e   :  { %5195 = vmatpush.bf16.msrb.mxu0 %v7994_v54  ;;  %v11291_v10 = vld [vmem:[#allocation2 + $0x544] sm:$0xf]  ;;  %v8087_v15 = vld [vmem:[#allocation2 + $0x550] sm:$0xf0]  ;;  %v7962_v36 = vor.u32 %v11259_v8, %v7959_v9 }
 0x10f   :  { %5208 = vmatpush.bf16.msrb.mxu1 %v8122_v57  ;;  %v11323_v17 = vld [vmem:[#allocation2 + $0x644] sm:$0xf]  ;;  %v8215_v21 = vld [vmem:[#allocation2 + $0x650] sm:$0xf0]  ;;  %v8090_v40 = vor.u32 %v11291_v10, %v8087_v15 }
 0x110   :  { %5221 = vmatpush.bf16.msrb.mxu2 %v8250_v58  ;;  %v11355_v27 = vld [vmem:[#allocation2 + $0x744] sm:$0xf]  ;;  %v8343_v32 = vld [vmem:[#allocation2 + $0x750] sm:$0xf0]  ;;  %v8218_v43 = vor.u32 %v11323_v17, %v8215_v21 }
 0x111   :  { %5234 = vmatpush.bf16.msrb.mxu3 %v8378_v62  ;;  %v11255_v47 = vld [vmem:[#allocation2 + $0x424] sm:$0xf]  ;;  %v7943_v48 = vld [vmem:[#allocation2 + $0x430] sm:$0xf0]  ;;  %v8346_v51 = vor.u32 %v11355_v27, %v8343_v32 }
 0x112   :  { %5196 = vmatpush.bf16.msrb.mxu0 %v7978_v5  ;;  %v11287_v50 = vld [vmem:[#allocation2 + $0x524] sm:$0xf]  ;;  %v8071_v52 = vld [vmem:[#allocation2 + $0x530] sm:$0xf0]  ;;  %v7946_v59 = vor.u32 %v11255_v47, %v7943_v48 }
 0x113   :  { %5209 = vmatpush.bf16.msrb.mxu1 %v8106_v55  ;;  %v11319_v54 = vld [vmem:[#allocation2 + $0x624] sm:$0xf]  ;;  %v8199_v56 = vld [vmem:[#allocation2 + $0x630] sm:$0xf0]  ;;  %v8074_v62 = vor.u32 %v11287_v50, %v8071_v52 }
 0x114   :  { %5222 = vmatpush.bf16.msrb.mxu2 %v8234_v6  ;;  %v11351_v57 = vld [vmem:[#allocation2 + $0x724] sm:$0xf]  ;;  %v8327_v58 = vld [vmem:[#allocation2 + $0x730] sm:$0xf0]  ;;  %v8202_v63 = vor.u32 %v11319_v54, %v8199_v56  ;;  %v4969_v6 = vpop.f32.mrf.mxu2 }
 0x115   :  { %5235 = vmatpush.bf16.msrb.mxu3 %v8362_v13  ;;  %v11251_v60 = vld [vmem:[#allocation2 + $0x404] sm:$0xf]  ;;  %v7927_v61 = vld [vmem:[#allocation2 + $0x410] sm:$0xf0]  ;;  %v8330_v3 = vor.u32 %v11351_v57, %v8327_v58  ;;  %v4982_v13 = vpop.f32.mrf.mxu3 }
 0x116   :  { %5197 = vmatpush.bf16.msrb.mxu0 %v7962_v36  ;;  %v11283_v0 = vld [vmem:[#allocation2 + $0x504] sm:$0xf]  ;;  %v8055_v1 = vld [vmem:[#allocation2 + $0x510] sm:$0xf0]  ;;  %v7930_v14 = vor.u32 %v11251_v60, %v7927_v61 }
 0x117   :  { %5210 = vmatpush.bf16.msrb.mxu1 %v8090_v40  ;;  %v11315_v2 = vld [vmem:[#allocation2 + $0x604] sm:$0xf]  ;;  %v8183_v4 = vld [vmem:[#allocation2 + $0x610] sm:$0xf0]  ;;  %v8058_v24 = vor.u32 %v11283_v0, %v8055_v1 }
 0x118   :  { %5223 = vmatpush.bf16.msrb.mxu2 %v8218_v43  ;;  %v11347_v5 = vld [vmem:[#allocation2 + $0x704] sm:$0xf]  ;;  %v8311_v55 = vld [vmem:[#allocation2 + $0x710] sm:$0xf0]  ;;  %v8186_v26 = vor.u32 %v11315_v2, %v8183_v4 }
 0x119   :  { %5236 = vmatpush.bf16.msrb.mxu3 %v8346_v51  ;;  %v11407_v8 = vld [vmem:[#allocation2 + $0x8e4] sm:$0xf]  ;;  %v8551_v9 = vld [vmem:[#allocation2 + $0x8f0] sm:$0xf0]  ;;  %v8314_v34 = vor.u32 %v11347_v5, %v8311_v55 }
 0x11a   :  { %v11439_v10 = vld [vmem:[#allocation2 + $0x9e4] sm:$0xf]  ;;  %5198 = vmatpush.bf16.msrb.mxu0 %v7946_v59  ;;  %v8679_v15 = vld [vmem:[#allocation2 + $0x9f0] sm:$0xf0]  ;;  %v8554_v36 = vor.u32 %v11407_v8, %v8551_v9 }
 0x11b   :  { %v11471_v17 = vld [vmem:[#allocation2 + $0xae4] sm:$0xf]  ;;  %v8807_v21 = vld [vmem:[#allocation2 + $0xaf0] sm:$0xf0]  ;;  %5211 = vmatpush.bf16.msrb.mxu1 %v8074_v62  ;;  %v8682_v39 = vor.u32 %v11439_v10, %v8679_v15 }
 0x11c   :  { %5224 = vmatpush.bf16.msrb.mxu2 %v8202_v63  ;;  %v11503_v27 = vld [vmem:[#allocation2 + $0xbe4] sm:$0xf]  ;;  %v8935_v32 = vld [vmem:[#allocation2 + $0xbf0] sm:$0xf0]  ;;  %v8810_v40 = vor.u32 %v11471_v17, %v8807_v21 }
 0x11d   :  { %5237 = vmatpush.bf16.msrb.mxu3 %v8330_v3  ;;  %v11403_v43 = vld [vmem:[#allocation2 + $0x8c4] sm:$0xf]  ;;  %v8535_v47 = vld [vmem:[#allocation2 + $0x8d0] sm:$0xf0]  ;;  %v8938_v50 = vor.u32 %v11503_v27, %v8935_v32 }
 0x11e   :  { %v11435_v48 = vld [vmem:[#allocation2 + $0x9c4] sm:$0xf]  ;;  %5199 = vmatpush.bf16.msrb.mxu0 %v7930_v14  ;;  %v8663_v51 = vld [vmem:[#allocation2 + $0x9d0] sm:$0xf0]  ;;  %v8538_v58 = vor.u32 %v11403_v43, %v8535_v47 }
 0x11f   :  { %v11467_v52 = vld [vmem:[#allocation2 + $0xac4] sm:$0xf]  ;;  %v8791_v54 = vld [vmem:[#allocation2 + $0xad0] sm:$0xf0]  ;;  %5212 = vmatpush.bf16.msrb.mxu1 %v8058_v24  ;;  %v8666_v59 = vor.u32 %v11435_v48, %v8663_v51  ;;  %v4993_v24 = vpop.f32.mrf.mxu0 }
 0x120   :  { %5225 = vmatpush.bf16.msrb.mxu2 %v8186_v26  ;;  %v11499_v56 = vld [vmem:[#allocation2 + $0xbc4] sm:$0xf]  ;;  %v8919_v57 = vld [vmem:[#allocation2 + $0xbd0] sm:$0xf0]  ;;  %v8794_v60 = vor.u32 %v11467_v52, %v8791_v54  ;;  %v4994_v32 = vadd.f32 %v4993_v24, %v12407_v53 }
 0x121   :  { %5238 = vmatpush.bf16.msrb.mxu3 %v8314_v34  ;;  %v11399_v61 = vld [vmem:[#allocation2 + $0x8a4] sm:$0xf]  ;;  %v8519_v62 = vld [vmem:[#allocation2 + $0x8b0] sm:$0xf0]  ;;  %v8922_v0 = vor.u32 %v11499_v56, %v8919_v57  ;;  %5200 = vmatmul.bf16.vlgmr.msrb.gmra.mxu0 %v12315_v41 }
 0x122   :  { %5244 = vmatpush.bf16.msra.mxu0 %v8554_v36  ;;  %v11431_v63 = vld [vmem:[#allocation2 + $0x9a4] sm:$0xf]  ;;  %v8647_v1 = vld [vmem:[#allocation2 + $0x9b0] sm:$0xf0]  ;;  %v8522_v55 = vor.u32 %v11399_v61, %v8519_v62  ;;  %5213 = vmatmul.bf16.vlgmr.msrb.gmra.mxu1 %v12319_v44  ;;  %v5006_v36 = vpop.f32.mrf.mxu1 }
 0x123   :  { %5257 = vmatpush.bf16.msra.mxu1 %v8682_v39  ;;  %5226 = vmatmul.bf16.vlgmr.msrb.gmra.mxu2 %v12313_v38  ;;  %v11463_v2 = vld [vmem:[#allocation2 + $0xaa4] sm:$0xf]  ;;  %v8775_v3 = vld [vmem:[#allocation2 + $0xab0] sm:$0xf0]  ;;  %v8650_v6 = vor.u32 %v11431_v63, %v8647_v1  ;;  %v5007_v51 = vadd.f32 %v5006_v36, %v4994_v32 }
 0x124   :  { %5270 = vmatpush.bf16.msra.mxu2 %v8810_v40  ;;  %v11495_v4 = vld [vmem:[#allocation2 + $0xba4] sm:$0xf]  ;;  %v8903_v5 = vld [vmem:[#allocation2 + $0xbb0] sm:$0xf0]  ;;  %5239 = vmatmul.bf16.vlgmr.msrb.gmra.mxu3 %v12317_v42  ;;  %v8778_v8 = vor.u32 %v11463_v2, %v8775_v3 }
 0x125   :  { %5283 = vmatpush.bf16.msra.mxu3 %v8938_v50  ;;  %v11395_v9 = vld [vmem:[#allocation2 + $0x884] sm:$0xf]  ;;  %v8503_v10 = vld [vmem:[#allocation2 + $0x890] sm:$0xf0]  ;;  %v8906_v14 = vor.u32 %v11495_v4, %v8903_v5 }
 0x126   :  { %5245 = vmatpush.bf16.msra.mxu0 %v8538_v58  ;;  %v11427_v13 = vld [vmem:[#allocation2 + $0x984] sm:$0xf]  ;;  %v8631_v15 = vld [vmem:[#allocation2 + $0x990] sm:$0xf0]  ;;  %v8506_v34 = vor.u32 %v11395_v9, %v8503_v10  ;;  %v5019_v1 = vpop.f32.mrf.mxu2 }
 0x127   :  { %5258 = vmatpush.bf16.msra.mxu1 %v8666_v59  ;;  %v11459_v17 = vld [vmem:[#allocation2 + $0xa84] sm:$0xf]  ;;  %v8759_v21 = vld [vmem:[#allocation2 + $0xa90] sm:$0xf0]  ;;  %v8634_v39 = vor.u32 %v11427_v13, %v8631_v15  ;;  %v5020_v5 = vadd.f32 %v5019_v1, %v5007_v51  ;;  %v4995_v9 = vpop.f32.mrf.mxu0 }
 0x128   :  { %5271 = vmatpush.bf16.msra.mxu2 %v8794_v60  ;;  %v11491_v26 = vld [vmem:[#allocation2 + $0xb84] sm:$0xf]  ;;  %v8887_v27 = vld [vmem:[#allocation2 + $0xb90] sm:$0xf0]  ;;  %v8762_v40 = vor.u32 %v11459_v17, %v8759_v21 }
 0x129   :  { %5284 = vmatpush.bf16.msra.mxu3 %v8922_v0  ;;  %v11391_v43 = vld [vmem:[#allocation2 + $0x864] sm:$0xf]  ;;  %v8487_v47 = vld [vmem:[#allocation2 + $0x870] sm:$0xf0]  ;;  %v8890_v50 = vor.u32 %v11491_v26, %v8887_v27 }
 0x12a   :  { %5246 = vmatpush.bf16.msra.mxu0 %v8522_v55  ;;  %v11423_v48 = vld [vmem:[#allocation2 + $0x964] sm:$0xf]  ;;  %v8615_v52 = vld [vmem:[#allocation2 + $0x970] sm:$0xf0]  ;;  %v8490_v59 = vor.u32 %v11391_v43, %v8487_v47  ;;  %v5032_v55 = vpop.f32.mrf.mxu3  ;;  %v5008_v13 = vpop.f32.mrf.mxu1 }
 0x12b   :  { %5259 = vmatpush.bf16.msra.mxu1 %v8650_v6  ;;  %v11455_v54 = vld [vmem:[#allocation2 + $0xa64] sm:$0xf]  ;;  %v8743_v56 = vld [vmem:[#allocation2 + $0xa70] sm:$0xf0]  ;;  %v8618_v53 = vor.u32 %v11423_v48, %v8615_v52 }
 0x12c   :  { %5272 = vmatpush.bf16.msra.mxu2 %v8778_v8  ;;  %v11487_v57 = vld [vmem:[#allocation2 + $0xb64] sm:$0xf]  ;;  %v8871_v58 = vld [vmem:[#allocation2 + $0xb70] sm:$0xf0]  ;;  %v8746_v60 = vor.u32 %v11455_v54, %v8743_v56 }
 0x12d   :  { %5285 = vmatpush.bf16.msra.mxu3 %v8906_v14  ;;  %v11387_v61 = vld [vmem:[#allocation2 + $0x844] sm:$0xf]  ;;  %v8471_v62 = vld [vmem:[#allocation2 + $0x850] sm:$0xf0]  ;;  %v8874_v0 = vor.u32 %v11487_v57, %v8871_v58  ;;  %v12414_v14 = vadd.f32 %v5032_v55, %v5020_v5 }
 0x12e   :  { %5247 = vmatpush.bf16.msra.mxu0 %v8506_v34  ;;  %v11419_v63 = vld [vmem:[#allocation2 + $0x944] sm:$0xf]  ;;  %v8599_v2 = vld [vmem:[#allocation2 + $0x950] sm:$0xf0]  ;;  %v8474_v10 = vor.u32 %v11387_v61, %v8471_v62 }
 0x12f   :  { %5260 = vmatpush.bf16.msra.mxu1 %v8634_v39  ;;  %v11451_v3 = vld [vmem:[#allocation2 + $0xa44] sm:$0xf]  ;;  %v8727_v4 = vld [vmem:[#allocation2 + $0xa50] sm:$0xf0]  ;;  %v8602_v15 = vor.u32 %v11419_v63, %v8599_v2 }
 0x130   :  { %5273 = vmatpush.bf16.msra.mxu2 %v8762_v40  ;;  %v11483_v6 = vld [vmem:[#allocation2 + $0xb44] sm:$0xf]  ;;  %v8855_v8 = vld [vmem:[#allocation2 + $0xb50] sm:$0xf0]  ;;  %v8730_v17 = vor.u32 %v11451_v3, %v8727_v4 }
 0x131   :  { %5286 = vmatpush.bf16.msra.mxu3 %v8890_v50  ;;  %v11383_v21 = vld [vmem:[#allocation2 + $0x824] sm:$0xf]  ;;  %v8455_v24 = vld [vmem:[#allocation2 + $0x830] sm:$0xf0]  ;;  %v8858_v27 = vor.u32 %v11483_v6, %v8855_v8 }
 0x132   :  { %5248 = vmatpush.bf16.msra.mxu0 %v8490_v59  ;;  %v11415_v26 = vld [vmem:[#allocation2 + $0x924] sm:$0xf]  ;;  %v8583_v32 = vld [vmem:[#allocation2 + $0x930] sm:$0xf0]  ;;  %v8458_v43 = vor.u32 %v11383_v21, %v8455_v24 }
 0x133   :  { %5261 = vmatpush.bf16.msra.mxu1 %v8618_v53  ;;  %v11447_v34 = vld [vmem:[#allocation2 + $0xa24] sm:$0xf]  ;;  %v8711_v36 = vld [vmem:[#allocation2 + $0xa30] sm:$0xf0]  ;;  %v8586_v50 = vor.u32 %v11415_v26, %v8583_v32 }
 0x134   :  { %5274 = vmatpush.bf16.msra.mxu2 %v8746_v60  ;;  %v11479_v39 = vld [vmem:[#allocation2 + $0xb24] sm:$0xf]  ;;  %v8839_v40 = vld [vmem:[#allocation2 + $0xb30] sm:$0xf0]  ;;  %v8714_v51 = vor.u32 %v11447_v34, %v8711_v36  ;;  %v5021_v60 = vpop.f32.mrf.mxu2 }
 0x135   :  { %5287 = vmatpush.bf16.msra.mxu3 %v8874_v0  ;;  %v11379_v47 = vld [vmem:[#allocation2 + $0x804] sm:$0xf]  ;;  %v8439_v48 = vld [vmem:[#allocation2 + $0x810] sm:$0xf0]  ;;  %v8842_v57 = vor.u32 %v11479_v39, %v8839_v40  ;;  %v5034_v0 = vpop.f32.mrf.mxu3 }
 0x136   :  { %5249 = vmatpush.bf16.msra.mxu0 %v8474_v10  ;;  %v11411_v52 = vld [vmem:[#allocation2 + $0x904] sm:$0xf]  ;;  %v8567_v54 = vld [vmem:[#allocation2 + $0x910] sm:$0xf0]  ;;  %v8442_v1 = vor.u32 %v11379_v47, %v8439_v48 }
 0x137   :  { %5262 = vmatpush.bf16.msra.mxu1 %v8602_v15  ;;  %v11443_v56 = vld [vmem:[#allocation2 + $0xa04] sm:$0xf]  ;;  %v8695_v58 = vld [vmem:[#allocation2 + $0xa10] sm:$0xf0]  ;;  %v8570_v5 = vor.u32 %v11411_v52, %v8567_v54 }
 0x138   :  { %5275 = vmatpush.bf16.msra.mxu2 %v8730_v17  ;;  %v11475_v59 = vld [vmem:[#allocation2 + $0xb04] sm:$0xf]  ;;  %v8823_v53 = vld [vmem:[#allocation2 + $0xb10] sm:$0xf0]  ;;  %v8698_v55 = vor.u32 %v11443_v56, %v8695_v58 }
 0x139   :  { %5288 = vmatpush.bf16.msra.mxu3 %v8858_v27  ;;  %v11535_v61 = vld [vmem:[#allocation2 + $0xce4] sm:$0xf]  ;;  %v9063_v62 = vld [vmem:[#allocation2 + $0xcf0] sm:$0xf0]  ;;  %v8826_v9 = vor.u32 %v11475_v59, %v8823_v53 }
 0x13a   :  { %v11567_v63 = vld [vmem:[#allocation2 + $0xde4] sm:$0xf]  ;;  %5250 = vmatpush.bf16.msra.mxu0 %v8458_v43  ;;  %v9191_v2 = vld [vmem:[#allocation2 + $0xdf0] sm:$0xf0]  ;;  %v9066_v10 = vor.u32 %v11535_v61, %v9063_v62 }
 0x13b   :  { %v11599_v3 = vld [vmem:[#allocation2 + $0xee4] sm:$0xf]  ;;  %v9319_v4 = vld [vmem:[#allocation2 + $0xef0] sm:$0xf0]  ;;  %5263 = vmatpush.bf16.msra.mxu1 %v8586_v50  ;;  %v9194_v13 = vor.u32 %v11567_v63, %v9191_v2 }
 0x13c   :  { %5276 = vmatpush.bf16.msra.mxu2 %v8714_v51  ;;  %v11631_v6 = vld [vmem:[#allocation2 + $0xfe4] sm:$0xf]  ;;  %v9447_v8 = vld [vmem:[#allocation2 + $0xff0] sm:$0xf0]  ;;  %v9322_v15 = vor.u32 %v11599_v3, %v9319_v4 }
 0x13d   :  { %5289 = vmatpush.bf16.msra.mxu3 %v8842_v57  ;;  %v11531_v17 = vld [vmem:[#allocation2 + $0xcc4] sm:$0xf]  ;;  %v9047_v21 = vld [vmem:[#allocation2 + $0xcd0] sm:$0xf0]  ;;  %v9450_v26 = vor.u32 %v11631_v6, %v9447_v8 }
 0x13e   :  { %v11563_v24 = vld [vmem:[#allocation2 + $0xdc4] sm:$0xf]  ;;  %5251 = vmatpush.bf16.msra.mxu0 %v8442_v1  ;;  %v9175_v27 = vld [vmem:[#allocation2 + $0xdd0] sm:$0xf0]  ;;  %v9050_v40 = vor.u32 %v11531_v17, %v9047_v21 }
 0x13f   :  { %v11595_v32 = vld [vmem:[#allocation2 + $0xec4] sm:$0xf]  ;;  %v9303_v34 = vld [vmem:[#allocation2 + $0xed0] sm:$0xf0]  ;;  %5264 = vmatpush.bf16.msra.mxu1 %v8570_v5  ;;  %v9178_v43 = vor.u32 %v11563_v24, %v9175_v27  ;;  %v5045_v5 = vpop.f32.mrf.mxu0 }
 0x140   :  { %5277 = vmatpush.bf16.msra.mxu2 %v8698_v55  ;;  %v11627_v36 = vld [vmem:[#allocation2 + $0xfc4] sm:$0xf]  ;;  %v9431_v39 = vld [vmem:[#allocation2 + $0xfd0] sm:$0xf0]  ;;  %v9306_v47 = vor.u32 %v11595_v32, %v9303_v34  ;;  %v5046_v8 = vadd.f32 %v5045_v5, %v12414_v14 }
 0x141   :  { %5290 = vmatpush.bf16.msra.mxu3 %v8826_v9  ;;  %v11527_v48 = vld [vmem:[#allocation2 + $0xca4] sm:$0xf]  ;;  %v9031_v50 = vld [vmem:[#allocation2 + $0xcb0] sm:$0xf0]  ;;  %5252 = vmatmul.bf16.vlgmr.msra.gmra.mxu0 %v12331_v25  ;;  %v9434_v52 = vor.u32 %v11627_v36, %v9431_v39 }
 0x142   :  { %5296 = vmatpush.bf16.msrb.mxu0 %v9066_v10  ;;  %v11559_v51 = vld [vmem:[#allocation2 + $0xda4] sm:$0xf]  ;;  %v9159_v54 = vld [vmem:[#allocation2 + $0xdb0] sm:$0xf0]  ;;  %5265 = vmatmul.bf16.vlgmr.msra.gmra.mxu1 %v12335_v30  ;;  %v9034_v53 = vor.u32 %v11527_v48, %v9031_v50  ;;  %v5058_v10 = vpop.f32.mrf.mxu1 }
 0x143   :  { %5309 = vmatpush.bf16.msrb.mxu1 %v9194_v13  ;;  %v11591_v56 = vld [vmem:[#allocation2 + $0xea4] sm:$0xf]  ;;  %v9287_v57 = vld [vmem:[#allocation2 + $0xeb0] sm:$0xf0]  ;;  %5278 = vmatmul.bf16.vlgmr.msra.gmra.mxu2 %v12333_v29  ;;  %v9162_v60 = vor.u32 %v11559_v51, %v9159_v54  ;;  %v5059_v27 = vadd.f32 %v5058_v10, %v5046_v8 }
 0x144   :  { %5322 = vmatpush.bf16.msrb.mxu2 %v9322_v15  ;;  %v11623_v58 = vld [vmem:[#allocation2 + $0xfa4] sm:$0xf]  ;;  %v9415_v59 = vld [vmem:[#allocation2 + $0xfb0] sm:$0xf0]  ;;  %5291 = vmatmul.bf16.vlgmr.msra.gmra.mxu3 %v12337_v33  ;;  %v9290_v61 = vor.u32 %v11591_v56, %v9287_v57  ;;  %v5071_v54 = vpop.f32.mrf.mxu2 }
 0x145   :  { %5335 = vmatpush.bf16.msrb.mxu3 %v9450_v26  ;;  %v11523_v62 = vld [vmem:[#allocation2 + $0xc84] sm:$0xf]  ;;  %v9015_v63 = vld [vmem:[#allocation2 + $0xc90] sm:$0xf0]  ;;  %v9418_v1 = vor.u32 %v11623_v58, %v9415_v59  ;;  %v5072_v59 = vadd.f32 %v5071_v54, %v5059_v27 }
 0x146   :  { %5297 = vmatpush.bf16.msrb.mxu0 %v9050_v40  ;;  %v11555_v0 = vld [vmem:[#allocation2 + $0xd84] sm:$0xf]  ;;  %v9143_v2 = vld [vmem:[#allocation2 + $0xd90] sm:$0xf0]  ;;  %v9018_v9 = vor.u32 %v11523_v62, %v9015_v63 }
 0x147   :  { %5310 = vmatpush.bf16.msrb.mxu1 %v9178_v43  ;;  %v11587_v3 = vld [vmem:[#allocation2 + $0xe84] sm:$0xf]  ;;  %v9271_v4 = vld [vmem:[#allocation2 + $0xe90] sm:$0xf0]  ;;  %v9146_v13 = vor.u32 %v11555_v0, %v9143_v2  ;;  %v5047_v62 = vpop.f32.mrf.mxu0 }
 0x148   :  { %5323 = vmatpush.bf16.msrb.mxu2 %v9306_v47  ;;  %v11619_v55 = vld [vmem:[#allocation2 + $0xf84] sm:$0xf]  ;;  %v9399_v6 = vld [vmem:[#allocation2 + $0xf90] sm:$0xf0]  ;;  %v9274_v15 = vor.u32 %v11587_v3, %v9271_v4 }
 0x149   :  { %5336 = vmatpush.bf16.msrb.mxu3 %v9434_v52  ;;  %v11519_v17 = vld [vmem:[#allocation2 + $0xc64] sm:$0xf]  ;;  %v8999_v21 = vld [vmem:[#allocation2 + $0xc70] sm:$0xf0]  ;;  %v9402_v26 = vor.u32 %v11619_v55, %v9399_v6 }
 0x14a   :  { %5298 = vmatpush.bf16.msrb.mxu0 %v9034_v53  ;;  %v11551_v24 = vld [vmem:[#allocation2 + $0xd64] sm:$0xf]  ;;  %v9127_v32 = vld [vmem:[#allocation2 + $0xd70] sm:$0xf0]  ;;  %v9002_v43 = vor.u32 %v11519_v17, %v8999_v21  ;;  %v5084_v53 = vpop.f32.mrf.mxu3  ;;  %v5060_v0 = vpop.f32.mrf.mxu1 }
 0x14b   :  { %5311 = vmatpush.bf16.msrb.mxu1 %v9162_v60  ;;  %v11583_v34 = vld [vmem:[#allocation2 + $0xe64] sm:$0xf]  ;;  %v9255_v36 = vld [vmem:[#allocation2 + $0xe70] sm:$0xf0]  ;;  %v9130_v14 = vor.u32 %v11551_v24, %v9127_v32 }
 0x14c   :  { %5324 = vmatpush.bf16.msrb.mxu2 %v9290_v61  ;;  %v11615_v39 = vld [vmem:[#allocation2 + $0xf64] sm:$0xf]  ;;  %v9383_v40 = vld [vmem:[#allocation2 + $0xf70] sm:$0xf0]  ;;  %v9258_v47 = vor.u32 %v11583_v34, %v9255_v36 }
 0x14d   :  { %5337 = vmatpush.bf16.msrb.mxu3 %v9418_v1  ;;  %v11515_v48 = vld [vmem:[#allocation2 + $0xc44] sm:$0xf]  ;;  %v8983_v50 = vld [vmem:[#allocation2 + $0xc50] sm:$0xf0]  ;;  %v9386_v52 = vor.u32 %v11615_v39, %v9383_v40  ;;  %v12421_v1 = vadd.f32 %v5084_v53, %v5072_v59 }
 0x14e   :  { %5299 = vmatpush.bf16.msrb.mxu0 %v9018_v9  ;;  %v11547_v51 = vld [vmem:[#allocation2 + $0xd44] sm:$0xf]  ;;  %v9111_v56 = vld [vmem:[#allocation2 + $0xd50] sm:$0xf0]  ;;  %v8986_v63 = vor.u32 %v11515_v48, %v8983_v50 }
 0x14f   :  { %5312 = vmatpush.bf16.msrb.mxu1 %v9146_v13  ;;  %v11579_v57 = vld [vmem:[#allocation2 + $0xe44] sm:$0xf]  ;;  %v9239_v58 = vld [vmem:[#allocation2 + $0xe50] sm:$0xf0]  ;;  %v9114_v2 = vor.u32 %v11547_v51, %v9111_v56 }
 0x150   :  { %5325 = vmatpush.bf16.msrb.mxu2 %v9274_v15  ;;  %v11611_v60 = vld [vmem:[#allocation2 + $0xf44] sm:$0xf]  ;;  %v9367_v61 = vld [vmem:[#allocation2 + $0xf50] sm:$0xf0]  ;;  %v9242_v3 = vor.u32 %v11579_v57, %v9239_v58 }
 0x151   :  { %5338 = vmatpush.bf16.msrb.mxu3 %v9402_v26  ;;  %v11511_v4 = vld [vmem:[#allocation2 + $0xc24] sm:$0xf]  ;;  %v8967_v5 = vld [vmem:[#allocation2 + $0xc30] sm:$0xf0]  ;;  %v9370_v6 = vor.u32 %v11611_v60, %v9367_v61 }
 0x152   :  { %5300 = vmatpush.bf16.msrb.mxu0 %v9002_v43  ;;  %v11543_v55 = vld [vmem:[#allocation2 + $0xd24] sm:$0xf]  ;;  %v9095_v8 = vld [vmem:[#allocation2 + $0xd30] sm:$0xf0]  ;;  %v8970_v17 = vor.u32 %v11511_v4, %v8967_v5 }
 0x153   :  { %5313 = vmatpush.bf16.msrb.mxu1 %v9130_v14  ;;  %v11575_v9 = vld [vmem:[#allocation2 + $0xe24] sm:$0xf]  ;;  %v9223_v10 = vld [vmem:[#allocation2 + $0xe30] sm:$0xf0]  ;;  %v9098_v26 = vor.u32 %v11543_v55, %v9095_v8 }
 0x154   :  { %5326 = vmatpush.bf16.msrb.mxu2 %v9258_v47  ;;  %v11607_v13 = vld [vmem:[#allocation2 + $0xf24] sm:$0xf]  ;;  %v9351_v15 = vld [vmem:[#allocation2 + $0xf30] sm:$0xf0]  ;;  %v9226_v27 = vor.u32 %v11575_v9, %v9223_v10  ;;  %v5073_v47 = vpop.f32.mrf.mxu2 }
 0x155   :  { %5339 = vmatpush.bf16.msrb.mxu3 %v9386_v52  ;;  %v11507_v21 = vld [vmem:[#allocation2 + $0xc04] sm:$0xf]  ;;  %v8951_v24 = vld [vmem:[#allocation2 + $0xc10] sm:$0xf0]  ;;  %v9354_v39 = vor.u32 %v11607_v13, %v9351_v15  ;;  %v5086_v52 = vpop.f32.mrf.mxu3 }
 0x156   :  { %5301 = vmatpush.bf16.msrb.mxu0 %v8986_v63  ;;  %v11539_v32 = vld [vmem:[#allocation2 + $0xd04] sm:$0xf]  ;;  %v9079_v34 = vld [vmem:[#allocation2 + $0xd10] sm:$0xf0]  ;;  %v8954_v54 = vor.u32 %v11507_v21, %v8951_v24 }
 0x157   :  { %5314 = vmatpush.bf16.msrb.mxu1 %v9114_v2  ;;  %v11571_v36 = vld [vmem:[#allocation2 + $0xe04] sm:$0xf]  ;;  %v9207_v40 = vld [vmem:[#allocation2 + $0xe10] sm:$0xf0]  ;;  %v9082_v59 = vor.u32 %v11539_v32, %v9079_v34 }
 0x158   :  { %5327 = vmatpush.bf16.msrb.mxu2 %v9242_v3  ;;  %v11603_v43 = vld [vmem:[#allocation2 + $0xf04] sm:$0xf]  ;;  %v9335_v14 = vld [vmem:[#allocation2 + $0xf10] sm:$0xf0]  ;;  %v9210_v53 = vor.u32 %v11571_v36, %v9207_v40 }
 0x159   :  { %5340 = vmatpush.bf16.msrb.mxu3 %v9370_v6  ;;  %v11663_v48 = vld [vmem:[#allocation2 + $0x10e4] sm:$0xf]  ;;  %v9575_v50 = vld [vmem:[#allocation2 + $0x10f0] sm:$0xf0]  ;;  %v9338_v62 = vor.u32 %v11603_v43, %v9335_v14 }
 0x15a   :  { %v11695_v51 = vld [vmem:[#allocation2 + $0x11e4] sm:$0xf]  ;;  %5302 = vmatpush.bf16.msrb.mxu0 %v8970_v17  ;;  %v9703_v56 = vld [vmem:[#allocation2 + $0x11f0] sm:$0xf0]  ;;  %v9578_v63 = vor.u32 %v11663_v48, %v9575_v50 }
 0x15b   :  { %v11727_v57 = vld [vmem:[#allocation2 + $0x12e4] sm:$0xf]  ;;  %v9831_v58 = vld [vmem:[#allocation2 + $0x12f0] sm:$0xf0]  ;;  %5315 = vmatpush.bf16.msrb.mxu1 %v9098_v26  ;;  %v9706_v0 = vor.u32 %v11695_v51, %v9703_v56 }
 0x15c   :  { %5328 = vmatpush.bf16.msrb.mxu2 %v9226_v27  ;;  %v11759_v60 = vld [vmem:[#allocation2 + $0x13e4] sm:$0xf]  ;;  %v9959_v61 = vld [vmem:[#allocation2 + $0x13f0] sm:$0xf0]  ;;  %v9834_v2 = vor.u32 %v11727_v57, %v9831_v58 }
 0x15d   :  { %5341 = vmatpush.bf16.msrb.mxu3 %v9354_v39  ;;  %v11659_v3 = vld [vmem:[#allocation2 + $0x10c4] sm:$0xf]  ;;  %v9559_v4 = vld [vmem:[#allocation2 + $0x10d0] sm:$0xf0]  ;;  %v9962_v55 = vor.u32 %v11759_v60, %v9959_v61 }
 0x15e   :  { %v11691_v5 = vld [vmem:[#allocation2 + $0x11c4] sm:$0xf]  ;;  %5303 = vmatpush.bf16.msrb.mxu0 %v8954_v54  ;;  %v9687_v6 = vld [vmem:[#allocation2 + $0x11d0] sm:$0xf0]  ;;  %v9562_v15 = vor.u32 %v11659_v3, %v9559_v4 }
 0x15f   :  { %v11723_v8 = vld [vmem:[#allocation2 + $0x12c4] sm:$0xf]  ;;  %v9815_v9 = vld [vmem:[#allocation2 + $0x12d0] sm:$0xf0]  ;;  %5316 = vmatpush.bf16.msrb.mxu1 %v9082_v59  ;;  %v9690_v17 = vor.u32 %v11691_v5, %v9687_v6  ;;  %v5097_v59 = vpop.f32.mrf.mxu0 }
 0x160   :  { %5329 = vmatpush.bf16.msrb.mxu2 %v9210_v53  ;;  %v11755_v10 = vld [vmem:[#allocation2 + $0x13c4] sm:$0xf]  ;;  %v9943_v13 = vld [vmem:[#allocation2 + $0x13d0] sm:$0xf0]  ;;  %v9818_v21 = vor.u32 %v11723_v8, %v9815_v9  ;;  %v5098_v61 = vadd.f32 %v5097_v59, %v12421_v1 }
 0x161   :  { %5342 = vmatpush.bf16.msrb.mxu3 %v9338_v62  ;;  %v11655_v24 = vld [vmem:[#allocation2 + $0x10a4] sm:$0xf]  ;;  %v9543_v26 = vld [vmem:[#allocation2 + $0x10b0] sm:$0xf0]  ;;  %5304 = vmatmul.bf16.vlgmr.msrb.gmra.mxu0 %v12349_v23  ;;  %v9946_v32 = vor.u32 %v11755_v10, %v9943_v13 }
 0x162   :  { %5348 = vmatpush.bf16.msra.mxu0 %v9578_v63  ;;  %v11687_v27 = vld [vmem:[#allocation2 + $0x11a4] sm:$0xf]  ;;  %v9671_v34 = vld [vmem:[#allocation2 + $0x11b0] sm:$0xf0]  ;;  %5317 = vmatmul.bf16.vlgmr.msrb.gmra.mxu1 %v12353_v31  ;;  %v9546_v14 = vor.u32 %v11655_v24, %v9543_v26  ;;  %v5110_v63 = vpop.f32.mrf.mxu1 }
 0x163   :  { %5361 = vmatpush.bf16.msra.mxu1 %v9706_v0  ;;  %v11719_v36 = vld [vmem:[#allocation2 + $0x12a4] sm:$0xf]  ;;  %v9799_v39 = vld [vmem:[#allocation2 + $0x12b0] sm:$0xf0]  ;;  %5330 = vmatmul.bf16.vlgmr.msrb.gmra.mxu2 %v12351_v28  ;;  %v9674_v47 = vor.u32 %v11687_v27, %v9671_v34  ;;  %v5111_v6 = vadd.f32 %v5110_v63, %v5098_v61 }
 0x164   :  { %5374 = vmatpush.bf16.msra.mxu2 %v9834_v2  ;;  %v11751_v40 = vld [vmem:[#allocation2 + $0x13a4] sm:$0xf]  ;;  %v9927_v43 = vld [vmem:[#allocation2 + $0x13b0] sm:$0xf0]  ;;  %5343 = vmatmul.bf16.vlgmr.msrb.gmra.mxu3 %v12355_v35  ;;  %v9802_v48 = vor.u32 %v11719_v36, %v9799_v39 }
 0x165   :  { %5387 = vmatpush.bf16.msra.mxu3 %v9962_v55  ;;  %v11651_v50 = vld [vmem:[#allocation2 + $0x1084] sm:$0xf]  ;;  %v9527_v51 = vld [vmem:[#allocation2 + $0x1090] sm:$0xf0]  ;;  %v9930_v54 = vor.u32 %v11751_v40, %v9927_v43 }
 0x166   :  { %5349 = vmatpush.bf16.msra.mxu0 %v9562_v15  ;;  %v11683_v52 = vld [vmem:[#allocation2 + $0x1184] sm:$0xf]  ;;  %v9655_v56 = vld [vmem:[#allocation2 + $0x1190] sm:$0xf0]  ;;  %v9530_v62 = vor.u32 %v11651_v50, %v9527_v51  ;;  %v5123_v34 = vpop.f32.mrf.mxu2 }
 0x167   :  { %5362 = vmatpush.bf16.msra.mxu1 %v9690_v17  ;;  %v11715_v57 = vld [vmem:[#allocation2 + $0x1284] sm:$0xf]  ;;  %v9783_v58 = vld [vmem:[#allocation2 + $0x1290] sm:$0xf0]  ;;  %v9658_v0 = vor.u32 %v11683_v52, %v9655_v56  ;;  %v5124_v43 = vadd.f32 %v5123_v34, %v5111_v6  ;;  %v5099_v50 = vpop.f32.mrf.mxu0 }
 0x168   :  { %5375 = vmatpush.bf16.msra.mxu2 %v9818_v21  ;;  %v11747_v53 = vld [vmem:[#allocation2 + $0x1384] sm:$0xf]  ;;  %v9911_v60 = vld [vmem:[#allocation2 + $0x1390] sm:$0xf0]  ;;  %v9786_v2 = vor.u32 %v11715_v57, %v9783_v58 }
 0x169   :  { %5388 = vmatpush.bf16.msra.mxu3 %v9946_v32  ;;  %v11647_v3 = vld [vmem:[#allocation2 + $0x1064] sm:$0xf]  ;;  %v9511_v4 = vld [vmem:[#allocation2 + $0x1070] sm:$0xf0]  ;;  %v9914_v55 = vor.u32 %v11747_v53, %v9911_v60 }
 0x16a   :  { %5350 = vmatpush.bf16.msra.mxu0 %v9546_v14  ;;  %v11679_v5 = vld [vmem:[#allocation2 + $0x1164] sm:$0xf]  ;;  %v9639_v8 = vld [vmem:[#allocation2 + $0x1170] sm:$0xf0]  ;;  %v9514_v17 = vor.u32 %v11647_v3, %v9511_v4  ;;  %v5136_v14 = vpop.f32.mrf.mxu3  ;;  %v5112_v52 = vpop.f32.mrf.mxu1 }
 0x16b   :  { %5363 = vmatpush.bf16.msra.mxu1 %v9674_v47  ;;  %v11711_v9 = vld [vmem:[#allocation2 + $0x1264] sm:$0xf]  ;;  %v9767_v10 = vld [vmem:[#allocation2 + $0x1270] sm:$0xf0]  ;;  %v9642_v1 = vor.u32 %v11679_v5, %v9639_v8 }
 0x16c   :  { %5376 = vmatpush.bf16.msra.mxu2 %v9802_v48  ;;  %v11743_v13 = vld [vmem:[#allocation2 + $0x1364] sm:$0xf]  ;;  %v9895_v15 = vld [vmem:[#allocation2 + $0x1370] sm:$0xf0]  ;;  %v9770_v21 = vor.u32 %v11711_v9, %v9767_v10 }
 0x16d   :  { %5389 = vmatpush.bf16.msra.mxu3 %v9930_v54  ;;  %v11643_v24 = vld [vmem:[#allocation2 + $0x1044] sm:$0xf]  ;;  %v9495_v26 = vld [vmem:[#allocation2 + $0x1050] sm:$0xf0]  ;;  %v9898_v32 = vor.u32 %v11743_v13, %v9895_v15  ;;  %v12428_v54 = vadd.f32 %v5136_v14, %v5124_v43 }
 0x16e   :  { %5351 = vmatpush.bf16.msra.mxu0 %v9530_v62  ;;  %v11675_v27 = vld [vmem:[#allocation2 + $0x1144] sm:$0xf]  ;;  %v9623_v36 = vld [vmem:[#allocation2 + $0x1150] sm:$0xf0]  ;;  %v9498_v51 = vor.u32 %v11643_v24, %v9495_v26 }
 0x16f   :  { %5364 = vmatpush.bf16.msra.mxu1 %v9658_v0  ;;  %v11707_v39 = vld [vmem:[#allocation2 + $0x1244] sm:$0xf]  ;;  %v9751_v40 = vld [vmem:[#allocation2 + $0x1250] sm:$0xf0]  ;;  %v9626_v56 = vor.u32 %v11675_v27, %v9623_v36 }
 0x170   :  { %5377 = vmatpush.bf16.msra.mxu2 %v9786_v2  ;;  %v11739_v47 = vld [vmem:[#allocation2 + $0x1344] sm:$0xf]  ;;  %v9879_v48 = vld [vmem:[#allocation2 + $0x1350] sm:$0xf0]  ;;  %v9754_v57 = vor.u32 %v11707_v39, %v9751_v40 }
 0x171   :  { %5390 = vmatpush.bf16.msra.mxu3 %v9914_v55  ;;  %v11639_v58 = vld [vmem:[#allocation2 + $0x1024] sm:$0xf]  ;;  %v9479_v59 = vld [vmem:[#allocation2 + $0x1030] sm:$0xf0]  ;;  %v9882_v60 = vor.u32 %v11739_v47, %v9879_v48 }
 0x172   :  { %5352 = vmatpush.bf16.msra.mxu0 %v9514_v17  ;;  %v11671_v53 = vld [vmem:[#allocation2 + $0x1124] sm:$0xf]  ;;  %v9607_v61 = vld [vmem:[#allocation2 + $0x1130] sm:$0xf0]  ;;  %v9482_v3 = vor.u32 %v11639_v58, %v9479_v59 }
 0x173   :  { %5365 = vmatpush.bf16.msra.mxu1 %v9642_v1  ;;  %v11703_v62 = vld [vmem:[#allocation2 + $0x1224] sm:$0xf]  ;;  %v9735_v63 = vld [vmem:[#allocation2 + $0x1230] sm:$0xf0]  ;;  %v9610_v55 = vor.u32 %v11671_v53, %v9607_v61 }
 0x174   :  { %5378 = vmatpush.bf16.msra.mxu2 %v9770_v21  ;;  %v11735_v0 = vld [vmem:[#allocation2 + $0x1324] sm:$0xf]  ;;  %v9863_v2 = vld [vmem:[#allocation2 + $0x1330] sm:$0xf0]  ;;  %v9738_v6 = vor.u32 %v11703_v62, %v9735_v63  ;;  %v5125_v21 = vpop.f32.mrf.mxu2 }
 0x175   :  { %5391 = vmatpush.bf16.msra.mxu3 %v9898_v32  ;;  %v11635_v4 = vld [vmem:[#allocation2 + $0x1004] sm:$0xf]  ;;  %v9463_v5 = vld [vmem:[#allocation2 + $0x1010] sm:$0xf0]  ;;  %v9866_v13 = vor.u32 %v11735_v0, %v9863_v2  ;;  %v5138_v32 = vpop.f32.mrf.mxu3 }
 0x176   :  { %5353 = vmatpush.bf16.msra.mxu0 %v9498_v51  ;;  %v11667_v8 = vld [vmem:[#allocation2 + $0x1104] sm:$0xf]  ;;  %v9591_v9 = vld [vmem:[#allocation2 + $0x1110] sm:$0xf0]  ;;  %v9466_v34 = vor.u32 %v11635_v4, %v9463_v5 }
 0x177   :  { %5366 = vmatpush.bf16.msra.mxu1 %v9626_v56  ;;  %v11699_v10 = vld [vmem:[#allocation2 + $0x1204] sm:$0xf]  ;;  %v9719_v15 = vld [vmem:[#allocation2 + $0x1210] sm:$0xf0]  ;;  %v9594_v43 = vor.u32 %v11667_v8, %v9591_v9 }
 0x178   :  { %5379 = vmatpush.bf16.msra.mxu2 %v9754_v57  ;;  %v11731_v17 = vld [vmem:[#allocation2 + $0x1304] sm:$0xf]  ;;  %v9847_v1 = vld [vmem:[#allocation2 + $0x1310] sm:$0xf0]  ;;  %v9722_v14 = vor.u32 %v11699_v10, %v9719_v15 }
 0x179   :  { %5392 = vmatpush.bf16.msra.mxu3 %v9882_v60  ;;  %v11791_v24 = vld [vmem:[#allocation2 + $0x14e4] sm:$0xf]  ;;  %v10087_v26 = vld [vmem:[#allocation2 + $0x14f0] sm:$0xf0]  ;;  %v9850_v50 = vor.u32 %v11731_v17, %v9847_v1 }
 0x17a   :  { %v11823_v27 = vld [vmem:[#allocation2 + $0x15e4] sm:$0xf]  ;;  %5354 = vmatpush.bf16.msra.mxu0 %v9482_v3  ;;  %v10215_v36 = vld [vmem:[#allocation2 + $0x15f0] sm:$0xf0]  ;;  %v10090_v51 = vor.u32 %v11791_v24, %v10087_v26 }
 0x17b   :  { %v11855_v39 = vld [vmem:[#allocation2 + $0x16e4] sm:$0xf]  ;;  %v10343_v40 = vld [vmem:[#allocation2 + $0x16f0] sm:$0xf0]  ;;  %5367 = vmatpush.bf16.msra.mxu1 %v9610_v55  ;;  %v10218_v52 = vor.u32 %v11823_v27, %v10215_v36 }
 0x17c   :  { %5380 = vmatpush.bf16.msra.mxu2 %v9738_v6  ;;  %v11887_v47 = vld [vmem:[#allocation2 + $0x17e4] sm:$0xf]  ;;  %v10471_v48 = vld [vmem:[#allocation2 + $0x17f0] sm:$0xf0]  ;;  %v10346_v56 = vor.u32 %v11855_v39, %v10343_v40 }
 0x17d   :  { %5393 = vmatpush.bf16.msra.mxu3 %v9866_v13  ;;  %v11787_v57 = vld [vmem:[#allocation2 + $0x14c4] sm:$0xf]  ;;  %v10071_v58 = vld [vmem:[#allocation2 + $0x14d0] sm:$0xf0]  ;;  %v10474_v53 = vor.u32 %v11887_v47, %v10471_v48 }
 0x17e   :  { %v11819_v59 = vld [vmem:[#allocation2 + $0x15c4] sm:$0xf]  ;;  %5355 = vmatpush.bf16.msra.mxu0 %v9466_v34  ;;  %v10199_v60 = vld [vmem:[#allocation2 + $0x15d0] sm:$0xf0]  ;;  %v10074_v2 = vor.u32 %v11787_v57, %v10071_v58  ;;  %v12066_v34 = vld [vmem:[#allocation4] sm:$0xf] }
 0x17f   :  { %v11851_v61 = vld [vmem:[#allocation2 + $0x16c4] sm:$0xf]  ;;  %v10327_v62 = vld [vmem:[#allocation2 + $0x16d0] sm:$0xf0]  ;;  %5368 = vmatpush.bf16.msra.mxu1 %v9594_v43  ;;  %v10202_v3 = vor.u32 %v11819_v59, %v10199_v60  ;;  %v897_v36 = vperm.slane %v12066_v34, 1  ;;  %v5162_v60 = vpop.f32.mrf.mxu1 }
 0x180   :  { %5381 = vmatpush.bf16.msra.mxu2 %v9722_v14  ;;  %v11883_v63 = vld [vmem:[#allocation2 + $0x17c4] sm:$0xf]  ;;  %v10455_v0 = vld [vmem:[#allocation2 + $0x17d0] sm:$0xf0]  ;;  %v10330_v4 = vor.u32 %v11851_v61, %v10327_v62 }
 0x181   :  { %5394 = vmatpush.bf16.msra.mxu3 %v9850_v50  ;;  %v11783_v5 = vld [vmem:[#allocation2 + $0x14a4] sm:$0xf]  ;;  %v10055_v55 = vld [vmem:[#allocation2 + $0x14b0] sm:$0xf0]  ;;  %5356 = vmatmul.bf16.vlgmr.msra.gmra.mxu0 %v12367_v37  ;;  %v10458_v8 = vor.u32 %v11883_v63, %v10455_v0 }
 0x182   :  { %5400 = vmatpush.bf16.msrb.mxu0 %v10090_v51  ;;  %v11815_v6 = vld [vmem:[#allocation2 + $0x15a4] sm:$0xf]  ;;  %v10183_v9 = vld [vmem:[#allocation2 + $0x15b0] sm:$0xf0]  ;;  %5369 = vmatmul.bf16.vlgmr.msra.gmra.mxu1 %v12371_v46  ;;  %v10058_v1 = vor.u32 %v11783_v5, %v10055_v55  ;;  %v5149_v51 = vpop.f32.mrf.mxu0 }
 0x183   :  { %5413 = vmatpush.bf16.msrb.mxu1 %v10218_v52  ;;  %v11847_v10 = vld [vmem:[#allocation2 + $0x16a4] sm:$0xf]  ;;  %v10311_v13 = vld [vmem:[#allocation2 + $0x16b0] sm:$0xf0]  ;;  %5382 = vmatmul.bf16.vlgmr.msra.gmra.mxu2 %v12369_v45  ;;  %v10186_v24 = vor.u32 %v11815_v6, %v10183_v9 }
 0x184   :  { %5426 = vmatpush.bf16.msrb.mxu2 %v10346_v56  ;;  %v11879_v15 = vld [vmem:[#allocation2 + $0x17a4] sm:$0xf]  ;;  %v10439_v17 = vld [vmem:[#allocation2 + $0x17b0] sm:$0xf0]  ;;  %5395 = vmatmul.bf16.vlgmr.msra.gmra.mxu3 %v12373_v49  ;;  %v10314_v26 = vor.u32 %v11847_v10, %v10311_v13 }
 0x185   :  { %5439 = vmatpush.bf16.msrb.mxu3 %v10474_v53  ;;  %v11779_v21 = vld [vmem:[#allocation2 + $0x1484] sm:$0xf]  ;;  %v10039_v27 = vld [vmem:[#allocation2 + $0x1490] sm:$0xf0]  ;;  %v10442_v39 = vor.u32 %v11879_v15, %v10439_v17  ;;  %v5150_v53 = vadd.f32 %v5149_v51, %v897_v36 }
 0x186   :  { %5401 = vmatpush.bf16.msrb.mxu0 %v10074_v2  ;;  %v11811_v32 = vld [vmem:[#allocation2 + $0x1584] sm:$0xf]  ;;  %v10167_v40 = vld [vmem:[#allocation2 + $0x1590] sm:$0xf0]  ;;  %v10042_v50 = vor.u32 %v11779_v21, %v10039_v27  ;;  %v5175_v13 = vpop.f32.mrf.mxu2 }
 0x187   :  { %5414 = vmatpush.bf16.msrb.mxu1 %v10202_v3  ;;  %v11843_v43 = vld [vmem:[#allocation2 + $0x1684] sm:$0xf]  ;;  %v10295_v14 = vld [vmem:[#allocation2 + $0x1690] sm:$0xf0]  ;;  %v10170_v52 = vor.u32 %v11811_v32, %v10167_v40 }
 0x188   :  { %5427 = vmatpush.bf16.msrb.mxu2 %v10330_v4  ;;  %v11875_v47 = vld [vmem:[#allocation2 + $0x1784] sm:$0xf]  ;;  %v10423_v48 = vld [vmem:[#allocation2 + $0x1790] sm:$0xf0]  ;;  %v10298_v56 = vor.u32 %v11843_v43, %v10295_v14  ;;  %v5163_v4 = vadd.f32 %v5162_v60, %v5150_v53 }
 0x189   :  { %5440 = vmatpush.bf16.msrb.mxu3 %v10458_v8  ;;  %v11775_v57 = vld [vmem:[#allocation2 + $0x1464] sm:$0xf]  ;;  %v10023_v58 = vld [vmem:[#allocation2 + $0x1470] sm:$0xf0]  ;;  %v10426_v61 = vor.u32 %v11875_v47, %v10423_v48 }
 0x18a   :  { %5402 = vmatpush.bf16.msrb.mxu0 %v10058_v1  ;;  %v11807_v59 = vld [vmem:[#allocation2 + $0x1564] sm:$0xf]  ;;  %v10151_v62 = vld [vmem:[#allocation2 + $0x1570] sm:$0xf0]  ;;  %v10026_v5 = vor.u32 %v11775_v57, %v10023_v58 }
 0x18b   :  { %5415 = vmatpush.bf16.msrb.mxu1 %v10186_v24  ;;  %v11839_v63 = vld [vmem:[#allocation2 + $0x1664] sm:$0xf]  ;;  %v10279_v0 = vld [vmem:[#allocation2 + $0x1670] sm:$0xf0]  ;;  %v10154_v55 = vor.u32 %v11807_v59, %v10151_v62  ;;  %v5176_v24 = vadd.f32 %v5175_v13, %v5163_v4  ;;  %v11154_v13 = vld [vmem:[#allocation2 + $0xf4] sm:$0xf0] }
 0x18c   :  { %5428 = vmatpush.bf16.msrb.mxu2 %v10314_v26  ;;  %v11871_v2 = vld [vmem:[#allocation2 + $0x1764] sm:$0xf]  ;;  %v10407_v3 = vld [vmem:[#allocation2 + $0x1770] sm:$0xf0]  ;;  %v10282_v6 = vor.u32 %v11839_v63, %v10279_v0  ;;  %v5188_v26 = vpop.f32.mrf.mxu3 }
 0x18d   :  { %5441 = vmatpush.bf16.msrb.mxu3 %v10442_v39  ;;  %v11771_v8 = vld [vmem:[#allocation2 + $0x1444] sm:$0xf]  ;;  %v10007_v9 = vld [vmem:[#allocation2 + $0x1450] sm:$0xf0]  ;;  %v10410_v15 = vor.u32 %v11871_v2, %v10407_v3  ;;  %v12434_v36 = vadd.f32 %v5188_v26, %v5176_v24  ;;  %v5151_v39 = vpop.f32.mrf.mxu0  ;;  %v11218_v24 = vld [vmem:[#allocation2 + $0x2f4] sm:$0xf0] }
 0x18e   :  { %5403 = vmatpush.bf16.msrb.mxu0 %v10042_v50  ;;  %v11803_v10 = vld [vmem:[#allocation2 + $0x1544] sm:$0xf]  ;;  %v10135_v17 = vld [vmem:[#allocation2 + $0x1550] sm:$0xf0]  ;;  %v10010_v34 = vor.u32 %v11771_v8, %v10007_v9  ;;  %v5164_v50 = vpop.f32.mrf.mxu1  ;;  %v5177_v4 = vpop.f32.mrf.mxu2 }
 0x18f   :  { %5416 = vmatpush.bf16.msrb.mxu1 %v10170_v52  ;;  %v11835_v1 = vld [vmem:[#allocation2 + $0x1644] sm:$0xf]  ;;  %v10263_v21 = vld [vmem:[#allocation2 + $0x1650] sm:$0xf0]  ;;  %v10138_v40 = vor.u32 %v11803_v10, %v10135_v17  ;;  %v7533_v10 = vld [vmem:[#allocation2 + $0xe8] sm:$0xf] }
 0x190   :  { %5429 = vmatpush.bf16.msrb.mxu2 %v10298_v56  ;;  %v11867_v27 = vld [vmem:[#allocation2 + $0x1744] sm:$0xf]  ;;  %v10391_v32 = vld [vmem:[#allocation2 + $0x1750] sm:$0xf0]  ;;  %v10266_v43 = vor.u32 %v11835_v1, %v10263_v21  ;;  %v11186_v1 = vld [vmem:[#allocation2 + $0x1f4] sm:$0xf0] }
 0x191   :  { %5442 = vmatpush.bf16.msrb.mxu3 %v10426_v61  ;;  %v11767_v14 = vld [vmem:[#allocation2 + $0x1424] sm:$0xf]  ;;  %v9991_v47 = vld [vmem:[#allocation2 + $0x1430] sm:$0xf0]  ;;  %v10394_v51 = vor.u32 %v11867_v27, %v10391_v32  ;;  %v7789_v21 = vld [vmem:[#allocation2 + $0x2e8] sm:$0xf] }
 0x192   :  { %5404 = vmatpush.bf16.msrb.mxu0 %v10026_v5  ;;  %v11799_v48 = vld [vmem:[#allocation2 + $0x1524] sm:$0xf]  ;;  %v10119_v52 = vld [vmem:[#allocation2 + $0x1530] sm:$0xf0]  ;;  %v9994_v53 = vor.u32 %v11767_v14, %v9991_v47  ;;  %v7917_v32 = vld [vmem:[#allocation2 + $0x3e8] sm:$0xf]  ;;  %v7790_v14 = vor.u32 %v11218_v24, %v7789_v21 }
 0x193   :  { %5417 = vmatpush.bf16.msrb.mxu1 %v10154_v55  ;;  %v11831_v56 = vld [vmem:[#allocation2 + $0x1624] sm:$0xf]  ;;  %v10247_v57 = vld [vmem:[#allocation2 + $0x1630] sm:$0xf0]  ;;  %v10122_v62 = vor.u32 %v11799_v48, %v10119_v52  ;;  %v7517_v47 = vld [vmem:[#allocation2 + $0xc8] sm:$0xf] }
 0x194   :  { %5430 = vmatpush.bf16.msrb.mxu2 %v10282_v6  ;;  %v11863_v58 = vld [vmem:[#allocation2 + $0x1724] sm:$0xf]  ;;  %v10375_v59 = vld [vmem:[#allocation2 + $0x1730] sm:$0xf0]  ;;  %v10250_v63 = vor.u32 %v11831_v56, %v10247_v57  ;;  %v5190_v9 = vpop.f32.mrf.mxu3  ;;  %v11150_v48 = vld [vmem:[#allocation2 + $0xd4] sm:$0xf0] }
 0x195   :  { %5443 = vmatpush.bf16.msrb.mxu3 %v10410_v15  ;;  %v11763_v60 = vld [vmem:[#allocation2 + $0x1404] sm:$0xf]  ;;  %v9975_v61 = vld [vmem:[#allocation2 + $0x1410] sm:$0xf0]  ;;  %v10378_v5 = vor.u32 %v11863_v58, %v10375_v59  ;;  %v7661_v15 = vld [vmem:[#allocation2 + $0x1e8] sm:$0xf] }
 0x196   :  { %5405 = vmatpush.bf16.msrb.mxu0 %v10010_v34  ;;  %v11795_v0 = vld [vmem:[#allocation2 + $0x1504] sm:$0xf]  ;;  %v10103_v2 = vld [vmem:[#allocation2 + $0x1510] sm:$0xf0]  ;;  %v9978_v17 = vor.u32 %v11763_v60, %v9975_v61  ;;  %v11250_v34 = vld [vmem:[#allocation2 + $0x3f4] sm:$0xf0] }
 0x197   :  { %5418 = vmatpush.bf16.msrb.mxu1 %v10138_v40  ;;  %v11827_v3 = vld [vmem:[#allocation2 + $0x1604] sm:$0xf]  ;;  %v10231_v55 = vld [vmem:[#allocation2 + $0x1610] sm:$0xf0]  ;;  %v10106_v26 = vor.u32 %v11795_v0, %v10103_v2  ;;  %v7534_v40 = vor.u32 %v11154_v13, %v7533_v10  ;;  %v7645_v50 = vld [vmem:[#allocation2 + $0x1c8] sm:$0xf] }
 0x198   :  { %5431 = vmatpush.bf16.msrb.mxu2 %v10266_v43  ;;  %v11859_v6 = vld [vmem:[#allocation2 + $0x1704] sm:$0xf]  ;;  %v10359_v8 = vld [vmem:[#allocation2 + $0x1710] sm:$0xf0]  ;;  %v10234_v27 = vor.u32 %v11827_v3, %v10231_v55  ;;  %v7662_v43 = vor.u32 %v11186_v1, %v7661_v15  ;;  %v11182_v52 = vld [vmem:[#allocation2 + $0x1d4] sm:$0xf0] }
 0x199   :  { %5444 = vmatpush.bf16.msrb.mxu3 %v10394_v51  ;;  %v10362_v39 = vor.u32 %v11859_v6, %v10359_v8  ;;  %v7918_v51 = vor.u32 %v11250_v34, %v7917_v32  ;;  %v7773_v56 = vld [vmem:[#allocation2 + $0x2c8] sm:$0xf]  ;;  %v11214_v57 = vld [vmem:[#allocation2 + $0x2d4] sm:$0xf0]  ;;  %v7646_v60 = vor.u32 %v11182_v52, %v7645_v50 }
 0x19a   :  { %5406 = vmatpush.bf16.msrb.mxu0 %v9994_v53  ;;  %v7901_v58 = vld [vmem:[#allocation2 + $0x3c8] sm:$0xf]  ;;  %v11246_v59 = vld [vmem:[#allocation2 + $0x3d4] sm:$0xf0]  ;;  %v7518_v53 = vor.u32 %v11150_v48, %v7517_v47  ;;  %v7774_v61 = vor.u32 %v11214_v57, %v7773_v56 }
 0x19b   :  { %5419 = vmatpush.bf16.msrb.mxu1 %v10122_v62  ;;  %v7501_v62 = vld [vmem:[#allocation2 + $0xa8] sm:$0xf]  ;;  %v7902_v2 = vor.u32 %v11246_v59, %v7901_v58  ;;  %v11178_v3 = vld [vmem:[#allocation2 + $0x1b4] sm:$0xf0] }
 0x19c   :  { %5432 = vmatpush.bf16.msrb.mxu2 %v10250_v63  ;;  %v11146_v63 = vld [vmem:[#allocation2 + $0xb4] sm:$0xf0]  ;;  %v7629_v0 = vld [vmem:[#allocation2 + $0x1a8] sm:$0xf] }
 0x19d   :  { %5445 = vmatpush.bf16.msrb.mxu3 %v10378_v5  ;;  %v7757_v4 = vld [vmem:[#allocation2 + $0x2a8] sm:$0xf]  ;;  %v11210_v5 = vld [vmem:[#allocation2 + $0x2b4] sm:$0xf0]  ;;  %v7502_v8 = vor.u32 %v11146_v63, %v7501_v62  ;;  %v7630_v9 = vor.u32 %v11178_v3, %v7629_v0 }
 0x19e   :  { %5407 = vmatpush.bf16.msrb.mxu0 %v9978_v17  ;;  %v7885_v55 = vld [vmem:[#allocation2 + $0x3a8] sm:$0xf]  ;;  %v11242_v6 = vld [vmem:[#allocation2 + $0x3b4] sm:$0xf0]  ;;  %v7758_v10 = vor.u32 %v11210_v5, %v7757_v4 }
 0x19f   :  { %5420 = vmatpush.bf16.msrb.mxu1 %v10106_v26  ;;  %v7485_v13 = vld [vmem:[#allocation2 + $0x88] sm:$0xf]  ;;  %v11142_v15 = vld [vmem:[#allocation2 + $0x94] sm:$0xf0]  ;;  %v7886_v1 = vor.u32 %v11242_v6, %v7885_v55 }
 0x1a0   :  { %5433 = vmatpush.bf16.msrb.mxu2 %v10234_v27  ;;  %v7613_v17 = vld [vmem:[#allocation2 + $0x188] sm:$0xf]  ;;  %v11174_v21 = vld [vmem:[#allocation2 + $0x194] sm:$0xf0]  ;;  %v7486_v34 = vor.u32 %v11142_v15, %v7485_v13 }
 0x1a1   :  { %5446 = vmatpush.bf16.msrb.mxu3 %v10362_v39  ;;  %5408 = vmatmul.bf16.vlgmr.msrb.gmra.mxu0 %v12387_v7  ;;  %v7741_v24 = vld [vmem:[#allocation2 + $0x288] sm:$0xf]  ;;  %v11206_v26 = vld [vmem:[#allocation2 + $0x294] sm:$0xf0]  ;;  %v5201_v39 = vpop.f32.mrf.mxu0 }
 0x1a2   :  { %5452 = vmatpush.bf16.msra.mxu0 %v7534_v40  ;;  %5421 = vmatmul.bf16.vlgmr.msrb.gmra.mxu1 %v12391_v12  ;;  %v7869_v27 = vld [vmem:[#allocation2 + $0x388] sm:$0xf]  ;;  %v11238_v32 = vld [vmem:[#allocation2 + $0x394] sm:$0xf0]  ;;  %v7614_v40 = vor.u32 %v11174_v21, %v7613_v17  ;;  %v5202_v50 = vadd.f32 %v5201_v39, %v12434_v36 }
 0x1a3   :  { %5465 = vmatpush.bf16.msra.mxu1 %v7662_v43  ;;  %5434 = vmatmul.bf16.vlgmr.msrb.gmra.mxu2 %v12389_v11  ;;  %v7742_v43 = vor.u32 %v11206_v26, %v7741_v24  ;;  %v11138_v47 = vld [vmem:[#allocation2 + $0x74] sm:$0xf0]  ;;  %v7597_v48 = vld [vmem:[#allocation2 + $0x168] sm:$0xf]  ;;  %v7870_v52 = vor.u32 %v11238_v32, %v7869_v27 }
 0x1a4   :  { %5478 = vmatpush.bf16.msra.mxu2 %v7790_v14  ;;  %5447 = vmatmul.bf16.vlgmr.msrb.gmra.mxu3 %v12393_v16  ;;  %v7469_v14 = vld [vmem:[#allocation2 + $0x68] sm:$0xf]  ;;  %v11170_v56 = vld [vmem:[#allocation2 + $0x174] sm:$0xf0] }
 0x1a5   :  { %5491 = vmatpush.bf16.msra.mxu3 %v7918_v51  ;;  %v5214_v51 = vpop.f32.mrf.mxu1  ;;  %v7725_v57 = vld [vmem:[#allocation2 + $0x268] sm:$0xf]  ;;  %v11202_v58 = vld [vmem:[#allocation2 + $0x274] sm:$0xf0]  ;;  %v7598_v62 = vor.u32 %v11170_v56, %v7597_v48 }
 0x1a6   :  { %5453 = vmatpush.bf16.msra.mxu0 %v7518_v53  ;;  %v7853_v59 = vld [vmem:[#allocation2 + $0x368] sm:$0xf]  ;;  %v11234_v53 = vld [vmem:[#allocation2 + $0x374] sm:$0xf0]  ;;  %v7726_v63 = vor.u32 %v11202_v58, %v7725_v57  ;;  %v5227_v4 = vpop.f32.mrf.mxu2 }
 0x1a7   :  { %5466 = vmatpush.bf16.msra.mxu1 %v7646_v60  ;;  %v5215_v60 = vadd.f32 %v5214_v51, %v5202_v50  ;;  %v7453_v0 = vld [vmem:[#allocation2 + $0x48] sm:$0xf]  ;;  %v7854_v36 = vor.u32 %v11234_v53, %v7853_v59  ;;  %v11166_v5 = vld [vmem:[#allocation2 + $0x154] sm:$0xf0] }
 0x1a8   :  { %5479 = vmatpush.bf16.msra.mxu2 %v7774_v61  ;;  %v7470_v61 = vor.u32 %v11138_v47, %v7469_v14  ;;  %v7581_v3 = vld [vmem:[#allocation2 + $0x148] sm:$0xf]  ;;  %v11198_v6 = vld [vmem:[#allocation2 + $0x254] sm:$0xf0] }
 0x1a9   :  { %5492 = vmatpush.bf16.msra.mxu3 %v7902_v2  ;;  %v11134_v2 = vld [vmem:[#allocation2 + $0x54] sm:$0xf0]  ;;  %v7709_v55 = vld [vmem:[#allocation2 + $0x248] sm:$0xf]  ;;  %v7582_v21 = vor.u32 %v11166_v5, %v7581_v3 }
 0x1aa   :  { %5454 = vmatpush.bf16.msra.mxu0 %v7502_v8  ;;  %v5228_v8 = vadd.f32 %v5227_v4, %v5215_v60  ;;  %v11230_v13 = vld [vmem:[#allocation2 + $0x354] sm:$0xf0]  ;;  %v7454_v15 = vor.u32 %v11134_v2, %v7453_v0  ;;  %v7710_v24 = vor.u32 %v11198_v6, %v7709_v55  ;;  %v7437_v26 = vld [vmem:[#allocation2 + $0x28] sm:$0xf] }
 0x1ab   :  { %5467 = vmatpush.bf16.msra.mxu1 %v7630_v9  ;;  %v5240_v9 = vpop.f32.mrf.mxu3  ;;  %v11130_v27 = vld [vmem:[#allocation2 + $0x34] sm:$0xf0]  ;;  %v7565_v32 = vld [vmem:[#allocation2 + $0x128] sm:$0xf] }
 0x1ac   :  { %5480 = vmatpush.bf16.msra.mxu2 %v7758_v10  ;;  %v7837_v10 = vld [vmem:[#allocation2 + $0x348] sm:$0xf]  ;;  %v12441_v17 = vadd.f32 %v5240_v9, %v5228_v8  ;;  %v11194_v14 = vld [vmem:[#allocation2 + $0x234] sm:$0xf0]  ;;  %v7438_v50 = vor.u32 %v11130_v27, %v7437_v26 }
 0x1ad   :  { %5493 = vmatpush.bf16.msra.mxu3 %v7886_v1  ;;  %v5203_v1 = vpop.f32.mrf.mxu0  ;;  %v7838_v39 = vor.u32 %v11230_v13, %v7837_v10  ;;  %v7821_v47 = vld [vmem:[#allocation2 + $0x328] sm:$0xf]  ;;  %v11226_v48 = vld [vmem:[#allocation2 + $0x334] sm:$0xf0] }
 0x1ae   :  { %5455 = vmatpush.bf16.msra.mxu0 %v7486_v34  ;;  %v5216_v34 = vpop.f32.mrf.mxu1  ;;  %v7421_v51 = vld [vmem:[#allocation2 + $0x8] sm:$0xf]  ;;  %v11158_v59 = vld [vmem:[#allocation2 + $0x114] sm:$0xf0]  ;;  %v5229_v60 = vpop.f32.mrf.mxu2 }
 0x1af   :  { %5468 = vmatpush.bf16.msra.mxu1 %v7614_v40  ;;  %v11162_v40 = vld [vmem:[#allocation2 + $0x134] sm:$0xf0]  ;;  %v7549_v58 = vld [vmem:[#allocation2 + $0x108] sm:$0xf] }
 0x1b0   :  { %5481 = vmatpush.bf16.msra.mxu2 %v7742_v43  ;;  %v7693_v43 = vld [vmem:[#allocation2 + $0x228] sm:$0xf]  ;;  %v7566_v56 = vor.u32 %v11162_v40, %v7565_v32  ;;  %v11222_v0 = vld [vmem:[#allocation2 + $0x314] sm:$0xf0]  ;;  %v7550_v9 = vor.u32 %v11158_v59, %v7549_v58 }
 0x1b1   :  { %5494 = vmatpush.bf16.msra.mxu3 %v7870_v52  ;;  %v11126_v52 = vld [vmem:[#allocation2 + $0x14] sm:$0xf0]  ;;  %v7694_v57 = vor.u32 %v11194_v14, %v7693_v43  ;;  %v7677_v53 = vld [vmem:[#allocation2 + $0x208] sm:$0xf] }
 0x1b2   :  { %5456 = vmatpush.bf16.msra.mxu0 %v7470_v61  ;;  %v7822_v61 = vor.u32 %v11226_v48, %v7821_v47  ;;  %v8045_v3 = vld [vmem:[#allocation2 + $0x4e8] sm:$0xf]  ;;  %v11282_v4 = vld [vmem:[#allocation2 + $0x4f4] sm:$0xf0]  ;;  %v7422_v5 = vor.u32 %v11126_v52, %v7421_v51 }
 0x1b3   :  { %5469 = vmatpush.bf16.msra.mxu1 %v7598_v62  ;;  %v11190_v62 = vld [vmem:[#allocation2 + $0x214] sm:$0xf0]  ;;  %v5242_v2 = vpop.f32.mrf.mxu3  ;;  %v8301_v6 = vld [vmem:[#allocation2 + $0x6e8] sm:$0xf] }
 0x1b4   :  { %5482 = vmatpush.bf16.msra.mxu2 %v7726_v63  ;;  %v7805_v63 = vld [vmem:[#allocation2 + $0x308] sm:$0xf]  ;;  %v11314_v55 = vld [vmem:[#allocation2 + $0x5f4] sm:$0xf0]  ;;  %v7678_v10 = vor.u32 %v11190_v62, %v7677_v53 }
 0x1b5   :  { %5495 = vmatpush.bf16.msra.mxu3 %v7854_v36  ;;  %v8173_v36 = vld [vmem:[#allocation2 + $0x5e8] sm:$0xf]  ;;  %v11346_v8 = vld [vmem:[#allocation2 + $0x6f4] sm:$0xf0]  ;;  %v7806_v1 = vor.u32 %v11222_v0, %v7805_v63 }
 0x1b6   :  { %5457 = vmatpush.bf16.msra.mxu0 %v7454_v15  ;;  %v8429_v13 = vld [vmem:[#allocation2 + $0x7e8] sm:$0xf]  ;;  %v11378_v15 = vld [vmem:[#allocation2 + $0x7f4] sm:$0xf0]  ;;  %v8302_v26 = vor.u32 %v11346_v8, %v8301_v6 }
 0x1b7   :  { %5470 = vmatpush.bf16.msra.mxu1 %v7582_v21  ;;  %v8046_v21 = vor.u32 %v11282_v4, %v8045_v3  ;;  %v8029_v27 = vld [vmem:[#allocation2 + $0x4c8] sm:$0xf]  ;;  %v11278_v32 = vld [vmem:[#allocation2 + $0x4d4] sm:$0xf0] }
 0x1b8   :  { %5483 = vmatpush.bf16.msra.mxu2 %v7710_v24  ;;  %v8174_v24 = vor.u32 %v11314_v55, %v8173_v36  ;;  %v8157_v34 = vld [vmem:[#allocation2 + $0x5c8] sm:$0xf]  ;;  %v11310_v40 = vld [vmem:[#allocation2 + $0x5d4] sm:$0xf0] }
 0x1b9   :  { %5496 = vmatpush.bf16.msra.mxu3 %v7838_v39  ;;  %v8430_v39 = vor.u32 %v11378_v15, %v8429_v13  ;;  %v8285_v43 = vld [vmem:[#allocation2 + $0x6c8] sm:$0xf]  ;;  %v11342_v14 = vld [vmem:[#allocation2 + $0x6d4] sm:$0xf0]  ;;  %v8158_v51 = vor.u32 %v11310_v40, %v8157_v34 }
 0x1ba   :  { %5458 = vmatpush.bf16.msra.mxu0 %v7438_v50  ;;  %v8413_v47 = vld [vmem:[#allocation2 + $0x7c8] sm:$0xf]  ;;  %v11374_v48 = vld [vmem:[#allocation2 + $0x7d4] sm:$0xf0]  ;;  %v8030_v50 = vor.u32 %v11278_v32, %v8029_v27  ;;  %v8286_v52 = vor.u32 %v11342_v14, %v8285_v43 }
 0x1bb   :  { %5471 = vmatpush.bf16.msra.mxu1 %v7566_v56  ;;  %v8013_v56 = vld [vmem:[#allocation2 + $0x4a8] sm:$0xf]  ;;  %v8414_v59 = vor.u32 %v11374_v48, %v8413_v47  ;;  %v11306_v53 = vld [vmem:[#allocation2 + $0x5b4] sm:$0xf0] }
 0x1bc   :  { %5484 = vmatpush.bf16.msra.mxu2 %v7694_v57  ;;  %v11274_v57 = vld [vmem:[#allocation2 + $0x4b4] sm:$0xf0]  ;;  %v8141_v58 = vld [vmem:[#allocation2 + $0x5a8] sm:$0xf] }
 0x1bd   :  { %5497 = vmatpush.bf16.msra.mxu3 %v7822_v61  ;;  %v8269_v60 = vld [vmem:[#allocation2 + $0x6a8] sm:$0xf]  ;;  %v11338_v61 = vld [vmem:[#allocation2 + $0x6b4] sm:$0xf0]  ;;  %v8014_v0 = vor.u32 %v11274_v57, %v8013_v56  ;;  %v8142_v2 = vor.u32 %v11306_v53, %v8141_v58 }
 0x1be   :  { %5459 = vmatpush.bf16.msra.mxu0 %v7422_v5  ;;  %v8397_v62 = vld [vmem:[#allocation2 + $0x7a8] sm:$0xf]  ;;  %v11370_v63 = vld [vmem:[#allocation2 + $0x7b4] sm:$0xf0]  ;;  %v8270_v3 = vor.u32 %v11338_v61, %v8269_v60 }
 0x1bf   :  { %5472 = vmatpush.bf16.msra.mxu1 %v7550_v9  ;;  %v7997_v4 = vld [vmem:[#allocation2 + $0x488] sm:$0xf]  ;;  %v11270_v36 = vld [vmem:[#allocation2 + $0x494] sm:$0xf0]  ;;  %v8398_v55 = vor.u32 %v11370_v63, %v8397_v62 }
 0x1c0   :  { %5485 = vmatpush.bf16.msra.mxu2 %v7678_v10  ;;  %v8125_v5 = vld [vmem:[#allocation2 + $0x588] sm:$0xf]  ;;  %v11302_v6 = vld [vmem:[#allocation2 + $0x594] sm:$0xf0]  ;;  %v5253_v10 = vpop.f32.mrf.mxu0 }
 0x1c1   :  { %5498 = vmatpush.bf16.msra.mxu3 %v7806_v1  ;;  %5460 = vmatmul.bf16.vlgmr.msra.gmra.mxu0 %v12297_v19  ;;  %v8253_v8 = vld [vmem:[#allocation2 + $0x688] sm:$0xf]  ;;  %v11334_v9 = vld [vmem:[#allocation2 + $0x694] sm:$0xf0]  ;;  %v5254_v1 = vadd.f32 %v5253_v10, %v12441_v17 }
 0x1c2   :  { %5504 = vmatpush.bf16.msrb.mxu0 %v8046_v21  ;;  %5473 = vmatmul.bf16.vlgmr.msra.gmra.mxu1 %v12301_v22  ;;  %v8381_v13 = vld [vmem:[#allocation2 + $0x788] sm:$0xf]  ;;  %v11366_v15 = vld [vmem:[#allocation2 + $0x794] sm:$0xf0]  ;;  %v7998_v21 = vor.u32 %v11270_v36, %v7997_v4  ;;  %v8254_v27 = vor.u32 %v11334_v9, %v8253_v8 }
 0x1c3   :  { %5517 = vmatpush.bf16.msrb.mxu1 %v8174_v24  ;;  %5486 = vmatmul.bf16.vlgmr.msra.gmra.mxu2 %v12295_v18  ;;  %v5266_v24 = vpop.f32.mrf.mxu1  ;;  %v7981_v32 = vld [vmem:[#allocation2 + $0x468] sm:$0xf]  ;;  %v11266_v34 = vld [vmem:[#allocation2 + $0x474] sm:$0xf0]  ;;  %v8382_v40 = vor.u32 %v11366_v15, %v8381_v13 }
 0x1c4   :  { %5530 = vmatpush.bf16.msrb.mxu2 %v8302_v26  ;;  %5499 = vmatmul.bf16.vlgmr.msra.gmra.mxu3 %v12299_v20  ;;  %v8126_v26 = vor.u32 %v11302_v6, %v8125_v5  ;;  %v5267_v43 = vadd.f32 %v5266_v24, %v5254_v1  ;;  %v11298_v14 = vld [vmem:[#allocation2 + $0x574] sm:$0xf0]  ;;  %v8237_v47 = vld [vmem:[#allocation2 + $0x668] sm:$0xf] }
 0x1c5   :  { %5543 = vmatpush.bf16.msrb.mxu3 %v8430_v39  ;;  %v8109_v39 = vld [vmem:[#allocation2 + $0x568] sm:$0xf]  ;;  %v11330_v48 = vld [vmem:[#allocation2 + $0x674] sm:$0xf0] }
 0x1c6   :  { %5505 = vmatpush.bf16.msrb.mxu0 %v8030_v50  ;;  %v8365_v50 = vld [vmem:[#allocation2 + $0x768] sm:$0xf]  ;;  %v8110_v17 = vor.u32 %v11298_v14, %v8109_v39  ;;  %v8238_v56 = vor.u32 %v11330_v48, %v8237_v47  ;;  %v11262_v58 = vld [vmem:[#allocation2 + $0x454] sm:$0xf0]  ;;  %v5279_v60 = vpop.f32.mrf.mxu2 }
 0x1c7   :  { %5518 = vmatpush.bf16.msrb.mxu1 %v8158_v51  ;;  %v11362_v51 = vld [vmem:[#allocation2 + $0x774] sm:$0xf0]  ;;  %v7965_v57 = vld [vmem:[#allocation2 + $0x448] sm:$0xf] }
 0x1c8   :  { %5531 = vmatpush.bf16.msrb.mxu2 %v8286_v52  ;;  %v7982_v52 = vor.u32 %v11266_v34, %v7981_v32  ;;  %v8366_v53 = vor.u32 %v11362_v51, %v8365_v50  ;;  %v11294_v61 = vld [vmem:[#allocation2 + $0x554] sm:$0xf0]  ;;  %v8221_v62 = vld [vmem:[#allocation2 + $0x648] sm:$0xf]  ;;  %v5255_v36 = vpop.f32.mrf.mxu0  ;;  %v7966_v5 = vor.u32 %v11262_v58, %v7965_v57 }
 0x1c9   :  { %5544 = vmatpush.bf16.msrb.mxu3 %v8414_v59  ;;  %v8093_v59 = vld [vmem:[#allocation2 + $0x548] sm:$0xf]  ;;  %v11326_v63 = vld [vmem:[#allocation2 + $0x654] sm:$0xf0] }
 0x1ca   :  { %5506 = vmatpush.bf16.msrb.mxu0 %v8014_v0  ;;  %v5280_v0 = vadd.f32 %v5279_v60, %v5267_v43  ;;  %v11358_v4 = vld [vmem:[#allocation2 + $0x754] sm:$0xf0]  ;;  %v8094_v8 = vor.u32 %v11294_v61, %v8093_v59  ;;  %v8222_v9 = vor.u32 %v11326_v63, %v8221_v62  ;;  %v7949_v10 = vld [vmem:[#allocation2 + $0x428] sm:$0xf] }
 0x1cb   :  { %5519 = vmatpush.bf16.msrb.mxu1 %v8142_v2  ;;  %v5292_v2 = vpop.f32.mrf.mxu3  ;;  %v11258_v13 = vld [vmem:[#allocation2 + $0x434] sm:$0xf0]  ;;  %v8077_v15 = vld [vmem:[#allocation2 + $0x528] sm:$0xf] }
 0x1cc   :  { %5532 = vmatpush.bf16.msrb.mxu2 %v8270_v3  ;;  %v8349_v3 = vld [vmem:[#allocation2 + $0x748] sm:$0xf]  ;;  %v12448_v6 = vadd.f32 %v5292_v2, %v5280_v0  ;;  %v11354_v32 = vld [vmem:[#allocation2 + $0x734] sm:$0xf0]  ;;  %v7950_v34 = vor.u32 %v11258_v13, %v7949_v10 }
 0x1cd   :  { %5545 = vmatpush.bf16.msrb.mxu3 %v8398_v55  ;;  %v5268_v55 = vpop.f32.mrf.mxu1  ;;  %v8350_v1 = vor.u32 %v11358_v4, %v8349_v3  ;;  %v8205_v24 = vld [vmem:[#allocation2 + $0x628] sm:$0xf]  ;;  %v11286_v48 = vld [vmem:[#allocation2 + $0x514] sm:$0xf0] }
 0x1ce   :  { %5507 = vmatpush.bf16.msrb.mxu0 %v7998_v21  ;;  %v11290_v21 = vld [vmem:[#allocation2 + $0x534] sm:$0xf0]  ;;  %v7933_v39 = vld [vmem:[#allocation2 + $0x408] sm:$0xf]  ;;  %v5281_v57 = vpop.f32.mrf.mxu2 }
 0x1cf   :  { %5520 = vmatpush.bf16.msrb.mxu1 %v8126_v26  ;;  %v11322_v26 = vld [vmem:[#allocation2 + $0x634] sm:$0xf0]  ;;  %v8078_v43 = vor.u32 %v11290_v21, %v8077_v15  ;;  %v8061_v47 = vld [vmem:[#allocation2 + $0x508] sm:$0xf] }
 0x1d0   :  { %5533 = vmatpush.bf16.msrb.mxu2 %v8254_v27  ;;  %v8333_v27 = vld [vmem:[#allocation2 + $0x728] sm:$0xf]  ;;  %v8206_v14 = vor.u32 %v11322_v26, %v8205_v24  ;;  %v11410_v59 = vld [vmem:[#allocation2 + $0x8f4] sm:$0xf0]  ;;  %v8062_v2 = vor.u32 %v11286_v48, %v8061_v47 }
 0x1d1   :  { %5546 = vmatpush.bf16.msrb.mxu3 %v8382_v40  ;;  %v11254_v40 = vld [vmem:[#allocation2 + $0x414] sm:$0xf0]  ;;  %v8189_v50 = vld [vmem:[#allocation2 + $0x608] sm:$0xf]  ;;  %v8334_v51 = vor.u32 %v11354_v32, %v8333_v27 }
 0x1d2   :  { %5508 = vmatpush.bf16.msrb.mxu0 %v7982_v52  ;;  %v11318_v52 = vld [vmem:[#allocation2 + $0x614] sm:$0xf0]  ;;  %v8557_v58 = vld [vmem:[#allocation2 + $0x8e8] sm:$0xf]  ;;  %v7934_v61 = vor.u32 %v11254_v40, %v7933_v39 }
 0x1d3   :  { %5521 = vmatpush.bf16.msrb.mxu1 %v8110_v17  ;;  %v8317_v17 = vld [vmem:[#allocation2 + $0x708] sm:$0xf]  ;;  %v5294_v60 = vpop.f32.mrf.mxu3  ;;  %v11442_v62 = vld [vmem:[#allocation2 + $0x9f4] sm:$0xf0]  ;;  %v8190_v3 = vor.u32 %v11318_v52, %v8189_v50  ;;  %v8558_v55 = vor.u32 %v11410_v59, %v8557_v58 }
 0x1d4   :  { %5534 = vmatpush.bf16.msrb.mxu2 %v8238_v56  ;;  %v11350_v56 = vld [vmem:[#allocation2 + $0x714] sm:$0xf0]  ;;  %v8813_v63 = vld [vmem:[#allocation2 + $0xae8] sm:$0xf] }
 0x1d5   :  { %5547 = vmatpush.bf16.msrb.mxu3 %v8366_v53  ;;  %v8685_v53 = vld [vmem:[#allocation2 + $0x9e8] sm:$0xf]  ;;  %v11474_v0 = vld [vmem:[#allocation2 + $0xaf4] sm:$0xf0] }
 0x1d6   :  { %5509 = vmatpush.bf16.msrb.mxu0 %v7966_v5  ;;  %v8941_v4 = vld [vmem:[#allocation2 + $0xbe8] sm:$0xf]  ;;  %v11506_v36 = vld [vmem:[#allocation2 + $0xbf4] sm:$0xf0]  ;;  %v8318_v5 = vor.u32 %v11350_v56, %v8317_v17 }
 0x1d7   :  { %5522 = vmatpush.bf16.msrb.mxu1 %v8094_v8  ;;  %v8686_v8 = vor.u32 %v11442_v62, %v8685_v53  ;;  %v8541_v10 = vld [vmem:[#allocation2 + $0x8c8] sm:$0xf]  ;;  %v11406_v13 = vld [vmem:[#allocation2 + $0x8d4] sm:$0xf0] }
 0x1d8   :  { %5535 = vmatpush.bf16.msrb.mxu2 %v8222_v9  ;;  %v8814_v9 = vor.u32 %v11474_v0, %v8813_v63  ;;  %v8669_v15 = vld [vmem:[#allocation2 + $0x9c8] sm:$0xf]  ;;  %v11438_v21 = vld [vmem:[#allocation2 + $0x9d4] sm:$0xf0] }
 0x1d9   :  { %5548 = vmatpush.bf16.msrb.mxu3 %v8350_v1  ;;  %v8942_v1 = vor.u32 %v11506_v36, %v8941_v4  ;;  %v8797_v24 = vld [vmem:[#allocation2 + $0xac8] sm:$0xf]  ;;  %v11470_v26 = vld [vmem:[#allocation2 + $0xad4] sm:$0xf0]  ;;  %v8670_v39 = vor.u32 %v11438_v21, %v8669_v15 }
 0x1da   :  { %5510 = vmatpush.bf16.msrb.mxu0 %v7950_v34  ;;  %v8925_v27 = vld [vmem:[#allocation2 + $0xbc8] sm:$0xf]  ;;  %v11502_v32 = vld [vmem:[#allocation2 + $0xbd4] sm:$0xf0]  ;;  %v8542_v34 = vor.u32 %v11406_v13, %v8541_v10  ;;  %v8798_v40 = vor.u32 %v11470_v26, %v8797_v24 }
 0x1db   :  { %5523 = vmatpush.bf16.msrb.mxu1 %v8078_v43  ;;  %v8525_v43 = vld [vmem:[#allocation2 + $0x8a8] sm:$0xf]  ;;  %v8926_v48 = vor.u32 %v11502_v32, %v8925_v27  ;;  %v11434_v50 = vld [vmem:[#allocation2 + $0x9b4] sm:$0xf0] }
 0x1dc   :  { %5536 = vmatpush.bf16.msrb.mxu2 %v8206_v14  ;;  %v11402_v14 = vld [vmem:[#allocation2 + $0x8b4] sm:$0xf0]  ;;  %v8653_v47 = vld [vmem:[#allocation2 + $0x9a8] sm:$0xf] }
 0x1dd   :  { %5549 = vmatpush.bf16.msrb.mxu3 %v8334_v51  ;;  %v8781_v51 = vld [vmem:[#allocation2 + $0xaa8] sm:$0xf]  ;;  %v11466_v52 = vld [vmem:[#allocation2 + $0xab4] sm:$0xf0]  ;;  %v8526_v57 = vor.u32 %v11402_v14, %v8525_v43  ;;  %v8654_v58 = vor.u32 %v11434_v50, %v8653_v47 }
 0x1de   :  { %5511 = vmatpush.bf16.msrb.mxu0 %v7934_v61  ;;  %v8909_v17 = vld [vmem:[#allocation2 + $0xba8] sm:$0xf]  ;;  %v11498_v56 = vld [vmem:[#allocation2 + $0xbb4] sm:$0xf0]  ;;  %v8782_v59 = vor.u32 %v11466_v52, %v8781_v51 }
 0x1df   :  { %5524 = vmatpush.bf16.msrb.mxu1 %v8062_v2  ;;  %v8509_v53 = vld [vmem:[#allocation2 + $0x888] sm:$0xf]  ;;  %v11398_v60 = vld [vmem:[#allocation2 + $0x894] sm:$0xf0]  ;;  %v8910_v62 = vor.u32 %v11498_v56, %v8909_v17 }
 0x1e0   :  { %5537 = vmatpush.bf16.msrb.mxu2 %v8190_v3  ;;  %v8637_v61 = vld [vmem:[#allocation2 + $0x988] sm:$0xf]  ;;  %v11430_v63 = vld [vmem:[#allocation2 + $0x994] sm:$0xf0]  ;;  %v5305_v3 = vpop.f32.mrf.mxu0 }
 0x1e1   :  { %5550 = vmatpush.bf16.msrb.mxu3 %v8318_v5  ;;  %5512 = vmatmul.bf16.vlgmr.msrb.gmra.mxu0 %v12315_v41  ;;  %v8765_v0 = vld [vmem:[#allocation2 + $0xa88] sm:$0xf]  ;;  %v11462_v2 = vld [vmem:[#allocation2 + $0xa94] sm:$0xf0]  ;;  %v5306_v5 = vadd.f32 %v5305_v3, %v12448_v6 }
 0x1e2   :  { %5556 = vmatpush.bf16.msra.mxu0 %v8558_v55  ;;  %5525 = vmatmul.bf16.vlgmr.msrb.gmra.mxu1 %v12319_v44  ;;  %v8893_v4 = vld [vmem:[#allocation2 + $0xb88] sm:$0xf]  ;;  %v11494_v36 = vld [vmem:[#allocation2 + $0xb94] sm:$0xf0]  ;;  %v8510_v55 = vor.u32 %v11398_v60, %v8509_v53  ;;  %v8766_v10 = vor.u32 %v11462_v2, %v8765_v0 }
 0x1e3   :  { %5569 = vmatpush.bf16.msra.mxu1 %v8686_v8  ;;  %5538 = vmatmul.bf16.vlgmr.msrb.gmra.mxu2 %v12313_v38  ;;  %v5318_v8 = vpop.f32.mrf.mxu1  ;;  %v8493_v13 = vld [vmem:[#allocation2 + $0x868] sm:$0xf]  ;;  %v11394_v15 = vld [vmem:[#allocation2 + $0x874] sm:$0xf0]  ;;  %v8894_v21 = vor.u32 %v11494_v36, %v8893_v4 }
 0x1e4   :  { %5582 = vmatpush.bf16.msra.mxu2 %v8814_v9  ;;  %5551 = vmatmul.bf16.vlgmr.msrb.gmra.mxu3 %v12317_v42  ;;  %v8638_v9 = vor.u32 %v11430_v63, %v8637_v61  ;;  %v5319_v24 = vadd.f32 %v5318_v8, %v5306_v5  ;;  %v11426_v26 = vld [vmem:[#allocation2 + $0x974] sm:$0xf0]  ;;  %v8749_v27 = vld [vmem:[#allocation2 + $0xa68] sm:$0xf] }
 0x1e5   :  { %5595 = vmatpush.bf16.msra.mxu3 %v8942_v1  ;;  %v8621_v1 = vld [vmem:[#allocation2 + $0x968] sm:$0xf]  ;;  %v11458_v32 = vld [vmem:[#allocation2 + $0xa74] sm:$0xf0] }
 0x1e6   :  { %5557 = vmatpush.bf16.msra.mxu0 %v8542_v34  ;;  %v8877_v34 = vld [vmem:[#allocation2 + $0xb68] sm:$0xf]  ;;  %v8622_v6 = vor.u32 %v11426_v26, %v8621_v1  ;;  %v8750_v43 = vor.u32 %v11458_v32, %v8749_v27  ;;  %v11390_v47 = vld [vmem:[#allocation2 + $0x854] sm:$0xf0]  ;;  %v5331_v51 = vpop.f32.mrf.mxu2 }
 0x1e7   :  { %5570 = vmatpush.bf16.msra.mxu1 %v8670_v39  ;;  %v11490_v39 = vld [vmem:[#allocation2 + $0xb74] sm:$0xf0]  ;;  %v8477_v14 = vld [vmem:[#allocation2 + $0x848] sm:$0xf] }
 0x1e8   :  { %5583 = vmatpush.bf16.msra.mxu2 %v8798_v40  ;;  %v8494_v40 = vor.u32 %v11394_v15, %v8493_v13  ;;  %v8878_v50 = vor.u32 %v11490_v39, %v8877_v34  ;;  %v11422_v52 = vld [vmem:[#allocation2 + $0x954] sm:$0xf0]  ;;  %v8733_v17 = vld [vmem:[#allocation2 + $0xa48] sm:$0xf]  ;;  %v5307_v60 = vpop.f32.mrf.mxu0  ;;  %v8478_v61 = vor.u32 %v11390_v47, %v8477_v14 }
 0x1e9   :  { %5596 = vmatpush.bf16.msra.mxu3 %v8926_v48  ;;  %v8605_v48 = vld [vmem:[#allocation2 + $0x948] sm:$0xf]  ;;  %v11454_v56 = vld [vmem:[#allocation2 + $0xa54] sm:$0xf0] }
 0x1ea   :  { %5558 = vmatpush.bf16.msra.mxu0 %v8526_v57  ;;  %v5332_v57 = vadd.f32 %v5331_v51, %v5319_v24  ;;  %v11486_v53 = vld [vmem:[#allocation2 + $0xb54] sm:$0xf0]  ;;  %v8606_v0 = vor.u32 %v11422_v52, %v8605_v48  ;;  %v8734_v2 = vor.u32 %v11454_v56, %v8733_v17  ;;  %v8461_v3 = vld [vmem:[#allocation2 + $0x828] sm:$0xf] }
 0x1eb   :  { %5571 = vmatpush.bf16.msra.mxu1 %v8654_v58  ;;  %v5344_v58 = vpop.f32.mrf.mxu3  ;;  %v11386_v4 = vld [vmem:[#allocation2 + $0x834] sm:$0xf0]  ;;  %v8589_v36 = vld [vmem:[#allocation2 + $0x928] sm:$0xf] }
 0x1ec   :  { %5584 = vmatpush.bf16.msra.mxu2 %v8782_v59  ;;  %v8861_v59 = vld [vmem:[#allocation2 + $0xb48] sm:$0xf]  ;;  %v12455_v63 = vadd.f32 %v5344_v58, %v5332_v57  ;;  %v11482_v13 = vld [vmem:[#allocation2 + $0xb34] sm:$0xf0]  ;;  %v8462_v15 = vor.u32 %v11386_v4, %v8461_v3 }
 0x1ed   :  { %5597 = vmatpush.bf16.msra.mxu3 %v8910_v62  ;;  %v5320_v62 = vpop.f32.mrf.mxu1  ;;  %v8862_v5 = vor.u32 %v11486_v53, %v8861_v59  ;;  %v8717_v8 = vld [vmem:[#allocation2 + $0xa28] sm:$0xf]  ;;  %v11414_v32 = vld [vmem:[#allocation2 + $0x914] sm:$0xf0] }
 0x1ee   :  { %5559 = vmatpush.bf16.msra.mxu0 %v8510_v55  ;;  %v11418_v55 = vld [vmem:[#allocation2 + $0x934] sm:$0xf0]  ;;  %v8445_v1 = vld [vmem:[#allocation2 + $0x808] sm:$0xf]  ;;  %v5333_v14 = vpop.f32.mrf.mxu2 }
 0x1ef   :  { %5572 = vmatpush.bf16.msra.mxu1 %v8638_v9  ;;  %v11450_v9 = vld [vmem:[#allocation2 + $0xa34] sm:$0xf0]  ;;  %v8590_v24 = vor.u32 %v11418_v55, %v8589_v36  ;;  %v8573_v27 = vld [vmem:[#allocation2 + $0x908] sm:$0xf] }
 0x1f0   :  { %5585 = vmatpush.bf16.msra.mxu2 %v8766_v10  ;;  %v8845_v10 = vld [vmem:[#allocation2 + $0xb28] sm:$0xf]  ;;  %v8718_v26 = vor.u32 %v11450_v9, %v8717_v8  ;;  %v11538_v48 = vld [vmem:[#allocation2 + $0xcf4] sm:$0xf0]  ;;  %v8574_v58 = vor.u32 %v11414_v32, %v8573_v27 }
 0x1f1   :  { %5598 = vmatpush.bf16.msra.mxu3 %v8894_v21  ;;  %v11382_v21 = vld [vmem:[#allocation2 + $0x814] sm:$0xf0]  ;;  %v8701_v34 = vld [vmem:[#allocation2 + $0xa08] sm:$0xf]  ;;  %v8846_v39 = vor.u32 %v11482_v13, %v8845_v10 }
 0x1f2   :  { %5560 = vmatpush.bf16.msra.mxu0 %v8494_v40  ;;  %v11446_v40 = vld [vmem:[#allocation2 + $0xa14] sm:$0xf0]  ;;  %v9069_v47 = vld [vmem:[#allocation2 + $0xce8] sm:$0xf]  ;;  %v8446_v52 = vor.u32 %v11382_v21, %v8445_v1 }
 0x1f3   :  { %5573 = vmatpush.bf16.msra.mxu1 %v8622_v6  ;;  %v8829_v6 = vld [vmem:[#allocation2 + $0xb08] sm:$0xf]  ;;  %v5346_v51 = vpop.f32.mrf.mxu3  ;;  %v11570_v17 = vld [vmem:[#allocation2 + $0xdf4] sm:$0xf0]  ;;  %v8702_v59 = vor.u32 %v11446_v40, %v8701_v34  ;;  %v9070_v62 = vor.u32 %v11538_v48, %v9069_v47 }
 0x1f4   :  { %5586 = vmatpush.bf16.msra.mxu2 %v8750_v43  ;;  %v11478_v43 = vld [vmem:[#allocation2 + $0xb14] sm:$0xf0]  ;;  %v9325_v56 = vld [vmem:[#allocation2 + $0xee8] sm:$0xf] }
 0x1f5   :  { %5599 = vmatpush.bf16.msra.mxu3 %v8878_v50  ;;  %v9197_v50 = vld [vmem:[#allocation2 + $0xde8] sm:$0xf]  ;;  %v11602_v57 = vld [vmem:[#allocation2 + $0xef4] sm:$0xf0] }
 0x1f6   :  { %5561 = vmatpush.bf16.msra.mxu0 %v8478_v61  ;;  %v9453_v53 = vld [vmem:[#allocation2 + $0xfe8] sm:$0xf]  ;;  %v11634_v60 = vld [vmem:[#allocation2 + $0xff4] sm:$0xf0]  ;;  %v8830_v61 = vor.u32 %v11478_v43, %v8829_v6 }
 0x1f7   :  { %5574 = vmatpush.bf16.msra.mxu1 %v8606_v0  ;;  %v9198_v0 = vor.u32 %v11570_v17, %v9197_v50  ;;  %v9053_v3 = vld [vmem:[#allocation2 + $0xcc8] sm:$0xf]  ;;  %v11534_v4 = vld [vmem:[#allocation2 + $0xcd4] sm:$0xf0] }
 0x1f8   :  { %5587 = vmatpush.bf16.msra.mxu2 %v8734_v2  ;;  %v9326_v2 = vor.u32 %v11602_v57, %v9325_v56  ;;  %v9181_v36 = vld [vmem:[#allocation2 + $0xdc8] sm:$0xf]  ;;  %v11566_v55 = vld [vmem:[#allocation2 + $0xdd4] sm:$0xf0] }
 0x1f9   :  { %5600 = vmatpush.bf16.msra.mxu3 %v8862_v5  ;;  %v9454_v5 = vor.u32 %v11634_v60, %v9453_v53  ;;  %v9309_v8 = vld [vmem:[#allocation2 + $0xec8] sm:$0xf]  ;;  %v11598_v9 = vld [vmem:[#allocation2 + $0xed4] sm:$0xf0]  ;;  %v9182_v1 = vor.u32 %v11566_v55, %v9181_v36 }
 0x1fa   :  { %5562 = vmatpush.bf16.msra.mxu0 %v8462_v15  ;;  %v9437_v10 = vld [vmem:[#allocation2 + $0xfc8] sm:$0xf]  ;;  %v11630_v13 = vld [vmem:[#allocation2 + $0xfd4] sm:$0xf0]  ;;  %v9054_v15 = vor.u32 %v11534_v4, %v9053_v3  ;;  %v9310_v21 = vor.u32 %v11598_v9, %v9309_v8 }
 0x1fb   :  { %5575 = vmatpush.bf16.msra.mxu1 %v8590_v24  ;;  %v9037_v24 = vld [vmem:[#allocation2 + $0xca8] sm:$0xf]  ;;  %v9438_v32 = vor.u32 %v11630_v13, %v9437_v10  ;;  %v11562_v34 = vld [vmem:[#allocation2 + $0xdb4] sm:$0xf0] }
 0x1fc   :  { %5588 = vmatpush.bf16.msra.mxu2 %v8718_v26  ;;  %v11530_v26 = vld [vmem:[#allocation2 + $0xcb4] sm:$0xf0]  ;;  %v9165_v27 = vld [vmem:[#allocation2 + $0xda8] sm:$0xf] }
 0x1fd   :  { %5601 = vmatpush.bf16.msra.mxu3 %v8846_v39  ;;  %v9293_v39 = vld [vmem:[#allocation2 + $0xea8] sm:$0xf]  ;;  %v11594_v40 = vld [vmem:[#allocation2 + $0xeb4] sm:$0xf0]  ;;  %v9038_v14 = vor.u32 %v11530_v26, %v9037_v24  ;;  %v9166_v47 = vor.u32 %v11562_v34, %v9165_v27 }
 0x1fe   :  { %5563 = vmatpush.bf16.msra.mxu0 %v8446_v52  ;;  %v9421_v6 = vld [vmem:[#allocation2 + $0xfa8] sm:$0xf]  ;;  %v11626_v43 = vld [vmem:[#allocation2 + $0xfb4] sm:$0xf0]  ;;  %v9294_v48 = vor.u32 %v11594_v40, %v9293_v39 }
 0x1ff   :  { %5576 = vmatpush.bf16.msra.mxu1 %v8574_v58  ;;  %v9021_v50 = vld [vmem:[#allocation2 + $0xc88] sm:$0xf]  ;;  %v11526_v51 = vld [vmem:[#allocation2 + $0xc94] sm:$0xf0]  ;;  %v9422_v17 = vor.u32 %v11626_v43, %v9421_v6 }
 0x200   :  { %5589 = vmatpush.bf16.msra.mxu2 %v8702_v59  ;;  %v9149_v52 = vld [vmem:[#allocation2 + $0xd88] sm:$0xf]  ;;  %v11558_v56 = vld [vmem:[#allocation2 + $0xd94] sm:$0xf0]  ;;  %v5357_v59 = vpop.f32.mrf.mxu0 }
 0x201   :  { %5602 = vmatpush.bf16.msra.mxu3 %v8830_v61  ;;  %5564 = vmatmul.bf16.vlgmr.msra.gmra.mxu0 %v12331_v25  ;;  %v9277_v57 = vld [vmem:[#allocation2 + $0xe88] sm:$0xf]  ;;  %v11590_v58 = vld [vmem:[#allocation2 + $0xe94] sm:$0xf0]  ;;  %v5358_v61 = vadd.f32 %v5357_v59, %v12455_v63 }
 0x202   :  { %5608 = vmatpush.bf16.msrb.mxu0 %v9070_v62  ;;  %5577 = vmatmul.bf16.vlgmr.msra.gmra.mxu1 %v12335_v30  ;;  %v9405_v53 = vld [vmem:[#allocation2 + $0xf88] sm:$0xf]  ;;  %v11622_v60 = vld [vmem:[#allocation2 + $0xf94] sm:$0xf0]  ;;  %v9022_v62 = vor.u32 %v11526_v51, %v9021_v50  ;;  %v9278_v3 = vor.u32 %v11590_v58, %v9277_v57 }
 0x203   :  { %5621 = vmatpush.bf16.msrb.mxu1 %v9198_v0  ;;  %5590 = vmatmul.bf16.vlgmr.msra.gmra.mxu2 %v12333_v29  ;;  %v5370_v0 = vpop.f32.mrf.mxu1  ;;  %v9005_v4 = vld [vmem:[#allocation2 + $0xc68] sm:$0xf]  ;;  %v11522_v36 = vld [vmem:[#allocation2 + $0xc74] sm:$0xf0]  ;;  %v9406_v55 = vor.u32 %v11622_v60, %v9405_v53 }
 0x204   :  { %5634 = vmatpush.bf16.msrb.mxu2 %v9326_v2  ;;  %5603 = vmatmul.bf16.vlgmr.msra.gmra.mxu3 %v12337_v33  ;;  %v9150_v2 = vor.u32 %v11558_v56, %v9149_v52  ;;  %v5371_v8 = vadd.f32 %v5370_v0, %v5358_v61  ;;  %v11554_v9 = vld [vmem:[#allocation2 + $0xd74] sm:$0xf0]  ;;  %v9261_v10 = vld [vmem:[#allocation2 + $0xe68] sm:$0xf] }
 0x205   :  { %5647 = vmatpush.bf16.msrb.mxu3 %v9454_v5  ;;  %v9133_v5 = vld [vmem:[#allocation2 + $0xd68] sm:$0xf]  ;;  %v11586_v13 = vld [vmem:[#allocation2 + $0xe74] sm:$0xf0] }
 0x206   :  { %5609 = vmatpush.bf16.msrb.mxu0 %v9054_v15  ;;  %v9389_v15 = vld [vmem:[#allocation2 + $0xf68] sm:$0xf]  ;;  %v9134_v63 = vor.u32 %v11554_v9, %v9133_v5  ;;  %v9262_v24 = vor.u32 %v11586_v13, %v9261_v10  ;;  %v11518_v27 = vld [vmem:[#allocation2 + $0xc54] sm:$0xf0]  ;;  %v5383_v39 = vpop.f32.mrf.mxu2 }
 0x207   :  { %5622 = vmatpush.bf16.msrb.mxu1 %v9182_v1  ;;  %v11618_v1 = vld [vmem:[#allocation2 + $0xf74] sm:$0xf0]  ;;  %v8989_v26 = vld [vmem:[#allocation2 + $0xc48] sm:$0xf] }
 0x208   :  { %5635 = vmatpush.bf16.msrb.mxu2 %v9310_v21  ;;  %v9006_v21 = vor.u32 %v11522_v36, %v9005_v4  ;;  %v9390_v34 = vor.u32 %v11618_v1, %v9389_v15  ;;  %v11550_v40 = vld [vmem:[#allocation2 + $0xd54] sm:$0xf0]  ;;  %v9245_v6 = vld [vmem:[#allocation2 + $0xe48] sm:$0xf]  ;;  %v5359_v51 = vpop.f32.mrf.mxu0  ;;  %v8990_v52 = vor.u32 %v11518_v27, %v8989_v26 }
 0x209   :  { %5648 = vmatpush.bf16.msrb.mxu3 %v9438_v32  ;;  %v9117_v32 = vld [vmem:[#allocation2 + $0xd48] sm:$0xf]  ;;  %v11582_v43 = vld [vmem:[#allocation2 + $0xe54] sm:$0xf0] }
 0x20a   :  { %5610 = vmatpush.bf16.msrb.mxu0 %v9038_v14  ;;  %v5384_v14 = vadd.f32 %v5383_v39, %v5371_v8  ;;  %v11614_v50 = vld [vmem:[#allocation2 + $0xf54] sm:$0xf0]  ;;  %v9118_v57 = vor.u32 %v11550_v40, %v9117_v32  ;;  %v9246_v58 = vor.u32 %v11582_v43, %v9245_v6  ;;  %v8973_v59 = vld [vmem:[#allocation2 + $0xc28] sm:$0xf] }
 0x20b   :  { %5623 = vmatpush.bf16.msrb.mxu1 %v9166_v47  ;;  %v5396_v47 = vpop.f32.mrf.mxu3  ;;  %v11514_v53 = vld [vmem:[#allocation2 + $0xc34] sm:$0xf0]  ;;  %v9101_v60 = vld [vmem:[#allocation2 + $0xd28] sm:$0xf] }
 0x20c   :  { %5636 = vmatpush.bf16.msrb.mxu2 %v9294_v48  ;;  %v9373_v48 = vld [vmem:[#allocation2 + $0xf48] sm:$0xf]  ;;  %v12462_v56 = vadd.f32 %v5396_v47, %v5384_v14  ;;  %v11610_v4 = vld [vmem:[#allocation2 + $0xf34] sm:$0xf0]  ;;  %v8974_v36 = vor.u32 %v11514_v53, %v8973_v59 }
 0x20d   :  { %5649 = vmatpush.bf16.msrb.mxu3 %v9422_v17  ;;  %v5372_v17 = vpop.f32.mrf.mxu1  ;;  %v9374_v61 = vor.u32 %v11614_v50, %v9373_v48  ;;  %v9229_v0 = vld [vmem:[#allocation2 + $0xe28] sm:$0xf]  ;;  %v11542_v13 = vld [vmem:[#allocation2 + $0xd14] sm:$0xf0] }
 0x20e   :  { %5611 = vmatpush.bf16.msrb.mxu0 %v9022_v62  ;;  %v11546_v62 = vld [vmem:[#allocation2 + $0xd34] sm:$0xf0]  ;;  %v8957_v5 = vld [vmem:[#allocation2 + $0xc08] sm:$0xf]  ;;  %v5385_v26 = vpop.f32.mrf.mxu2 }
 0x20f   :  { %5624 = vmatpush.bf16.msrb.mxu1 %v9150_v2  ;;  %v11578_v2 = vld [vmem:[#allocation2 + $0xe34] sm:$0xf0]  ;;  %v9102_v8 = vor.u32 %v11546_v62, %v9101_v60  ;;  %v9085_v10 = vld [vmem:[#allocation2 + $0xd08] sm:$0xf] }
 0x210   :  { %5637 = vmatpush.bf16.msrb.mxu2 %v9278_v3  ;;  %v9357_v3 = vld [vmem:[#allocation2 + $0xf28] sm:$0xf]  ;;  %v9230_v9 = vor.u32 %v11578_v2, %v9229_v0  ;;  %v11666_v32 = vld [vmem:[#allocation2 + $0x10f4] sm:$0xf0]  ;;  %v9086_v47 = vor.u32 %v11542_v13, %v9085_v10 }
 0x211   :  { %5650 = vmatpush.bf16.msrb.mxu3 %v9406_v55  ;;  %v11510_v55 = vld [vmem:[#allocation2 + $0xc14] sm:$0xf0]  ;;  %v9213_v15 = vld [vmem:[#allocation2 + $0xe08] sm:$0xf]  ;;  %v9358_v1 = vor.u32 %v11610_v4, %v9357_v3 }
 0x212   :  { %5612 = vmatpush.bf16.msrb.mxu0 %v9006_v21  ;;  %v11574_v21 = vld [vmem:[#allocation2 + $0xe14] sm:$0xf0]  ;;  %v9581_v27 = vld [vmem:[#allocation2 + $0x10e8] sm:$0xf]  ;;  %v8958_v40 = vor.u32 %v11510_v55, %v8957_v5 }
 0x213   :  { %5625 = vmatpush.bf16.msrb.mxu1 %v9134_v63  ;;  %v9341_v63 = vld [vmem:[#allocation2 + $0xf08] sm:$0xf]  ;;  %v5398_v39 = vpop.f32.mrf.mxu3  ;;  %v11698_v6 = vld [vmem:[#allocation2 + $0x11f4] sm:$0xf0]  ;;  %v9214_v48 = vor.u32 %v11574_v21, %v9213_v15  ;;  %v9582_v17 = vor.u32 %v11666_v32, %v9581_v27 }
 0x214   :  { %5638 = vmatpush.bf16.msrb.mxu2 %v9262_v24  ;;  %v11606_v24 = vld [vmem:[#allocation2 + $0xf14] sm:$0xf0]  ;;  %v9837_v43 = vld [vmem:[#allocation2 + $0x12e8] sm:$0xf] }
 0x215   :  { %5651 = vmatpush.bf16.msrb.mxu3 %v9390_v34  ;;  %v9709_v34 = vld [vmem:[#allocation2 + $0x11e8] sm:$0xf]  ;;  %v11730_v14 = vld [vmem:[#allocation2 + $0x12f4] sm:$0xf0] }
 0x216   :  { %5613 = vmatpush.bf16.msrb.mxu0 %v8990_v52  ;;  %v9965_v50 = vld [vmem:[#allocation2 + $0x13e8] sm:$0xf]  ;;  %v11762_v51 = vld [vmem:[#allocation2 + $0x13f4] sm:$0xf0]  ;;  %v9342_v52 = vor.u32 %v11606_v24, %v9341_v63 }
 0x217   :  { %5626 = vmatpush.bf16.msrb.mxu1 %v9118_v57  ;;  %v9710_v57 = vor.u32 %v11698_v6, %v9709_v34  ;;  %v9565_v59 = vld [vmem:[#allocation2 + $0x10c8] sm:$0xf]  ;;  %v11662_v53 = vld [vmem:[#allocation2 + $0x10d4] sm:$0xf0] }
 0x218   :  { %5639 = vmatpush.bf16.msrb.mxu2 %v9246_v58  ;;  %v9838_v58 = vor.u32 %v11730_v14, %v9837_v43  ;;  %v9693_v60 = vld [vmem:[#allocation2 + $0x11c8] sm:$0xf]  ;;  %v11694_v62 = vld [vmem:[#allocation2 + $0x11d4] sm:$0xf0] }
 0x219   :  { %5652 = vmatpush.bf16.msrb.mxu3 %v9374_v61  ;;  %v9966_v61 = vor.u32 %v11762_v51, %v9965_v50  ;;  %v9821_v0 = vld [vmem:[#allocation2 + $0x12c8] sm:$0xf]  ;;  %v11726_v2 = vld [vmem:[#allocation2 + $0x12d4] sm:$0xf0]  ;;  %v9694_v5 = vor.u32 %v11694_v62, %v9693_v60 }
 0x21a   :  { %5614 = vmatpush.bf16.msrb.mxu0 %v8974_v36  ;;  %v9949_v3 = vld [vmem:[#allocation2 + $0x13c8] sm:$0xf]  ;;  %v11758_v4 = vld [vmem:[#allocation2 + $0x13d4] sm:$0xf0]  ;;  %v9566_v36 = vor.u32 %v11662_v53, %v9565_v59  ;;  %v9822_v55 = vor.u32 %v11726_v2, %v9821_v0 }
 0x21b   :  { %5627 = vmatpush.bf16.msrb.mxu1 %v9102_v8  ;;  %v9549_v8 = vld [vmem:[#allocation2 + $0x10a8] sm:$0xf]  ;;  %v9950_v13 = vor.u32 %v11758_v4, %v9949_v3  ;;  %v11690_v15 = vld [vmem:[#allocation2 + $0x11b4] sm:$0xf0] }
 0x21c   :  { %5640 = vmatpush.bf16.msrb.mxu2 %v9230_v9  ;;  %v11658_v9 = vld [vmem:[#allocation2 + $0x10b4] sm:$0xf0]  ;;  %v9677_v10 = vld [vmem:[#allocation2 + $0x11a8] sm:$0xf] }
 0x21d   :  { %5653 = vmatpush.bf16.msrb.mxu3 %v9358_v1  ;;  %v9805_v1 = vld [vmem:[#allocation2 + $0x12a8] sm:$0xf]  ;;  %v11722_v21 = vld [vmem:[#allocation2 + $0x12b4] sm:$0xf0]  ;;  %v9550_v26 = vor.u32 %v11658_v9, %v9549_v8  ;;  %v9678_v27 = vor.u32 %v11690_v15, %v9677_v10 }
 0x21e   :  { %5615 = vmatpush.bf16.msrb.mxu0 %v8958_v40  ;;  %v9933_v63 = vld [vmem:[#allocation2 + $0x13a8] sm:$0xf]  ;;  %v11754_v24 = vld [vmem:[#allocation2 + $0x13b4] sm:$0xf0]  ;;  %v9806_v32 = vor.u32 %v11722_v21, %v9805_v1 }
 0x21f   :  { %5628 = vmatpush.bf16.msrb.mxu1 %v9086_v47  ;;  %v9533_v34 = vld [vmem:[#allocation2 + $0x1088] sm:$0xf]  ;;  %v11654_v39 = vld [vmem:[#allocation2 + $0x1094] sm:$0xf0]  ;;  %v9934_v6 = vor.u32 %v11754_v24, %v9933_v63 }
 0x220   :  { %5641 = vmatpush.bf16.msrb.mxu2 %v9214_v48  ;;  %v9661_v40 = vld [vmem:[#allocation2 + $0x1188] sm:$0xf]  ;;  %v11686_v43 = vld [vmem:[#allocation2 + $0x1194] sm:$0xf0]  ;;  %v5409_v48 = vpop.f32.mrf.mxu0 }
 0x221   :  { %5654 = vmatpush.bf16.msrb.mxu3 %v9342_v52  ;;  %5616 = vmatmul.bf16.vlgmr.msrb.gmra.mxu0 %v12349_v23  ;;  %v9789_v14 = vld [vmem:[#allocation2 + $0x1288] sm:$0xf]  ;;  %v11718_v47 = vld [vmem:[#allocation2 + $0x1294] sm:$0xf0]  ;;  %v5410_v52 = vadd.f32 %v5409_v48, %v12462_v56 }
 0x222   :  { %5660 = vmatpush.bf16.msra.mxu0 %v9582_v17  ;;  %5629 = vmatmul.bf16.vlgmr.msrb.gmra.mxu1 %v12353_v31  ;;  %v9917_v50 = vld [vmem:[#allocation2 + $0x1388] sm:$0xf]  ;;  %v11750_v51 = vld [vmem:[#allocation2 + $0x1394] sm:$0xf0]  ;;  %v9534_v17 = vor.u32 %v11654_v39, %v9533_v34  ;;  %v9790_v59 = vor.u32 %v11718_v47, %v9789_v14 }
 0x223   :  { %5673 = vmatpush.bf16.msra.mxu1 %v9710_v57  ;;  %5642 = vmatmul.bf16.vlgmr.msrb.gmra.mxu2 %v12351_v28  ;;  %v5422_v57 = vpop.f32.mrf.mxu1  ;;  %v9517_v53 = vld [vmem:[#allocation2 + $0x1068] sm:$0xf]  ;;  %v11650_v60 = vld [vmem:[#allocation2 + $0x1074] sm:$0xf0]  ;;  %v9918_v62 = vor.u32 %v11750_v51, %v9917_v50 }
 0x224   :  { %5686 = vmatpush.bf16.msra.mxu2 %v9838_v58  ;;  %5655 = vmatmul.bf16.vlgmr.msrb.gmra.mxu3 %v12355_v35  ;;  %v9662_v58 = vor.u32 %v11686_v43, %v9661_v40  ;;  %v5423_v0 = vadd.f32 %v5422_v57, %v5410_v52  ;;  %v11682_v2 = vld [vmem:[#allocation2 + $0x1174] sm:$0xf0]  ;;  %v9773_v3 = vld [vmem:[#allocation2 + $0x1268] sm:$0xf] }
 0x225   :  { %5699 = vmatpush.bf16.msra.mxu3 %v9966_v61  ;;  %v9645_v61 = vld [vmem:[#allocation2 + $0x1168] sm:$0xf]  ;;  %v11714_v4 = vld [vmem:[#allocation2 + $0x1274] sm:$0xf0] }
 0x226   :  { %5661 = vmatpush.bf16.msra.mxu0 %v9566_v36  ;;  %v9901_v36 = vld [vmem:[#allocation2 + $0x1368] sm:$0xf]  ;;  %v9646_v56 = vor.u32 %v11682_v2, %v9645_v61  ;;  %v9774_v8 = vor.u32 %v11714_v4, %v9773_v3  ;;  %v11646_v10 = vld [vmem:[#allocation2 + $0x1054] sm:$0xf0]  ;;  %v5435_v1 = vpop.f32.mrf.mxu2 }
 0x227   :  { %5674 = vmatpush.bf16.msra.mxu1 %v9694_v5  ;;  %v11746_v5 = vld [vmem:[#allocation2 + $0x1374] sm:$0xf0]  ;;  %v9501_v9 = vld [vmem:[#allocation2 + $0x1048] sm:$0xf] }
 0x228   :  { %5687 = vmatpush.bf16.msra.mxu2 %v9822_v55  ;;  %v9518_v55 = vor.u32 %v11650_v60, %v9517_v53  ;;  %v9902_v15 = vor.u32 %v11746_v5, %v9901_v36  ;;  %v11678_v21 = vld [vmem:[#allocation2 + $0x1154] sm:$0xf0]  ;;  %v9757_v63 = vld [vmem:[#allocation2 + $0x1248] sm:$0xf]  ;;  %v5411_v39 = vpop.f32.mrf.mxu0  ;;  %v9502_v40 = vor.u32 %v11646_v10, %v9501_v9 }
 0x229   :  { %5700 = vmatpush.bf16.msra.mxu3 %v9950_v13  ;;  %v9629_v13 = vld [vmem:[#allocation2 + $0x1148] sm:$0xf]  ;;  %v11710_v24 = vld [vmem:[#allocation2 + $0x1254] sm:$0xf0] }
 0x22a   :  { %5662 = vmatpush.bf16.msra.mxu0 %v9550_v26  ;;  %v5436_v26 = vadd.f32 %v5435_v1, %v5423_v0  ;;  %v11742_v34 = vld [vmem:[#allocation2 + $0x1354] sm:$0xf0]  ;;  %v9630_v14 = vor.u32 %v11678_v21, %v9629_v13  ;;  %v9758_v47 = vor.u32 %v11710_v24, %v9757_v63  ;;  %v9485_v48 = vld [vmem:[#allocation2 + $0x1028] sm:$0xf] }
 0x22b   :  { %5675 = vmatpush.bf16.msra.mxu1 %v9678_v27  ;;  %v5448_v27 = vpop.f32.mrf.mxu3  ;;  %v11642_v50 = vld [vmem:[#allocation2 + $0x1034] sm:$0xf0]  ;;  %v9613_v51 = vld [vmem:[#allocation2 + $0x1128] sm:$0xf] }
 0x22c   :  { %5688 = vmatpush.bf16.msra.mxu2 %v9806_v32  ;;  %v9885_v32 = vld [vmem:[#allocation2 + $0x1348] sm:$0xf]  ;;  %v12469_v43 = vadd.f32 %v5448_v27, %v5436_v26  ;;  %v11738_v53 = vld [vmem:[#allocation2 + $0x1334] sm:$0xf0]  ;;  %v9486_v60 = vor.u32 %v11642_v50, %v9485_v48 }
 0x22d   :  { %5701 = vmatpush.bf16.msra.mxu3 %v9934_v6  ;;  %v5424_v6 = vpop.f32.mrf.mxu1  ;;  %v9886_v52 = vor.u32 %v11742_v34, %v9885_v32  ;;  %v9741_v57 = vld [vmem:[#allocation2 + $0x1228] sm:$0xf]  ;;  %v11670_v4 = vld [vmem:[#allocation2 + $0x1114] sm:$0xf0] }
 0x22e   :  { %5663 = vmatpush.bf16.msra.mxu0 %v9534_v17  ;;  %v11674_v17 = vld [vmem:[#allocation2 + $0x1134] sm:$0xf0]  ;;  %v9469_v61 = vld [vmem:[#allocation2 + $0x1008] sm:$0xf]  ;;  %v5437_v9 = vpop.f32.mrf.mxu2 }
 0x22f   :  { %5676 = vmatpush.bf16.msra.mxu1 %v9662_v58  ;;  %v11706_v58 = vld [vmem:[#allocation2 + $0x1234] sm:$0xf0]  ;;  %v9614_v0 = vor.u32 %v11674_v17, %v9613_v51  ;;  %v9597_v3 = vld [vmem:[#allocation2 + $0x1108] sm:$0xf] }
 0x230   :  { %5689 = vmatpush.bf16.msra.mxu2 %v9790_v59  ;;  %v9869_v59 = vld [vmem:[#allocation2 + $0x1328] sm:$0xf]  ;;  %v9742_v2 = vor.u32 %v11706_v58, %v9741_v57  ;;  %v11794_v13 = vld [vmem:[#allocation2 + $0x14f4] sm:$0xf0]  ;;  %v9598_v27 = vor.u32 %v11670_v4, %v9597_v3 }
 0x231   :  { %5702 = vmatpush.bf16.msra.mxu3 %v9918_v62  ;;  %v11638_v62 = vld [vmem:[#allocation2 + $0x1014] sm:$0xf0]  ;;  %v9725_v36 = vld [vmem:[#allocation2 + $0x1208] sm:$0xf]  ;;  %v9870_v5 = vor.u32 %v11738_v53, %v9869_v59 }
 0x232   :  { %5664 = vmatpush.bf16.msra.mxu0 %v9518_v55  ;;  %v11702_v55 = vld [vmem:[#allocation2 + $0x1214] sm:$0xf0]  ;;  %v10093_v10 = vld [vmem:[#allocation2 + $0x14e8] sm:$0xf]  ;;  %v9470_v21 = vor.u32 %v11638_v62, %v9469_v61 }
 0x233   :  { %5677 = vmatpush.bf16.msra.mxu1 %v9646_v56  ;;  %v9853_v56 = vld [vmem:[#allocation2 + $0x1308] sm:$0xf]  ;;  %v5450_v1 = vpop.f32.mrf.mxu3  ;;  %v11826_v63 = vld [vmem:[#allocation2 + $0x15f4] sm:$0xf0]  ;;  %v9726_v32 = vor.u32 %v11702_v55, %v9725_v36  ;;  %v10094_v6 = vor.u32 %v11794_v13, %v10093_v10 }
 0x234   :  { %5690 = vmatpush.bf16.msra.mxu2 %v9774_v8  ;;  %v11734_v8 = vld [vmem:[#allocation2 + $0x1314] sm:$0xf0]  ;;  %v10349_v24 = vld [vmem:[#allocation2 + $0x16e8] sm:$0xf] }
 0x235   :  { %5703 = vmatpush.bf16.msra.mxu3 %v9902_v15  ;;  %v10221_v15 = vld [vmem:[#allocation2 + $0x15e8] sm:$0xf]  ;;  %v11858_v26 = vld [vmem:[#allocation2 + $0x16f4] sm:$0xf0] }
 0x236   :  { %5665 = vmatpush.bf16.msra.mxu0 %v9502_v40  ;;  %v10477_v34 = vld [vmem:[#allocation2 + $0x17e8] sm:$0xf]  ;;  %v11890_v39 = vld [vmem:[#allocation2 + $0x17f4] sm:$0xf0]  ;;  %v9854_v40 = vor.u32 %v11734_v8, %v9853_v56 }
 0x237   :  { %5678 = vmatpush.bf16.msra.mxu1 %v9630_v14  ;;  %v10222_v14 = vor.u32 %v11826_v63, %v10221_v15  ;;  %v10077_v48 = vld [vmem:[#allocation2 + $0x14c8] sm:$0xf]  ;;  %v11790_v50 = vld [vmem:[#allocation2 + $0x14d4] sm:$0xf0]  ;;  %v12067_v63 = vld [vmem:[#allocation4] sm:$0xf] }
 0x238   :  { %5691 = vmatpush.bf16.msra.mxu2 %v9758_v47  ;;  %v10350_v47 = vor.u32 %v11858_v26, %v10349_v24  ;;  %v10205_v51 = vld [vmem:[#allocation2 + $0x15c8] sm:$0xf]  ;;  %v11822_v17 = vld [vmem:[#allocation2 + $0x15d4] sm:$0xf0]  ;;  %v898_v24 = vperm.slane %v12067_v63, 2 }
 0x239   :  { %5704 = vmatpush.bf16.msra.mxu3 %v9886_v52  ;;  %v10478_v52 = vor.u32 %v11890_v39, %v10477_v34  ;;  %v10333_v57 = vld [vmem:[#allocation2 + $0x16c8] sm:$0xf]  ;;  %v11854_v58 = vld [vmem:[#allocation2 + $0x16d4] sm:$0xf0]  ;;  %v10206_v61 = vor.u32 %v11822_v17, %v10205_v51 }
 0x23a   :  { %5666 = vmatpush.bf16.msra.mxu0 %v9486_v60  ;;  %v10461_v59 = vld [vmem:[#allocation2 + $0x17c8] sm:$0xf]  ;;  %v11886_v53 = vld [vmem:[#allocation2 + $0x17d4] sm:$0xf0]  ;;  %v10078_v60 = vor.u32 %v11790_v50, %v10077_v48  ;;  %v10334_v62 = vor.u32 %v11854_v58, %v10333_v57 }
 0x23b   :  { %5679 = vmatpush.bf16.msra.mxu1 %v9614_v0  ;;  %v10061_v0 = vld [vmem:[#allocation2 + $0x14a8] sm:$0xf]  ;;  %v10462_v4 = vor.u32 %v11886_v53, %v10461_v59  ;;  %v11818_v36 = vld [vmem:[#allocation2 + $0x15b4] sm:$0xf0] }
 0x23c   :  { %5692 = vmatpush.bf16.msra.mxu2 %v9742_v2  ;;  %v11786_v2 = vld [vmem:[#allocation2 + $0x14b4] sm:$0xf0]  ;;  %v10189_v3 = vld [vmem:[#allocation2 + $0x15a8] sm:$0xf] }
 0x23d   :  { %5705 = vmatpush.bf16.msra.mxu3 %v9870_v5  ;;  %v10317_v5 = vld [vmem:[#allocation2 + $0x16a8] sm:$0xf]  ;;  %v11850_v55 = vld [vmem:[#allocation2 + $0x16b4] sm:$0xf0]  ;;  %v10062_v9 = vor.u32 %v11786_v2, %v10061_v0  ;;  %v10190_v13 = vor.u32 %v11818_v36, %v10189_v3 }
 0x23e   :  { %5667 = vmatpush.bf16.msra.mxu0 %v9470_v21  ;;  %v10445_v56 = vld [vmem:[#allocation2 + $0x17a8] sm:$0xf]  ;;  %v11882_v8 = vld [vmem:[#allocation2 + $0x17b4] sm:$0xf0]  ;;  %v10318_v15 = vor.u32 %v11850_v55, %v10317_v5 }
 0x23f   :  { %5680 = vmatpush.bf16.msra.mxu1 %v9598_v27  ;;  %v10045_v10 = vld [vmem:[#allocation2 + $0x1488] sm:$0xf]  ;;  %v11782_v1 = vld [vmem:[#allocation2 + $0x1494] sm:$0xf0]  ;;  %v10446_v26 = vor.u32 %v11882_v8, %v10445_v56  ;;  %v5474_v57 = vpop.f32.mrf.mxu1 }
 0x240   :  { %5693 = vmatpush.bf16.msra.mxu2 %v9726_v32  ;;  %v10173_v21 = vld [vmem:[#allocation2 + $0x1588] sm:$0xf]  ;;  %v11814_v27 = vld [vmem:[#allocation2 + $0x1594] sm:$0xf0] }
 0x241   :  { %5706 = vmatpush.bf16.msra.mxu3 %v9854_v40  ;;  %5668 = vmatmul.bf16.vlgmr.msra.gmra.mxu0 %v12367_v37  ;;  %v10301_v32 = vld [vmem:[#allocation2 + $0x1688] sm:$0xf]  ;;  %v11846_v34 = vld [vmem:[#allocation2 + $0x1694] sm:$0xf0] }
 0x242   :  { %5712 = vmatpush.bf16.msrb.mxu0 %v10094_v6  ;;  %5681 = vmatmul.bf16.vlgmr.msra.gmra.mxu1 %v12371_v46  ;;  %v10429_v39 = vld [vmem:[#allocation2 + $0x1788] sm:$0xf]  ;;  %v11878_v40 = vld [vmem:[#allocation2 + $0x1794] sm:$0xf0]  ;;  %v10046_v6 = vor.u32 %v11782_v1, %v10045_v10  ;;  %v10302_v48 = vor.u32 %v11846_v34, %v10301_v32 }
 0x243   :  { %5725 = vmatpush.bf16.msrb.mxu1 %v10222_v14  ;;  %5694 = vmatmul.bf16.vlgmr.msra.gmra.mxu2 %v12369_v45  ;;  %v5461_v14 = vpop.f32.mrf.mxu0  ;;  %v10029_v50 = vld [vmem:[#allocation2 + $0x1468] sm:$0xf]  ;;  %v11778_v51 = vld [vmem:[#allocation2 + $0x1474] sm:$0xf0]  ;;  %v10430_v58 = vor.u32 %v11878_v40, %v10429_v39 }
 0x244   :  { %5738 = vmatpush.bf16.msrb.mxu2 %v10350_v47  ;;  %5707 = vmatmul.bf16.vlgmr.msra.gmra.mxu3 %v12373_v49  ;;  %v10174_v47 = vor.u32 %v11814_v27, %v10173_v21  ;;  %v5462_v17 = vadd.f32 %v5461_v14, %v898_v24  ;;  %v11810_v59 = vld [vmem:[#allocation2 + $0x1574] sm:$0xf0]  ;;  %v10285_v53 = vld [vmem:[#allocation2 + $0x1668] sm:$0xf]  ;;  %v10030_v2 = vor.u32 %v11778_v51, %v10029_v50 }
 0x245   :  { %5751 = vmatpush.bf16.msrb.mxu3 %v10478_v52  ;;  %v10157_v52 = vld [vmem:[#allocation2 + $0x1568] sm:$0xf]  ;;  %v11774_v5 = vld [vmem:[#allocation2 + $0x1454] sm:$0xf0] }
 0x246   :  { %5713 = vmatpush.bf16.msrb.mxu0 %v10078_v60  ;;  %v11842_v60 = vld [vmem:[#allocation2 + $0x1674] sm:$0xf0]  ;;  %v5475_v0 = vadd.f32 %v5474_v57, %v5462_v17  ;;  %v10158_v3 = vor.u32 %v11810_v59, %v10157_v52  ;;  %v10013_v36 = vld [vmem:[#allocation2 + $0x1448] sm:$0xf]  ;;  %v5487_v56 = vpop.f32.mrf.mxu2 }
 0x247   :  { %5726 = vmatpush.bf16.msrb.mxu1 %v10206_v61  ;;  %v10413_v61 = vld [vmem:[#allocation2 + $0x1768] sm:$0xf]  ;;  %v5500_v1 = vpop.f32.mrf.mxu3  ;;  %v11870_v63 = vld [vmem:[#allocation2 + $0x1754] sm:$0xf0]  ;;  %v10014_v24 = vor.u32 %v11774_v5, %v10013_v36  ;;  %v5476_v14 = vpop.f32.mrf.mxu1 }
 0x248   :  { %5739 = vmatpush.bf16.msrb.mxu2 %v10334_v62  ;;  %v11874_v62 = vld [vmem:[#allocation2 + $0x1774] sm:$0xf0]  ;;  %v10141_v55 = vld [vmem:[#allocation2 + $0x1548] sm:$0xf]  ;;  %v7519_v14 = vld [vmem:[#allocation2 + $0xd8] sm:$0xf0] }
 0x249   :  { %5752 = vmatpush.bf16.msrb.mxu3 %v10462_v4  ;;  %v10286_v4 = vor.u32 %v11842_v60, %v10285_v53  ;;  %v10414_v8 = vor.u32 %v11874_v62, %v10413_v61  ;;  %v10269_v10 = vld [vmem:[#allocation2 + $0x1648] sm:$0xf]  ;;  %v11770_v40 = vld [vmem:[#allocation2 + $0x1434] sm:$0xf0] }
 0x24a   :  { %5714 = vmatpush.bf16.msrb.mxu0 %v10062_v9  ;;  %v11806_v9 = vld [vmem:[#allocation2 + $0x1554] sm:$0xf0]  ;;  %v10397_v21 = vld [vmem:[#allocation2 + $0x1748] sm:$0xf] }
 0x24b   :  { %5727 = vmatpush.bf16.msrb.mxu1 %v10190_v13  ;;  %v11838_v13 = vld [vmem:[#allocation2 + $0x1654] sm:$0xf0]  ;;  %v5463_v27 = vpop.f32.mrf.mxu0  ;;  %v10142_v32 = vor.u32 %v11806_v9, %v10141_v55  ;;  %v9997_v39 = vld [vmem:[#allocation2 + $0x1428] sm:$0xf]  ;;  %v11184_v9 = vld [vmem:[#allocation2 + $0x1ec] sm:$0xf] }
 0x24c   :  { %5740 = vmatpush.bf16.msrb.mxu2 %v10318_v15  ;;  %v5488_v15 = vadd.f32 %v5487_v56, %v5475_v0  ;;  %v10270_v34 = vor.u32 %v11838_v13, %v10269_v10  ;;  %v10253_v50 = vld [vmem:[#allocation2 + $0x1628] sm:$0xf]  ;;  %v11834_v51 = vld [vmem:[#allocation2 + $0x1634] sm:$0xf0]  ;;  %v9998_v57 = vor.u32 %v11770_v40, %v9997_v39  ;;  %v11152_v56 = vld [vmem:[#allocation2 + $0xec] sm:$0xf] }
 0x24d   :  { %5753 = vmatpush.bf16.msrb.mxu3 %v10446_v26  ;;  %v10381_v52 = vld [vmem:[#allocation2 + $0x1728] sm:$0xf]  ;;  %v11866_v17 = vld [vmem:[#allocation2 + $0x1734] sm:$0xf0]  ;;  %v10254_v60 = vor.u32 %v11834_v51, %v10253_v50  ;;  %v7663_v13 = vld [vmem:[#allocation2 + $0x1f8] sm:$0xf0] }
 0x24e   :  { %5715 = vmatpush.bf16.msrb.mxu0 %v10046_v6  ;;  %v12475_v26 = vadd.f32 %v5500_v1, %v5488_v15  ;;  %v10125_v6 = vld [vmem:[#allocation2 + $0x1528] sm:$0xf]  ;;  %v11766_v59 = vld [vmem:[#allocation2 + $0x1414] sm:$0xf0]  ;;  %v11216_v15 = vld [vmem:[#allocation2 + $0x2ec] sm:$0xf]  ;;  %v7666_v39 = vor.u32 %v11184_v9, %v7663_v13 }
 0x24f   :  { %5728 = vmatpush.bf16.msrb.mxu1 %v10174_v47  ;;  %v10398_v47 = vor.u32 %v11870_v63, %v10397_v21  ;;  %v10109_v61 = vld [vmem:[#allocation2 + $0x1508] sm:$0xf]  ;;  %v11798_v62 = vld [vmem:[#allocation2 + $0x1514] sm:$0xf0]  ;;  %v5502_v55 = vpop.f32.mrf.mxu3  ;;  %v7791_v1 = vld [vmem:[#allocation2 + $0x2f8] sm:$0xf0] }
 0x250   :  { %5741 = vmatpush.bf16.msrb.mxu2 %v10302_v48  ;;  %v11802_v48 = vld [vmem:[#allocation2 + $0x1534] sm:$0xf0]  ;;  %v10237_v0 = vld [vmem:[#allocation2 + $0x1608] sm:$0xf]  ;;  %v10110_v21 = vor.u32 %v11798_v62, %v10109_v61  ;;  %v7919_v27 = vld [vmem:[#allocation2 + $0x3f8] sm:$0xf0]  ;;  %v7794_v40 = vor.u32 %v11216_v15, %v7791_v1 }
 0x251   :  { %5754 = vmatpush.bf16.msrb.mxu3 %v10430_v58  ;;  %v9981_v58 = vld [vmem:[#allocation2 + $0x1408] sm:$0xf]  ;;  %v10126_v53 = vor.u32 %v11802_v48, %v10125_v6  ;;  %v11862_v5 = vld [vmem:[#allocation2 + $0x1714] sm:$0xf0]  ;;  %v11148_v6 = vld [vmem:[#allocation2 + $0xcc] sm:$0xf] }
 0x252   :  { %5716 = vmatpush.bf16.msrb.mxu0 %v10030_v2  ;;  %v5489_v2 = vpop.f32.mrf.mxu2  ;;  %v10365_v36 = vld [vmem:[#allocation2 + $0x1708] sm:$0xf]  ;;  %v9982_v10 = vor.u32 %v11766_v59, %v9981_v58  ;;  %v7647_v50 = vld [vmem:[#allocation2 + $0x1d8] sm:$0xf0]  ;;  %v11212_v51 = vld [vmem:[#allocation2 + $0x2cc] sm:$0xf]  ;;  %v7522_v58 = vor.u32 %v11148_v6, %v7519_v14 }
 0x253   :  { %5729 = vmatpush.bf16.msrb.mxu1 %v10158_v3  ;;  %v10382_v3 = vor.u32 %v11866_v17, %v10381_v52  ;;  %v7775_v52 = vld [vmem:[#allocation2 + $0x2d8] sm:$0xf0]  ;;  %v11244_v17 = vld [vmem:[#allocation2 + $0x3cc] sm:$0xf] }
 0x254   :  { %5742 = vmatpush.bf16.msrb.mxu2 %v10286_v4  ;;  %v11830_v4 = vld [vmem:[#allocation2 + $0x1614] sm:$0xf0]  ;;  %v7503_v61 = vld [vmem:[#allocation2 + $0xb8] sm:$0xf0]  ;;  %v11176_v62 = vld [vmem:[#allocation2 + $0x1ac] sm:$0xf] }
 0x255   :  { %5755 = vmatpush.bf16.msrb.mxu3 %v10414_v8  ;;  %v7535_v8 = vld [vmem:[#allocation2 + $0xf8] sm:$0xf0]  ;;  %v10238_v63 = vor.u32 %v11830_v4, %v10237_v0  ;;  %v11140_v9 = vld [vmem:[#allocation2 + $0x8c] sm:$0xf] }
 0x256   :  { %5717 = vmatpush.bf16.msrb.mxu0 %v10014_v24  ;;  %v11248_v24 = vld [vmem:[#allocation2 + $0x3ec] sm:$0xf]  ;;  %v7631_v2 = vld [vmem:[#allocation2 + $0x1b8] sm:$0xf0] }
 0x257   :  { %5730 = vmatpush.bf16.msrb.mxu1 %v10142_v32  ;;  %v10366_v32 = vor.u32 %v11862_v5, %v10365_v36  ;;  %v7922_v48 = vor.u32 %v11248_v24, %v7919_v27  ;;  %v7759_v4 = vld [vmem:[#allocation2 + $0x2b8] sm:$0xf0]  ;;  %v11240_v36 = vld [vmem:[#allocation2 + $0x3ac] sm:$0xf] }
 0x258   :  { %5743 = vmatpush.bf16.msrb.mxu2 %v10270_v34  ;;  %v7538_v34 = vor.u32 %v11152_v56, %v7535_v8  ;;  %v7887_v5 = vld [vmem:[#allocation2 + $0x3b8] sm:$0xf0]  ;;  %v7634_v56 = vor.u32 %v11176_v62, %v7631_v2  ;;  %v11172_v13 = vld [vmem:[#allocation2 + $0x18c] sm:$0xf] }
 0x259   :  { %5756 = vmatpush.bf16.msrb.mxu3 %v10398_v47  ;;  %v11180_v47 = vld [vmem:[#allocation2 + $0x1cc] sm:$0xf]  ;;  %v7890_v15 = vor.u32 %v11240_v36, %v7887_v5  ;;  %v7615_v1 = vld [vmem:[#allocation2 + $0x198] sm:$0xf0] }
 0x25a   :  { %5718 = vmatpush.bf16.msrb.mxu0 %v9998_v57  ;;  %v7903_v57 = vld [vmem:[#allocation2 + $0x3d8] sm:$0xf0]  ;;  %v7650_v59 = vor.u32 %v11180_v47, %v7647_v50  ;;  %v11236_v24 = vld [vmem:[#allocation2 + $0x38c] sm:$0xf] }
 0x25b   :  { %5731 = vmatpush.bf16.msrb.mxu1 %v10126_v53  ;;  %v7778_v53 = vor.u32 %v11212_v51, %v7775_v52  ;;  %v7906_v0 = vor.u32 %v11244_v17, %v7903_v57  ;;  %v7871_v27 = vld [vmem:[#allocation2 + $0x398] sm:$0xf0]  ;;  %v11136_v6 = vld [vmem:[#allocation2 + $0x6c] sm:$0xf] }
 0x25c   :  { %5744 = vmatpush.bf16.msrb.mxu2 %v10254_v60  ;;  %v11144_v60 = vld [vmem:[#allocation2 + $0xac] sm:$0xf]  ;;  %v7471_v14 = vld [vmem:[#allocation2 + $0x78] sm:$0xf0]  ;;  %v7874_v51 = vor.u32 %v11236_v24, %v7871_v27 }
 0x25d   :  { %5757 = vmatpush.bf16.msrb.mxu3 %v10382_v3  ;;  %v11208_v3 = vld [vmem:[#allocation2 + $0x2ac] sm:$0xf]  ;;  %v7506_v55 = vor.u32 %v11144_v60, %v7503_v61  ;;  %v7599_v52 = vld [vmem:[#allocation2 + $0x178] sm:$0xf0]  ;;  %v7474_v60 = vor.u32 %v11136_v6, %v7471_v14 }
 0x25e   :  { %5719 = vmatpush.bf16.msrb.mxu0 %v9982_v10  ;;  %v7762_v8 = vor.u32 %v11208_v3, %v7759_v4  ;;  %v7487_v10 = vld [vmem:[#allocation2 + $0x98] sm:$0xf0]  ;;  %v11168_v47 = vld [vmem:[#allocation2 + $0x16c] sm:$0xf] }
 0x25f   :  { %5732 = vmatpush.bf16.msrb.mxu1 %v10110_v21  ;;  %v11204_v21 = vld [vmem:[#allocation2 + $0x28c] sm:$0xf]  ;;  %v5526_v50 = vpop.f32.mrf.mxu1  ;;  %v7727_v57 = vld [vmem:[#allocation2 + $0x278] sm:$0xf0]  ;;  %v7602_v61 = vor.u32 %v11168_v47, %v7599_v52 }
 0x260   :  { %5745 = vmatpush.bf16.msrb.mxu2 %v10238_v63  ;;  %v7743_v63 = vld [vmem:[#allocation2 + $0x298] sm:$0xf0]  ;;  %v11200_v17 = vld [vmem:[#allocation2 + $0x26c] sm:$0xf] }
 0x261   :  { %5758 = vmatpush.bf16.msrb.mxu3 %v10366_v32  ;;  %5720 = vmatmul.bf16.vlgmr.msrb.gmra.mxu0 %v12387_v7  ;;  %v7490_v32 = vor.u32 %v11140_v9, %v7487_v10  ;;  %v7730_v62 = vor.u32 %v11200_v17, %v7727_v57  ;;  %v7455_v2 = vld [vmem:[#allocation2 + $0x58] sm:$0xf0]  ;;  %v11164_v3 = vld [vmem:[#allocation2 + $0x14c] sm:$0xf] }
 0x262   :  { %5764 = vmatpush.bf16.msra.mxu0 %v7538_v34  ;;  %5733 = vmatmul.bf16.vlgmr.msrb.gmra.mxu1 %v12391_v12  ;;  %v5513_v34 = vpop.f32.mrf.mxu0  ;;  %v7583_v36 = vld [vmem:[#allocation2 + $0x158] sm:$0xf0]  ;;  %v11196_v5 = vld [vmem:[#allocation2 + $0x24c] sm:$0xf] }
 0x263   :  { %5777 = vmatpush.bf16.msra.mxu1 %v7666_v39  ;;  %5746 = vmatmul.bf16.vlgmr.msrb.gmra.mxu2 %v12389_v11  ;;  %v7618_v39 = vor.u32 %v11172_v13, %v7615_v1  ;;  %v11228_v9 = vld [vmem:[#allocation2 + $0x34c] sm:$0xf]  ;;  %v7839_v10 = vld [vmem:[#allocation2 + $0x358] sm:$0xf0] }
 0x264   :  { %5790 = vmatpush.bf16.msra.mxu2 %v7794_v40  ;;  %5759 = vmatmul.bf16.vlgmr.msrb.gmra.mxu3 %v12393_v16  ;;  %v7746_v40 = vor.u32 %v11204_v21, %v7743_v63  ;;  %v7586_v21 = vor.u32 %v11164_v3, %v7583_v36  ;;  %v11128_v24 = vld [vmem:[#allocation2 + $0x2c] sm:$0xf]  ;;  %v7439_v27 = vld [vmem:[#allocation2 + $0x38] sm:$0xf0] }
 0x265   :  { %5803 = vmatpush.bf16.msra.mxu3 %v7922_v48  ;;  %v5514_v48 = vadd.f32 %v5513_v34, %v12475_v26  ;;  %v11192_v6 = vld [vmem:[#allocation2 + $0x22c] sm:$0xf]  ;;  %v7695_v14 = vld [vmem:[#allocation2 + $0x238] sm:$0xf0] }
 0x266   :  { %5765 = vmatpush.bf16.msra.mxu0 %v7522_v58  ;;  %v11232_v58 = vld [vmem:[#allocation2 + $0x36c] sm:$0xf]  ;;  %v5539_v4 = vpop.f32.mrf.mxu2  ;;  %v7423_v52 = vld [vmem:[#allocation2 + $0x18] sm:$0xf0]  ;;  %v7698_v57 = vor.u32 %v11192_v6, %v7695_v14 }
 0x267   :  { %5778 = vmatpush.bf16.msra.mxu1 %v7650_v59  ;;  %v7855_v59 = vld [vmem:[#allocation2 + $0x378] sm:$0xf0]  ;;  %v5528_v34 = vpop.f32.mrf.mxu1  ;;  %v11224_v47 = vld [vmem:[#allocation2 + $0x32c] sm:$0xf] }
 0x268   :  { %5791 = vmatpush.bf16.msra.mxu2 %v7778_v53  ;;  %v5527_v53 = vadd.f32 %v5526_v50, %v5514_v48  ;;  %v7858_v26 = vor.u32 %v11232_v58, %v7855_v59  ;;  %v7823_v48 = vld [vmem:[#allocation2 + $0x338] sm:$0xf0]  ;;  %v7442_v50 = vor.u32 %v11128_v24, %v7439_v27  ;;  %v11156_v58 = vld [vmem:[#allocation2 + $0x10c] sm:$0xf] }
 0x269   :  { %5804 = vmatpush.bf16.msra.mxu3 %v7906_v0  ;;  %v11132_v0 = vld [vmem:[#allocation2 + $0x4c] sm:$0xf]  ;;  %v7551_v59 = vld [vmem:[#allocation2 + $0x118] sm:$0xf0] }
 0x26a   :  { %5766 = vmatpush.bf16.msra.mxu0 %v7506_v55  ;;  %v7711_v55 = vld [vmem:[#allocation2 + $0x258] sm:$0xf0]  ;;  %v7458_v13 = vor.u32 %v11132_v0, %v7455_v2  ;;  %v5515_v1 = vpop.f32.mrf.mxu0  ;;  %v11220_v0 = vld [vmem:[#allocation2 + $0x30c] sm:$0xf] }
 0x26b   :  { %5779 = vmatpush.bf16.msra.mxu1 %v7634_v56  ;;  %v5540_v56 = vadd.f32 %v5539_v4, %v5527_v53  ;;  %v7714_v63 = vor.u32 %v11196_v5, %v7711_v55  ;;  %v11188_v53 = vld [vmem:[#allocation2 + $0x20c] sm:$0xf]  ;;  %v7807_v2 = vld [vmem:[#allocation2 + $0x318] sm:$0xf0] }
 0x26c   :  { %5792 = vmatpush.bf16.msra.mxu2 %v7762_v8  ;;  %v5552_v8 = vpop.f32.mrf.mxu3  ;;  %v11280_v4 = vld [vmem:[#allocation2 + $0x4ec] sm:$0xf]  ;;  %v8175_v55 = vld [vmem:[#allocation2 + $0x5f8] sm:$0xf0] }
 0x26d   :  { %5805 = vmatpush.bf16.msra.mxu3 %v7890_v15  ;;  %v12482_v15 = vadd.f32 %v5552_v8, %v5540_v56  ;;  %v11312_v36 = vld [vmem:[#allocation2 + $0x5ec] sm:$0xf]  ;;  %v8303_v8 = vld [vmem:[#allocation2 + $0x6f8] sm:$0xf0] }
 0x26e   :  { %5767 = vmatpush.bf16.msra.mxu0 %v7490_v32  ;;  %v11160_v32 = vld [vmem:[#allocation2 + $0x12c] sm:$0xf]  ;;  %v8431_v1 = vld [vmem:[#allocation2 + $0x7f8] sm:$0xf0]  ;;  %v8178_v24 = vor.u32 %v11312_v36, %v8175_v55 }
 0x26f   :  { %5780 = vmatpush.bf16.msra.mxu1 %v7618_v39  ;;  %v7842_v39 = vor.u32 %v11228_v9, %v7839_v10  ;;  %v11344_v56 = vld [vmem:[#allocation2 + $0x6ec] sm:$0xf]  ;;  %v7554_v9 = vor.u32 %v11156_v58, %v7551_v59  ;;  %v8031_v34 = vld [vmem:[#allocation2 + $0x4d8] sm:$0xf0] }
 0x270   :  { %5793 = vmatpush.bf16.msra.mxu2 %v7746_v40  ;;  %v7567_v40 = vld [vmem:[#allocation2 + $0x138] sm:$0xf0]  ;;  %v8306_v27 = vor.u32 %v11344_v56, %v8303_v8  ;;  %v11340_v14 = vld [vmem:[#allocation2 + $0x6cc] sm:$0xf] }
 0x271   :  { %5806 = vmatpush.bf16.msra.mxu3 %v7874_v51  ;;  %v11124_v51 = vld [vmem:[#allocation2 + $0xc] sm:$0xf]  ;;  %v7570_v17 = vor.u32 %v11160_v32, %v7567_v40  ;;  %v8159_v6 = vld [vmem:[#allocation2 + $0x5d8] sm:$0xf0] }
 0x272   :  { %5768 = vmatpush.bf16.msra.mxu0 %v7474_v60  ;;  %v5541_v60 = vpop.f32.mrf.mxu2  ;;  %v7426_v5 = vor.u32 %v11124_v51, %v7423_v52  ;;  %v11276_v32 = vld [vmem:[#allocation2 + $0x4cc] sm:$0xf]  ;;  %v8015_v58 = vld [vmem:[#allocation2 + $0x4b8] sm:$0xf0] }
 0x273   :  { %5781 = vmatpush.bf16.msra.mxu1 %v7602_v61  ;;  %v7826_v61 = vor.u32 %v11224_v47, %v7823_v48  ;;  %v8287_v47 = vld [vmem:[#allocation2 + $0x6d8] sm:$0xf0]  ;;  %v11372_v48 = vld [vmem:[#allocation2 + $0x7cc] sm:$0xf]  ;;  %v8034_v51 = vor.u32 %v11276_v32, %v8031_v34 }
 0x274   :  { %5794 = vmatpush.bf16.msra.mxu2 %v7730_v62  ;;  %v7679_v62 = vld [vmem:[#allocation2 + $0x218] sm:$0xf0]  ;;  %v5554_v3 = vpop.f32.mrf.mxu3  ;;  %v11304_v59 = vld [vmem:[#allocation2 + $0x5ac] sm:$0xf] }
 0x275   :  { %5807 = vmatpush.bf16.msra.mxu3 %v7858_v26  ;;  %v8047_v26 = vld [vmem:[#allocation2 + $0x4f8] sm:$0xf0]  ;;  %v7682_v10 = vor.u32 %v11188_v53, %v7679_v62  ;;  %v11268_v36 = vld [vmem:[#allocation2 + $0x48c] sm:$0xf] }
 0x276   :  { %5769 = vmatpush.bf16.msra.mxu0 %v7458_v13  ;;  %v11376_v13 = vld [vmem:[#allocation2 + $0x7ec] sm:$0xf]  ;;  %v8143_v60 = vld [vmem:[#allocation2 + $0x5b8] sm:$0xf0] }
 0x277   :  { %5782 = vmatpush.bf16.msra.mxu1 %v7586_v21  ;;  %v7810_v21 = vor.u32 %v11220_v0, %v7807_v2  ;;  %v8434_v40 = vor.u32 %v11376_v13, %v8431_v1  ;;  %v8271_v62 = vld [vmem:[#allocation2 + $0x6b8] sm:$0xf0]  ;;  %v11368_v0 = vld [vmem:[#allocation2 + $0x7ac] sm:$0xf] }
 0x278   :  { %5795 = vmatpush.bf16.msra.mxu2 %v7714_v63  ;;  %v8050_v63 = vor.u32 %v11280_v4, %v8047_v26  ;;  %v8399_v2 = vld [vmem:[#allocation2 + $0x7b8] sm:$0xf0]  ;;  %v8146_v4 = vor.u32 %v11304_v59, %v8143_v60  ;;  %v11300_v55 = vld [vmem:[#allocation2 + $0x58c] sm:$0xf] }
 0x279   :  { %5808 = vmatpush.bf16.msra.mxu3 %v7842_v39  ;;  %v11308_v39 = vld [vmem:[#allocation2 + $0x5cc] sm:$0xf]  ;;  %v8402_v56 = vor.u32 %v11368_v0, %v8399_v2  ;;  %v8383_v13 = vld [vmem:[#allocation2 + $0x798] sm:$0xf0] }
 0x27a   :  { %5770 = vmatpush.bf16.msra.mxu0 %v7442_v50  ;;  %v8415_v50 = vld [vmem:[#allocation2 + $0x7d8] sm:$0xf0]  ;;  %v8162_v52 = vor.u32 %v11308_v39, %v8159_v6  ;;  %v11332_v8 = vld [vmem:[#allocation2 + $0x68c] sm:$0xf] }
 0x27b   :  { %5783 = vmatpush.bf16.msra.mxu1 %v7570_v17  ;;  %v8290_v17 = vor.u32 %v11340_v14, %v8287_v47  ;;  %v8418_v53 = vor.u32 %v11372_v48, %v8415_v50  ;;  %v11296_v32 = vld [vmem:[#allocation2 + $0x56c] sm:$0xf]  ;;  %v8239_v14 = vld [vmem:[#allocation2 + $0x678] sm:$0xf0] }
 0x27c   :  { %5796 = vmatpush.bf16.msra.mxu2 %v7698_v57  ;;  %v11272_v57 = vld [vmem:[#allocation2 + $0x4ac] sm:$0xf]  ;;  %v8367_v48 = vld [vmem:[#allocation2 + $0x778] sm:$0xf0] }
 0x27d   :  { %5809 = vmatpush.bf16.msra.mxu3 %v7826_v61  ;;  %v11336_v61 = vld [vmem:[#allocation2 + $0x6ac] sm:$0xf]  ;;  %v8018_v3 = vor.u32 %v11272_v57, %v8015_v58 }
 0x27e   :  { %5771 = vmatpush.bf16.msra.mxu0 %v7426_v5  ;;  %v8274_v26 = vor.u32 %v11336_v61, %v8271_v62  ;;  %v7999_v5 = vld [vmem:[#allocation2 + $0x498] sm:$0xf0]  ;;  %v11328_v6 = vld [vmem:[#allocation2 + $0x66c] sm:$0xf] }
 0x27f   :  { %5784 = vmatpush.bf16.msra.mxu1 %v7554_v9  ;;  %v8255_v9 = vld [vmem:[#allocation2 + $0x698] sm:$0xf0]  ;;  %v8002_v1 = vor.u32 %v11268_v36, %v7999_v5  ;;  %v11360_v47 = vld [vmem:[#allocation2 + $0x76c] sm:$0xf] }
 0x280   :  { %5797 = vmatpush.bf16.msra.mxu2 %v7682_v10  ;;  %v5565_v10 = vpop.f32.mrf.mxu0  ;;  %v11292_v57 = vld [vmem:[#allocation2 + $0x54c] sm:$0xf]  ;;  %v8370_v58 = vor.u32 %v11360_v47, %v8367_v48  ;;  %v8223_v61 = vld [vmem:[#allocation2 + $0x658] sm:$0xf0] }
 0x281   :  { %5810 = vmatpush.bf16.msra.mxu3 %v7810_v21  ;;  %5772 = vmatmul.bf16.vlgmr.msra.gmra.mxu0 %v12297_v19  ;;  %v11364_v19 = vld [vmem:[#allocation2 + $0x78c] sm:$0xf]  ;;  %v8319_v48 = vld [vmem:[#allocation2 + $0x718] sm:$0xf0] }
 0x282   :  { %5816 = vmatpush.bf16.msrb.mxu0 %v8050_v63  ;;  %5785 = vmatmul.bf16.vlgmr.msra.gmra.mxu1 %v12301_v22  ;;  %v5578_v22 = vpop.f32.mrf.mxu1  ;;  %v8258_v63 = vor.u32 %v11332_v8, %v8255_v9  ;;  %v8386_v34 = vor.u32 %v11364_v19, %v8383_v13  ;;  %v11324_v60 = vld [vmem:[#allocation2 + $0x64c] sm:$0xf]  ;;  %v7951_v8 = vld [vmem:[#allocation2 + $0x438] sm:$0xf0] }
 0x283   :  { %5829 = vmatpush.bf16.msrb.mxu1 %v8178_v24  ;;  %5798 = vmatmul.bf16.vlgmr.msra.gmra.mxu2 %v12295_v18  ;;  %v8127_v18 = vld [vmem:[#allocation2 + $0x598] sm:$0xf0]  ;;  %v11264_v24 = vld [vmem:[#allocation2 + $0x46c] sm:$0xf] }
 0x284   :  { %5842 = vmatpush.bf16.msrb.mxu2 %v8306_v27  ;;  %5811 = vmatmul.bf16.vlgmr.msra.gmra.mxu3 %v12299_v20  ;;  %v5566_v20 = vadd.f32 %v5565_v10, %v12482_v15  ;;  %v8130_v21 = vor.u32 %v11300_v55, %v8127_v18  ;;  %v7983_v27 = vld [vmem:[#allocation2 + $0x478] sm:$0xf0]  ;;  %v11356_v2 = vld [vmem:[#allocation2 + $0x74c] sm:$0xf] }
 0x285   :  { %5855 = vmatpush.bf16.msrb.mxu3 %v8434_v40  ;;  %v8111_v40 = vld [vmem:[#allocation2 + $0x578] sm:$0xf0]  ;;  %v7986_v50 = vor.u32 %v11264_v24, %v7983_v27  ;;  %v11256_v18 = vld [vmem:[#allocation2 + $0x42c] sm:$0xf] }
 0x286   :  { %5817 = vmatpush.bf16.msrb.mxu0 %v8034_v51  ;;  %v5579_v39 = vadd.f32 %v5578_v22, %v5566_v20  ;;  %v8114_v15 = vor.u32 %v11296_v32, %v8111_v40  ;;  %v8242_v51 = vor.u32 %v11328_v6, %v8239_v14  ;;  %v5591_v59 = vpop.f32.mrf.mxu2  ;;  %v11288_v9 = vld [vmem:[#allocation2 + $0x52c] sm:$0xf]  ;;  %v8079_v19 = vld [vmem:[#allocation2 + $0x538] sm:$0xf0] }
 0x287   :  { %5830 = vmatpush.bf16.msrb.mxu1 %v8162_v52  ;;  %v11260_v52 = vld [vmem:[#allocation2 + $0x44c] sm:$0xf]  ;;  %v5604_v0 = vpop.f32.mrf.mxu3  ;;  %v8207_v20 = vld [vmem:[#allocation2 + $0x638] sm:$0xf0]  ;;  %v8082_v27 = vor.u32 %v11288_v9, %v8079_v19 }
 0x288   :  { %5843 = vmatpush.bf16.msrb.mxu2 %v8290_v17  ;;  %v7967_v17 = vld [vmem:[#allocation2 + $0x458] sm:$0xf0]  ;;  %v5592_v62 = vadd.f32 %v5591_v59, %v5579_v39  ;;  %v11320_v13 = vld [vmem:[#allocation2 + $0x62c] sm:$0xf] }
 0x289   :  { %5856 = vmatpush.bf16.msrb.mxu3 %v8418_v53  ;;  %v8095_v53 = vld [vmem:[#allocation2 + $0x558] sm:$0xf0]  ;;  %v8210_v32 = vor.u32 %v11320_v13, %v8207_v20  ;;  %v11316_v40 = vld [vmem:[#allocation2 + $0x60c] sm:$0xf] }
 0x28a   :  { %5818 = vmatpush.bf16.msrb.mxu0 %v8018_v3  ;;  %v8351_v3 = vld [vmem:[#allocation2 + $0x758] sm:$0xf0]  ;;  %v5580_v36 = vpop.f32.mrf.mxu1  ;;  %v12489_v5 = vadd.f32 %v5604_v0, %v5592_v62  ;;  %v8098_v55 = vor.u32 %v11292_v57, %v8095_v53  ;;  %v11348_v47 = vld [vmem:[#allocation2 + $0x70c] sm:$0xf] }
 0x28b   :  { %5831 = vmatpush.bf16.msrb.mxu1 %v8146_v4  ;;  %v5567_v4 = vpop.f32.mrf.mxu0  ;;  %v8354_v10 = vor.u32 %v11356_v2, %v8351_v3  ;;  %v8335_v22 = vld [vmem:[#allocation2 + $0x738] sm:$0xf0]  ;;  %v11472_v59 = vld [vmem:[#allocation2 + $0xaec] sm:$0xf]  ;;  %v8322_v2 = vor.u32 %v11348_v47, %v8319_v48 }
 0x28c   :  { %5844 = vmatpush.bf16.msrb.mxu2 %v8274_v26  ;;  %v7970_v26 = vor.u32 %v11260_v52, %v7967_v17  ;;  %v7935_v24 = vld [vmem:[#allocation2 + $0x418] sm:$0xf0]  ;;  %v11440_v52 = vld [vmem:[#allocation2 + $0x9ec] sm:$0xf] }
 0x28d   :  { %5857 = vmatpush.bf16.msrb.mxu3 %v8402_v56  ;;  %v8226_v56 = vor.u32 %v11324_v60, %v8223_v61  ;;  %v8063_v39 = vld [vmem:[#allocation2 + $0x518] sm:$0xf0]  ;;  %v11504_v62 = vld [vmem:[#allocation2 + $0xbec] sm:$0xf] }
 0x28e   :  { %5819 = vmatpush.bf16.msrb.mxu0 %v8002_v1  ;;  %v11352_v1 = vld [vmem:[#allocation2 + $0x72c] sm:$0xf]  ;;  %v8191_v14 = vld [vmem:[#allocation2 + $0x618] sm:$0xf0] }
 0x28f   :  { %5832 = vmatpush.bf16.msrb.mxu1 %v8130_v21  ;;  %v7954_v21 = vor.u32 %v11256_v18, %v7951_v8  ;;  %v8338_v6 = vor.u32 %v11352_v1, %v8335_v22  ;;  %v5606_v17 = vpop.f32.mrf.mxu3  ;;  %v8815_v53 = vld [vmem:[#allocation2 + $0xaf8] sm:$0xf0]  ;;  %v8194_v61 = vor.u32 %v11316_v40, %v8191_v14  ;;  %v11404_v36 = vld [vmem:[#allocation2 + $0x8cc] sm:$0xf] }
 0x290   :  { %5845 = vmatpush.bf16.msrb.mxu2 %v8258_v63  ;;  %v11252_v63 = vld [vmem:[#allocation2 + $0x40c] sm:$0xf]  ;;  %v8943_v0 = vld [vmem:[#allocation2 + $0xbf8] sm:$0xf0] }
 0x291   :  { %5858 = vmatpush.bf16.msrb.mxu3 %v8386_v34  ;;  %v11284_v34 = vld [vmem:[#allocation2 + $0x50c] sm:$0xf]  ;;  %v7938_v57 = vor.u32 %v11252_v63, %v7935_v24  ;;  %v8946_v18 = vor.u32 %v11504_v62, %v8943_v0  ;;  %v8671_v8 = vld [vmem:[#allocation2 + $0x9d8] sm:$0xf0] }
 0x292   :  { %5820 = vmatpush.bf16.msrb.mxu0 %v7986_v50  ;;  %v5593_v50 = vpop.f32.mrf.mxu2  ;;  %v8066_v60 = vor.u32 %v11284_v34, %v8063_v39  ;;  %v11468_v9 = vld [vmem:[#allocation2 + $0xacc] sm:$0xf]  ;;  %v8927_v13 = vld [vmem:[#allocation2 + $0xbd8] sm:$0xf0] }
 0x293   :  { %5833 = vmatpush.bf16.msrb.mxu1 %v8114_v15  ;;  %v11408_v15 = vld [vmem:[#allocation2 + $0x8ec] sm:$0xf]  ;;  %v8527_v63 = vld [vmem:[#allocation2 + $0x8b8] sm:$0xf0] }
 0x294   :  { %5846 = vmatpush.bf16.msrb.mxu2 %v8242_v51  ;;  %v8559_v51 = vld [vmem:[#allocation2 + $0x8f8] sm:$0xf0]  ;;  %v11500_v19 = vld [vmem:[#allocation2 + $0xbcc] sm:$0xf] }
 0x295   :  { %5859 = vmatpush.bf16.msrb.mxu3 %v8370_v58  ;;  %v8687_v58 = vld [vmem:[#allocation2 + $0x9f8] sm:$0xf0]  ;;  %v8562_v3 = vor.u32 %v11408_v15, %v8559_v51  ;;  %v11432_v24 = vld [vmem:[#allocation2 + $0x9ac] sm:$0xf] }
 0x296   :  { %5821 = vmatpush.bf16.msrb.mxu0 %v7970_v26  ;;  %v8690_v4 = vor.u32 %v11440_v52, %v8687_v58  ;;  %v8818_v26 = vor.u32 %v11472_v59, %v8815_v53  ;;  %v11464_v34 = vld [vmem:[#allocation2 + $0xaac] sm:$0xf]  ;;  %v8783_v39 = vld [vmem:[#allocation2 + $0xab8] sm:$0xf0] }
 0x297   :  { %5834 = vmatpush.bf16.msrb.mxu1 %v8098_v55  ;;  %v8543_v55 = vld [vmem:[#allocation2 + $0x8d8] sm:$0xf0]  ;;  %v11496_v40 = vld [vmem:[#allocation2 + $0xbac] sm:$0xf]  ;;  %v8786_v48 = vor.u32 %v11464_v34, %v8783_v39 }
 0x298   :  { %5847 = vmatpush.bf16.msrb.mxu2 %v8226_v56  ;;  %v11436_v56 = vld [vmem:[#allocation2 + $0x9cc] sm:$0xf]  ;;  %v8546_v20 = vor.u32 %v11404_v36, %v8543_v55  ;;  %v8511_v15 = vld [vmem:[#allocation2 + $0x898] sm:$0xf0] }
 0x299   :  { %5860 = vmatpush.bf16.msrb.mxu3 %v8354_v10  ;;  %v8799_v10 = vld [vmem:[#allocation2 + $0xad8] sm:$0xf0]  ;;  %v8674_v1 = vor.u32 %v11436_v56, %v8671_v8  ;;  %v11396_v50 = vld [vmem:[#allocation2 + $0x88c] sm:$0xf] }
 0x29a   :  { %5822 = vmatpush.bf16.msrb.mxu0 %v7954_v21  ;;  %v8802_v22 = vor.u32 %v11468_v9, %v8799_v10  ;;  %v11400_v21 = vld [vmem:[#allocation2 + $0x8ac] sm:$0xf]  ;;  %v8639_v52 = vld [vmem:[#allocation2 + $0x998] sm:$0xf0]  ;;  %v8514_v53 = vor.u32 %v11396_v50, %v8511_v15 }
 0x29b   :  { %5835 = vmatpush.bf16.msrb.mxu1 %v8082_v27  ;;  %v8930_v27 = vor.u32 %v11500_v19, %v8927_v13  ;;  %v8530_v14 = vor.u32 %v11400_v21, %v8527_v63  ;;  %v11460_v17 = vld [vmem:[#allocation2 + $0xa8c] sm:$0xf]  ;;  %v8895_v59 = vld [vmem:[#allocation2 + $0xb98] sm:$0xf0] }
 0x29c   :  { %5848 = vmatpush.bf16.msrb.mxu2 %v8210_v32  ;;  %v8655_v32 = vld [vmem:[#allocation2 + $0x9b8] sm:$0xf0]  ;;  %v11392_v62 = vld [vmem:[#allocation2 + $0x86c] sm:$0xf] }
 0x29d   :  { %5861 = vmatpush.bf16.msrb.mxu3 %v8338_v6  ;;  %v8911_v6 = vld [vmem:[#allocation2 + $0xbb8] sm:$0xf0]  ;;  %v8658_v47 = vor.u32 %v11432_v24, %v8655_v32  ;;  %v11456_v36 = vld [vmem:[#allocation2 + $0xa6c] sm:$0xf] }
 0x29e   :  { %5823 = vmatpush.bf16.msrb.mxu0 %v7938_v57  ;;  %v8914_v51 = vor.u32 %v11496_v40, %v8911_v6  ;;  %v8767_v57 = vld [vmem:[#allocation2 + $0xa98] sm:$0xf0]  ;;  %v5617_v58 = vpop.f32.mrf.mxu0  ;;  %v11488_v56 = vld [vmem:[#allocation2 + $0xb6c] sm:$0xf] }
 0x29f   :  { %5836 = vmatpush.bf16.msrb.mxu1 %v8066_v60  ;;  %v8495_v0 = vld [vmem:[#allocation2 + $0x878] sm:$0xf0]  ;;  %v11388_v10 = vld [vmem:[#allocation2 + $0x84c] sm:$0xf] }
 0x2a0   :  { %5849 = vmatpush.bf16.msrb.mxu2 %v8194_v61  ;;  %v8770_v61 = vor.u32 %v11460_v17, %v8767_v57  ;;  %v8751_v55 = vld [vmem:[#allocation2 + $0xa78] sm:$0xf0]  ;;  %v8498_v8 = vor.u32 %v11392_v62, %v8495_v0  ;;  %v11420_v13 = vld [vmem:[#allocation2 + $0x94c] sm:$0xf] }
 0x2a1   :  { %5862 = vmatpush.bf16.msrb.mxu3 %v8322_v2  ;;  %5824 = vmatmul.bf16.vlgmr.msrb.gmra.mxu0 %v12315_v41  ;;  %v11492_v41 = vld [vmem:[#allocation2 + $0xb8c] sm:$0xf]  ;;  %v8754_v9 = vor.u32 %v11456_v36, %v8751_v55  ;;  %v8479_v19 = vld [vmem:[#allocation2 + $0x858] sm:$0xf0] }
 0x2a2   :  { %5868 = vmatpush.bf16.msra.mxu0 %v8562_v3  ;;  %5837 = vmatmul.bf16.vlgmr.msrb.gmra.mxu1 %v12319_v44  ;;  %v5630_v44 = vpop.f32.mrf.mxu1  ;;  %v11424_v2 = vld [vmem:[#allocation2 + $0x96c] sm:$0xf]  ;;  %v8898_v3 = vor.u32 %v11492_v41, %v8895_v59  ;;  %v8735_v63 = vld [vmem:[#allocation2 + $0xa58] sm:$0xf0]  ;;  %v8482_v40 = vor.u32 %v11388_v10, %v8479_v19 }
 0x2a3   :  { %5881 = vmatpush.bf16.msra.mxu1 %v8690_v4  ;;  %5850 = vmatmul.bf16.vlgmr.msrb.gmra.mxu2 %v12313_v38  ;;  %v11428_v38 = vld [vmem:[#allocation2 + $0x98c] sm:$0xf]  ;;  %v8863_v34 = vld [vmem:[#allocation2 + $0xb58] sm:$0xf0] }
 0x2a4   :  { %5894 = vmatpush.bf16.msra.mxu2 %v8818_v26  ;;  %5863 = vmatmul.bf16.vlgmr.msrb.gmra.mxu3 %v12317_v42  ;;  %v5618_v42 = vadd.f32 %v5617_v58, %v12489_v5  ;;  %v8642_v60 = vor.u32 %v11428_v38, %v8639_v52  ;;  %v8623_v26 = vld [vmem:[#allocation2 + $0x978] sm:$0xf0]  ;;  %v11452_v21 = vld [vmem:[#allocation2 + $0xa4c] sm:$0xf] }
 0x2a5   :  { %5907 = vmatpush.bf16.msra.mxu3 %v8946_v18  ;;  %v8879_v18 = vld [vmem:[#allocation2 + $0xb78] sm:$0xf0]  ;;  %v8626_v5 = vor.u32 %v11424_v2, %v8623_v26  ;;  %v11484_v32 = vld [vmem:[#allocation2 + $0xb4c] sm:$0xf] }
 0x2a6   :  { %5869 = vmatpush.bf16.msra.mxu0 %v8546_v20  ;;  %v5631_v4 = vadd.f32 %v5630_v44, %v5618_v42  ;;  %v8882_v20 = vor.u32 %v11488_v56, %v8879_v18  ;;  %v5619_v39 = vpop.f32.mrf.mxu0  ;;  %v11384_v50 = vld [vmem:[#allocation2 + $0x82c] sm:$0xf]  ;;  %v8463_v15 = vld [vmem:[#allocation2 + $0x838] sm:$0xf0] }
 0x2a7   :  { %5882 = vmatpush.bf16.msra.mxu1 %v8674_v1  ;;  %v5643_v1 = vpop.f32.mrf.mxu2  ;;  %v11416_v38 = vld [vmem:[#allocation2 + $0x92c] sm:$0xf]  ;;  %v8591_v52 = vld [vmem:[#allocation2 + $0x938] sm:$0xf0]  ;;  %v8466_v59 = vor.u32 %v11384_v50, %v8463_v15 }
 0x2a8   :  { %5895 = vmatpush.bf16.msra.mxu2 %v8802_v22  ;;  %v8607_v22 = vld [vmem:[#allocation2 + $0x958] sm:$0xf0]  ;;  %v5644_v24 = vadd.f32 %v5643_v1, %v5631_v4  ;;  %v11448_v17 = vld [vmem:[#allocation2 + $0xa2c] sm:$0xf]  ;;  %v8594_v44 = vor.u32 %v11416_v38, %v8591_v52 }
 0x2a9   :  { %5908 = vmatpush.bf16.msra.mxu3 %v8930_v27  ;;  %v5656_v27 = vpop.f32.mrf.mxu3  ;;  %v8719_v57 = vld [vmem:[#allocation2 + $0xa38] sm:$0xf0]  ;;  %v11480_v58 = vld [vmem:[#allocation2 + $0xb2c] sm:$0xf] }
 0x2aa   :  { %5870 = vmatpush.bf16.msra.mxu0 %v8530_v14  ;;  %v5632_v6 = vpop.f32.mrf.mxu1  ;;  %v12496_v14 = vadd.f32 %v5656_v27, %v5644_v24  ;;  %v8847_v41 = vld [vmem:[#allocation2 + $0xb38] sm:$0xf0]  ;;  %v11380_v42 = vld [vmem:[#allocation2 + $0x80c] sm:$0xf] }
 0x2ab   :  { %5883 = vmatpush.bf16.msra.mxu1 %v8658_v47  ;;  %v8610_v47 = vor.u32 %v11420_v13, %v8607_v22  ;;  %v8575_v62 = vld [vmem:[#allocation2 + $0x918] sm:$0xf0]  ;;  %v11444_v0 = vld [vmem:[#allocation2 + $0xa0c] sm:$0xf]  ;;  %v8850_v2 = vor.u32 %v11480_v58, %v8847_v41 }
 0x2ac   :  { %5896 = vmatpush.bf16.msra.mxu2 %v8786_v48  ;;  %v8738_v48 = vor.u32 %v11452_v21, %v8735_v63  ;;  %v11476_v4 = vld [vmem:[#allocation2 + $0xb0c] sm:$0xf]  ;;  %v8831_v26 = vld [vmem:[#allocation2 + $0xb18] sm:$0xf0] }
 0x2ad   :  { %5909 = vmatpush.bf16.msra.mxu3 %v8914_v51  ;;  %v8866_v51 = vor.u32 %v11484_v32, %v8863_v34  ;;  %v11536_v55 = vld [vmem:[#allocation2 + $0xcec] sm:$0xf]  ;;  %v9071_v56 = vld [vmem:[#allocation2 + $0xcf8] sm:$0xf0]  ;;  %v8834_v21 = vor.u32 %v11476_v4, %v8831_v26 }
 0x2ae   :  { %5871 = vmatpush.bf16.msra.mxu0 %v8514_v53  ;;  %v8447_v53 = vld [vmem:[#allocation2 + $0x818] sm:$0xf0]  ;;  %v11568_v18 = vld [vmem:[#allocation2 + $0xdec] sm:$0xf]  ;;  %v9074_v63 = vor.u32 %v11536_v55, %v9071_v56 }
 0x2af   :  { %5884 = vmatpush.bf16.msra.mxu1 %v8642_v60  ;;  %v8722_v60 = vor.u32 %v11448_v17, %v8719_v57  ;;  %v5645_v36 = vpop.f32.mrf.mxu2  ;;  %v11600_v10 = vld [vmem:[#allocation2 + $0xeec] sm:$0xf]  ;;  %v9327_v19 = vld [vmem:[#allocation2 + $0xef8] sm:$0xf0] }
 0x2b0   :  { %5897 = vmatpush.bf16.msra.mxu2 %v8770_v61  ;;  %v11412_v61 = vld [vmem:[#allocation2 + $0x90c] sm:$0xf]  ;;  %v9455_v22 = vld [vmem:[#allocation2 + $0xff8] sm:$0xf0]  ;;  %v9330_v27 = vor.u32 %v11600_v10, %v9327_v19 }
 0x2b1   :  { %5910 = vmatpush.bf16.msra.mxu3 %v8898_v3  ;;  %v8703_v3 = vld [vmem:[#allocation2 + $0xa18] sm:$0xf0]  ;;  %v8578_v13 = vor.u32 %v11412_v61, %v8575_v62  ;;  %v11632_v1 = vld [vmem:[#allocation2 + $0xfec] sm:$0xf] }
 0x2b2   :  { %5872 = vmatpush.bf16.msra.mxu0 %v8498_v8  ;;  %v5658_v8 = vpop.f32.mrf.mxu3  ;;  %v11532_v32 = vld [vmem:[#allocation2 + $0xccc] sm:$0xf]  ;;  %v9055_v34 = vld [vmem:[#allocation2 + $0xcd8] sm:$0xf0] }
 0x2b3   :  { %5885 = vmatpush.bf16.msra.mxu1 %v8626_v5  ;;  %v8450_v5 = vor.u32 %v11380_v42, %v8447_v53  ;;  %v11564_v39 = vld [vmem:[#allocation2 + $0xdcc] sm:$0xf]  ;;  %v9183_v6 = vld [vmem:[#allocation2 + $0xdd8] sm:$0xf0]  ;;  %v9058_v38 = vor.u32 %v11532_v32, %v9055_v34 }
 0x2b4   :  { %5898 = vmatpush.bf16.msra.mxu2 %v8754_v9  ;;  %v9199_v9 = vld [vmem:[#allocation2 + $0xdf8] sm:$0xf0]  ;;  %v11628_v50 = vld [vmem:[#allocation2 + $0xfcc] sm:$0xf] }
 0x2b5   :  { %5911 = vmatpush.bf16.msra.mxu3 %v8882_v20  ;;  %v8706_v20 = vor.u32 %v11444_v0, %v8703_v3  ;;  %v9202_v24 = vor.u32 %v11568_v18, %v9199_v9  ;;  %v9439_v15 = vld [vmem:[#allocation2 + $0xfd8] sm:$0xf0]  ;;  %v11528_v17 = vld [vmem:[#allocation2 + $0xcac] sm:$0xf] }
 0x2b6   :  { %5873 = vmatpush.bf16.msra.mxu0 %v8482_v40  ;;  %v9458_v40 = vor.u32 %v11632_v1, %v9455_v22  ;;  %v9039_v57 = vld [vmem:[#allocation2 + $0xcb8] sm:$0xf0]  ;;  %v11560_v58 = vld [vmem:[#allocation2 + $0xdac] sm:$0xf]  ;;  %v9442_v41 = vor.u32 %v11628_v50, %v9439_v15 }
 0x2b7   :  { %5886 = vmatpush.bf16.msra.mxu1 %v8610_v47  ;;  %v11596_v47 = vld [vmem:[#allocation2 + $0xecc] sm:$0xf]  ;;  %v9295_v53 = vld [vmem:[#allocation2 + $0xeb8] sm:$0xf0]  ;;  %v9042_v61 = vor.u32 %v11528_v17, %v9039_v57 }
 0x2b8   :  { %5899 = vmatpush.bf16.msra.mxu2 %v8738_v48  ;;  %v9311_v48 = vld [vmem:[#allocation2 + $0xed8] sm:$0xf0]  ;;  %v11592_v42 = vld [vmem:[#allocation2 + $0xeac] sm:$0xf] }
 0x2b9   :  { %5912 = vmatpush.bf16.msra.mxu3 %v8866_v51  ;;  %v9186_v51 = vor.u32 %v11564_v39, %v9183_v6  ;;  %v9314_v52 = vor.u32 %v11596_v47, %v9311_v48  ;;  %v9298_v0 = vor.u32 %v11592_v42, %v9295_v53  ;;  %v11556_v3 = vld [vmem:[#allocation2 + $0xd8c] sm:$0xf]  ;;  %v9151_v26 = vld [vmem:[#allocation2 + $0xd98] sm:$0xf0] }
 0x2ba   :  { %5874 = vmatpush.bf16.msra.mxu0 %v8466_v59  ;;  %v9167_v59 = vld [vmem:[#allocation2 + $0xdb8] sm:$0xf0]  ;;  %v11588_v36 = vld [vmem:[#allocation2 + $0xe8c] sm:$0xf] }
 0x2bb   :  { %5887 = vmatpush.bf16.msra.mxu1 %v8594_v44  ;;  %v11624_v44 = vld [vmem:[#allocation2 + $0xfac] sm:$0xf]  ;;  %v9170_v62 = vor.u32 %v11560_v58, %v9167_v59  ;;  %v9407_v56 = vld [vmem:[#allocation2 + $0xf98] sm:$0xf0] }
 0x2bc   :  { %5900 = vmatpush.bf16.msra.mxu2 %v8722_v60  ;;  %v9423_v60 = vld [vmem:[#allocation2 + $0xfb8] sm:$0xf0]  ;;  %v11520_v10 = vld [vmem:[#allocation2 + $0xc6c] sm:$0xf] }
 0x2bd   :  { %5913 = vmatpush.bf16.msra.mxu3 %v8850_v2  ;;  %v11524_v2 = vld [vmem:[#allocation2 + $0xc8c] sm:$0xf]  ;;  %v9426_v4 = vor.u32 %v11624_v44, %v9423_v60  ;;  %v9007_v19 = vld [vmem:[#allocation2 + $0xc78] sm:$0xf0] }
 0x2be   :  { %5875 = vmatpush.bf16.msra.mxu0 %v8450_v5  ;;  %v5669_v55 = vpop.f32.mrf.mxu0  ;;  %v9154_v5 = vor.u32 %v11556_v3, %v9151_v26  ;;  %v9135_v22 = vld [vmem:[#allocation2 + $0xd78] sm:$0xf0]  ;;  %v9010_v32 = vor.u32 %v11520_v10, %v9007_v19  ;;  %v11516_v39 = vld [vmem:[#allocation2 + $0xc4c] sm:$0xf] }
 0x2bf   :  { %5888 = vmatpush.bf16.msra.mxu1 %v8578_v13  ;;  %v5682_v8 = vpop.f32.mrf.mxu1  ;;  %v11552_v13 = vld [vmem:[#allocation2 + $0xd6c] sm:$0xf]  ;;  %v9119_v50 = vld [vmem:[#allocation2 + $0xd58] sm:$0xf0] }
 0x2c0   :  { %5901 = vmatpush.bf16.msra.mxu2 %v8706_v20  ;;  %v11548_v6 = vld [vmem:[#allocation2 + $0xd4c] sm:$0xf]  ;;  %v9375_v57 = vld [vmem:[#allocation2 + $0xf58] sm:$0xf0] }
 0x2c1   :  { %5914 = vmatpush.bf16.msra.mxu3 %v8834_v21  ;;  %5876 = vmatmul.bf16.vlgmr.msra.gmra.mxu0 %v12331_v25  ;;  %v9023_v25 = vld [vmem:[#allocation2 + $0xc98] sm:$0xf0]  ;;  %v11584_v21 = vld [vmem:[#allocation2 + $0xe6c] sm:$0xf]  ;;  %v9122_v53 = vor.u32 %v11548_v6, %v9119_v50 }
 0x2c2   :  { %5920 = vmatpush.bf16.msrb.mxu0 %v9074_v63  ;;  %5889 = vmatmul.bf16.vlgmr.msra.gmra.mxu1 %v12335_v30  ;;  %v11620_v30 = vld [vmem:[#allocation2 + $0xf8c] sm:$0xf]  ;;  %v9026_v18 = vor.u32 %v11524_v2, %v9023_v25  ;;  %v9263_v63 = vld [vmem:[#allocation2 + $0xe78] sm:$0xf0] }
 0x2c3   :  { %5933 = vmatpush.bf16.msrb.mxu1 %v9202_v24  ;;  %5902 = vmatmul.bf16.vlgmr.msra.gmra.mxu2 %v12333_v29  ;;  %v9279_v29 = vld [vmem:[#allocation2 + $0xe98] sm:$0xf0]  ;;  %v9410_v20 = vor.u32 %v11620_v30, %v9407_v56  ;;  %v11616_v24 = vld [vmem:[#allocation2 + $0xf6c] sm:$0xf]  ;;  %v9266_v34 = vor.u32 %v11584_v21, %v9263_v63 }
 0x2c4   :  { %5946 = vmatpush.bf16.msrb.mxu2 %v9330_v27  ;;  %5915 = vmatmul.bf16.vlgmr.msra.gmra.mxu3 %v12337_v33  ;;  %v5670_v33 = vadd.f32 %v5669_v55, %v12496_v14  ;;  %v9282_v9 = vor.u32 %v11588_v36, %v9279_v29  ;;  %v9391_v27 = vld [vmem:[#allocation2 + $0xf78] sm:$0xf0]  ;;  %v9138_v14 = vor.u32 %v11552_v13, %v9135_v22  ;;  %v11580_v15 = vld [vmem:[#allocation2 + $0xe4c] sm:$0xf] }
 0x2c5   :  { %5959 = vmatpush.bf16.msrb.mxu3 %v9458_v40  ;;  %v8991_v40 = vld [vmem:[#allocation2 + $0xc58] sm:$0xf0]  ;;  %v9394_v47 = vor.u32 %v11616_v24, %v9391_v27  ;;  %v11612_v17 = vld [vmem:[#allocation2 + $0xf4c] sm:$0xf] }
 0x2c6   :  { %5921 = vmatpush.bf16.msrb.mxu0 %v9058_v38  ;;  %v5683_v1 = vadd.f32 %v5682_v8, %v5670_v33  ;;  %v5695_v48 = vpop.f32.mrf.mxu2  ;;  %v9247_v38 = vld [vmem:[#allocation2 + $0xe58] sm:$0xf0]  ;;  %v5671_v58 = vpop.f32.mrf.mxu0  ;;  %v11512_v60 = vld [vmem:[#allocation2 + $0xc2c] sm:$0xf] }
 0x2c7   :  { %5934 = vmatpush.bf16.msrb.mxu1 %v9186_v51  ;;  %v5684_v59 = vpop.f32.mrf.mxu1  ;;  %v9250_v44 = vor.u32 %v11580_v15, %v9247_v38  ;;  %v9103_v2 = vld [vmem:[#allocation2 + $0xd38] sm:$0xf0]  ;;  %v11576_v25 = vld [vmem:[#allocation2 + $0xe2c] sm:$0xf] }
 0x2c8   :  { %5947 = vmatpush.bf16.msrb.mxu2 %v9314_v52  ;;  %v5696_v51 = vadd.f32 %v5695_v48, %v5683_v1  ;;  %v5708_v52 = vpop.f32.mrf.mxu3  ;;  %v9231_v3 = vld [vmem:[#allocation2 + $0xe38] sm:$0xf0]  ;;  %v11508_v29 = vld [vmem:[#allocation2 + $0xc0c] sm:$0xf] }
 0x2c9   :  { %5960 = vmatpush.bf16.msrb.mxu3 %v9442_v41  ;;  %v8994_v41 = vor.u32 %v11516_v39, %v8991_v40  ;;  %v9359_v26 = vld [vmem:[#allocation2 + $0xf38] sm:$0xf0]  ;;  %v9234_v56 = vor.u32 %v11576_v25, %v9231_v3  ;;  %v11540_v33 = vld [vmem:[#allocation2 + $0xd0c] sm:$0xf] }
 0x2ca   :  { %5922 = vmatpush.bf16.msrb.mxu0 %v9042_v61  ;;  %v12503_v42 = vadd.f32 %v5708_v52, %v5696_v51  ;;  %v8975_v61 = vld [vmem:[#allocation2 + $0xc38] sm:$0xf0]  ;;  %v11572_v8 = vld [vmem:[#allocation2 + $0xe0c] sm:$0xf] }
 0x2cb   :  { %5935 = vmatpush.bf16.msrb.mxu1 %v9170_v62  ;;  %v11544_v62 = vld [vmem:[#allocation2 + $0xd2c] sm:$0xf]  ;;  %v8978_v36 = vor.u32 %v11512_v60, %v8975_v61  ;;  %v8959_v55 = vld [vmem:[#allocation2 + $0xc18] sm:$0xf0] }
 0x2cc   :  { %5948 = vmatpush.bf16.msrb.mxu2 %v9298_v0  ;;  %v9378_v0 = vor.u32 %v11612_v17, %v9375_v57  ;;  %v9106_v30 = vor.u32 %v11544_v62, %v9103_v2  ;;  %v11604_v10 = vld [vmem:[#allocation2 + $0xf0c] sm:$0xf]  ;;  %v9343_v19 = vld [vmem:[#allocation2 + $0xf18] sm:$0xf0]  ;;  %v8962_v63 = vor.u32 %v11508_v29, %v8959_v55 }
 0x2cd   :  { %5961 = vmatpush.bf16.msrb.mxu3 %v9426_v4  ;;  %v11608_v4 = vld [vmem:[#allocation2 + $0xf2c] sm:$0xf]  ;;  %v9583_v1 = vld [vmem:[#allocation2 + $0x10f8] sm:$0xf0]  ;;  %v9346_v6 = vor.u32 %v11604_v10, %v9343_v19 }
 0x2ce   :  { %5923 = vmatpush.bf16.msrb.mxu0 %v9026_v18  ;;  %v9087_v18 = vld [vmem:[#allocation2 + $0xd18] sm:$0xf0]  ;;  %v5697_v13 = vpop.f32.mrf.mxu2  ;;  %v11696_v22 = vld [vmem:[#allocation2 + $0x11ec] sm:$0xf] }
 0x2cf   :  { %5936 = vmatpush.bf16.msrb.mxu1 %v9154_v5  ;;  %v9362_v5 = vor.u32 %v11608_v4, %v9359_v26  ;;  %v9711_v24 = vld [vmem:[#allocation2 + $0x11f8] sm:$0xf0]  ;;  %v11728_v27 = vld [vmem:[#allocation2 + $0x12ec] sm:$0xf] }
 0x2d0   :  { %5949 = vmatpush.bf16.msrb.mxu2 %v9282_v9  ;;  %v9215_v9 = vld [vmem:[#allocation2 + $0xe18] sm:$0xf0]  ;;  %v5710_v21 = vpop.f32.mrf.mxu3  ;;  %v11760_v39 = vld [vmem:[#allocation2 + $0x13ec] sm:$0xf]  ;;  %v9714_v48 = vor.u32 %v11696_v22, %v9711_v24 }
 0x2d1   :  { %5962 = vmatpush.bf16.msrb.mxu3 %v9410_v20  ;;  %v11664_v20 = vld [vmem:[#allocation2 + $0x10ec] sm:$0xf]  ;;  %v9967_v40 = vld [vmem:[#allocation2 + $0x13f8] sm:$0xf0] }
 0x2d2   :  { %5924 = vmatpush.bf16.msrb.mxu0 %v9010_v32  ;;  %v9839_v32 = vld [vmem:[#allocation2 + $0x12f8] sm:$0xf0]  ;;  %v11660_v15 = vld [vmem:[#allocation2 + $0x10cc] sm:$0xf]  ;;  %v9970_v52 = vor.u32 %v11760_v39, %v9967_v40 }
 0x2d3   :  { %5937 = vmatpush.bf16.msrb.mxu1 %v9138_v14  ;;  %v9090_v14 = vor.u32 %v11540_v33, %v9087_v18  ;;  %v9842_v50 = vor.u32 %v11728_v27, %v9839_v32  ;;  %v9567_v38 = vld [vmem:[#allocation2 + $0x10d8] sm:$0xf0]  ;;  %v11692_v51 = vld [vmem:[#allocation2 + $0x11cc] sm:$0xf] }
 0x2d4   :  { %5950 = vmatpush.bf16.msrb.mxu2 %v9266_v34  ;;  %v9218_v34 = vor.u32 %v11572_v8, %v9215_v9  ;;  %v9695_v17 = vld [vmem:[#allocation2 + $0x11d8] sm:$0xf0]  ;;  %v11724_v57 = vld [vmem:[#allocation2 + $0x12cc] sm:$0xf] }
 0x2d5   :  { %5963 = vmatpush.bf16.msrb.mxu3 %v9394_v47  ;;  %v9586_v47 = vor.u32 %v11664_v20, %v9583_v1  ;;  %v9823_v58 = vld [vmem:[#allocation2 + $0x12d8] sm:$0xf0]  ;;  %v11656_v61 = vld [vmem:[#allocation2 + $0x10ac] sm:$0xf] }
 0x2d6   :  { %5925 = vmatpush.bf16.msrb.mxu0 %v8994_v41  ;;  %v11756_v41 = vld [vmem:[#allocation2 + $0x13cc] sm:$0xf]  ;;  %v9951_v59 = vld [vmem:[#allocation2 + $0x13d8] sm:$0xf0]  ;;  %v9826_v60 = vor.u32 %v11724_v57, %v9823_v58 }
 0x2d7   :  { %5938 = vmatpush.bf16.msrb.mxu1 %v9122_v53  ;;  %v9570_v53 = vor.u32 %v11660_v15, %v9567_v38  ;;  %v9551_v62 = vld [vmem:[#allocation2 + $0x10b8] sm:$0xf0]  ;;  %v9954_v2 = vor.u32 %v11756_v41, %v9951_v59  ;;  %v11720_v3 = vld [vmem:[#allocation2 + $0x12ac] sm:$0xf] }
 0x2d8   :  { %5951 = vmatpush.bf16.msrb.mxu2 %v9250_v44  ;;  %v9698_v44 = vor.u32 %v11692_v51, %v9695_v17  ;;  %v9679_v25 = vld [vmem:[#allocation2 + $0x11b8] sm:$0xf0]  ;;  %v11752_v26 = vld [vmem:[#allocation2 + $0x13ac] sm:$0xf]  ;;  %v9554_v29 = vor.u32 %v11656_v61, %v9551_v62 }
 0x2d9   :  { %5964 = vmatpush.bf16.msrb.mxu3 %v9378_v0  ;;  %v11688_v0 = vld [vmem:[#allocation2 + $0x11ac] sm:$0xf]  ;;  %v9807_v4 = vld [vmem:[#allocation2 + $0x12b8] sm:$0xf0] }
 0x2da   :  { %5926 = vmatpush.bf16.msrb.mxu0 %v8978_v36  ;;  %v9935_v36 = vld [vmem:[#allocation2 + $0x13b8] sm:$0xf0]  ;;  %v9682_v55 = vor.u32 %v11688_v0, %v9679_v25  ;;  %v11684_v33 = vld [vmem:[#allocation2 + $0x118c] sm:$0xf] }
 0x2db   :  { %5939 = vmatpush.bf16.msrb.mxu1 %v9106_v30  ;;  %v9810_v30 = vor.u32 %v11720_v3, %v9807_v4  ;;  %v9938_v18 = vor.u32 %v11752_v26, %v9935_v36  ;;  %v9663_v8 = vld [vmem:[#allocation2 + $0x1198] sm:$0xf0]  ;;  %v11648_v22 = vld [vmem:[#allocation2 + $0x106c] sm:$0xf] }
 0x2dc   :  { %5952 = vmatpush.bf16.msrb.mxu2 %v9234_v56  ;;  %v11652_v56 = vld [vmem:[#allocation2 + $0x108c] sm:$0xf]  ;;  %v9919_v10 = vld [vmem:[#allocation2 + $0x1398] sm:$0xf0]  ;;  %v9666_v20 = vor.u32 %v11684_v33, %v9663_v8 }
 0x2dd   :  { %5965 = vmatpush.bf16.msrb.mxu3 %v9362_v5  ;;  %v11716_v5 = vld [vmem:[#allocation2 + $0x128c] sm:$0xf]  ;;  %v9519_v21 = vld [vmem:[#allocation2 + $0x1078] sm:$0xf0] }
 0x2de   :  { %5927 = vmatpush.bf16.msrb.mxu0 %v8962_v63  ;;  %v5721_v9 = vpop.f32.mrf.mxu0  ;;  %v11680_v63 = vld [vmem:[#allocation2 + $0x116c] sm:$0xf]  ;;  %v9647_v32 = vld [vmem:[#allocation2 + $0x1178] sm:$0xf0] }
 0x2df   :  { %5940 = vmatpush.bf16.msrb.mxu1 %v9090_v14  ;;  %v5734_v13 = vpop.f32.mrf.mxu1  ;;  %v11712_v14 = vld [vmem:[#allocation2 + $0x126c] sm:$0xf]  ;;  %v9903_v40 = vld [vmem:[#allocation2 + $0x1378] sm:$0xf0] }
 0x2e0   :  { %5953 = vmatpush.bf16.msrb.mxu2 %v9218_v34  ;;  %v9775_v34 = vld [vmem:[#allocation2 + $0x1278] sm:$0xf0]  ;;  %v11744_v39 = vld [vmem:[#allocation2 + $0x136c] sm:$0xf] }
 0x2e1   :  { %5966 = vmatpush.bf16.msrb.mxu3 %v9346_v6  ;;  %5928 = vmatmul.bf16.vlgmr.msrb.gmra.mxu0 %v12349_v23  ;;  %v9535_v23 = vld [vmem:[#allocation2 + $0x1098] sm:$0xf0]  ;;  %v9522_v6 = vor.u32 %v11648_v22, %v9519_v21  ;;  %v11676_v15 = vld [vmem:[#allocation2 + $0x114c] sm:$0xf]  ;;  %v9906_v38 = vor.u32 %v11744_v39, %v9903_v40 }
 0x2e2   :  { %5972 = vmatpush.bf16.msra.mxu0 %v9586_v47  ;;  %5941 = vmatmul.bf16.vlgmr.msrb.gmra.mxu1 %v12353_v31  ;;  %v11748_v31 = vld [vmem:[#allocation2 + $0x138c] sm:$0xf]  ;;  %v9538_v19 = vor.u32 %v11652_v56, %v9535_v23  ;;  %v9778_v47 = vor.u32 %v11712_v14, %v9775_v34  ;;  %v9759_v57 = vld [vmem:[#allocation2 + $0x1258] sm:$0xf0] }
 0x2e3   :  { %5985 = vmatpush.bf16.msra.mxu1 %v9714_v48  ;;  %5954 = vmatmul.bf16.vlgmr.msrb.gmra.mxu2 %v12351_v28  ;;  %v9791_v28 = vld [vmem:[#allocation2 + $0x1298] sm:$0xf0]  ;;  %v9922_v24 = vor.u32 %v11748_v31, %v9919_v10  ;;  %v11644_v48 = vld [vmem:[#allocation2 + $0x104c] sm:$0xf] }
 0x2e4   :  { %5998 = vmatpush.bf16.msra.mxu2 %v9842_v50  ;;  %5967 = vmatmul.bf16.vlgmr.msrb.gmra.mxu3 %v12355_v35  ;;  %v5722_v35 = vadd.f32 %v5721_v9, %v12503_v42  ;;  %v9794_v1 = vor.u32 %v11716_v5, %v9791_v28  ;;  %v9650_v42 = vor.u32 %v11680_v63, %v9647_v32  ;;  %v9503_v50 = vld [vmem:[#allocation2 + $0x1058] sm:$0xf0]  ;;  %v11708_v17 = vld [vmem:[#allocation2 + $0x124c] sm:$0xf] }
 0x2e5   :  { %6011 = vmatpush.bf16.msra.mxu3 %v9970_v52  ;;  %v9631_v52 = vld [vmem:[#allocation2 + $0x1158] sm:$0xf0]  ;;  %v11740_v59 = vld [vmem:[#allocation2 + $0x134c] sm:$0xf] }
 0x2e6   :  { %5973 = vmatpush.bf16.msra.mxu0 %v9570_v53  ;;  %v5735_v27 = vadd.f32 %v5734_v13, %v5722_v35  ;;  %v5747_v51 = vpop.f32.mrf.mxu2  ;;  %v9887_v53 = vld [vmem:[#allocation2 + $0x1358] sm:$0xf0]  ;;  %v9634_v0 = vor.u32 %v11676_v15, %v9631_v52  ;;  %v11640_v25 = vld [vmem:[#allocation2 + $0x102c] sm:$0xf] }
 0x2e7   :  { %5986 = vmatpush.bf16.msra.mxu1 %v9698_v44  ;;  %v5760_v41 = vpop.f32.mrf.mxu3  ;;  %v5723_v44 = vpop.f32.mrf.mxu0  ;;  %v9487_v3 = vld [vmem:[#allocation2 + $0x1038] sm:$0xf0]  ;;  %v11672_v4 = vld [vmem:[#allocation2 + $0x112c] sm:$0xf]  ;;  %v9890_v26 = vor.u32 %v11740_v59, %v9887_v53 }
 0x2e8   :  { %5999 = vmatpush.bf16.msra.mxu2 %v9826_v60  ;;  %v5748_v58 = vadd.f32 %v5747_v51, %v5735_v27  ;;  %v9506_v60 = vor.u32 %v11644_v48, %v9503_v50  ;;  %v5736_v61 = vpop.f32.mrf.mxu1  ;;  %v9615_v36 = vld [vmem:[#allocation2 + $0x1138] sm:$0xf0]  ;;  %v9490_v23 = vor.u32 %v11640_v25, %v9487_v3  ;;  %v11636_v33 = vld [vmem:[#allocation2 + $0x100c] sm:$0xf] }
 0x2e9   :  { %6012 = vmatpush.bf16.msra.mxu3 %v9954_v2  ;;  %v9762_v2 = vor.u32 %v11708_v17, %v9759_v57  ;;  %v9871_v56 = vld [vmem:[#allocation2 + $0x1338] sm:$0xf0]  ;;  %v9618_v8 = vor.u32 %v11672_v4, %v9615_v36  ;;  %v11668_v28 = vld [vmem:[#allocation2 + $0x110c] sm:$0xf] }
 0x2ea   :  { %5974 = vmatpush.bf16.msra.mxu0 %v9554_v29  ;;  %v12510_v62 = vadd.f32 %v5760_v41, %v5748_v58  ;;  %v11704_v29 = vld [vmem:[#allocation2 + $0x122c] sm:$0xf]  ;;  %v9599_v9 = vld [vmem:[#allocation2 + $0x1118] sm:$0xf0] }
 0x2eb   :  { %5987 = vmatpush.bf16.msra.mxu1 %v9682_v55  ;;  %v9743_v55 = vld [vmem:[#allocation2 + $0x1238] sm:$0xf0]  ;;  %v11700_v31 = vld [vmem:[#allocation2 + $0x120c] sm:$0xf]  ;;  %v9602_v34 = vor.u32 %v11668_v28, %v9599_v9 }
 0x2ec   :  { %6000 = vmatpush.bf16.msra.mxu2 %v9810_v30  ;;  %v11736_v30 = vld [vmem:[#allocation2 + $0x132c] sm:$0xf]  ;;  %v9746_v5 = vor.u32 %v11704_v29, %v9743_v55  ;;  %v9727_v35 = vld [vmem:[#allocation2 + $0x1218] sm:$0xf0] }
 0x2ed   :  { %6013 = vmatpush.bf16.msra.mxu3 %v9938_v18  ;;  %v9471_v18 = vld [vmem:[#allocation2 + $0x1018] sm:$0xf0]  ;;  %v9874_v10 = vor.u32 %v11736_v30, %v9871_v56  ;;  %v11824_v21 = vld [vmem:[#allocation2 + $0x15ec] sm:$0xf]  ;;  %v9730_v39 = vor.u32 %v11700_v31, %v9727_v35 }
 0x2ee   :  { %5975 = vmatpush.bf16.msra.mxu0 %v9538_v19  ;;  %v11732_v19 = vld [vmem:[#allocation2 + $0x130c] sm:$0xf]  ;;  %v9855_v13 = vld [vmem:[#allocation2 + $0x1318] sm:$0xf0] }
 0x2ef   :  { %5988 = vmatpush.bf16.msra.mxu1 %v9666_v20  ;;  %v5749_v20 = vpop.f32.mrf.mxu2  ;;  %v10095_v22 = vld [vmem:[#allocation2 + $0x14f8] sm:$0xf0]  ;;  %v5762_v63 = vpop.f32.mrf.mxu3  ;;  %v11856_v32 = vld [vmem:[#allocation2 + $0x16ec] sm:$0xf] }
 0x2f0   :  { %6001 = vmatpush.bf16.msra.mxu2 %v9794_v1  ;;  %v11792_v1 = vld [vmem:[#allocation2 + $0x14ec] sm:$0xf]  ;;  %v10223_v27 = vld [vmem:[#allocation2 + $0x15f8] sm:$0xf0] }
 0x2f1   :  { %6014 = vmatpush.bf16.msra.mxu3 %v9922_v24  ;;  %v9474_v24 = vor.u32 %v11636_v33, %v9471_v18  ;;  %v10351_v14 = vld [vmem:[#allocation2 + $0x16f8] sm:$0xf0]  ;;  %v11888_v40 = vld [vmem:[#allocation2 + $0x17ec] sm:$0xf]  ;;  %v10226_v48 = vor.u32 %v11824_v21, %v10223_v27  ;;  %v12068_v18 = vld [vmem:[#allocation4] sm:$0xf] }
 0x2f2   :  { %5976 = vmatpush.bf16.msra.mxu0 %v9522_v6  ;;  %v10479_v6 = vld [vmem:[#allocation2 + $0x17f8] sm:$0xf0]  ;;  %v10354_v50 = vor.u32 %v11856_v32, %v10351_v14  ;;  %v11788_v15 = vld [vmem:[#allocation2 + $0x14cc] sm:$0xf] }
 0x2f3   :  { %5989 = vmatpush.bf16.msra.mxu1 %v9650_v42  ;;  %v9858_v42 = vor.u32 %v11732_v19, %v9855_v13  ;;  %v11820_v51 = vld [vmem:[#allocation2 + $0x15cc] sm:$0xf]  ;;  %v10482_v52 = vor.u32 %v11888_v40, %v10479_v6  ;;  %v10207_v17 = vld [vmem:[#allocation2 + $0x15d8] sm:$0xf0] }
 0x2f4   :  { %6002 = vmatpush.bf16.msra.mxu2 %v9778_v47  ;;  %v10098_v47 = vor.u32 %v11792_v1, %v10095_v22  ;;  %v11852_v57 = vld [vmem:[#allocation2 + $0x16cc] sm:$0xf]  ;;  %v10335_v58 = vld [vmem:[#allocation2 + $0x16d8] sm:$0xf0]  ;;  %v10210_v44 = vor.u32 %v11820_v51, %v10207_v17 }
 0x2f5   :  { %6015 = vmatpush.bf16.msra.mxu3 %v9906_v38  ;;  %v10079_v38 = vld [vmem:[#allocation2 + $0x14d8] sm:$0xf0]  ;;  %v11884_v41 = vld [vmem:[#allocation2 + $0x17cc] sm:$0xf] }
 0x2f6   :  { %5977 = vmatpush.bf16.msra.mxu0 %v9506_v60  ;;  %v10463_v59 = vld [vmem:[#allocation2 + $0x17d8] sm:$0xf0]  ;;  %v10082_v53 = vor.u32 %v11788_v15, %v10079_v38  ;;  %v10338_v60 = vor.u32 %v11852_v57, %v10335_v58  ;;  %v11784_v61 = vld [vmem:[#allocation2 + $0x14ac] sm:$0xf] }
 0x2f7   :  { %5990 = vmatpush.bf16.msra.mxu1 %v9634_v0  ;;  %v10063_v0 = vld [vmem:[#allocation2 + $0x14b8] sm:$0xf0]  ;;  %v10466_v25 = vor.u32 %v11884_v41, %v10463_v59  ;;  %v11848_v4 = vld [vmem:[#allocation2 + $0x16ac] sm:$0xf] }
 0x2f8   :  { %6003 = vmatpush.bf16.msra.mxu2 %v9762_v2  ;;  %v11816_v2 = vld [vmem:[#allocation2 + $0x15ac] sm:$0xf]  ;;  %v10191_v3 = vld [vmem:[#allocation2 + $0x15b8] sm:$0xf0]  ;;  %v10066_v55 = vor.u32 %v11784_v61, %v10063_v0 }
 0x2f9   :  { %6016 = vmatpush.bf16.msra.mxu3 %v9890_v26  ;;  %v10319_v26 = vld [vmem:[#allocation2 + $0x16b8] sm:$0xf0]  ;;  %v11880_v36 = vld [vmem:[#allocation2 + $0x17ac] sm:$0xf]  ;;  %v10194_v56 = vor.u32 %v11816_v2, %v10191_v3 }
 0x2fa   :  { %5978 = vmatpush.bf16.msra.mxu0 %v9490_v23  ;;  %v10447_v29 = vld [vmem:[#allocation2 + $0x17b8] sm:$0xf0]  ;;  %v11780_v30 = vld [vmem:[#allocation2 + $0x148c] sm:$0xf]  ;;  %v10322_v23 = vor.u32 %v11848_v4, %v10319_v26 }
 0x2fb   :  { %5991 = vmatpush.bf16.msra.mxu1 %v9618_v8  ;;  %v11812_v33 = vld [vmem:[#allocation2 + $0x158c] sm:$0xf]  ;;  %v899_v8 = vperm.slane %v12068_v18, 3  ;;  %v10431_v31 = vld [vmem:[#allocation2 + $0x1798] sm:$0xf0] }
 0x2fc   :  { %6004 = vmatpush.bf16.msra.mxu2 %v9746_v5  ;;  %v10450_v5 = vor.u32 %v11880_v36, %v10447_v29  ;;  %v11844_v28 = vld [vmem:[#allocation2 + $0x168c] sm:$0xf]  ;;  %v10031_v20 = vld [vmem:[#allocation2 + $0x1478] sm:$0xf0] }
 0x2fd   :  { %6017 = vmatpush.bf16.msra.mxu3 %v9874_v10  ;;  %v11876_v9 = vld [vmem:[#allocation2 + $0x178c] sm:$0xf]  ;;  %v10287_v32 = vld [vmem:[#allocation2 + $0x1678] sm:$0xf0] }
 0x2fe   :  { %5979 = vmatpush.bf16.msra.mxu0 %v9474_v24  ;;  %v5773_v10 = vpop.f32.mrf.mxu0  ;;  %v11776_v13 = vld [vmem:[#allocation2 + $0x146c] sm:$0xf]  ;;  %v10434_v63 = vor.u32 %v11876_v9, %v10431_v31  ;;  %v10159_v24 = vld [vmem:[#allocation2 + $0x1578] sm:$0xf0] }
 0x2ff   :  { %5992 = vmatpush.bf16.msra.mxu1 %v9602_v34  ;;  %v11808_v1 = vld [vmem:[#allocation2 + $0x156c] sm:$0xf]  ;;  %v5774_v22 = vadd.f32 %v5773_v10, %v899_v8  ;;  %v5786_v21 = vpop.f32.mrf.mxu1  ;;  %v10415_v34 = vld [vmem:[#allocation2 + $0x1778] sm:$0xf0]  ;;  %v10034_v40 = vor.u32 %v11776_v13, %v10031_v20  ;;  %v11921_v13 = vld [vmem:[#allocation6 + $0xec] sm:$0xf0] }
 0x300   :  { %6005 = vmatpush.bf16.msra.mxu2 %v9730_v39  ;;  %v11840_v27 = vld [vmem:[#allocation2 + $0x166c] sm:$0xf]  ;;  %v10162_v6 = vor.u32 %v11808_v1, %v10159_v24  ;;  %v10143_v51 = vld [vmem:[#allocation2 + $0x1558] sm:$0xf0]  ;;  %v10725_v20 = vld [vmem:[#allocation6 + $0x1e0] sm:$0xf] }
 0x301   :  { %6018 = vmatpush.bf16.msra.mxu3 %v9858_v42  ;;  %5980 = vmatmul.bf16.vlgmr.msra.gmra.mxu0 %v12367_v37  ;;  %v10047_v37 = vld [vmem:[#allocation2 + $0x1498] sm:$0xf0]  ;;  %v11872_v14 = vld [vmem:[#allocation2 + $0x176c] sm:$0xf]  ;;  %v5787_v39 = vadd.f32 %v5786_v21, %v5774_v22  ;;  %v10290_v42 = vor.u32 %v11840_v27, %v10287_v32  ;;  %v11953_v22 = vld [vmem:[#allocation6 + $0x1ec] sm:$0xf0] }
 0x302   :  { %6024 = vmatpush.bf16.msrb.mxu0 %v10098_v47  ;;  %5993 = vmatmul.bf16.vlgmr.msra.gmra.mxu1 %v12371_v46  ;;  %v10303_v46 = vld [vmem:[#allocation2 + $0x1698] sm:$0xf0]  ;;  %v11772_v47 = vld [vmem:[#allocation2 + $0x144c] sm:$0xf]  ;;  %v10418_v38 = vor.u32 %v11872_v14, %v10415_v34  ;;  %v10853_v21 = vld [vmem:[#allocation6 + $0x2e0] sm:$0xf]  ;;  %v10726_v34 = vor.u32 %v11953_v22, %v10725_v20 }
 0x303   :  { %6037 = vmatpush.bf16.msrb.mxu1 %v10226_v48  ;;  %6006 = vmatmul.bf16.vlgmr.msra.gmra.mxu2 %v12369_v45  ;;  %v10175_v45 = vld [vmem:[#allocation2 + $0x1598] sm:$0xf0]  ;;  %v10306_v19 = vor.u32 %v11844_v28, %v10303_v46  ;;  %v11868_v41 = vld [vmem:[#allocation2 + $0x174c] sm:$0xf] }
 0x304   :  { %6050 = vmatpush.bf16.msrb.mxu2 %v10354_v50  ;;  %6019 = vmatmul.bf16.vlgmr.msra.gmra.mxu3 %v12373_v49  ;;  %v10050_v49 = vor.u32 %v11780_v30, %v10047_v37  ;;  %v10178_v35 = vor.u32 %v11812_v33, %v10175_v45  ;;  %v10015_v48 = vld [vmem:[#allocation2 + $0x1458] sm:$0xf0]  ;;  %v11804_v50 = vld [vmem:[#allocation2 + $0x154c] sm:$0xf] }
 0x305   :  { %6063 = vmatpush.bf16.msrb.mxu3 %v10482_v52  ;;  %v11836_v52 = vld [vmem:[#allocation2 + $0x164c] sm:$0xf]  ;;  %v10271_v17 = vld [vmem:[#allocation2 + $0x1658] sm:$0xf0]  ;;  %v10146_v61 = vor.u32 %v11804_v50, %v10143_v51  ;;  %v11981_v50 = vld [vmem:[#allocation6 + $0x2cc] sm:$0xf0] }
 0x306   :  { %6025 = vmatpush.bf16.msrb.mxu0 %v10082_v53  ;;  %v5799_v15 = vpop.f32.mrf.mxu2  ;;  %v10399_v59 = vld [vmem:[#allocation2 + $0x1758] sm:$0xf0]  ;;  %v10018_v53 = vor.u32 %v11772_v47, %v10015_v48  ;;  %v10274_v0 = vor.u32 %v11836_v52, %v10271_v17  ;;  %v11768_v2 = vld [vmem:[#allocation2 + $0x142c] sm:$0xf]  ;;  %v11949_v47 = vld [vmem:[#allocation6 + $0x1cc] sm:$0xf0] }
 0x307   :  { %6038 = vmatpush.bf16.msrb.mxu1 %v10210_v44  ;;  %v5800_v57 = vadd.f32 %v5799_v15, %v5787_v39  ;;  %v5812_v58 = vpop.f32.mrf.mxu3  ;;  %v11800_v3 = vld [vmem:[#allocation2 + $0x152c] sm:$0xf]  ;;  %v5788_v4 = vpop.f32.mrf.mxu1  ;;  %v10402_v26 = vor.u32 %v11868_v41, %v10399_v59  ;;  %v10127_v36 = vld [vmem:[#allocation2 + $0x1538] sm:$0xf0]  ;;  %v10837_v48 = vld [vmem:[#allocation6 + $0x2c0] sm:$0xf] }
 0x308   :  { %6051 = vmatpush.bf16.msrb.mxu2 %v10338_v60  ;;  %v5775_v60 = vpop.f32.mrf.mxu0  ;;  %v11832_v29 = vld [vmem:[#allocation2 + $0x162c] sm:$0xf]  ;;  %v9983_v33 = vld [vmem:[#allocation2 + $0x1418] sm:$0xf0]  ;;  %v10130_v18 = vor.u32 %v11800_v3, %v10127_v36  ;;  %v10838_v51 = vor.u32 %v11981_v50, %v10837_v48  ;;  %v10565_v52 = vld [vmem:[#allocation6 + $0xa0] sm:$0xf] }
 0x309   :  { %6064 = vmatpush.bf16.msrb.mxu3 %v10466_v25  ;;  %v12516_v44 = vadd.f32 %v5812_v58, %v5800_v57  ;;  %v9999_v25 = vld [vmem:[#allocation2 + $0x1438] sm:$0xf0]  ;;  %v11864_v30 = vld [vmem:[#allocation2 + $0x172c] sm:$0xf]  ;;  %v11913_v17 = vld [vmem:[#allocation6 + $0xac] sm:$0xf0] }
 0x30a   :  { %6026 = vmatpush.bf16.msrb.mxu0 %v10066_v55  ;;  %v10255_v55 = vld [vmem:[#allocation2 + $0x1638] sm:$0xf0]  ;;  %v11764_v37 = vld [vmem:[#allocation2 + $0x140c] sm:$0xf]  ;;  %v10693_v57 = vld [vmem:[#allocation6 + $0x1a0] sm:$0xf] }
 0x30b   :  { %6039 = vmatpush.bf16.msrb.mxu1 %v10194_v56  ;;  %v10383_v56 = vld [vmem:[#allocation2 + $0x1738] sm:$0xf0]  ;;  %v10258_v8 = vor.u32 %v11832_v29, %v10255_v55  ;;  %v11828_v28 = vld [vmem:[#allocation2 + $0x160c] sm:$0xf]  ;;  %v9986_v1 = vor.u32 %v11764_v37, %v9983_v33  ;;  %v11945_v58 = vld [vmem:[#allocation6 + $0x1ac] sm:$0xf0] }
 0x30c   :  { %6052 = vmatpush.bf16.msrb.mxu2 %v10322_v23  ;;  %v10002_v23 = vor.u32 %v11768_v2, %v9999_v25  ;;  %v10111_v45 = vld [vmem:[#allocation2 + $0x1518] sm:$0xf0]  ;;  %v10386_v9 = vor.u32 %v11864_v30, %v10383_v56  ;;  %v10821_v41 = vld [vmem:[#allocation6 + $0x2a0] sm:$0xf]  ;;  %v11977_v59 = vld [vmem:[#allocation6 + $0x2ac] sm:$0xf0]  ;;  %v10694_v60 = vor.u32 %v11945_v58, %v10693_v57 }
 0x30d   :  { %6065 = vmatpush.bf16.msrb.mxu3 %v10450_v5  ;;  %v11796_v5 = vld [vmem:[#allocation2 + $0x150c] sm:$0xf]  ;;  %v10239_v31 = vld [vmem:[#allocation2 + $0x1618] sm:$0xf0]  ;;  %v11909_v2 = vld [vmem:[#allocation6 + $0x8c] sm:$0xf0] }
 0x30e   :  { %6027 = vmatpush.bf16.msrb.mxu0 %v10050_v49  ;;  %v5801_v46 = vpop.f32.mrf.mxu2  ;;  %v11860_v49 = vld [vmem:[#allocation2 + $0x170c] sm:$0xf]  ;;  %v10367_v10 = vld [vmem:[#allocation2 + $0x1718] sm:$0xf0]  ;;  %v10114_v24 = vor.u32 %v11796_v5, %v10111_v45  ;;  %v10242_v27 = vor.u32 %v11828_v28, %v10239_v31  ;;  %v10677_v25 = vld [vmem:[#allocation6 + $0x180] sm:$0xf] }
 0x30f   :  { %6040 = vmatpush.bf16.msrb.mxu1 %v10178_v35  ;;  %v5814_v35 = vpop.f32.mrf.mxu3  ;;  %v10370_v32 = vor.u32 %v11860_v49, %v10367_v10  ;;  %v11941_v3 = vld [vmem:[#allocation6 + $0x18c] sm:$0xf0]  ;;  %v10661_v55 = vld [vmem:[#allocation6 + $0x160] sm:$0xf]  ;;  %v10599_v58 = vld [vmem:[#allocation6 + $0xf0] sm:$0xf0] }
 0x310   :  { %6053 = vmatpush.bf16.msrb.mxu2 %v10306_v19  ;;  %v10597_v19 = vld [vmem:[#allocation6 + $0xe0] sm:$0xf]  ;;  %v11973_v4 = vld [vmem:[#allocation6 + $0x28c] sm:$0xf0] }
 0x311   :  { %6066 = vmatpush.bf16.msrb.mxu3 %v10434_v63  ;;  %v11985_v63 = vld [vmem:[#allocation6 + $0x2ec] sm:$0xf0]  ;;  %v10598_v14 = vor.u32 %v11921_v13, %v10597_v19  ;;  %v10789_v37 = vld [vmem:[#allocation6 + $0x260] sm:$0xf] }
 0x312   :  { %6028 = vmatpush.bf16.msrb.mxu0 %v10034_v40  ;;  %v10854_v39 = vor.u32 %v11985_v63, %v10853_v21  ;;  %v10581_v40 = vld [vmem:[#allocation6 + $0xc0] sm:$0xf]  ;;  %v11905_v29 = vld [vmem:[#allocation6 + $0x6c] sm:$0xf0] }
 0x313   :  { %6041 = vmatpush.bf16.msrb.mxu1 %v10162_v6  ;;  %v11917_v6 = vld [vmem:[#allocation6 + $0xcc] sm:$0xf0]  ;;  %v10517_v28 = vld [vmem:[#allocation6 + $0x40] sm:$0xf] }
 0x314   :  { %6054 = vmatpush.bf16.msrb.mxu2 %v10290_v42  ;;  %v10709_v42 = vld [vmem:[#allocation6 + $0x1c0] sm:$0xf]  ;;  %v10582_v15 = vor.u32 %v11917_v6, %v10581_v40  ;;  %v11969_v33 = vld [vmem:[#allocation6 + $0x26c] sm:$0xf0] }
 0x315   :  { %6067 = vmatpush.bf16.msrb.mxu3 %v10418_v38  ;;  %v10710_v38 = vor.u32 %v11949_v47, %v10709_v42  ;;  %v10790_v45 = vor.u32 %v11969_v33, %v10789_v37  ;;  %v11901_v46 = vld [vmem:[#allocation6 + $0x4c] sm:$0xf0]  ;;  %v10773_v10 = vld [vmem:[#allocation6 + $0x240] sm:$0xf]  ;;  %v11911_v37 = vld [vmem:[#allocation6 + $0xa4] sm:$0xf] }
 0x316   :  { %6029 = vmatpush.bf16.msrb.mxu0 %v10018_v53  ;;  %v10566_v53 = vor.u32 %v11913_v17, %v10565_v52  ;;  %v11933_v49 = vld [vmem:[#allocation6 + $0x14c] sm:$0xf0]  ;;  %v10518_v13 = vor.u32 %v11901_v46, %v10517_v28  ;;  %v10501_v63 = vld [vmem:[#allocation6 + $0x20] sm:$0xf]  ;;  %v11919_v17 = vld [vmem:[#allocation6 + $0xe4] sm:$0xf] }
 0x317   :  { %6042 = vmatpush.bf16.msrb.mxu1 %v10146_v61  ;;  %v10822_v61 = vor.u32 %v11977_v59, %v10821_v41  ;;  %v11965_v35 = vld [vmem:[#allocation6 + $0x24c] sm:$0xf0]  ;;  %v10485_v6 = vld [vmem:[#allocation6] sm:$0xf]  ;;  %v11951_v41 = vld [vmem:[#allocation6 + $0x1e4] sm:$0xf] }
 0x318   :  { %6055 = vmatpush.bf16.msrb.mxu2 %v10274_v0  ;;  %v10549_v0 = vld [vmem:[#allocation6 + $0x80] sm:$0xf]  ;;  %v10774_v21 = vor.u32 %v11965_v35, %v10773_v10  ;;  %v11893_v48 = vld [vmem:[#allocation6 + $0xc] sm:$0xf0]  ;;  %v10727_v59 = vld [vmem:[#allocation6 + $0x1f0] sm:$0xf0] }
 0x319   :  { %6068 = vmatpush.bf16.msrb.mxu3 %v10402_v26  ;;  %v10613_v50 = vld [vmem:[#allocation6 + $0x100] sm:$0xf]  ;;  %v11957_v52 = vld [vmem:[#allocation6 + $0x20c] sm:$0xf0]  ;;  %v10823_v28 = vld [vmem:[#allocation6 + $0x2b0] sm:$0xf0] }
 0x31a   :  { %6030 = vmatpush.bf16.msrb.mxu0 %v10002_v23  ;;  %v11937_v23 = vld [vmem:[#allocation6 + $0x16c] sm:$0xf0]  ;;  %v10551_v10 = vld [vmem:[#allocation6 + $0x90] sm:$0xf0]  ;;  %v11939_v35 = vld [vmem:[#allocation6 + $0x184] sm:$0xf] }
 0x31b   :  { %6043 = vmatpush.bf16.msrb.mxu1 %v10130_v18  ;;  %v10662_v5 = vor.u32 %v11937_v23, %v10661_v55  ;;  %v11979_v55 = vld [vmem:[#allocation6 + $0x2c4] sm:$0xf] }
 0x31c   :  { %6056 = vmatpush.bf16.msrb.mxu2 %v10258_v8 }
 0x31d   :  { %6069 = vmatpush.bf16.msrb.mxu3 %v10386_v9  ;;  %v10645_v9 = vld [vmem:[#allocation6 + $0x140] sm:$0xf] }
 0x31e   :  { %6031 = vmatpush.bf16.msrb.mxu0 %v9986_v1  ;;  %v5825_v26 = vpop.f32.mrf.mxu0  ;;  %v10646_v22 = vor.u32 %v11933_v49, %v10645_v9 }
 0x31f   :  { %6044 = vmatpush.bf16.msrb.mxu1 %v10114_v24  ;;  %v5826_v30 = vadd.f32 %v5825_v26, %v12516_v44  ;;  %v5838_v56 = vpop.f32.mrf.mxu1  ;;  %v11897_v24 = vld [vmem:[#allocation6 + $0x2c] sm:$0xf0]  ;;  %v11915_v26 = vld [vmem:[#allocation6 + $0xc4] sm:$0xf] }
 0x320   :  { %6057 = vmatpush.bf16.msrb.mxu2 %v10242_v27  ;;  %v10629_v27 = vld [vmem:[#allocation6 + $0x120] sm:$0xf]  ;;  %v10502_v40 = vor.u32 %v11897_v24, %v10501_v63 }
 0x321   :  { %6070 = vmatpush.bf16.msrb.mxu3 %v10370_v32  ;;  %6032 = vmatmul.bf16.vlgmr.msrb.gmra.mxu0 %v12387_v7  ;;  %v10805_v7 = vld [vmem:[#allocation6 + $0x280] sm:$0xf]  ;;  %v5839_v18 = vadd.f32 %v5838_v56, %v5826_v30  ;;  %v10839_v30 = vld [vmem:[#allocation6 + $0x2d0] sm:$0xf0] }
 0x322   :  { %6862 = vmatpush.bf16.msra.mxu0 %v10598_v14  ;;  %6045 = vmatmul.bf16.vlgmr.msrb.gmra.mxu1 %v12391_v12  ;;  %v10550_v12 = vor.u32 %v11909_v2, %v10549_v0  ;;  %v10806_v36 = vor.u32 %v11973_v4, %v10805_v7  ;;  %v11929_v14 = vld [vmem:[#allocation6 + $0x12c] sm:$0xf0]  ;;  %v6076_v0 = vmax.f32 %v12428_v54, 0.0  ;;  %v6077_v2 = vmax.f32 %v12469_v43, 0.0 }
 0x323   :  { %6875 = vmatpush.bf16.msra.mxu1 %v10726_v34  ;;  %6058 = vmatmul.bf16.vlgmr.msrb.gmra.mxu2 %v12389_v11  ;;  %v10678_v11 = vor.u32 %v11941_v3, %v10677_v25  ;;  %v10757_v34 = vld [vmem:[#allocation6 + $0x220] sm:$0xf]  ;;  %v10630_v42 = vor.u32 %v11929_v14, %v10629_v27  ;;  %v6078_v7 = vmax.f32 %v12510_v62, 0.0  ;;  %v10602_v4 = vor.u32 %v11919_v17, %v10599_v58  ;;  %v11903_v27 = vld [vmem:[#allocation6 + $0x64] sm:$0xf] }
 0x324   :  { %6888 = vmatpush.bf16.msra.mxu2 %v10854_v39  ;;  %6071 = vmatmul.bf16.vlgmr.msrb.gmra.mxu3 %v12393_v16  ;;  %v10533_v16 = vld [vmem:[#allocation6 + $0x60] sm:$0xf]  ;;  %v11961_v39 = vld [vmem:[#allocation6 + $0x22c] sm:$0xf0]  ;;  %v12528_v56 = vpack.c.bf16 %v6076_v0, %v6076_v0  ;;  %v12530_v54 = vpack.c.bf16 %v6077_v2, %v6077_v2  ;;  %v10842_v33 = vor.u32 %v11979_v55, %v10839_v30  ;;  %v10535_v14 = vld [vmem:[#allocation6 + $0x70] sm:$0xf0] }
 0x325   :  { %v10534_v8 = vor.u32 %v11905_v29, %v10533_v16  ;;  %v10758_v47 = vor.u32 %v11961_v39, %v10757_v34  ;;  %v11947_v16 = vld [vmem:[#allocation6 + $0x1c4] sm:$0xf]  ;;  %v10711_v29 = vld [vmem:[#allocation6 + $0x1d0] sm:$0xf0]  ;;  %v12532_v43 = vpack.c.bf16 %v6078_v7, %v6078_v7 }
 0x326   :  { %6863 = vmatpush.bf16.msra.mxu0 %v10582_v15  ;;  %v5851_v31 = vpop.f32.mrf.mxu2  ;;  %v5827_v1 = vpop.f32.mrf.mxu0  ;;  %v11925_v15 = vld [vmem:[#allocation6 + $0x10c] sm:$0xf0]  ;;  %v10714_v23 = vor.u32 %v11947_v16, %v10711_v29  ;;  %v11935_v34 = vld [vmem:[#allocation6 + $0x164] sm:$0xf]  ;;  %v10663_v39 = vld [vmem:[#allocation6 + $0x170] sm:$0xf0] }
 0x327   :  { %6876 = vmatpush.bf16.msra.mxu1 %v10710_v38  ;;  %v5852_v19 = vadd.f32 %v5851_v31, %v5839_v18  ;;  %v5864_v44 = vpop.f32.mrf.mxu3  ;;  %v5840_v32 = vpop.f32.mrf.mxu1  ;;  %v10614_v25 = vor.u32 %v11925_v15, %v10613_v50  ;;  %v10567_v18 = vld [vmem:[#allocation6 + $0xb0] sm:$0xf0]  ;;  %v11907_v31 = vld [vmem:[#allocation6 + $0x84] sm:$0xf] }
 0x328   :  { %6889 = vmatpush.bf16.msra.mxu2 %v10838_v51  ;;  %v10741_v51 = vld [vmem:[#allocation6 + $0x200] sm:$0xf]  ;;  %v10570_v46 = vor.u32 %v11911_v37, %v10567_v18  ;;  %v11899_v50 = vld [vmem:[#allocation6 + $0x44] sm:$0xf]  ;;  %v10615_v30 = vld [vmem:[#allocation6 + $0x110] sm:$0xf0] }
 0x329   :  { %v12523_v20 = vadd.f32 %v5864_v44, %v5852_v19  ;;  %v10742_v3 = vor.u32 %v11957_v52, %v10741_v51  ;;  %v10679_v19 = vld [vmem:[#allocation6 + $0x190] sm:$0xf0]  ;;  %v11971_v44 = vld [vmem:[#allocation6 + $0x284] sm:$0xf]  ;;  %v12017_v18 = vld [vmem:[#allocation6 + $0x3ec] sm:$0xf0] }
 0x32a   :  { %6864 = vmatpush.bf16.msra.mxu0 %v10566_v53  ;;  %v10486_v53 = vor.u32 %v11893_v48, %v10485_v6  ;;  %v10682_v63 = vor.u32 %v11939_v35, %v10679_v19  ;;  %v11967_v6 = vld [vmem:[#allocation6 + $0x264] sm:$0xf]  ;;  %v10666_v48 = vor.u32 %v11935_v34, %v10663_v39  ;;  %v10647_v51 = vld [vmem:[#allocation6 + $0x150] sm:$0xf0]  ;;  %v10845_v34 = vld [vmem:[#allocation6 + $0x2c8] sm:$0xf] }
 0x32b   :  { %6877 = vmatpush.bf16.msra.mxu1 %v10694_v60  ;;  %v11983_v60 = vld [vmem:[#allocation6 + $0x2e4] sm:$0xf]  ;;  %v10743_v37 = vld [vmem:[#allocation6 + $0x210] sm:$0xf0]  ;;  %v11982_v39 = vld [vmem:[#allocation6 + $0x2d4] sm:$0xf0] }
 0x32c   :  { %6890 = vmatpush.bf16.msra.mxu2 %v10822_v61  ;;  %v10855_v61 = vld [vmem:[#allocation6 + $0x2f0] sm:$0xf0]  ;;  %v11963_v17 = vld [vmem:[#allocation6 + $0x244] sm:$0xf] }
 0x32d   :  { %v11927_v7 = vld [vmem:[#allocation6 + $0x124] sm:$0xf] }
 0x32e   :  { %6865 = vmatpush.bf16.msra.mxu0 %v10550_v12  ;;  %v5853_v38 = vpop.f32.mrf.mxu2  ;;  %v10730_v12 = vor.u32 %v11951_v41, %v10727_v59  ;;  %v11923_v55 = vld [vmem:[#allocation6 + $0x104] sm:$0xf] }
 0x32f   :  { %6878 = vmatpush.bf16.msra.mxu1 %v10678_v11  ;;  %v5866_v57 = vpop.f32.mrf.mxu3  ;;  %v10858_v11 = vor.u32 %v11983_v60, %v10855_v61  ;;  %v11931_v38 = vld [vmem:[#allocation6 + $0x144] sm:$0xf]  ;;  %v10618_v19 = vor.u32 %v11923_v55, %v10615_v30 }
 0x330   :  { %6891 = vmatpush.bf16.msra.mxu2 %v10806_v36  ;;  %v10583_v36 = vld [vmem:[#allocation6 + $0xd0] sm:$0xf0]  ;;  %v10650_v60 = vor.u32 %v11931_v38, %v10647_v51  ;;  %v11895_v61 = vld [vmem:[#allocation6 + $0x24] sm:$0xf]  ;;  %v10829_v38 = vld [vmem:[#allocation6 + $0x2a8] sm:$0xf] }
 0x331   :  { %v10586_v62 = vor.u32 %v11915_v26, %v10583_v36  ;;  %v10775_v57 = vld [vmem:[#allocation6 + $0x250] sm:$0xf0]  ;;  %v11978_v51 = vld [vmem:[#allocation6 + $0x2b4] sm:$0xf0] }
 0x332   :  { %6866 = vmatpush.bf16.msra.mxu0 %v10534_v8  ;;  %v11943_v8 = vld [vmem:[#allocation6 + $0x1a4] sm:$0xf]  ;;  %v10759_v26 = vld [vmem:[#allocation6 + $0x230] sm:$0xf0] }
 0x333   :  { %6879 = vmatpush.bf16.msra.mxu1 %v10662_v5  ;;  %v10695_v5 = vld [vmem:[#allocation6 + $0x1b0] sm:$0xf0] }
 0x334   :  { %6892 = vmatpush.bf16.msra.mxu2 %v10790_v45  ;;  %v11975_v45 = vld [vmem:[#allocation6 + $0x2a4] sm:$0xf]  ;;  %v10698_v9 = vor.u32 %v11943_v8, %v10695_v5  ;;  %v10487_v36 = vld [vmem:[#allocation6 + $0x10] sm:$0xf0]  ;;  %v10605_v8 = vld [vmem:[#allocation6 + $0xe8] sm:$0xf] }
 0x335   :  { %v10826_v49 = vor.u32 %v11975_v45, %v10823_v28  ;;  %v11922_v5 = vld [vmem:[#allocation6 + $0xf4] sm:$0xf0]  ;;  %v10733_v45 = vld [vmem:[#allocation6 + $0x1e8] sm:$0xf] }
 0x336   :  { %6867 = vmatpush.bf16.msra.mxu0 %v10518_v13  ;;  %v10807_v13 = vld [vmem:[#allocation6 + $0x290] sm:$0xf0] }
 0x337   :  { %6880 = vmatpush.bf16.msra.mxu1 %v10646_v22  ;;  %v10810_v32 = vor.u32 %v11971_v44, %v10807_v13  ;;  %v10606_v13 = vor.u32 %v11922_v5, %v10605_v8  ;;  %v11970_v8 = vld [vmem:[#allocation6 + $0x274] sm:$0xf0] }
 0x338   :  { %6893 = vmatpush.bf16.msra.mxu2 %v10774_v21  ;;  %v10554_v21 = vor.u32 %v11907_v31, %v10551_v10  ;;  %v10861_v31 = vld [vmem:[#allocation6 + $0x2e8] sm:$0xf] }
 0x33a   :  { %6868 = vmatpush.bf16.msra.mxu0 %v10502_v40 }
 0x33b   :  { %6881 = vmatpush.bf16.msra.mxu1 %v10630_v42  ;;  %v10791_v42 = vld [vmem:[#allocation6 + $0x270] sm:$0xf0] }
 0x33c   :  { %6894 = vmatpush.bf16.msra.mxu2 %v10758_v47  ;;  %v10538_v47 = vor.u32 %v11903_v27, %v10535_v14  ;;  %v10794_v15 = vor.u32 %v11967_v6, %v10791_v42  ;;  %v10965_v27 = vld [vmem:[#allocation6 + $0x3c0] sm:$0xf]  ;;  %v11950_v14 = vld [vmem:[#allocation6 + $0x1d4] sm:$0xf0]  ;;  %v10573_v42 = vld [vmem:[#allocation6 + $0xa8] sm:$0xf] }
 0x33e   :  { %6869 = vmatpush.bf16.msra.mxu0 %v10486_v53  ;;  %v5877_v1 = vpop.f32.mrf.mxu0 }
 0x33f   :  { %6882 = vmatpush.bf16.msra.mxu1 %v10614_v25  ;;  %v5878_v22 = vadd.f32 %v5877_v1, %v12523_v20  ;;  %v5890_v24 = vpop.f32.mrf.mxu1  ;;  %v10519_v20 = vld [vmem:[#allocation6 + $0x50] sm:$0xf0]  ;;  %v10778_v25 = vor.u32 %v11963_v17, %v10775_v57  ;;  %v10589_v1 = vld [vmem:[#allocation6 + $0xc8] sm:$0xf]  ;;  %v12009_v17 = vld [vmem:[#allocation6 + $0x3ac] sm:$0xf0] }
 0x340   :  { %6895 = vmatpush.bf16.msra.mxu2 %v10742_v3  ;;  %v10522_v53 = vor.u32 %v11899_v50, %v10519_v20  ;;  %v10503_v3 = vld [vmem:[#allocation6 + $0x30] sm:$0xf0]  ;;  %v10846_v50 = vor.u32 %v11982_v39, %v10845_v34  ;;  %v11946_v20 = vld [vmem:[#allocation6 + $0x1b4] sm:$0xf0]  ;;  %v10637_v39 = vld [vmem:[#allocation6 + $0x128] sm:$0xf] }
 0x341   :  { %6870 = vmatmul.bf16.vlgmr.msra.gmra.mxu0 %v12528_v56  ;;  %v5891_v40 = vadd.f32 %v5890_v24, %v5878_v22  ;;  %v10506_v16 = vor.u32 %v11895_v61, %v10503_v3  ;;  %v11918_v22 = vld [vmem:[#allocation6 + $0xd4] sm:$0xf0]  ;;  %v10717_v24 = vld [vmem:[#allocation6 + $0x1c8] sm:$0xf] }
 0x342   :  { %6914 = vmatpush.bf16.msrb.mxu0 %v10602_v4  ;;  %6883 = vmatmul.bf16.vlgmr.msra.gmra.mxu1 %v12530_v54  ;;  %v10631_v4 = vld [vmem:[#allocation6 + $0x130] sm:$0xf0]  ;;  %v10590_v6 = vor.u32 %v11918_v22, %v10589_v1  ;;  %v10685_v61 = vld [vmem:[#allocation6 + $0x188] sm:$0xf]  ;;  %v11942_v3 = vld [vmem:[#allocation6 + $0x194] sm:$0xf0] }
 0x343   :  { %6927 = vmatpush.bf16.msrb.mxu1 %v10730_v12  ;;  %6896 = vmatmul.bf16.vlgmr.msra.gmra.mxu2 %v12532_v43  ;;  %v11959_v12 = vld [vmem:[#allocation6 + $0x224] sm:$0xf]  ;;  %v10634_v29 = vor.u32 %v11927_v7, %v10631_v4  ;;  %v10813_v7 = vld [vmem:[#allocation6 + $0x288] sm:$0xf]  ;;  %v11974_v4 = vld [vmem:[#allocation6 + $0x294] sm:$0xf0] }
 0x344   :  { %6940 = vmatpush.bf16.msrb.mxu2 %v10858_v11  ;;  %v11891_v11 = vld [vmem:[#allocation6 + $0x4] sm:$0xf]  ;;  %v10814_v55 = vor.u32 %v11974_v4, %v10813_v7  ;;  %v11952_v7 = vld [vmem:[#allocation6 + $0x1ec] sm:$0xf]  ;;  %v10735_v4 = vld [vmem:[#allocation6 + $0x1f8] sm:$0xf0] }
 0x345   :  { %v10490_v35 = vor.u32 %v11891_v11, %v10487_v36  ;;  %v10541_v36 = vld [vmem:[#allocation6 + $0x68] sm:$0xf] }
 0x346   :  { %6915 = vmatpush.bf16.msrb.mxu0 %v10586_v62  ;;  %v5903_v52 = vpop.f32.mrf.mxu2  ;;  %v5879_v59 = vpop.f32.mrf.mxu0  ;;  %v11955_v62 = vld [vmem:[#allocation6 + $0x204] sm:$0xf] }
 0x347   :  { %6928 = vmatpush.bf16.msrb.mxu1 %v10714_v23  ;;  %v5904_v58 = vadd.f32 %v5903_v52, %v5891_v40  ;;  %v5916_v41 = vpop.f32.mrf.mxu3  ;;  %v5892_v0 = vpop.f32.mrf.mxu1  ;;  %v10762_v23 = vor.u32 %v11959_v12, %v10759_v26  ;;  %v10746_v44 = vor.u32 %v11955_v62, %v10743_v37  ;;  %v10949_v52 = vld [vmem:[#allocation6 + $0x3a0] sm:$0xf]  ;;  %v11910_v59 = vld [vmem:[#allocation6 + $0x94] sm:$0xf0]  ;;  %v10669_v62 = vld [vmem:[#allocation6 + $0x168] sm:$0xf] }
 0x348   :  { %6941 = vmatpush.bf16.msrb.mxu2 %v10842_v33  ;;  %v10981_v33 = vld [vmem:[#allocation6 + $0x3e0] sm:$0xf]  ;;  %v10950_v57 = vor.u32 %v12009_v17, %v10949_v52  ;;  %v12001_v37 = vld [vmem:[#allocation6 + $0x36c] sm:$0xf0]  ;;  %v10621_v52 = vld [vmem:[#allocation6 + $0x108] sm:$0xf] }
 0x349   :  { %v12538_v2 = vadd.f32 %v5916_v41, %v5904_v58  ;;  %v10557_v41 = vld [vmem:[#allocation6 + $0x88] sm:$0xf]  ;;  %v10933_v0 = vld [vmem:[#allocation6 + $0x380] sm:$0xf]  ;;  %v11926_v17 = vld [vmem:[#allocation6 + $0x114] sm:$0xf0] }
 0x34a   :  { %6916 = vmatpush.bf16.msrb.mxu0 %v10570_v46  ;;  %v10982_v46 = vor.u32 %v12017_v18, %v10981_v33  ;;  %v10558_v11 = vor.u32 %v11910_v59, %v10557_v41  ;;  %v11938_v33 = vld [vmem:[#allocation6 + $0x174] sm:$0xf0]  ;;  %v10797_v18 = vld [vmem:[#allocation6 + $0x268] sm:$0xf] }
 0x34b   :  { %6929 = vmatpush.bf16.msrb.mxu1 %v10698_v9  ;;  %v11954_v9 = vld [vmem:[#allocation6 + $0x1f4] sm:$0xf0] }
 0x34c   :  { %6942 = vmatpush.bf16.msrb.mxu2 %v10826_v49  ;;  %v11986_v49 = vld [vmem:[#allocation6 + $0x2f4] sm:$0xf0]  ;;  %6901 = vmatpush.bf16.msra.mxu3 %v10982_v46 }
 0x34d   :  { %v11902_v46 = vld [vmem:[#allocation6 + $0x54] sm:$0xf0] }
 0x34e   :  { %6917 = vmatpush.bf16.msrb.mxu0 %v10554_v21  ;;  %v5905_v28 = vpop.f32.mrf.mxu2  ;;  %v10734_v21 = vor.u32 %v11954_v9, %v10733_v45  ;;  %v10670_v9 = vor.u32 %v11938_v33, %v10669_v62  ;;  %v11958_v59 = vld [vmem:[#allocation6 + $0x214] sm:$0xf0] }
 0x34f   :  { %6930 = vmatpush.bf16.msrb.mxu1 %v10682_v63  ;;  %v5918_v10 = vpop.f32.mrf.mxu3  ;;  %v10862_v63 = vor.u32 %v11986_v49, %v10861_v31  ;;  %v10525_v28 = vld [vmem:[#allocation6 + $0x48] sm:$0xf]  ;;  %v10798_v31 = vor.u32 %v11970_v8, %v10797_v18  ;;  %v10738_v18 = vor.u32 %v11952_v7, %v10735_v4  ;;  %v11916_v8 = vld [vmem:[#allocation6 + $0xcc] sm:$0xf]  ;;  %v10671_v4 = vld [vmem:[#allocation6 + $0x178] sm:$0xf0] }
 0x350   :  { %6943 = vmatpush.bf16.msrb.mxu2 %v10810_v32  ;;  %v12013_v32 = vld [vmem:[#allocation6 + $0x3cc] sm:$0xf0]  ;;  %v10653_v49 = vld [vmem:[#allocation6 + $0x148] sm:$0xf]  ;;  %v10901_v10 = vld [vmem:[#allocation6 + $0x340] sm:$0xf] }
 0x351   :  { %v10966_v40 = vor.u32 %v12013_v32, %v10965_v27  ;;  %v11898_v27 = vld [vmem:[#allocation6 + $0x34] sm:$0xf0]  ;;  %v11936_v7 = vld [vmem:[#allocation6 + $0x16c] sm:$0xf] }
 0x352   :  { %6918 = vmatpush.bf16.msrb.mxu0 %v10538_v47  ;;  %v11914_v47 = vld [vmem:[#allocation6 + $0xb4] sm:$0xf0] }
 0x353   :  { %6931 = vmatpush.bf16.msrb.mxu1 %v10666_v48  ;;  %v10718_v48 = vor.u32 %v11950_v14, %v10717_v24  ;;  %6902 = vmatpush.bf16.msra.mxu3 %v10966_v40  ;;  %v10574_v58 = vor.u32 %v11914_v47, %v10573_v42  ;;  %v10509_v24 = vld [vmem:[#allocation6 + $0x28] sm:$0xf]  ;;  %v11930_v40 = vld [vmem:[#allocation6 + $0x134] sm:$0xf0] }
 0x354   :  { %6944 = vmatpush.bf16.msrb.mxu2 %v10794_v15  ;;  %v10701_v15 = vld [vmem:[#allocation6 + $0x1a8] sm:$0xf]  ;;  %v11962_v47 = vld [vmem:[#allocation6 + $0x234] sm:$0xf0] }
 0x356   :  { %6919 = vmatpush.bf16.msrb.mxu0 %v10522_v53  ;;  %v10702_v53 = vor.u32 %v11946_v20, %v10701_v15  ;;  %v10493_v15 = vld [vmem:[#allocation6 + $0x8] sm:$0xf]  ;;  %v11894_v20 = vld [vmem:[#allocation6 + $0x14] sm:$0xf0] }
 0x357   :  { %6932 = vmatpush.bf16.msrb.mxu1 %v10650_v60  ;;  %v10830_v60 = vor.u32 %v11978_v51, %v10829_v38  ;;  %6903 = vmatpush.bf16.msra.mxu3 %v10950_v57  ;;  %v10510_v51 = vor.u32 %v11898_v27, %v10509_v24  ;;  %v10749_v57 = vld [vmem:[#allocation6 + $0x208] sm:$0xf]  ;;  %v10575_v27 = vld [vmem:[#allocation6 + $0xb8] sm:$0xf0] }
 0x358   :  { %6945 = vmatpush.bf16.msrb.mxu2 %v10778_v25  ;;  %v12005_v25 = vld [vmem:[#allocation6 + $0x38c] sm:$0xf0] }
 0x359   :  { %v10934_v12 = vor.u32 %v12005_v25, %v10933_v0  ;;  %v12015_v0 = vld [vmem:[#allocation6 + $0x3e4] sm:$0xf]  ;;  %v10983_v25 = vld [vmem:[#allocation6 + $0x3f0] sm:$0xf0] }
 0x35a   :  { %6920 = vmatpush.bf16.msrb.mxu0 %v10506_v16  ;;  %v11906_v16 = vld [vmem:[#allocation6 + $0x74] sm:$0xf0]  ;;  %v10986_v62 = vor.u32 %v12015_v0, %v10983_v25 }
 0x35b   :  { %6933 = vmatpush.bf16.msrb.mxu1 %v10634_v29  ;;  %v10686_v29 = vor.u32 %v11942_v3, %v10685_v61  ;;  %6904 = vmatpush.bf16.msra.mxu3 %v10934_v12  ;;  %v10542_v45 = vor.u32 %v11906_v16, %v10541_v36  ;;  %v11920_v61 = vld [vmem:[#allocation6 + $0xec] sm:$0xf]  ;;  %v10607_v3 = vld [vmem:[#allocation6 + $0xf8] sm:$0xf0]  ;;  %v10494_v36 = vor.u32 %v11894_v20, %v10493_v15 }
 0x35c   :  { %6946 = vmatpush.bf16.msrb.mxu2 %v10762_v23  ;;  %v10917_v23 = vld [vmem:[#allocation6 + $0x360] sm:$0xf]  ;;  %v11984_v16 = vld [vmem:[#allocation6 + $0x2ec] sm:$0xf]  ;;  %v10610_v33 = vor.u32 %v11920_v61, %v10607_v3  ;;  %v10559_v20 = vld [vmem:[#allocation6 + $0x98] sm:$0xf0] }
 0x35d   :  { %v10918_v5 = vor.u32 %v12001_v37, %v10917_v23  ;;  %v10622_v23 = vor.u32 %v11926_v17, %v10621_v52  ;;  %v10750_v37 = vor.u32 %v11958_v59, %v10749_v57  ;;  %v11972_v52 = vld [vmem:[#allocation6 + $0x28c] sm:$0xf]  ;;  %v10815_v17 = vld [vmem:[#allocation6 + $0x298] sm:$0xf0]  ;;  %v10919_v61 = vld [vmem:[#allocation6 + $0x370] sm:$0xf0] }
 0x35e   :  { %6921 = vmatpush.bf16.msrb.mxu0 %v10490_v35  ;;  %v12543_v26 = vpop.f32.mrf.mxu0  ;;  %v11997_v35 = vld [vmem:[#allocation6 + $0x34c] sm:$0xf0]  ;;  %v10818_v0 = vor.u32 %v11972_v52, %v10815_v17  ;;  %v10543_v3 = vld [vmem:[#allocation6 + $0x78] sm:$0xf0] }
 0x35f   :  { %6934 = vmatpush.bf16.msrb.mxu1 %v10618_v19  ;;  %v12545_v30 = vpop.f32.mrf.mxu1  ;;  %v11934_v19 = vld [vmem:[#allocation6 + $0x154] sm:$0xf0]  ;;  %6905 = vmatpush.bf16.msra.mxu3 %v10918_v5  ;;  %v10902_v22 = vor.u32 %v11997_v35, %v10901_v10  ;;  %v12011_v5 = vld [vmem:[#allocation6 + $0x3c4] sm:$0xf]  ;;  %v10847_v10 = vld [vmem:[#allocation6 + $0x2d8] sm:$0xf0] }
 0x360   :  { %6947 = vmatpush.bf16.msrb.mxu2 %v10746_v44  ;;  %v10781_v44 = vld [vmem:[#allocation6 + $0x248] sm:$0xf]  ;;  %v10654_v14 = vor.u32 %v11934_v19, %v10653_v49  ;;  %v11980_v49 = vld [vmem:[#allocation6 + $0x2cc] sm:$0xf]  ;;  %v10751_v52 = vld [vmem:[#allocation6 + $0x218] sm:$0xf0] }
 0x361   :  { %6922 = vmatmul.bf16.vlgmr.msrb.gmra.mxu0 %v12528_v56  ;;  %v10850_v24 = vor.u32 %v11980_v49, %v10847_v10 }
 0x362   :  { %6966 = vmatpush.bf16.msra.mxu0 %v10606_v13  ;;  %6935 = vmatmul.bf16.vlgmr.msrb.gmra.mxu1 %v12530_v54  ;;  %v11966_v13 = vld [vmem:[#allocation6 + $0x254] sm:$0xf0] }
 0x363   :  { %6979 = vmatpush.bf16.msra.mxu1 %v10734_v21  ;;  %6948 = vmatmul.bf16.vlgmr.msrb.gmra.mxu2 %v12532_v43  ;;  %v10782_v34 = vor.u32 %v11966_v13, %v10781_v44  ;;  %v11912_v13 = vld [vmem:[#allocation6 + $0xac] sm:$0xf] }
 0x364   :  { %6992 = vmatpush.bf16.msra.mxu2 %v10862_v63  ;;  %v10526_v63 = vor.u32 %v11902_v46, %v10525_v28  ;;  %6906 = vmatpush.bf16.msra.mxu3 %v10902_v22  ;;  %v10591_v46 = vld [vmem:[#allocation6 + $0xd8] sm:$0xf0]  ;;  %v12007_v22 = vld [vmem:[#allocation6 + $0x3a4] sm:$0xf] }
 0x365   :  { %v10594_v19 = vor.u32 %v11916_v8, %v10591_v46  ;;  %v10655_v8 = vld [vmem:[#allocation6 + $0x158] sm:$0xf0] }
 0x366   :  { %6967 = vmatpush.bf16.msra.mxu0 %v10590_v6  ;;  %v12547_v1 = vpop.f32.mrf.mxu2  ;;  %v5931_v32 = vpop.f32.mrf.mxu0  ;;  %v10765_v6 = vld [vmem:[#allocation6 + $0x228] sm:$0xf] }
 0x367   :  { %6980 = vmatpush.bf16.msra.mxu1 %v10718_v48  ;;  %v12549_v21 = vpop.f32.mrf.mxu3  ;;  %v5944_v42 = vpop.f32.mrf.mxu1  ;;  %v10885_v48 = vld [vmem:[#allocation6 + $0x320] sm:$0xf]  ;;  %v10766_v41 = vor.u32 %v11962_v47, %v10765_v6  ;;  %v11944_v32 = vld [vmem:[#allocation6 + $0x1ac] sm:$0xf]  ;;  %v10578_v6 = vor.u32 %v11912_v13, %v10575_v27  ;;  %v10887_v13 = vld [vmem:[#allocation6 + $0x330] sm:$0xf0] }
 0x368   :  { %6993 = vmatpush.bf16.msra.mxu2 %v10846_v50  ;;  %v11993_v50 = vld [vmem:[#allocation6 + $0x32c] sm:$0xf0]  ;;  %v11908_v47 = vld [vmem:[#allocation6 + $0x8c] sm:$0xf]  ;;  %v10639_v27 = vld [vmem:[#allocation6 + $0x138] sm:$0xf0] }
 0x369   :  { %v10886_v38 = vor.u32 %v11993_v50, %v10885_v48  ;;  %v12003_v48 = vld [vmem:[#allocation6 + $0x384] sm:$0xf]  ;;  %v10935_v50 = vld [vmem:[#allocation6 + $0x390] sm:$0xf0] }
 0x36a   :  { %6968 = vmatpush.bf16.msra.mxu0 %v10574_v58  ;;  %v10638_v58 = vor.u32 %v11930_v40, %v10637_v39  ;;  %v10831_v39 = vld [vmem:[#allocation6 + $0x2b8] sm:$0xf0]  ;;  %v10938_v57 = vor.u32 %v12003_v48, %v10935_v50 }
 0x36b   :  { %6981 = vmatpush.bf16.msra.mxu1 %v10702_v53  ;;  %v10869_v53 = vld [vmem:[#allocation6 + $0x300] sm:$0xf]  ;;  %6907 = vmatpush.bf16.msra.mxu3 %v10886_v38  ;;  %v11940_v38 = vld [vmem:[#allocation6 + $0x18c] sm:$0xf]  ;;  %v10495_v50 = vld [vmem:[#allocation6 + $0x18] sm:$0xf0] }
 0x36c   :  { %6994 = vmatpush.bf16.msra.mxu2 %v10830_v60  ;;  %v11989_v60 = vld [vmem:[#allocation6 + $0x30c] sm:$0xf0] }
 0x36e   :  { %6969 = vmatpush.bf16.msra.mxu0 %v10558_v11  ;;  %v5957_v12 = vpop.f32.mrf.mxu2  ;;  %v10870_v11 = vor.u32 %v11989_v60, %v10869_v53  ;;  %v11904_v53 = vld [vmem:[#allocation6 + $0x6c] sm:$0xf]  ;;  %v11999_v60 = vld [vmem:[#allocation6 + $0x364] sm:$0xf] }
 0x36f   :  { %6982 = vmatpush.bf16.msra.mxu1 %v10686_v29  ;;  %v10863_v29 = vld [vmem:[#allocation6 + $0x2f8] sm:$0xf0]  ;;  %v11968_v12 = vld [vmem:[#allocation6 + $0x26c] sm:$0xf] }
 0x370   :  { %6995 = vmatpush.bf16.msra.mxu2 %v10814_v55  ;;  %v5970_v55 = vpop.f32.mrf.mxu3  ;;  %v10866_v28 = vor.u32 %v11984_v16, %v10863_v29  ;;  %6908 = vmatpush.bf16.msra.mxu3 %v10870_v11  ;;  %v10799_v11 = vld [vmem:[#allocation6 + $0x278] sm:$0xf0]  ;;  %v10546_v16 = vor.u32 %v11904_v53, %v10543_v3  ;;  %v10674_v29 = vor.u32 %v11936_v7, %v10671_v4 }
 0x371   :  { %v11900_v55 = vld [vmem:[#allocation6 + $0x4c] sm:$0xf] }
 0x372   :  { %6970 = vmatpush.bf16.msra.mxu0 %v10542_v45  ;;  %v10967_v45 = vld [vmem:[#allocation6 + $0x3d0] sm:$0xf0] }
 0x373   :  { %6983 = vmatpush.bf16.msra.mxu1 %v10670_v9  ;;  %v11948_v9 = vld [vmem:[#allocation6 + $0x1cc] sm:$0xf]  ;;  %v10970_v35 = vor.u32 %v12011_v5, %v10967_v45  ;;  %v10783_v45 = vld [vmem:[#allocation6 + $0x258] sm:$0xf0] }
 0x374   :  { %6996 = vmatpush.bf16.msra.mxu2 %v10798_v31  ;;  %v10719_v31 = vld [vmem:[#allocation6 + $0x1d8] sm:$0xf0]  ;;  %6953 = vmatpush.bf16.msrb.mxu3 %v10986_v62  ;;  %v11995_v62 = vld [vmem:[#allocation6 + $0x344] sm:$0xf]  ;;  %v11964_v5 = vld [vmem:[#allocation6 + $0x24c] sm:$0xf] }
 0x375   :  { %v10722_v44 = vor.u32 %v11948_v9, %v10719_v31  ;;  %v5930_v9 = vadd.f32 %v12543_v26, %v12538_v2 }
 0x376   :  { %6971 = vmatpush.bf16.msra.mxu0 %v10526_v63  ;;  %v10951_v63 = vld [vmem:[#allocation6 + $0x3b0] sm:$0xf0] }
 0x377   :  { %6984 = vmatpush.bf16.msra.mxu1 %v10654_v14  ;;  %v10703_v14 = vld [vmem:[#allocation6 + $0x1b8] sm:$0xf0]  ;;  %v10954_v40 = vor.u32 %v12007_v22, %v10951_v63  ;;  %v10786_v22 = vor.u32 %v11964_v5, %v10783_v45  ;;  %v5943_v2 = vadd.f32 %v12545_v30, %v5930_v9  ;;  %v10957_v5 = vld [vmem:[#allocation6 + $0x3a8] sm:$0xf]  ;;  %v12010_v45 = vld [vmem:[#allocation6 + $0x3b4] sm:$0xf0] }
 0x378   :  { %6997 = vmatpush.bf16.msra.mxu2 %v10782_v34  ;;  %v11976_v34 = vld [vmem:[#allocation6 + $0x2ac] sm:$0xf]  ;;  %6954 = vmatpush.bf16.msrb.mxu3 %v10970_v35  ;;  %v10706_v42 = vor.u32 %v11944_v32, %v10703_v14  ;;  %v10511_v63 = vld [vmem:[#allocation6 + $0x38] sm:$0xf0]  ;;  %v12006_v9 = vld [vmem:[#allocation6 + $0x394] sm:$0xf0] }
 0x379   :  { %v10834_v15 = vor.u32 %v11976_v34, %v10831_v39  ;;  %v11896_v35 = vld [vmem:[#allocation6 + $0x2c] sm:$0xf]  ;;  %v10767_v34 = vld [vmem:[#allocation6 + $0x238] sm:$0xf0] }
 0x37a   :  { %6972 = vmatpush.bf16.msra.mxu0 %v10510_v51  ;;  %v10687_v51 = vld [vmem:[#allocation6 + $0x198] sm:$0xf0]  ;;  %v11960_v14 = vld [vmem:[#allocation6 + $0x22c] sm:$0xf]  ;;  %v10514_v26 = vor.u32 %v11896_v35, %v10511_v63  ;;  %v10925_v35 = vld [vmem:[#allocation6 + $0x368] sm:$0xf] }
 0x37b   :  { %6985 = vmatpush.bf16.msra.mxu1 %v10638_v58  ;;  %v10690_v59 = vor.u32 %v11940_v38, %v10687_v51  ;;  %v10770_v48 = vor.u32 %v11960_v14, %v10767_v34  ;;  %v5956_v38 = vadd.f32 %v12547_v1, %v5943_v2  ;;  %v11956_v51 = vld [vmem:[#allocation6 + $0x20c] sm:$0xf]  ;;  %v10893_v34 = vld [vmem:[#allocation6 + $0x328] sm:$0xf] }
 0x37c   :  { %6998 = vmatpush.bf16.msra.mxu2 %v10766_v41  ;;  %6955 = vmatpush.bf16.msrb.mxu3 %v10954_v40  ;;  %v10562_v41 = vor.u32 %v11908_v47, %v10559_v20  ;;  %v10871_v47 = vld [vmem:[#allocation6 + $0x310] sm:$0xf0]  ;;  %v10623_v20 = vld [vmem:[#allocation6 + $0x118] sm:$0xf0]  ;;  %v10754_v53 = vor.u32 %v11956_v51, %v10751_v52  ;;  %v12012_v51 = vld [vmem:[#allocation6 + $0x3cc] sm:$0xf] }
 0x37d   :  { %v10975_v52 = vld [vmem:[#allocation6 + $0x3d8] sm:$0xf0] }
 0x37e   :  { %6973 = vmatpush.bf16.msra.mxu0 %v10494_v36  ;;  %v12554_v58 = vpop.f32.mrf.mxu0  ;;  %v10922_v36 = vor.u32 %v11999_v60, %v10919_v61  ;;  %v5969_v60 = vadd.f32 %v12549_v21, %v5956_v38 }
 0x37f   :  { %6986 = vmatpush.bf16.msra.mxu1 %v10622_v23  ;;  %v12556_v25 = vpop.f32.mrf.mxu1  ;;  %v10903_v23 = vld [vmem:[#allocation6 + $0x350] sm:$0xf0] }
 0x380   :  { %6999 = vmatpush.bf16.msra.mxu2 %v10750_v37  ;;  %6956 = vmatpush.bf16.msrb.mxu3 %v10938_v57  ;;  %v10802_v37 = vor.u32 %v11968_v12, %v10799_v11  ;;  %v10906_v46 = vor.u32 %v11995_v62, %v10903_v23  ;;  %v5982_v61 = vadd.f32 %v12554_v58, %v5969_v60  ;;  %v10989_v62 = vld [vmem:[#allocation6 + $0x3e8] sm:$0xf]  ;;  %v10943_v60 = vld [vmem:[#allocation6 + $0x398] sm:$0xf0] }
 0x381   :  { %6974 = vmatmul.bf16.vlgmr.msra.gmra.mxu0 %v12528_v56 }
 0x382   :  { %7018 = vmatpush.bf16.msrb.mxu0 %v10610_v33  ;;  %6987 = vmatmul.bf16.vlgmr.msra.gmra.mxu1 %v12530_v54  ;;  %v10527_v33 = vld [vmem:[#allocation6 + $0x58] sm:$0xf0]  ;;  %v5995_v1 = vadd.f32 %v12556_v25, %v5982_v61  ;;  %v10973_v25 = vld [vmem:[#allocation6 + $0x3c8] sm:$0xf] }
 0x383   :  { %7031 = vmatpush.bf16.msrb.mxu1 %v10738_v18  ;;  %7000 = vmatmul.bf16.vlgmr.msra.gmra.mxu2 %v12532_v43  ;;  %v11932_v18 = vld [vmem:[#allocation6 + $0x14c] sm:$0xf]  ;;  %v10530_v49 = vor.u32 %v11900_v55, %v10527_v33 }
 0x384   :  { %7044 = vmatpush.bf16.msrb.mxu2 %v10866_v28  ;;  %6957 = vmatpush.bf16.msrb.mxu3 %v10922_v36  ;;  %v10658_v10 = vor.u32 %v11932_v18, %v10655_v8 }
 0x386   :  { %7019 = vmatpush.bf16.msrb.mxu0 %v10594_v19  ;;  %v6007_v28 = vpop.f32.mrf.mxu2  ;;  %v5983_v19 = vpop.f32.mrf.mxu0 }
 0x387   :  { %7032 = vmatpush.bf16.msrb.mxu1 %v10722_v44  ;;  %v6020_v31 = vpop.f32.mrf.mxu3  ;;  %v11991_v44 = vld [vmem:[#allocation6 + $0x324] sm:$0xf]  ;;  %v5996_v32 = vpop.f32.mrf.mxu1  ;;  %v12002_v19 = vld [vmem:[#allocation6 + $0x374] sm:$0xf0] }
 0x388   :  { %7045 = vmatpush.bf16.msrb.mxu2 %v10850_v24  ;;  %v11928_v24 = vld [vmem:[#allocation6 + $0x12c] sm:$0xf]  ;;  %6958 = vmatpush.bf16.msrb.mxu3 %v10906_v46  ;;  %v10890_v39 = vor.u32 %v11991_v44, %v10887_v13  ;;  %v10941_v46 = vld [vmem:[#allocation6 + $0x388] sm:$0xf]  ;;  %v10926_v13 = vor.u32 %v12002_v19, %v10925_v35 }
 0x389   :  { %v10642_v40 = vor.u32 %v11928_v24, %v10639_v27  ;;  %v10909_v24 = vld [vmem:[#allocation6 + $0x348] sm:$0xf]  ;;  %v11998_v27 = vld [vmem:[#allocation6 + $0x354] sm:$0xf0] }
 0x38a   :  { %7020 = vmatpush.bf16.msrb.mxu0 %v10578_v6  ;;  %v11892_v6 = vld [vmem:[#allocation6 + $0xc] sm:$0xf]  ;;  %v10910_v14 = vor.u32 %v11998_v27, %v10909_v24  ;;  %v12034_v24 = vld [vmem:[#allocation9 + $0x78] sm:$0xff]  ;;  %v12033_v27 = vld [vmem:[#allocation9 + $0x70] sm:$0xff] }
 0x38b   :  { %7033 = vmatpush.bf16.msrb.mxu1 %v10706_v42  ;;  %v11987_v42 = vld [vmem:[#allocation6 + $0x304] sm:$0xf]  ;;  %v10498_v30 = vor.u32 %v11892_v6, %v10495_v50  ;;  %v12016_v50 = vld [vmem:[#allocation6 + $0x3ec] sm:$0xf] }
 0x38c   :  { %7046 = vmatpush.bf16.msrb.mxu2 %v10834_v15  ;;  %v11924_v15 = vld [vmem:[#allocation6 + $0x10c] sm:$0xf]  ;;  %6959 = vmatpush.bf16.msrb.mxu3 %v10890_v39  ;;  %v10874_v57 = vor.u32 %v11987_v42, %v10871_v47  ;;  %v11994_v39 = vld [vmem:[#allocation6 + $0x334] sm:$0xf0]  ;;  %v10877_v47 = vld [vmem:[#allocation6 + $0x308] sm:$0xf] }
 0x38d   :  { %v10894_v6 = vor.u32 %v11994_v39, %v10893_v34  ;;  %v12020_v39 = vld [vmem:[#allocation9 + $0x8] sm:$0xff] }
 0x38e   :  { %7021 = vmatpush.bf16.msrb.mxu0 %v10562_v41  ;;  %v6009_v17 = vpop.f32.mrf.mxu2  ;;  %v10626_v41 = vor.u32 %v11924_v15, %v10623_v20  ;;  %v10991_v15 = vld [vmem:[#allocation6 + $0x3f8] sm:$0xf0] }
 0x38f   :  { %7034 = vmatpush.bf16.msrb.mxu1 %v10690_v59  ;;  %v6022_v59 = vpop.f32.mrf.mxu3  ;;  %v10994_v38 = vor.u32 %v12016_v50, %v10991_v15  ;;  %v12030_v15 = vld [vmem:[#allocation9 + $0x58] sm:$0xff] }
 0x390   :  { %7047 = vmatpush.bf16.msrb.mxu2 %v10818_v0  ;;  %6960 = vmatpush.bf16.msrb.mxu3 %v10874_v57  ;;  %v6008_v0 = vadd.f32 %v6007_v28, %v5995_v1  ;;  %v10958_v28 = vor.u32 %v12010_v45, %v10957_v5  ;;  %v10978_v57 = vor.u32 %v12012_v51, %v10975_v52  ;;  %v12000_v1 = vld [vmem:[#allocation6 + $0x36c] sm:$0xf]  ;;  %v12029_v51 = vld [vmem:[#allocation9 + $0x50] sm:$0xff] }
 0x391   :  { %v12041_v52 = vld [vmem:[#allocation9 + $0xb0] sm:$0xff] }
 0x392   :  { %7022 = vmatpush.bf16.msrb.mxu0 %v10546_v16  ;;  %v6021_v3 = vadd.f32 %v6020_v31, %v6008_v0  ;;  %v12571_v31 = vld [vmem:[#allocation7] sm:$0xf]  ;;  %v10927_v0 = vld [vmem:[#allocation6 + $0x378] sm:$0xf0] }
 0x393   :  { %7035 = vmatpush.bf16.msrb.mxu1 %v10674_v29  ;;  %v6216_v5 = vperm.slane %v12571_v31, 2  ;;  %v6217_v34 = vperm.slane %v12571_v31, 3 }
 0x394   :  { %7048 = vmatpush.bf16.msrb.mxu2 %v10802_v37 }
 0x396   :  { %7023 = vmatpush.bf16.msrb.mxu0 %v10530_v49  ;;  %v10942_v49 = vor.u32 %v12006_v9, %v10941_v46 }
 0x397   :  { %7036 = vmatpush.bf16.msrb.mxu1 %v10658_v10  ;;  %v6214_v10 = vperm.slane %v12571_v31, 0 }
 0x398   :  { %7049 = vmatpush.bf16.msrb.mxu2 %v10786_v22 }
 0x39a   :  { %7024 = vmatpush.bf16.msrb.mxu0 %v10514_v26 }
 0x39b   :  { %7037 = vmatpush.bf16.msrb.mxu1 %v10642_v40 }
 0x39c   :  { %7050 = vmatpush.bf16.msrb.mxu2 %v10770_v48  ;;  %v11990_v48 = vld [vmem:[#allocation6 + $0x314] sm:$0xf0] }
 0x39d   :  { %v10878_v20 = vor.u32 %v11990_v48, %v10877_v47  ;;  %v12019_v47 = vld [vmem:[#allocation9] sm:$0xff] }
 0x39e   :  { %7025 = vmatpush.bf16.msrb.mxu0 %v10498_v30  ;;  %v6033_v7 = vpop.f32.mrf.mxu0  ;;  %v12008_v30 = vld [vmem:[#allocation6 + $0x3ac] sm:$0xf]  ;;  %v12031_v48 = vld [vmem:[#allocation9 + $0x60] sm:$0xff] }
 0x39f   :  { %7038 = vmatpush.bf16.msrb.mxu1 %v10626_v41  ;;  %v6046_v4 = vpop.f32.mrf.mxu1  ;;  %v6034_v12 = vadd.f32 %v6033_v7, %v6021_v3  ;;  %v10959_v41 = vld [vmem:[#allocation6 + $0x3b8] sm:$0xf0]  ;;  %v6215_v3 = vperm.slane %v12571_v31, 1  ;;  %v10930_v7 = vor.u32 %v12000_v1, %v10927_v0  ;;  %v12037_v1 = vld [vmem:[#allocation9 + $0x90] sm:$0xff] }
 0x3a0   :  { %7051 = vmatpush.bf16.msrb.mxu2 %v10754_v53  ;;  %v10962_v59 = vor.u32 %v12008_v30, %v10959_v41  ;;  %v12004_v53 = vld [vmem:[#allocation6 + $0x38c] sm:$0xf] }
 0x3a1   :  { %7026 = vmatmul.bf16.vlgmr.msrb.gmra.mxu0 %v12528_v56  ;;  %v6047_v21 = vadd.f32 %v6046_v4, %v6034_v12  ;;  %v12018_v56 = vld [vmem:[#allocation6 + $0x3f4] sm:$0xf0]  ;;  %v10946_v61 = vor.u32 %v12004_v53, %v10943_v60  ;;  %v12028_v30 = vld [vmem:[#allocation9 + $0x48] sm:$0xff]  ;;  %v12027_v53 = vld [vmem:[#allocation9 + $0x40] sm:$0xff] }
 0x3a2   :  { %7039 = vmatmul.bf16.vlgmr.msrb.gmra.mxu1 %v12530_v54  ;;  %v10990_v54 = vor.u32 %v12018_v56, %v10989_v62  ;;  %v12040_v41 = vld [vmem:[#allocation9 + $0xa8] sm:$0xff]  ;;  %v12039_v60 = vld [vmem:[#allocation9 + $0xa0] sm:$0xff] }
 0x3a3   :  { %7052 = vmatmul.bf16.vlgmr.msrb.gmra.mxu2 %v12532_v43  ;;  %v12014_v43 = vld [vmem:[#allocation6 + $0x3d4] sm:$0xf0]  ;;  %7351 = vmatpush.bf16.msra.mxu1 %v12034_v24 }
 0x3a4   :  { %v10974_v8 = vor.u32 %v12014_v43, %v10973_v25  ;;  %v11988_v43 = vld [vmem:[#allocation6 + $0x30c] sm:$0xf] }
 0x3a6   :  { %v6059_v11 = vpop.f32.mrf.mxu2  ;;  %v6035_v16 = vpop.f32.mrf.mxu0 }
 0x3a7   :  { %v6072_v36 = vpop.f32.mrf.mxu3  ;;  %v6060_v58 = vadd.f32 %v6059_v11, %v6047_v21  ;;  %v6048_v29 = vpop.f32.mrf.mxu1  ;;  %v11996_v21 = vld [vmem:[#allocation6 + $0x34c] sm:$0xf]  ;;  %v10911_v11 = vld [vmem:[#allocation6 + $0x358] sm:$0xf0]  ;;  %7352 = vmatpush.bf16.msra.mxu1 %v12033_v27  ;;  %v12061_v27 = vld [vmem:[#allocation10] ss:$0 sm:$0xff] }
 0x3a8   :  { %v10914_v16 = vor.u32 %v11996_v21, %v10911_v11  ;;  %v11992_v29 = vld [vmem:[#allocation6 + $0x32c] sm:$0xf]  ;;  %v12050_v21 = vld [vmem:[#allocation9 + $0xf8] sm:$0xff] }
 0x3a9   :  { %v6073_v55 = vadd.f32 %v6072_v36, %v6060_v58 }
 0x3ab   :  { %v6079_v23 = vmax.f32 %v6073_v55, 0.0  ;;  %v10895_v55 = vld [vmem:[#allocation6 + $0x338] sm:$0xf0] }
 0x3ac   :  { %v10898_v56 = vor.u32 %v11992_v29, %v10895_v55  ;;  %v12047_v29 = vld [vmem:[#allocation9 + $0xe0] sm:$0xff] }
 0x3ad   :  { %v12568_v37 = vpack.c.bf16 %v6079_v23, %v6079_v23 }
 0x3ae   :  { %v6061_v33 = vpop.f32.mrf.mxu2 }
 0x3af   :  { %v6074_v18 = vpop.f32.mrf.mxu3  ;;  %6909 = vmatmul.bf16.vlgmr.msra.gmra.mxu3 %v12568_v37  ;;  %v10879_v33 = vld [vmem:[#allocation6 + $0x318] sm:$0xf0] }
 0x3b0   :  { %7005 = vmatpush.bf16.msra.mxu3 %v10990_v54  ;;  %v10882_v18 = vor.u32 %v11988_v43, %v10879_v33  ;;  %v12044_v33 = vld [vmem:[#allocation9 + $0xc8] sm:$0xff] }
 0x3b4   :  { %7006 = vmatpush.bf16.msra.mxu3 %v10974_v8 }
 0x3b8   :  { %7007 = vmatpush.bf16.msra.mxu3 %v10958_v28 }
 0x3bc   :  { %7008 = vmatpush.bf16.msra.mxu3 %v10942_v49  ;;  %v12026_v49 = vld [vmem:[#allocation9 + $0x38] sm:$0xff] }
 0x3bd   :  { %7338 = vmatpush.bf16.msra.mxu0 %v12026_v49 }
 0x3be   :  { %v6871_v44 = vpop.f32.mrf.mxu0 }
 0x3bf   :  { %v6872_v22 = vadd.f32 %v6871_v44, %v6214_v10  ;;  %v6884_v63 = vpop.f32.mrf.mxu1  ;;  %6961 = vmatmul.bf16.vlgmr.msrb.gmra.mxu3 %v12568_v37  ;;  %v12025_v10 = vld [vmem:[#allocation9 + $0x30] sm:$0xff] }
 0x3c0   :  { %7009 = vmatpush.bf16.msra.mxu3 %v10926_v13 }
 0x3c1   :  { %v6885_v32 = vadd.f32 %v6884_v63, %v6872_v22  ;;  %7339 = vmatpush.bf16.msra.mxu0 %v12025_v10  ;;  %v12024_v22 = vld [vmem:[#allocation9 + $0x28] sm:$0xff]  ;;  %v12023_v63 = vld [vmem:[#allocation9 + $0x20] sm:$0xff] }
 0x3c4   :  { %7010 = vmatpush.bf16.msra.mxu3 %v10910_v14  ;;  %v12021_v14 = vld [vmem:[#allocation9 + $0x10] sm:$0xff] }
 0x3c5   :  { %7340 = vmatpush.bf16.msra.mxu0 %v12024_v22 }
 0x3c6   :  { %v6897_v2 = vpop.f32.mrf.mxu2  ;;  %v6873_v40 = vpop.f32.mrf.mxu0 }
 0x3c7   :  { %v12575_v26 = vadd.f32 %v6897_v2, %v6885_v32  ;;  %v6886_v42 = vpop.f32.mrf.mxu1  ;;  %v12022_v32 = vld [vmem:[#allocation9 + $0x18] sm:$0xff]  ;;  %v12032_v2 = vld [vmem:[#allocation9 + $0x68] sm:$0xff] }
 0x3c8   :  { %7011 = vmatpush.bf16.msra.mxu3 %v10894_v6  ;;  %7353 = vmatpush.bf16.msra.mxu1 %v12032_v2 }
 0x3c9   :  { %7341 = vmatpush.bf16.msra.mxu0 %v12023_v63 }
 0x3cc   :  { %7012 = vmatpush.bf16.msra.mxu3 %v10878_v20  ;;  %7354 = vmatpush.bf16.msra.mxu1 %v12031_v48  ;;  %v12042_v20 = vld [vmem:[#allocation9 + $0xb8] sm:$0xff] }
 0x3cd   :  { %7342 = vmatpush.bf16.msra.mxu0 %v12022_v32  ;;  %7364 = vmatpush.bf16.msra.mxu2 %v12042_v20 }
 0x3ce   :  { %v6899_v17 = vpop.f32.mrf.mxu2 }
 0x3cf   :  { %7013 = vmatmul.bf16.vlgmr.msra.gmra.mxu3 %v12568_v37 }
 0x3d0   :  { %7057 = vmatpush.bf16.msrb.mxu3 %v10994_v38  ;;  %7355 = vmatpush.bf16.msra.mxu1 %v12030_v15 }
 0x3d1   :  { %7343 = vmatpush.bf16.msra.mxu0 %v12021_v14  ;;  %7365 = vmatpush.bf16.msra.mxu2 %v12041_v52 }
 0x3d4   :  { %7058 = vmatpush.bf16.msrb.mxu3 %v10978_v57  ;;  %7356 = vmatpush.bf16.msra.mxu1 %v12029_v51 }
 0x3d5   :  { %7344 = vmatpush.bf16.msra.mxu0 %v12020_v39  ;;  %7366 = vmatpush.bf16.msra.mxu2 %v12040_v41 }
 0x3d8   :  { %7059 = vmatpush.bf16.msrb.mxu3 %v10962_v59  ;;  %7357 = vmatpush.bf16.msra.mxu1 %v12028_v30 }
 0x3d9   :  { %7345 = vmatpush.bf16.msra.mxu0 %v12019_v47  ;;  %7367 = vmatpush.bf16.msra.mxu2 %v12039_v60 }
 0x3dc   :  { %7060 = vmatpush.bf16.msrb.mxu3 %v10946_v61  ;;  %7358 = vmatpush.bf16.msra.mxu1 %v12027_v53  ;;  %v12038_v61 = vld [vmem:[#allocation9 + $0x98] sm:$0xff] }
 0x3dd   :  { %7368 = vmatpush.bf16.msra.mxu2 %v12038_v61 }
 0x3de   :  { %v6923_v4 = vpop.f32.mrf.mxu0 }
 0x3df   :  { %v6936_v12 = vpop.f32.mrf.mxu1  ;;  %v6924_v36 = vadd.f32 %v6923_v4, %v6215_v3  ;;  %v12036_v3 = vld [vmem:[#allocation9 + $0x88] sm:$0xff] }
 0x3e0   :  { %7061 = vmatpush.bf16.msrb.mxu3 %v10930_v7 }
 0x3e1   :  { %v6937_v58 = vadd.f32 %v6936_v12, %v6924_v36  ;;  %7369 = vmatpush.bf16.msra.mxu2 %v12037_v1  ;;  %v12035_v12 = vld [vmem:[#allocation9 + $0x80] sm:$0xff] }
 0x3e4   :  { %7062 = vmatpush.bf16.msrb.mxu3 %v10914_v16  ;;  %v12048_v16 = vld [vmem:[#allocation9 + $0xe8] sm:$0xff] }
 0x3e5   :  { %7370 = vmatpush.bf16.msra.mxu2 %v12036_v3 }
 0x3e6   :  { %v6949_v62 = vpop.f32.mrf.mxu2  ;;  %v6925_v54 = vpop.f32.mrf.mxu0 }
 0x3e7   :  { %v12579_v23 = vadd.f32 %v6949_v62, %v6937_v58  ;;  %v6938_v25 = vpop.f32.mrf.mxu1  ;;  %v12049_v58 = vld [vmem:[#allocation9 + $0xf0] sm:$0xff] }
 0x3e8   :  { %7063 = vmatpush.bf16.msrb.mxu3 %v10898_v56  ;;  %v12046_v56 = vld [vmem:[#allocation9 + $0xd8] sm:$0xff]  ;;  %v12045_v25 = vld [vmem:[#allocation9 + $0xd0] sm:$0xff] }
 0x3e9   :  { %7371 = vmatpush.bf16.msra.mxu2 %v12035_v12 }
 0x3ec   :  { %7064 = vmatpush.bf16.msrb.mxu3 %v10882_v18 }
 0x3ee   :  { %v6951_v8 = vpop.f32.mrf.mxu2 }
 0x3ef   :  { %7065 = vmatmul.bf16.vlgmr.msrb.gmra.mxu3 %v12568_v37  ;;  %v12043_v8 = vld [vmem:[#allocation9 + $0xc0] sm:$0xff] }
 0x3f0   :  { %7377 = vmatpush.bf16.msra.mxu3 %v12050_v21 }
 0x3f4   :  { %7378 = vmatpush.bf16.msra.mxu3 %v12049_v58 }
 0x3f8   :  { %7379 = vmatpush.bf16.msra.mxu3 %v12048_v16 }
 0x3fc   :  { %7380 = vmatpush.bf16.msra.mxu3 %v12047_v29 }
 0x3fe   :  { %v6975_v45 = vpop.f32.mrf.mxu0 }
 0x3ff   :  { %v6976_v28 = vadd.f32 %v6975_v45, %v6216_v5  ;;  %v6988_v46 = vpop.f32.mrf.mxu1 }
 0x400   :  { %7381 = vmatpush.bf16.msra.mxu3 %v12046_v56 }
 0x401   :  { %v6989_v9 = vadd.f32 %v6988_v46, %v6976_v28 }
 0x404   :  { %7382 = vmatpush.bf16.msra.mxu3 %v12045_v25 }
 0x406   :  { %v7001_v35 = vpop.f32.mrf.mxu2  ;;  %v6977_v44 = vpop.f32.mrf.mxu0 }
 0x407   :  { %v12583_v19 = vadd.f32 %v7001_v35, %v6989_v9  ;;  %v6990_v13 = vpop.f32.mrf.mxu1 }
 0x408   :  { %7383 = vmatpush.bf16.msra.mxu3 %v12044_v33 }
 0x40c   :  { %7384 = vmatpush.bf16.msra.mxu3 %v12043_v8 }
 0x40e   :  { %v7003_v37 = vpop.f32.mrf.mxu2 }
 0x41e   :  { %v7027_v40 = vpop.f32.mrf.mxu0 }
 0x41f   :  { %v7040_v6 = vpop.f32.mrf.mxu1  ;;  %v7028_v42 = vadd.f32 %v7027_v40, %v6217_v34 }
 0x421   :  { %v7041_v50 = vadd.f32 %v7040_v6, %v7028_v42 }
 0x426   :  { %v7053_v38 = vpop.f32.mrf.mxu2  ;;  %v7029_v17 = vpop.f32.mrf.mxu0 }
 0x427   :  { %v7054_v31 = vadd.f32 %v7053_v38, %v7041_v50  ;;  %v7042_v57 = vpop.f32.mrf.mxu1 }
 0x42e   :  { %v7055_v59 = vpop.f32.mrf.mxu2 }
 0x432   :  { %v6910_v0 = vpop.f32.mrf.mxu3 }
 0x433   :  { %v6911_v7 = vadd.f32 %v6910_v0, %v12575_v26 }
 0x435   :  { %v7070_v4 = vmax.f32 %v6911_v7, 0.0 }
 0x437   :  { %v7074_v11 = vpack.c.bf16 %v7070_v4, %v7070_v4 }
 0x439   :  { %7346 = vmatmul.bf16.vlgmr.msra.gmra.mxu0 %v7074_v11 }
 0x43a   :  { %v6912_v36 = vpop.f32.mrf.mxu3 }
 0x442   :  { %v6962_v55 = vpop.f32.mrf.mxu3 }
 0x443   :  { %v6963_v62 = vadd.f32 %v6962_v55, %v12579_v23 }
 0x445   :  { %v7071_v26 = vmax.f32 %v6963_v62, 0.0 }
 0x447   :  { %v7075_v54 = vpack.c.bf16 %v7071_v26, %v7071_v26 }
 0x449   :  { %7359 = vmatmul.bf16.vlgmr.msra.gmra.mxu1 %v7075_v54 }
 0x44a   :  { %v6964_v43 = vpop.f32.mrf.mxu3 }
 0x452   :  { %v7014_v18 = vpop.f32.mrf.mxu3 }
 0x453   :  { %v7015_v5 = vadd.f32 %v7014_v18, %v12583_v19 }
 0x455   :  { %v7072_v45 = vmax.f32 %v7015_v5, 0.0 }
 0x457   :  { %v7076_v28 = vpack.c.bf16 %v7072_v45, %v7072_v45 }
 0x459   :  { %7372 = vmatmul.bf16.vlgmr.msra.gmra.mxu2 %v7076_v28 }
 0x45a   :  { %v7016_v23 = vpop.f32.mrf.mxu3 }
 0x472   :  { %v7066_v46 = vpop.f32.mrf.mxu3 }
 0x473   :  { %v7067_v9 = vadd.f32 %v7066_v46, %v7054_v31 }
 0x475   :  { %v7073_v49 = vmax.f32 %v7067_v9, 0.0 }
 0x477   :  { %v7077_v10 = vpack.c.bf16 %v7073_v49, %v7073_v49 }
 0x479   :  { %7385 = vmatmul.bf16.vlgmr.msra.gmra.mxu3 %v7077_v10 }
 0x47a   :  { %v7068_v35 = vpop.f32.mrf.mxu3 }
 0x4b6   :  { %v7347_v44 = vpop.f32.mrf.mxu0 }
 0x4b7   :  { %v7348_v32 = vadd.f32 %v12061_v27, %v7347_v44 }
 0x4be   :  { %v7349_v13 = vpop.f32.mrf.mxu0 }
 0x4c6   :  { %v7360_v22 = vpop.f32.mrf.mxu1 }
 0x4c7   :  { %v7361_v19 = vadd.f32 %v7360_v22, %v7348_v32 }
 0x4ce   :  { %v7362_v63 = vpop.f32.mrf.mxu1 }
 0x4dc   :  { %v7373_v24 = vpop.f32.mrf.mxu2 }
 0x4dd   :  { %v7374_v14 = vadd.f32 %v7373_v24, %v7361_v19 }
 0x4e4   :  { %v7375_v37 = vpop.f32.mrf.mxu2 }
 0x4fc   :  { %v7386_v34 = vpop.f32.mrf.mxu3 }
 0x4fd   :  { %v7387_v39 = vadd.f32 %v7386_v34, %v7374_v14 }
 0x4ff   :  { %7390 = vmax.xlane.f32.xlu0 %v7387_v39 }
 0x504   :  { %v7388_v2 = vpop.f32.mrf.mxu3 }
 0x572   :  { %v7391_v40 = vpop.xlane.xlu0 %7390 }
 0x573   :  { %v7392_v6 = vsub.f32 %v7387_v39, %v7391_v40 }
 0x575   :  { %v7393_v42 = vmul.f32 1.442695, %v7392_v6 }
 0x577   :  { %12062 = vpow2.f32 %v7393_v42 }
 0x57d   :  { %v12063_v47 = vpop.eup %12062 }
 0x57e   :  { %7395 = vadd.xlane.f32.xlu0 %v12063_v47 }
 0x5f1   :  { %v7396_v48 = vpop.xlane.xlu0 %7395 }
 0x5f2   :  { %12064 = vrcp.f32 %v7396_v48 }
 0x5f8   :  { %v12065_v50 = vpop.eup %12064 }
 0x5f9   :  { %v7398_v15 = vmul.f32 %v12065_v50, %v7396_v48 }
 0x5fb   :  { %v7399_v20 = vsub.f32 2.0, %v7398_v15 }
 0x5fd   :  { %v7400_v38 = vmul.f32 %v12065_v50, %v7399_v20 }
 0x5ff   :  { %v7401_v51 = vmul.f32 %v12063_v47, %v7400_v38 }
 0x601   :  { %7402 = vst [vmem:[%s12599_s7] sm:$0xff] %v7401_v51 }
 0x602   :  { %7407 = vsyncpa [#allocation3], 1 }
 0x603   :  { %7408 = vsyncpa [#allocation5], 1 }
 0x604   :  { %7409 = vsyncpa [#allocation8], 1 }
 0x605   :  { %7410 = vsyncpa [#allocation11], 1 }

</bundles_post_ra>
